<compile_context>
chip_gen: v5e
topology: v5e:2x2
jax: 0.10.0
libtpu: 0.0.40
codegen_flags: <defaults>
</compile_context>

<pallas_src>
import math

import jax
import jax.numpy as jnp
from jax.experimental import pallas as pl
from jax.experimental.pallas import tpu as pltpu

F32 = jnp.float32


# ---------------------------------------------------------------------------
# in-kernel math helpers (all elementwise / 2-D, lowering-safe)
# ---------------------------------------------------------------------------

def _sigmoid(x):
    return 1.0 / (1.0 + jnp.exp(-x))


def _silu(x):
    return x * _sigmoid(x)


def _softplus(x):
    return jnp.maximum(x, 0.0) + jnp.log(1.0 + jnp.exp(-jnp.abs(x)))


def _mamba_len1(xrow, p, m):
    """Mamba block applied to length-1 sequences (mamba2 / mamba3 on the ch_ind path).

    xrow: (M, d_model) -- M independent batch rows, L == 1.
    The selective scan collapses to  y = (sum_n C_n*B_n) * (dt*u) + D*u, gated by SiLU(z).
    """
    d_inner = m["d_inner"]
    dt_rank = m["dt_rank"]
    N = m["d_state"]
    dconv = m["d_conv"]

    xz = jnp.dot(xrow, p["in_proj_w"], preferred_element_type=F32)      # (M, 2*d_inner)
    xc = xz[:, :d_inner]
    z = xz[:, d_inner:]
    # causal depthwise conv at L==1: only the last tap sees real (non-padded) data
    u = _silu(xc * p["conv_w"][dconv - 1:dconv, :] + p["conv_b"])       # (M, d_inner)

    x_dbl = jnp.dot(u, p["x_proj_w"], preferred_element_type=F32)       # (M, dt_rank+2N)
    dt_in = x_dbl[:, :dt_rank]
    Bm = x_dbl[:, dt_rank:dt_rank + N]
    Cm = x_dbl[:, dt_rank + N:dt_rank + 2 * N]

    delta = _softplus(
        jnp.dot(dt_in, p["dt_proj_w"], preferred_element_type=F32) + p["dt_proj_b"])
    cb = jnp.sum(Cm * Bm, axis=1, keepdims=True)                        # (M, 1)
    y = cb * (delta * u) + p["D"] * u
    y = y * _silu(z)
    return jnp.dot(y, p["out_proj_w"], preferred_element_type=F32)      # (M, d_model)


def _mamba_dmodel1(s, p, m):
    """Mamba block with d_model == 1 (mamba1 / mamba4), vectorized over the batch.

    s: (M, L) -- each row is a length-L scalar sequence.  Returns (M, L).
    """
    assert m["d_model"] == 1
    M, L = s.shape
    d_inner = m["d_inner"]
    dt_rank = m["dt_rank"]
    N = m["d_state"]
    dconv = m["d_conv"]

    w_in = p["in_proj_w"]        # (1, 2*d_inner)
    conv_w = p["conv_w"]         # (dconv, d_inner)
    conv_b = p["conv_b"]         # (1, d_inner)
    x_w = p["x_proj_w"]          # (d_inner, dt_rank + 2N)
    dt_w = p["dt_proj_w"]        # (dt_rank, d_inner)
    dt_b = p["dt_proj_b"]        # (1, d_inner)
    A = -jnp.exp(p["A_log"])     # (d_inner, N)
    D = p["D"]                   # (1, d_inner)
    w_out = p["out_proj_w"]      # (d_inner, 1)

    st = s.T                     # (L, M): time on sublanes -> per-step row slices

    # in_proj (scalar feature) + causal depthwise conv + SiLU, per inner channel
    us, zs = [], []
    for d in range(d_inner):
        xp = st * w_in[0:1, d:d + 1]
        z_d = st * w_in[0:1, d_inner + d:d_inner + d + 1]
        acc = jnp.zeros_like(st)
        for k in range(dconv):
            shift = dconv - 1 - k
            if shift == 0:
                sh = xp
            else:
                sh = jnp.concatenate(
                    [jnp.zeros((shift, M), F32), xp[:L - shift, :]], axis=0)
            acc = acc + sh * conv_w[k:k + 1, d:d + 1]
        us.append(_silu(acc + conv_b[0:1, d:d + 1]))
        zs.append(z_d)

    # x_proj (tiny contraction over d_inner done as broadcast-multiply-accumulate)
    def proj_col(j):
        acc = us[0] * x_w[0:1, j:j + 1]
        for d in range(1, d_inner):
            acc = acc + us[d] * x_w[d:d + 1, j:j + 1]
        return acc

    dts = [proj_col(r) for r in range(dt_rank)]
    Bs = [proj_col(dt_rank + n) for n in range(N)]
    Cs = [proj_col(dt_rank + N + n) for n in range(N)]

    # dt_proj + softplus
    deltas, dus = [], []
    for d in range(d_inner):
        acc = dts[0] * dt_w[0:1, d:d + 1]
        for r in range(1, dt_rank):
            acc = acc + dts[r] * dt_w[r:r + 1, d:d + 1]
        delta_d = _softplus(acc + dt_b[0:1, d:d + 1])
        deltas.append(delta_d)
        dus.append(delta_d * us[d])

    # Precompute dA = exp(delta*A) and dB*u for ALL timesteps, packed onto the lane
    # dim as (d, n, batch) so the serial recurrence is one lane-dense madd per step.
    dA_cols, dBu_cols = [], []
    for d in range(d_inner):
        for n in range(N):
            dA_cols.append(deltas[d] * A[d:d + 1, n:n + 1])
            dBu_cols.append(Bs[n] * dus[d])
    dA_all = jnp.exp(jnp.concatenate(dA_cols, axis=1))      # (L, d_inner*N*M)
    dBu_all = jnp.concatenate(dBu_cols, axis=1)             # (L, d_inner*N*M)

    # Fully unrolled selective scan (L is small and static).
    h = dBu_all[0:1, :]
    hs = [h]
    for t in range(1, L):
        h = dA_all[t:t + 1, :] * h + dBu_all[t:t + 1, :]
        hs.append(h)
    H = jnp.concatenate(hs, axis=0)                         # (L, d_inner*N*M)

    # y = C.h + D*u, gate with SiLU(z), out_proj (d_model == 1)  -- all vectorized
    out_t = None
    for d in range(d_inner):
        y_d = D[0:1, d:d + 1] * us[d]
        for n in range(N):
            col = (d * N + n) * M
            y_d = y_d + Cs[n] * H[:, col:col + M]
        y_d = y_d * _silu(zs[d])
        contrib = y_d * w_out[d:d + 1, 0:1]
        out_t = contrib if out_t is None else out_t + contrib
    return out_t.T                                          # (M, L)


# ---------------------------------------------------------------------------
# Fused whole-model kernel
# ---------------------------------------------------------------------------

def _make_fused_kernel(meta, treedef):
    def kernel(*refs):
        out_ref = refs[-1]
        vals = jax.tree_util.tree_unflatten(treedef, [r[...] for r in refs[:-1]])

        x = vals["x"]                                        # (M=B*C, L)
        # RevIN 'norm' (stats over the sequence dim, per (batch, channel) row)
        mean = jnp.mean(x, axis=1, keepdims=True)
        var = jnp.mean((x - mean) ** 2, axis=1, keepdims=True)
        std = jnp.sqrt(var + 1e-5)
        xn = (x - mean) / std
        if meta["revin"] == 1:
            xn = xn * vals["revin_w_rows"] + vals["revin_b_rows"]

        h1 = jnp.dot(xn, vals["lin1_w"], preferred_element_type=F32) + vals["lin1_b"]
        x_res1 = h1
        # dropout1 / dropout2: identity (eval mode)

        x3 = _mamba_len1(h1, vals["m3"], meta["m3"])         # L==1 Mamba (d_model=n1)
        x4 = _mamba_dmodel1(h1, vals["m4"], meta["m4"])      # d_model==1 Mamba over n1
        x4 = x4 + x3

        h2 = jnp.dot(h1, vals["lin2_w"], preferred_element_type=F32) + vals["lin2_b"]
        x_res2 = h2
        x1 = _mamba_dmodel1(h2, vals["m1"], meta["m1"])      # d_model==1 Mamba over n2
        x2 = _mamba_len1(h2, vals["m2"], meta["m2"])         # L==1 Mamba (d_model=n2)

        xs = x1 + x_res2 + x2 if meta["residual"] == 1 else x1 + x2
        h3 = jnp.dot(xs, vals["lin3_w"], preferred_element_type=F32) + vals["lin3_b"]
        if meta["residual"] == 1:
            h3 = h3 + x_res1

        # lin4 on cat([h3, x4], dim=-1) done as a split matmul (no lane concat)
        o = (jnp.dot(h3, vals["lin4_w_a"], preferred_element_type=F32)
             + jnp.dot(x4, vals["lin4_w_b"], preferred_element_type=F32)
             + vals["lin4_b"])

        # RevIN 'denorm'
        if meta["revin"] == 1:
            o = (o - vals["revin_b_rows"]) / (vals["revin_w_rows"] + 1e-5 * 1e-5)
        o = o * std + mean
        out_ref[...] = o
    return kernel


def model_forward(x, arrays, meta, cfg):
    B, L, C = x.shape
    M = B * C
    P = cfg["pred_len"]
    n1 = cfg["n1"]
    assert cfg["ch_ind"] == 1  # TODO(synk): ch_ind == 0 path not implemented

    # (B, L, C) -> (B, C, L) -> (B*C, L) : one tiny layout transform outside the kernel
    x2d = jnp.transpose(x, (0, 2, 1)).reshape(M, L)
    rw_rows = jnp.tile(arrays["revin_w"], (B,)).reshape(M, 1)
    rb_rows = jnp.tile(arrays["revin_b"], (B,)).reshape(M, 1)

    call_tree = {
        "x": x2d,
        "revin_w_rows": rw_rows,
        "revin_b_rows": rb_rows,
        "lin1_w": arrays["lin1_w"], "lin1_b": arrays["lin1_b"],
        "lin2_w": arrays["lin2_w"], "lin2_b": arrays["lin2_b"],
        "lin3_w": arrays["lin3_w"], "lin3_b": arrays["lin3_b"],
        "lin4_w_a": arrays["lin4_w"][:n1, :],
        "lin4_w_b": arrays["lin4_w"][n1:, :],
        "lin4_b": arrays["lin4_b"],
        "m1": arrays["m1"], "m2": arrays["m2"],
        "m3": arrays["m3"], "m4": arrays["m4"],
    }
    leaves, treedef = jax.tree_util.tree_flatten(call_tree)

    out2d = pl.pallas_call(
        _make_fused_kernel(meta, treedef),
        out_shape=jax.ShapeDtypeStruct((M, P), F32),
        compiler_params=pltpu.CompilerParams(vmem_limit_bytes=32 * 1024 * 1024),
    )(*leaves)

    # (B*C, P) -> (B, C, P) -> (B, P, C)
    return jnp.transpose(out2d.reshape(B, C, P), (0, 2, 1))


# ---------------------------------------------------------------------------
# Parameter construction (deterministic synthetic weights)
# ---------------------------------------------------------------------------

def _init_mamba(key, d_model, d_state, d_conv, expand):
    d_inner = expand * d_model
    dt_rank = math.ceil(d_model / 16)
    ks = jax.random.split(key, 5)
    s = 0.1
    A = jnp.tile(jnp.arange(1, d_state + 1, dtype=F32)[None, :], (d_inner, 1))
    arrays = {
        "in_proj_w": jax.random.normal(ks[0], (d_model, 2 * d_inner), F32) * s,
        "conv_w": jax.random.normal(ks[1], (d_conv, d_inner), F32) * s,
        "conv_b": jnp.zeros((1, d_inner), F32),
        "x_proj_w": jax.random.normal(ks[2], (d_inner, dt_rank + 2 * d_state), F32) * s,
        "dt_proj_w": jax.random.normal(ks[3], (dt_rank, d_inner), F32) * s,
        "dt_proj_b": jnp.full((1, d_inner), 0.1, F32),
        "A_log": jnp.log(A),
        "D": jnp.ones((1, d_inner), F32),
        "out_proj_w": jax.random.normal(ks[4], (d_inner, d_model), F32) * s,
    }
    meta = {"d_model": d_model, "d_inner": d_inner, "dt_rank": dt_rank,
            "d_state": d_state, "d_conv": d_conv}
    return arrays, meta


def init_model(key, cfg):
    ks = jax.random.split(key, 8)
    s = 0.1
    L, P = cfg["seq_len"], cfg["pred_len"]
    n1, n2, C = cfg["n1"], cfg["n2"], cfg["enc_in"]
    dm1 = 1 if cfg["ch_ind"] == 1 else n2
    dm2 = 1 if cfg["ch_ind"] == 1 else n1

    m1a, m1m = _init_mamba(ks[4], dm1, cfg["d_state"], cfg["dconv"], cfg["e_fact"])
    m2a, m2m = _init_mamba(ks[5], n2, cfg["d_state"], cfg["dconv"], cfg["e_fact"])
    m3a, m3m = _init_mamba(ks[6], n1, cfg["d_state"], cfg["dconv"], cfg["e_fact"])
    m4a, m4m = _init_mamba(ks[7], dm2, cfg["d_state"], cfg["dconv"], cfg["e_fact"])

    arrays = {
        "revin_w": jnp.ones((C,), F32),
        "revin_b": jnp.zeros((C,), F32),
        "lin1_w": jax.random.normal(ks[0], (L, n1), F32) * s,
        "lin1_b": jnp.zeros((1, n1), F32),
        "lin2_w": jax.random.normal(ks[1], (n1, n2), F32) * s,
        "lin2_b": jnp.zeros((1, n2), F32),
        "lin3_w": jax.random.normal(ks[2], (n2, n1), F32) * s,
        "lin3_b": jnp.zeros((1, n1), F32),
        "lin4_w": jax.random.normal(ks[3], (2 * n1, P), F32) * s,
        "lin4_b": jnp.zeros((1, P), F32),
        "m1": m1a, "m2": m2a, "m3": m3a, "m4": m4a,
    }
    meta = {"revin": cfg["revin"], "residual": cfg["residual"], "ch_ind": cfg["ch_ind"],
            "m1": m1m, "m2": m2m, "m3": m3m, "m4": m4m}
    return arrays, meta


# ---------------------------------------------------------------------------
# main
# ---------------------------------------------------------------------------

if __name__ == "__main__":
    cfg = dict(enc_in=4, seq_len=16, pred_len=8, n1=32, n2=16,
               dropout=0.0, revin=1, ch_ind=1, residual=1,
               d_state=8, dconv=2, e_fact=2)

    arrays, meta = init_model(jax.random.PRNGKey(42), cfg)

    x = jax.random.normal(jax.random.PRNGKey(0),
                          (2, cfg["seq_len"], cfg["enc_in"]), F32)

    fwd = jax.jit(lambda xx, pp: model_forward(xx, pp, meta, cfg))
    y = fwd(x, arrays)
    jax.block_until_ready(y)

    assert y.shape == (2, cfg["pred_len"], cfg["enc_in"])
    assert bool(jnp.all(jnp.isfinite(y)))
    print("KERNEL_OK")
</pallas_src>

<mosaic_0001>
module attributes {stable_mosaic.version = 11 : i64} {
  func.func @kernel(%arg0: memref<1x32xf32, #tpu.memory_space<vmem>>, %arg1: memref<16x32xf32, #tpu.memory_space<vmem>>, %arg2: memref<1x16xf32, #tpu.memory_space<vmem>>, %arg3: memref<32x16xf32, #tpu.memory_space<vmem>>, %arg4: memref<1x32xf32, #tpu.memory_space<vmem>>, %arg5: memref<16x32xf32, #tpu.memory_space<vmem>>, %arg6: memref<1x8xf32, #tpu.memory_space<vmem>>, %arg7: memref<32x8xf32, #tpu.memory_space<vmem>>, %arg8: memref<32x8xf32, #tpu.memory_space<vmem>>, %arg9: memref<2x8xf32, #tpu.memory_space<vmem>>, %arg10: memref<1x2xf32, #tpu.memory_space<vmem>>, %arg11: memref<1x2xf32, #tpu.memory_space<vmem>>, %arg12: memref<2x2xf32, #tpu.memory_space<vmem>>, %arg13: memref<1x2xf32, #tpu.memory_space<vmem>>, %arg14: memref<1x2xf32, #tpu.memory_space<vmem>>, %arg15: memref<1x4xf32, #tpu.memory_space<vmem>>, %arg16: memref<2x1xf32, #tpu.memory_space<vmem>>, %arg17: memref<2x17xf32, #tpu.memory_space<vmem>>, %arg18: memref<32x8xf32, #tpu.memory_space<vmem>>, %arg19: memref<1x32xf32, #tpu.memory_space<vmem>>, %arg20: memref<1x32xf32, #tpu.memory_space<vmem>>, %arg21: memref<2x32xf32, #tpu.memory_space<vmem>>, %arg22: memref<1x32xf32, #tpu.memory_space<vmem>>, %arg23: memref<1x32xf32, #tpu.memory_space<vmem>>, %arg24: memref<16x64xf32, #tpu.memory_space<vmem>>, %arg25: memref<32x16xf32, #tpu.memory_space<vmem>>, %arg26: memref<32x17xf32, #tpu.memory_space<vmem>>, %arg27: memref<64x8xf32, #tpu.memory_space<vmem>>, %arg28: memref<1x64xf32, #tpu.memory_space<vmem>>, %arg29: memref<1x64xf32, #tpu.memory_space<vmem>>, %arg30: memref<2x64xf32, #tpu.memory_space<vmem>>, %arg31: memref<1x64xf32, #tpu.memory_space<vmem>>, %arg32: memref<2x64xf32, #tpu.memory_space<vmem>>, %arg33: memref<32x128xf32, #tpu.memory_space<vmem>>, %arg34: memref<64x32xf32, #tpu.memory_space<vmem>>, %arg35: memref<64x18xf32, #tpu.memory_space<vmem>>, %arg36: memref<2x8xf32, #tpu.memory_space<vmem>>, %arg37: memref<1x2xf32, #tpu.memory_space<vmem>>, %arg38: memref<1x2xf32, #tpu.memory_space<vmem>>, %arg39: memref<2x2xf32, #tpu.memory_space<vmem>>, %arg40: memref<1x2xf32, #tpu.memory_space<vmem>>, %arg41: memref<1x2xf32, #tpu.memory_space<vmem>>, %arg42: memref<1x4xf32, #tpu.memory_space<vmem>>, %arg43: memref<2x1xf32, #tpu.memory_space<vmem>>, %arg44: memref<2x17xf32, #tpu.memory_space<vmem>>, %arg45: memref<8x1xf32, #tpu.memory_space<vmem>>, %arg46: memref<8x1xf32, #tpu.memory_space<vmem>>, %arg47: memref<8x16xf32, #tpu.memory_space<vmem>>, %arg48: memref<8x8xf32, #tpu.memory_space<vmem>>) attributes {dimension_semantics = [], scalar_prefetch = 0 : i64, scratch_operands = 0 : i64, tpu.core_type = #tpu.core_type<tc>} {
    %c0 = arith.constant 0 : index
    %c0_0 = arith.constant 0 : index
    %0 = vector.load %arg0[%c0, %c0_0] : memref<1x32xf32, #tpu.memory_space<vmem>>, vector<1x32xf32>
    %c0_1 = arith.constant 0 : index
    %c0_2 = arith.constant 0 : index
    %1 = vector.load %arg1[%c0_1, %c0_2] : memref<16x32xf32, #tpu.memory_space<vmem>>, vector<16x32xf32>
    %c0_3 = arith.constant 0 : index
    %c0_4 = arith.constant 0 : index
    %2 = vector.load %arg2[%c0_3, %c0_4] : memref<1x16xf32, #tpu.memory_space<vmem>>, vector<1x16xf32>
    %c0_5 = arith.constant 0 : index
    %c0_6 = arith.constant 0 : index
    %3 = vector.load %arg3[%c0_5, %c0_6] : memref<32x16xf32, #tpu.memory_space<vmem>>, vector<32x16xf32>
    %c0_7 = arith.constant 0 : index
    %c0_8 = arith.constant 0 : index
    %4 = vector.load %arg4[%c0_7, %c0_8] : memref<1x32xf32, #tpu.memory_space<vmem>>, vector<1x32xf32>
    %c0_9 = arith.constant 0 : index
    %c0_10 = arith.constant 0 : index
    %5 = vector.load %arg5[%c0_9, %c0_10] : memref<16x32xf32, #tpu.memory_space<vmem>>, vector<16x32xf32>
    %c0_11 = arith.constant 0 : index
    %c0_12 = arith.constant 0 : index
    %6 = vector.load %arg6[%c0_11, %c0_12] : memref<1x8xf32, #tpu.memory_space<vmem>>, vector<1x8xf32>
    %c0_13 = arith.constant 0 : index
    %c0_14 = arith.constant 0 : index
    %7 = vector.load %arg7[%c0_13, %c0_14] : memref<32x8xf32, #tpu.memory_space<vmem>>, vector<32x8xf32>
    %c0_15 = arith.constant 0 : index
    %c0_16 = arith.constant 0 : index
    %8 = vector.load %arg8[%c0_15, %c0_16] : memref<32x8xf32, #tpu.memory_space<vmem>>, vector<32x8xf32>
    %c0_17 = arith.constant 0 : index
    %c0_18 = arith.constant 0 : index
    %9 = vector.load %arg9[%c0_17, %c0_18] : memref<2x8xf32, #tpu.memory_space<vmem>>, vector<2x8xf32>
    %c0_19 = arith.constant 0 : index
    %c0_20 = arith.constant 0 : index
    %10 = vector.load %arg10[%c0_19, %c0_20] : memref<1x2xf32, #tpu.memory_space<vmem>>, vector<1x2xf32>
    %c0_21 = arith.constant 0 : index
    %c0_22 = arith.constant 0 : index
    %11 = vector.load %arg11[%c0_21, %c0_22] : memref<1x2xf32, #tpu.memory_space<vmem>>, vector<1x2xf32>
    %c0_23 = arith.constant 0 : index
    %c0_24 = arith.constant 0 : index
    %12 = vector.load %arg12[%c0_23, %c0_24] : memref<2x2xf32, #tpu.memory_space<vmem>>, vector<2x2xf32>
    %c0_25 = arith.constant 0 : index
    %c0_26 = arith.constant 0 : index
    %13 = vector.load %arg13[%c0_25, %c0_26] : memref<1x2xf32, #tpu.memory_space<vmem>>, vector<1x2xf32>
    %c0_27 = arith.constant 0 : index
    %c0_28 = arith.constant 0 : index
    %14 = vector.load %arg14[%c0_27, %c0_28] : memref<1x2xf32, #tpu.memory_space<vmem>>, vector<1x2xf32>
    %c0_29 = arith.constant 0 : index
    %c0_30 = arith.constant 0 : index
    %15 = vector.load %arg15[%c0_29, %c0_30] : memref<1x4xf32, #tpu.memory_space<vmem>>, vector<1x4xf32>
    %c0_31 = arith.constant 0 : index
    %c0_32 = arith.constant 0 : index
    %16 = vector.load %arg16[%c0_31, %c0_32] : memref<2x1xf32, #tpu.memory_space<vmem>>, vector<2x1xf32>
    %c0_33 = arith.constant 0 : index
    %c0_34 = arith.constant 0 : index
    %17 = vector.load %arg17[%c0_33, %c0_34] : memref<2x17xf32, #tpu.memory_space<vmem>>, vector<2x17xf32>
    %c0_35 = arith.constant 0 : index
    %c0_36 = arith.constant 0 : index
    %18 = vector.load %arg19[%c0_35, %c0_36] : memref<1x32xf32, #tpu.memory_space<vmem>>, vector<1x32xf32>
    %c0_37 = arith.constant 0 : index
    %c0_38 = arith.constant 0 : index
    %19 = vector.load %arg20[%c0_37, %c0_38] : memref<1x32xf32, #tpu.memory_space<vmem>>, vector<1x32xf32>
    %c0_39 = arith.constant 0 : index
    %c0_40 = arith.constant 0 : index
    %20 = vector.load %arg21[%c0_39, %c0_40] : memref<2x32xf32, #tpu.memory_space<vmem>>, vector<2x32xf32>
    %c0_41 = arith.constant 0 : index
    %c0_42 = arith.constant 0 : index
    %21 = vector.load %arg22[%c0_41, %c0_42] : memref<1x32xf32, #tpu.memory_space<vmem>>, vector<1x32xf32>
    %c0_43 = arith.constant 0 : index
    %c0_44 = arith.constant 0 : index
    %22 = vector.load %arg23[%c0_43, %c0_44] : memref<1x32xf32, #tpu.memory_space<vmem>>, vector<1x32xf32>
    %c0_45 = arith.constant 0 : index
    %c0_46 = arith.constant 0 : index
    %23 = vector.load %arg24[%c0_45, %c0_46] : memref<16x64xf32, #tpu.memory_space<vmem>>, vector<16x64xf32>
    %c0_47 = arith.constant 0 : index
    %c0_48 = arith.constant 0 : index
    %24 = vector.load %arg25[%c0_47, %c0_48] : memref<32x16xf32, #tpu.memory_space<vmem>>, vector<32x16xf32>
    %c0_49 = arith.constant 0 : index
    %c0_50 = arith.constant 0 : index
    %25 = vector.load %arg26[%c0_49, %c0_50] : memref<32x17xf32, #tpu.memory_space<vmem>>, vector<32x17xf32>
    %c0_51 = arith.constant 0 : index
    %c0_52 = arith.constant 0 : index
    %26 = vector.load %arg28[%c0_51, %c0_52] : memref<1x64xf32, #tpu.memory_space<vmem>>, vector<1x64xf32>
    %c0_53 = arith.constant 0 : index
    %c0_54 = arith.constant 0 : index
    %27 = vector.load %arg29[%c0_53, %c0_54] : memref<1x64xf32, #tpu.memory_space<vmem>>, vector<1x64xf32>
    %c0_55 = arith.constant 0 : index
    %c0_56 = arith.constant 0 : index
    %28 = vector.load %arg30[%c0_55, %c0_56] : memref<2x64xf32, #tpu.memory_space<vmem>>, vector<2x64xf32>
    %c0_57 = arith.constant 0 : index
    %c0_58 = arith.constant 0 : index
    %29 = vector.load %arg31[%c0_57, %c0_58] : memref<1x64xf32, #tpu.memory_space<vmem>>, vector<1x64xf32>
    %c0_59 = arith.constant 0 : index
    %c0_60 = arith.constant 0 : index
    %30 = vector.load %arg32[%c0_59, %c0_60] : memref<2x64xf32, #tpu.memory_space<vmem>>, vector<2x64xf32>
    %c0_61 = arith.constant 0 : index
    %c0_62 = arith.constant 0 : index
    %31 = vector.load %arg33[%c0_61, %c0_62] : memref<32x128xf32, #tpu.memory_space<vmem>>, vector<32x128xf32>
    %c0_63 = arith.constant 0 : index
    %c0_64 = arith.constant 0 : index
    %32 = vector.load %arg34[%c0_63, %c0_64] : memref<64x32xf32, #tpu.memory_space<vmem>>, vector<64x32xf32>
    %c0_65 = arith.constant 0 : index
    %c0_66 = arith.constant 0 : index
    %33 = vector.load %arg35[%c0_65, %c0_66] : memref<64x18xf32, #tpu.memory_space<vmem>>, vector<64x18xf32>
    %c0_67 = arith.constant 0 : index
    %c0_68 = arith.constant 0 : index
    %34 = vector.load %arg36[%c0_67, %c0_68] : memref<2x8xf32, #tpu.memory_space<vmem>>, vector<2x8xf32>
    %c0_69 = arith.constant 0 : index
    %c0_70 = arith.constant 0 : index
    %35 = vector.load %arg37[%c0_69, %c0_70] : memref<1x2xf32, #tpu.memory_space<vmem>>, vector<1x2xf32>
    %c0_71 = arith.constant 0 : index
    %c0_72 = arith.constant 0 : index
    %36 = vector.load %arg38[%c0_71, %c0_72] : memref<1x2xf32, #tpu.memory_space<vmem>>, vector<1x2xf32>
    %c0_73 = arith.constant 0 : index
    %c0_74 = arith.constant 0 : index
    %37 = vector.load %arg39[%c0_73, %c0_74] : memref<2x2xf32, #tpu.memory_space<vmem>>, vector<2x2xf32>
    %c0_75 = arith.constant 0 : index
    %c0_76 = arith.constant 0 : index
    %38 = vector.load %arg40[%c0_75, %c0_76] : memref<1x2xf32, #tpu.memory_space<vmem>>, vector<1x2xf32>
    %c0_77 = arith.constant 0 : index
    %c0_78 = arith.constant 0 : index
    %39 = vector.load %arg41[%c0_77, %c0_78] : memref<1x2xf32, #tpu.memory_space<vmem>>, vector<1x2xf32>
    %c0_79 = arith.constant 0 : index
    %c0_80 = arith.constant 0 : index
    %40 = vector.load %arg42[%c0_79, %c0_80] : memref<1x4xf32, #tpu.memory_space<vmem>>, vector<1x4xf32>
    %c0_81 = arith.constant 0 : index
    %c0_82 = arith.constant 0 : index
    %41 = vector.load %arg43[%c0_81, %c0_82] : memref<2x1xf32, #tpu.memory_space<vmem>>, vector<2x1xf32>
    %c0_83 = arith.constant 0 : index
    %c0_84 = arith.constant 0 : index
    %42 = vector.load %arg44[%c0_83, %c0_84] : memref<2x17xf32, #tpu.memory_space<vmem>>, vector<2x17xf32>
    %c0_85 = arith.constant 0 : index
    %c0_86 = arith.constant 0 : index
    %43 = vector.load %arg45[%c0_85, %c0_86] : memref<8x1xf32, #tpu.memory_space<vmem>>, vector<8x1xf32>
    %c0_87 = arith.constant 0 : index
    %c0_88 = arith.constant 0 : index
    %44 = vector.load %arg46[%c0_87, %c0_88] : memref<8x1xf32, #tpu.memory_space<vmem>>, vector<8x1xf32>
    %c0_89 = arith.constant 0 : index
    %c0_90 = arith.constant 0 : index
    %45 = vector.load %arg47[%c0_89, %c0_90] : memref<8x16xf32, #tpu.memory_space<vmem>>, vector<8x16xf32>
    %cst = arith.constant dense<0.000000e+00> : vector<8xf32>
    %46 = vector.multi_reduction <add>, %45, %cst [1] : vector<8x16xf32> to vector<8xf32>
    %47 = vector.shape_cast %46 : vector<8xf32> to vector<8x1xf32>
    %cst_91 = arith.constant 1.600000e+01 : f32
    %48 = vector.broadcast %cst_91 : f32 to vector<8x1xf32>
    %49 = arith.divf %47, %48 : vector<8x1xf32>
    %50 = vector.broadcast %49 : vector<8x1xf32> to vector<8x16xf32>
    %51 = arith.subf %45, %50 : vector<8x16xf32>
    %52 = arith.mulf %51, %51 : vector<8x16xf32>
    %cst_92 = arith.constant dense<0.000000e+00> : vector<8xf32>
    %53 = vector.multi_reduction <add>, %52, %cst_92 [1] : vector<8x16xf32> to vector<8xf32>
    %54 = vector.shape_cast %53 : vector<8xf32> to vector<8x1xf32>
    %cst_93 = arith.constant 1.600000e+01 : f32
    %55 = vector.broadcast %cst_93 : f32 to vector<8x1xf32>
    %56 = arith.divf %54, %55 : vector<8x1xf32>
    %cst_94 = arith.constant 9.99999974E-6 : f32
    %57 = vector.broadcast %cst_94 : f32 to vector<8x1xf32>
    %58 = arith.addf %56, %57 : vector<8x1xf32>
    %59 = math.sqrt %58 : vector<8x1xf32>
    %60 = vector.broadcast %49 : vector<8x1xf32> to vector<8x16xf32>
    %61 = arith.subf %45, %60 : vector<8x16xf32>
    %62 = vector.broadcast %59 : vector<8x1xf32> to vector<8x16xf32>
    %63 = arith.divf %61, %62 : vector<8x16xf32>
    %64 = vector.broadcast %44 : vector<8x1xf32> to vector<8x16xf32>
    %65 = arith.mulf %63, %64 : vector<8x16xf32>
    %66 = vector.broadcast %43 : vector<8x1xf32> to vector<8x16xf32>
    %67 = arith.addf %65, %66 : vector<8x16xf32>
    %cst_95 = arith.constant dense<0.000000e+00> : vector<8x32xf32>
    %68 = tpu.matmul %67, %1, %cst_95 {dimension_numbers = #tpu.dot_dimension_numbers<[1], [0], [0], [1], [0, 0, 1, 1], [], []>} : vector<8x16xf32>, vector<16x32xf32>, vector<8x32xf32> -> vector<8x32xf32>
    %69 = vector.broadcast %0 : vector<1x32xf32> to vector<8x32xf32>
    %70 = arith.addf %68, %69 : vector<8x32xf32>
    %cst_96 = arith.constant dense<0.000000e+00> : vector<8x128xf32>
    %71 = tpu.matmul %70, %31, %cst_96 {dimension_numbers = #tpu.dot_dimension_numbers<[1], [0], [0], [1], [0, 0, 1, 1], [], []>} : vector<8x32xf32>, vector<32x128xf32>, vector<8x128xf32> -> vector<8x128xf32>
    %72 = vector.extract_strided_slice %71 {offsets = [0, 0], sizes = [8, 64], strides = [1, 1]} : vector<8x128xf32> to vector<8x64xf32>
    %73 = vector.extract_strided_slice %71 {offsets = [0, 64], sizes = [8, 64], strides = [1, 1]} : vector<8x128xf32> to vector<8x64xf32>
    %74 = vector.extract_strided_slice %28 {offsets = [1, 0], sizes = [1, 64], strides = [1, 1]} : vector<2x64xf32> to vector<1x64xf32>
    %75 = vector.broadcast %74 : vector<1x64xf32> to vector<8x64xf32>
    %76 = arith.mulf %72, %75 : vector<8x64xf32>
    %77 = vector.broadcast %27 : vector<1x64xf32> to vector<8x64xf32>
    %78 = arith.addf %76, %77 : vector<8x64xf32>
    %cst_97 = arith.constant 0.000000e+00 : f32
    %79 = vector.broadcast %cst_97 : f32 to vector<8x64xf32>
    %80 = arith.subf %79, %78 : vector<8x64xf32>
    %81 = math.exp %80 : vector<8x64xf32>
    %cst_98 = arith.constant 1.000000e+00 : f32
    %82 = vector.broadcast %cst_98 : f32 to vector<8x64xf32>
    %83 = arith.addf %82, %81 : vector<8x64xf32>
    %cst_99 = arith.constant 1.000000e+00 : f32
    %84 = vector.broadcast %cst_99 : f32 to vector<8x64xf32>
    %85 = arith.divf %84, %83 : vector<8x64xf32>
    %86 = arith.mulf %78, %85 : vector<8x64xf32>
    %cst_100 = arith.constant dense<0.000000e+00> : vector<8x18xf32>
    %87 = tpu.matmul %86, %33, %cst_100 {dimension_numbers = #tpu.dot_dimension_numbers<[1], [0], [0], [1], [0, 0, 1, 1], [], []>} : vector<8x64xf32>, vector<64x18xf32>, vector<8x18xf32> -> vector<8x18xf32>
    %88 = vector.extract_strided_slice %87 {offsets = [0, 0], sizes = [8, 2], strides = [1, 1]} : vector<8x18xf32> to vector<8x2xf32>
    %89 = vector.extract_strided_slice %87 {offsets = [0, 2], sizes = [8, 8], strides = [1, 1]} : vector<8x18xf32> to vector<8x8xf32>
    %90 = vector.extract_strided_slice %87 {offsets = [0, 10], sizes = [8, 8], strides = [1, 1]} : vector<8x18xf32> to vector<8x8xf32>
    %cst_101 = arith.constant dense<0.000000e+00> : vector<8x64xf32>
    %91 = tpu.matmul %88, %30, %cst_101 {dimension_numbers = #tpu.dot_dimension_numbers<[1], [0], [0], [1], [0, 0, 1, 1], [], []>} : vector<8x2xf32>, vector<2x64xf32>, vector<8x64xf32> -> vector<8x64xf32>
    %92 = vector.broadcast %29 : vector<1x64xf32> to vector<8x64xf32>
    %93 = arith.addf %91, %92 : vector<8x64xf32>
    %cst_102 = arith.constant 0.000000e+00 : f32
    %94 = vector.broadcast %cst_102 : f32 to vector<8x64xf32>
    %95 = arith.maximumf %93, %94 : vector<8x64xf32>
    %96 = math.absf %93 : vector<8x64xf32>
    %cst_103 = arith.constant 0.000000e+00 : f32
    %97 = vector.broadcast %cst_103 : f32 to vector<8x64xf32>
    %98 = arith.subf %97, %96 : vector<8x64xf32>
    %99 = math.exp %98 : vector<8x64xf32>
    %cst_104 = arith.constant 1.000000e+00 : f32
    %100 = vector.broadcast %cst_104 : f32 to vector<8x64xf32>
    %101 = arith.addf %100, %99 : vector<8x64xf32>
    %102 = math.log %101 : vector<8x64xf32>
    %103 = arith.addf %95, %102 : vector<8x64xf32>
    %104 = arith.mulf %90, %89 : vector<8x8xf32>
    %cst_105 = arith.constant dense<0.000000e+00> : vector<8xf32>
    %105 = vector.multi_reduction <add>, %104, %cst_105 [1] : vector<8x8xf32> to vector<8xf32>
    %106 = vector.shape_cast %105 : vector<8xf32> to vector<8x1xf32>
    %107 = arith.mulf %103, %86 : vector<8x64xf32>
    %108 = vector.broadcast %106 : vector<8x1xf32> to vector<8x64xf32>
    %109 = arith.mulf %108, %107 : vector<8x64xf32>
    %110 = vector.broadcast %26 : vector<1x64xf32> to vector<8x64xf32>
    %111 = arith.mulf %110, %86 : vector<8x64xf32>
    %112 = arith.addf %109, %111 : vector<8x64xf32>
    %cst_106 = arith.constant 0.000000e+00 : f32
    %113 = vector.broadcast %cst_106 : f32 to vector<8x64xf32>
    %114 = arith.subf %113, %73 : vector<8x64xf32>
    %115 = math.exp %114 : vector<8x64xf32>
    %cst_107 = arith.constant 1.000000e+00 : f32
    %116 = vector.broadcast %cst_107 : f32 to vector<8x64xf32>
    %117 = arith.addf %116, %115 : vector<8x64xf32>
    %cst_108 = arith.constant 1.000000e+00 : f32
    %118 = vector.broadcast %cst_108 : f32 to vector<8x64xf32>
    %119 = arith.divf %118, %117 : vector<8x64xf32>
    %120 = arith.mulf %73, %119 : vector<8x64xf32>
    %121 = arith.mulf %112, %120 : vector<8x64xf32>
    %cst_109 = arith.constant dense<0.000000e+00> : vector<8x32xf32>
    %122 = tpu.matmul %121, %32, %cst_109 {dimension_numbers = #tpu.dot_dimension_numbers<[1], [0], [0], [1], [0, 0, 1, 1], [], []>} : vector<8x64xf32>, vector<64x32xf32>, vector<8x32xf32> -> vector<8x32xf32>
    %123 = math.exp %34 : vector<2x8xf32>
    %cst_110 = arith.constant 0.000000e+00 : f32
    %124 = vector.broadcast %cst_110 : f32 to vector<2x8xf32>
    %125 = arith.subf %124, %123 : vector<2x8xf32>
    %126 = tpu.transpose %70, [1, 0] : vector<8x32xf32> -> vector<32x8xf32>
    %127 = vector.extract_strided_slice %40 {offsets = [0, 0], sizes = [1, 1], strides = [1, 1]} : vector<1x4xf32> to vector<1x1xf32>
    %128 = vector.broadcast %127 : vector<1x1xf32> to vector<32x8xf32>
    %129 = arith.mulf %126, %128 : vector<32x8xf32>
    %130 = vector.extract_strided_slice %40 {offsets = [0, 2], sizes = [1, 1], strides = [1, 1]} : vector<1x4xf32> to vector<1x1xf32>
    %131 = vector.broadcast %130 : vector<1x1xf32> to vector<32x8xf32>
    %132 = arith.mulf %126, %131 : vector<32x8xf32>
    %cst_111 = arith.constant 0.000000e+00 : f32
    %133 = vector.broadcast %cst_111 : f32 to vector<32x8xf32>
    %cst_112 = arith.constant 0.000000e+00 : f32
    %134 = vector.broadcast %cst_112 : f32 to vector<1x8xf32>
    %135 = vector.extract_strided_slice %129 {offsets = [0, 0], sizes = [31, 8], strides = [1, 1]} : vector<32x8xf32> to vector<31x8xf32>
    %136 = tpu.concatenate %134, %135 in 0 : vector<1x8xf32>, vector<31x8xf32> -> vector<32x8xf32>
    %137 = vector.extract_strided_slice %37 {offsets = [0, 0], sizes = [1, 1], strides = [1, 1]} : vector<2x2xf32> to vector<1x1xf32>
    %138 = vector.broadcast %137 : vector<1x1xf32> to vector<32x8xf32>
    %139 = arith.mulf %136, %138 : vector<32x8xf32>
    %140 = arith.addf %133, %139 : vector<32x8xf32>
    %141 = vector.extract_strided_slice %37 {offsets = [1, 0], sizes = [1, 1], strides = [1, 1]} : vector<2x2xf32> to vector<1x1xf32>
    %142 = vector.broadcast %141 : vector<1x1xf32> to vector<32x8xf32>
    %143 = arith.mulf %129, %142 : vector<32x8xf32>
    %144 = arith.addf %140, %143 : vector<32x8xf32>
    %145 = vector.extract_strided_slice %36 {offsets = [0, 0], sizes = [1, 1], strides = [1, 1]} : vector<1x2xf32> to vector<1x1xf32>
    %146 = vector.broadcast %145 : vector<1x1xf32> to vector<32x8xf32>
    %147 = arith.addf %144, %146 : vector<32x8xf32>
    %cst_113 = arith.constant 0.000000e+00 : f32
    %148 = vector.broadcast %cst_113 : f32 to vector<32x8xf32>
    %149 = arith.subf %148, %147 : vector<32x8xf32>
    %150 = math.exp %149 : vector<32x8xf32>
    %cst_114 = arith.constant 1.000000e+00 : f32
    %151 = vector.broadcast %cst_114 : f32 to vector<32x8xf32>
    %152 = arith.addf %151, %150 : vector<32x8xf32>
    %cst_115 = arith.constant 1.000000e+00 : f32
    %153 = vector.broadcast %cst_115 : f32 to vector<32x8xf32>
    %154 = arith.divf %153, %152 : vector<32x8xf32>
    %155 = arith.mulf %147, %154 : vector<32x8xf32>
    %156 = vector.extract_strided_slice %40 {offsets = [0, 1], sizes = [1, 1], strides = [1, 1]} : vector<1x4xf32> to vector<1x1xf32>
    %157 = vector.broadcast %156 : vector<1x1xf32> to vector<32x8xf32>
    %158 = arith.mulf %126, %157 : vector<32x8xf32>
    %159 = vector.extract_strided_slice %40 {offsets = [0, 3], sizes = [1, 1], strides = [1, 1]} : vector<1x4xf32> to vector<1x1xf32>
    %160 = vector.broadcast %159 : vector<1x1xf32> to vector<32x8xf32>
    %161 = arith.mulf %126, %160 : vector<32x8xf32>
    %cst_116 = arith.constant 0.000000e+00 : f32
    %162 = vector.broadcast %cst_116 : f32 to vector<32x8xf32>
    %cst_117 = arith.constant 0.000000e+00 : f32
    %163 = vector.broadcast %cst_117 : f32 to vector<1x8xf32>
    %164 = vector.extract_strided_slice %158 {offsets = [0, 0], sizes = [31, 8], strides = [1, 1]} : vector<32x8xf32> to vector<31x8xf32>
    %165 = tpu.concatenate %163, %164 in 0 : vector<1x8xf32>, vector<31x8xf32> -> vector<32x8xf32>
    %166 = vector.extract_strided_slice %37 {offsets = [0, 1], sizes = [1, 1], strides = [1, 1]} : vector<2x2xf32> to vector<1x1xf32>
    %167 = vector.broadcast %166 : vector<1x1xf32> to vector<32x8xf32>
    %168 = arith.mulf %165, %167 : vector<32x8xf32>
    %169 = arith.addf %162, %168 : vector<32x8xf32>
    %170 = vector.extract_strided_slice %37 {offsets = [1, 1], sizes = [1, 1], strides = [1, 1]} : vector<2x2xf32> to vector<1x1xf32>
    %171 = vector.broadcast %170 : vector<1x1xf32> to vector<32x8xf32>
    %172 = arith.mulf %158, %171 : vector<32x8xf32>
    %173 = arith.addf %169, %172 : vector<32x8xf32>
    %174 = vector.extract_strided_slice %36 {offsets = [0, 1], sizes = [1, 1], strides = [1, 1]} : vector<1x2xf32> to vector<1x1xf32>
    %175 = vector.broadcast %174 : vector<1x1xf32> to vector<32x8xf32>
    %176 = arith.addf %173, %175 : vector<32x8xf32>
    %cst_118 = arith.constant 0.000000e+00 : f32
    %177 = vector.broadcast %cst_118 : f32 to vector<32x8xf32>
    %178 = arith.subf %177, %176 : vector<32x8xf32>
    %179 = math.exp %178 : vector<32x8xf32>
    %cst_119 = arith.constant 1.000000e+00 : f32
    %180 = vector.broadcast %cst_119 : f32 to vector<32x8xf32>
    %181 = arith.addf %180, %179 : vector<32x8xf32>
    %cst_120 = arith.constant 1.000000e+00 : f32
    %182 = vector.broadcast %cst_120 : f32 to vector<32x8xf32>
    %183 = arith.divf %182, %181 : vector<32x8xf32>
    %184 = arith.mulf %176, %183 : vector<32x8xf32>
    %185 = vector.extract_strided_slice %42 {offsets = [0, 0], sizes = [1, 1], strides = [1, 1]} : vector<2x17xf32> to vector<1x1xf32>
    %186 = vector.broadcast %185 : vector<1x1xf32> to vector<32x8xf32>
    %187 = arith.mulf %155, %186 : vector<32x8xf32>
    %188 = vector.extract_strided_slice %42 {offsets = [1, 0], sizes = [1, 1], strides = [1, 1]} : vector<2x17xf32> to vector<1x1xf32>
    %189 = vector.broadcast %188 : vector<1x1xf32> to vector<32x8xf32>
    %190 = arith.mulf %184, %189 : vector<32x8xf32>
    %191 = arith.addf %187, %190 : vector<32x8xf32>
    %192 = vector.extract_strided_slice %42 {offsets = [0, 1], sizes = [1, 1], strides = [1, 1]} : vector<2x17xf32> to vector<1x1xf32>
    %193 = vector.broadcast %192 : vector<1x1xf32> to vector<32x8xf32>
    %194 = arith.mulf %155, %193 : vector<32x8xf32>
    %195 = vector.extract_strided_slice %42 {offsets = [1, 1], sizes = [1, 1], strides = [1, 1]} : vector<2x17xf32> to vector<1x1xf32>
    %196 = vector.broadcast %195 : vector<1x1xf32> to vector<32x8xf32>
    %197 = arith.mulf %184, %196 : vector<32x8xf32>
    %198 = arith.addf %194, %197 : vector<32x8xf32>
    %199 = vector.extract_strided_slice %42 {offsets = [0, 2], sizes = [1, 1], strides = [1, 1]} : vector<2x17xf32> to vector<1x1xf32>
    %200 = vector.broadcast %199 : vector<1x1xf32> to vector<32x8xf32>
    %201 = arith.mulf %155, %200 : vector<32x8xf32>
    %202 = vector.extract_strided_slice %42 {offsets = [1, 2], sizes = [1, 1], strides = [1, 1]} : vector<2x17xf32> to vector<1x1xf32>
    %203 = vector.broadcast %202 : vector<1x1xf32> to vector<32x8xf32>
    %204 = arith.mulf %184, %203 : vector<32x8xf32>
    %205 = arith.addf %201, %204 : vector<32x8xf32>
    %206 = vector.extract_strided_slice %42 {offsets = [0, 3], sizes = [1, 1], strides = [1, 1]} : vector<2x17xf32> to vector<1x1xf32>
    %207 = vector.broadcast %206 : vector<1x1xf32> to vector<32x8xf32>
    %208 = arith.mulf %155, %207 : vector<32x8xf32>
    %209 = vector.extract_strided_slice %42 {offsets = [1, 3], sizes = [1, 1], strides = [1, 1]} : vector<2x17xf32> to vector<1x1xf32>
    %210 = vector.broadcast %209 : vector<1x1xf32> to vector<32x8xf32>
    %211 = arith.mulf %184, %210 : vector<32x8xf32>
    %212 = arith.addf %208, %211 : vector<32x8xf32>
    %213 = vector.extract_strided_slice %42 {offsets = [0, 4], sizes = [1, 1], strides = [1, 1]} : vector<2x17xf32> to vector<1x1xf32>
    %214 = vector.broadcast %213 : vector<1x1xf32> to vector<32x8xf32>
    %215 = arith.mulf %155, %214 : vector<32x8xf32>
    %216 = vector.extract_strided_slice %42 {offsets = [1, 4], sizes = [1, 1], strides = [1, 1]} : vector<2x17xf32> to vector<1x1xf32>
    %217 = vector.broadcast %216 : vector<1x1xf32> to vector<32x8xf32>
    %218 = arith.mulf %184, %217 : vector<32x8xf32>
    %219 = arith.addf %215, %218 : vector<32x8xf32>
    %220 = vector.extract_strided_slice %42 {offsets = [0, 5], sizes = [1, 1], strides = [1, 1]} : vector<2x17xf32> to vector<1x1xf32>
    %221 = vector.broadcast %220 : vector<1x1xf32> to vector<32x8xf32>
    %222 = arith.mulf %155, %221 : vector<32x8xf32>
    %223 = vector.extract_strided_slice %42 {offsets = [1, 5], sizes = [1, 1], strides = [1, 1]} : vector<2x17xf32> to vector<1x1xf32>
    %224 = vector.broadcast %223 : vector<1x1xf32> to vector<32x8xf32>
    %225 = arith.mulf %184, %224 : vector<32x8xf32>
    %226 = arith.addf %222, %225 : vector<32x8xf32>
    %227 = vector.extract_strided_slice %42 {offsets = [0, 6], sizes = [1, 1], strides = [1, 1]} : vector<2x17xf32> to vector<1x1xf32>
    %228 = vector.broadcast %227 : vector<1x1xf32> to vector<32x8xf32>
    %229 = arith.mulf %155, %228 : vector<32x8xf32>
    %230 = vector.extract_strided_slice %42 {offsets = [1, 6], sizes = [1, 1], strides = [1, 1]} : vector<2x17xf32> to vector<1x1xf32>
    %231 = vector.broadcast %230 : vector<1x1xf32> to vector<32x8xf32>
    %232 = arith.mulf %184, %231 : vector<32x8xf32>
    %233 = arith.addf %229, %232 : vector<32x8xf32>
    %234 = vector.extract_strided_slice %42 {offsets = [0, 7], sizes = [1, 1], strides = [1, 1]} : vector<2x17xf32> to vector<1x1xf32>
    %235 = vector.broadcast %234 : vector<1x1xf32> to vector<32x8xf32>
    %236 = arith.mulf %155, %235 : vector<32x8xf32>
    %237 = vector.extract_strided_slice %42 {offsets = [1, 7], sizes = [1, 1], strides = [1, 1]} : vector<2x17xf32> to vector<1x1xf32>
    %238 = vector.broadcast %237 : vector<1x1xf32> to vector<32x8xf32>
    %239 = arith.mulf %184, %238 : vector<32x8xf32>
    %240 = arith.addf %236, %239 : vector<32x8xf32>
    %241 = vector.extract_strided_slice %42 {offsets = [0, 8], sizes = [1, 1], strides = [1, 1]} : vector<2x17xf32> to vector<1x1xf32>
    %242 = vector.broadcast %241 : vector<1x1xf32> to vector<32x8xf32>
    %243 = arith.mulf %155, %242 : vector<32x8xf32>
    %244 = vector.extract_strided_slice %42 {offsets = [1, 8], sizes = [1, 1], strides = [1, 1]} : vector<2x17xf32> to vector<1x1xf32>
    %245 = vector.broadcast %244 : vector<1x1xf32> to vector<32x8xf32>
    %246 = arith.mulf %184, %245 : vector<32x8xf32>
    %247 = arith.addf %243, %246 : vector<32x8xf32>
    %248 = vector.extract_strided_slice %42 {offsets = [0, 9], sizes = [1, 1], strides = [1, 1]} : vector<2x17xf32> to vector<1x1xf32>
    %249 = vector.broadcast %248 : vector<1x1xf32> to vector<32x8xf32>
    %250 = arith.mulf %155, %249 : vector<32x8xf32>
    %251 = vector.extract_strided_slice %42 {offsets = [1, 9], sizes = [1, 1], strides = [1, 1]} : vector<2x17xf32> to vector<1x1xf32>
    %252 = vector.broadcast %251 : vector<1x1xf32> to vector<32x8xf32>
    %253 = arith.mulf %184, %252 : vector<32x8xf32>
    %254 = arith.addf %250, %253 : vector<32x8xf32>
    %255 = vector.extract_strided_slice %42 {offsets = [0, 10], sizes = [1, 1], strides = [1, 1]} : vector<2x17xf32> to vector<1x1xf32>
    %256 = vector.broadcast %255 : vector<1x1xf32> to vector<32x8xf32>
    %257 = arith.mulf %155, %256 : vector<32x8xf32>
    %258 = vector.extract_strided_slice %42 {offsets = [1, 10], sizes = [1, 1], strides = [1, 1]} : vector<2x17xf32> to vector<1x1xf32>
    %259 = vector.broadcast %258 : vector<1x1xf32> to vector<32x8xf32>
    %260 = arith.mulf %184, %259 : vector<32x8xf32>
    %261 = arith.addf %257, %260 : vector<32x8xf32>
    %262 = vector.extract_strided_slice %42 {offsets = [0, 11], sizes = [1, 1], strides = [1, 1]} : vector<2x17xf32> to vector<1x1xf32>
    %263 = vector.broadcast %262 : vector<1x1xf32> to vector<32x8xf32>
    %264 = arith.mulf %155, %263 : vector<32x8xf32>
    %265 = vector.extract_strided_slice %42 {offsets = [1, 11], sizes = [1, 1], strides = [1, 1]} : vector<2x17xf32> to vector<1x1xf32>
    %266 = vector.broadcast %265 : vector<1x1xf32> to vector<32x8xf32>
    %267 = arith.mulf %184, %266 : vector<32x8xf32>
    %268 = arith.addf %264, %267 : vector<32x8xf32>
    %269 = vector.extract_strided_slice %42 {offsets = [0, 12], sizes = [1, 1], strides = [1, 1]} : vector<2x17xf32> to vector<1x1xf32>
    %270 = vector.broadcast %269 : vector<1x1xf32> to vector<32x8xf32>
    %271 = arith.mulf %155, %270 : vector<32x8xf32>
    %272 = vector.extract_strided_slice %42 {offsets = [1, 12], sizes = [1, 1], strides = [1, 1]} : vector<2x17xf32> to vector<1x1xf32>
    %273 = vector.broadcast %272 : vector<1x1xf32> to vector<32x8xf32>
    %274 = arith.mulf %184, %273 : vector<32x8xf32>
    %275 = arith.addf %271, %274 : vector<32x8xf32>
    %276 = vector.extract_strided_slice %42 {offsets = [0, 13], sizes = [1, 1], strides = [1, 1]} : vector<2x17xf32> to vector<1x1xf32>
    %277 = vector.broadcast %276 : vector<1x1xf32> to vector<32x8xf32>
    %278 = arith.mulf %155, %277 : vector<32x8xf32>
    %279 = vector.extract_strided_slice %42 {offsets = [1, 13], sizes = [1, 1], strides = [1, 1]} : vector<2x17xf32> to vector<1x1xf32>
    %280 = vector.broadcast %279 : vector<1x1xf32> to vector<32x8xf32>
    %281 = arith.mulf %184, %280 : vector<32x8xf32>
    %282 = arith.addf %278, %281 : vector<32x8xf32>
    %283 = vector.extract_strided_slice %42 {offsets = [0, 14], sizes = [1, 1], strides = [1, 1]} : vector<2x17xf32> to vector<1x1xf32>
    %284 = vector.broadcast %283 : vector<1x1xf32> to vector<32x8xf32>
    %285 = arith.mulf %155, %284 : vector<32x8xf32>
    %286 = vector.extract_strided_slice %42 {offsets = [1, 14], sizes = [1, 1], strides = [1, 1]} : vector<2x17xf32> to vector<1x1xf32>
    %287 = vector.broadcast %286 : vector<1x1xf32> to vector<32x8xf32>
    %288 = arith.mulf %184, %287 : vector<32x8xf32>
    %289 = arith.addf %285, %288 : vector<32x8xf32>
    %290 = vector.extract_strided_slice %42 {offsets = [0, 15], sizes = [1, 1], strides = [1, 1]} : vector<2x17xf32> to vector<1x1xf32>
    %291 = vector.broadcast %290 : vector<1x1xf32> to vector<32x8xf32>
    %292 = arith.mulf %155, %291 : vector<32x8xf32>
    %293 = vector.extract_strided_slice %42 {offsets = [1, 15], sizes = [1, 1], strides = [1, 1]} : vector<2x17xf32> to vector<1x1xf32>
    %294 = vector.broadcast %293 : vector<1x1xf32> to vector<32x8xf32>
    %295 = arith.mulf %184, %294 : vector<32x8xf32>
    %296 = arith.addf %292, %295 : vector<32x8xf32>
    %297 = vector.extract_strided_slice %42 {offsets = [0, 16], sizes = [1, 1], strides = [1, 1]} : vector<2x17xf32> to vector<1x1xf32>
    %298 = vector.broadcast %297 : vector<1x1xf32> to vector<32x8xf32>
    %299 = arith.mulf %155, %298 : vector<32x8xf32>
    %300 = vector.extract_strided_slice %42 {offsets = [1, 16], sizes = [1, 1], strides = [1, 1]} : vector<2x17xf32> to vector<1x1xf32>
    %301 = vector.broadcast %300 : vector<1x1xf32> to vector<32x8xf32>
    %302 = arith.mulf %184, %301 : vector<32x8xf32>
    %303 = arith.addf %299, %302 : vector<32x8xf32>
    %304 = vector.extract_strided_slice %39 {offsets = [0, 0], sizes = [1, 1], strides = [1, 1]} : vector<1x2xf32> to vector<1x1xf32>
    %305 = vector.broadcast %304 : vector<1x1xf32> to vector<32x8xf32>
    %306 = arith.mulf %191, %305 : vector<32x8xf32>
    %307 = vector.extract_strided_slice %38 {offsets = [0, 0], sizes = [1, 1], strides = [1, 1]} : vector<1x2xf32> to vector<1x1xf32>
    %308 = vector.broadcast %307 : vector<1x1xf32> to vector<32x8xf32>
    %309 = arith.addf %306, %308 : vector<32x8xf32>
    %cst_121 = arith.constant 0.000000e+00 : f32
    %310 = vector.broadcast %cst_121 : f32 to vector<32x8xf32>
    %311 = arith.maximumf %309, %310 : vector<32x8xf32>
    %312 = math.absf %309 : vector<32x8xf32>
    %cst_122 = arith.constant 0.000000e+00 : f32
    %313 = vector.broadcast %cst_122 : f32 to vector<32x8xf32>
    %314 = arith.subf %313, %312 : vector<32x8xf32>
    %315 = math.exp %314 : vector<32x8xf32>
    %cst_123 = arith.constant 1.000000e+00 : f32
    %316 = vector.broadcast %cst_123 : f32 to vector<32x8xf32>
    %317 = arith.addf %316, %315 : vector<32x8xf32>
    %318 = math.log %317 : vector<32x8xf32>
    %319 = arith.addf %311, %318 : vector<32x8xf32>
    %320 = arith.mulf %319, %155 : vector<32x8xf32>
    %321 = vector.extract_strided_slice %39 {offsets = [0, 1], sizes = [1, 1], strides = [1, 1]} : vector<1x2xf32> to vector<1x1xf32>
    %322 = vector.broadcast %321 : vector<1x1xf32> to vector<32x8xf32>
    %323 = arith.mulf %191, %322 : vector<32x8xf32>
    %324 = vector.extract_strided_slice %38 {offsets = [0, 1], sizes = [1, 1], strides = [1, 1]} : vector<1x2xf32> to vector<1x1xf32>
    %325 = vector.broadcast %324 : vector<1x1xf32> to vector<32x8xf32>
    %326 = arith.addf %323, %325 : vector<32x8xf32>
    %cst_124 = arith.constant 0.000000e+00 : f32
    %327 = vector.broadcast %cst_124 : f32 to vector<32x8xf32>
    %328 = arith.maximumf %326, %327 : vector<32x8xf32>
    %329 = math.absf %326 : vector<32x8xf32>
    %cst_125 = arith.constant 0.000000e+00 : f32
    %330 = vector.broadcast %cst_125 : f32 to vector<32x8xf32>
    %331 = arith.subf %330, %329 : vector<32x8xf32>
    %332 = math.exp %331 : vector<32x8xf32>
    %cst_126 = arith.constant 1.000000e+00 : f32
    %333 = vector.broadcast %cst_126 : f32 to vector<32x8xf32>
    %334 = arith.addf %333, %332 : vector<32x8xf32>
    %335 = math.log %334 : vector<32x8xf32>
    %336 = arith.addf %328, %335 : vector<32x8xf32>
    %337 = arith.mulf %336, %184 : vector<32x8xf32>
    %338 = vector.extract_strided_slice %125 {offsets = [0, 0], sizes = [1, 1], strides = [1, 1]} : vector<2x8xf32> to vector<1x1xf32>
    %339 = vector.broadcast %338 : vector<1x1xf32> to vector<32x8xf32>
    %340 = arith.mulf %319, %339 : vector<32x8xf32>
    %341 = arith.mulf %198, %320 : vector<32x8xf32>
    %342 = vector.extract_strided_slice %125 {offsets = [0, 1], sizes = [1, 1], strides = [1, 1]} : vector<2x8xf32> to vector<1x1xf32>
    %343 = vector.broadcast %342 : vector<1x1xf32> to vector<32x8xf32>
    %344 = arith.mulf %319, %343 : vector<32x8xf32>
    %345 = arith.mulf %205, %320 : vector<32x8xf32>
    %346 = vector.extract_strided_slice %125 {offsets = [0, 2], sizes = [1, 1], strides = [1, 1]} : vector<2x8xf32> to vector<1x1xf32>
    %347 = vector.broadcast %346 : vector<1x1xf32> to vector<32x8xf32>
    %348 = arith.mulf %319, %347 : vector<32x8xf32>
    %349 = arith.mulf %212, %320 : vector<32x8xf32>
    %350 = vector.extract_strided_slice %125 {offsets = [0, 3], sizes = [1, 1], strides = [1, 1]} : vector<2x8xf32> to vector<1x1xf32>
    %351 = vector.broadcast %350 : vector<1x1xf32> to vector<32x8xf32>
    %352 = arith.mulf %319, %351 : vector<32x8xf32>
    %353 = arith.mulf %219, %320 : vector<32x8xf32>
    %354 = vector.extract_strided_slice %125 {offsets = [0, 4], sizes = [1, 1], strides = [1, 1]} : vector<2x8xf32> to vector<1x1xf32>
    %355 = vector.broadcast %354 : vector<1x1xf32> to vector<32x8xf32>
    %356 = arith.mulf %319, %355 : vector<32x8xf32>
    %357 = arith.mulf %226, %320 : vector<32x8xf32>
    %358 = vector.extract_strided_slice %125 {offsets = [0, 5], sizes = [1, 1], strides = [1, 1]} : vector<2x8xf32> to vector<1x1xf32>
    %359 = vector.broadcast %358 : vector<1x1xf32> to vector<32x8xf32>
    %360 = arith.mulf %319, %359 : vector<32x8xf32>
    %361 = arith.mulf %233, %320 : vector<32x8xf32>
    %362 = vector.extract_strided_slice %125 {offsets = [0, 6], sizes = [1, 1], strides = [1, 1]} : vector<2x8xf32> to vector<1x1xf32>
    %363 = vector.broadcast %362 : vector<1x1xf32> to vector<32x8xf32>
    %364 = arith.mulf %319, %363 : vector<32x8xf32>
    %365 = arith.mulf %240, %320 : vector<32x8xf32>
    %366 = vector.extract_strided_slice %125 {offsets = [0, 7], sizes = [1, 1], strides = [1, 1]} : vector<2x8xf32> to vector<1x1xf32>
    %367 = vector.broadcast %366 : vector<1x1xf32> to vector<32x8xf32>
    %368 = arith.mulf %319, %367 : vector<32x8xf32>
    %369 = arith.mulf %247, %320 : vector<32x8xf32>
    %370 = vector.extract_strided_slice %125 {offsets = [1, 0], sizes = [1, 1], strides = [1, 1]} : vector<2x8xf32> to vector<1x1xf32>
    %371 = vector.broadcast %370 : vector<1x1xf32> to vector<32x8xf32>
    %372 = arith.mulf %336, %371 : vector<32x8xf32>
    %373 = arith.mulf %198, %337 : vector<32x8xf32>
    %374 = vector.extract_strided_slice %125 {offsets = [1, 1], sizes = [1, 1], strides = [1, 1]} : vector<2x8xf32> to vector<1x1xf32>
    %375 = vector.broadcast %374 : vector<1x1xf32> to vector<32x8xf32>
    %376 = arith.mulf %336, %375 : vector<32x8xf32>
    %377 = arith.mulf %205, %337 : vector<32x8xf32>
    %378 = vector.extract_strided_slice %125 {offsets = [1, 2], sizes = [1, 1], strides = [1, 1]} : vector<2x8xf32> to vector<1x1xf32>
    %379 = vector.broadcast %378 : vector<1x1xf32> to vector<32x8xf32>
    %380 = arith.mulf %336, %379 : vector<32x8xf32>
    %381 = arith.mulf %212, %337 : vector<32x8xf32>
    %382 = vector.extract_strided_slice %125 {offsets = [1, 3], sizes = [1, 1], strides = [1, 1]} : vector<2x8xf32> to vector<1x1xf32>
    %383 = vector.broadcast %382 : vector<1x1xf32> to vector<32x8xf32>
    %384 = arith.mulf %336, %383 : vector<32x8xf32>
    %385 = arith.mulf %219, %337 : vector<32x8xf32>
    %386 = vector.extract_strided_slice %125 {offsets = [1, 4], sizes = [1, 1], strides = [1, 1]} : vector<2x8xf32> to vector<1x1xf32>
    %387 = vector.broadcast %386 : vector<1x1xf32> to vector<32x8xf32>
    %388 = arith.mulf %336, %387 : vector<32x8xf32>
    %389 = arith.mulf %226, %337 : vector<32x8xf32>
    %390 = vector.extract_strided_slice %125 {offsets = [1, 5], sizes = [1, 1], strides = [1, 1]} : vector<2x8xf32> to vector<1x1xf32>
    %391 = vector.broadcast %390 : vector<1x1xf32> to vector<32x8xf32>
    %392 = arith.mulf %336, %391 : vector<32x8xf32>
    %393 = arith.mulf %233, %337 : vector<32x8xf32>
    %394 = vector.extract_strided_slice %125 {offsets = [1, 6], sizes = [1, 1], strides = [1, 1]} : vector<2x8xf32> to vector<1x1xf32>
    %395 = vector.broadcast %394 : vector<1x1xf32> to vector<32x8xf32>
    %396 = arith.mulf %336, %395 : vector<32x8xf32>
    %397 = arith.mulf %240, %337 : vector<32x8xf32>
    %398 = vector.extract_strided_slice %125 {offsets = [1, 7], sizes = [1, 1], strides = [1, 1]} : vector<2x8xf32> to vector<1x1xf32>
    %399 = vector.broadcast %398 : vector<1x1xf32> to vector<32x8xf32>
    %400 = arith.mulf %336, %399 : vector<32x8xf32>
    %401 = arith.mulf %247, %337 : vector<32x8xf32>
    %402 = tpu.concatenate %340, %344, %348, %352, %356, %360, %364, %368, %372, %376, %380, %384, %388, %392, %396, %400 in 1 : vector<32x8xf32>, vector<32x8xf32>, vector<32x8xf32>, vector<32x8xf32>, vector<32x8xf32>, vector<32x8xf32>, vector<32x8xf32>, vector<32x8xf32>, vector<32x8xf32>, vector<32x8xf32>, vector<32x8xf32>, vector<32x8xf32>, vector<32x8xf32>, vector<32x8xf32>, vector<32x8xf32>, vector<32x8xf32> -> vector<32x128xf32>
    %403 = math.exp %402 : vector<32x128xf32>
    %404 = tpu.concatenate %341, %345, %349, %353, %357, %361, %365, %369, %373, %377, %381, %385, %389, %393, %397, %401 in 1 : vector<32x8xf32>, vector<32x8xf32>, vector<32x8xf32>, vector<32x8xf32>, vector<32x8xf32>, vector<32x8xf32>, vector<32x8xf32>, vector<32x8xf32>, vector<32x8xf32>, vector<32x8xf32>, vector<32x8xf32>, vector<32x8xf32>, vector<32x8xf32>, vector<32x8xf32>, vector<32x8xf32>, vector<32x8xf32> -> vector<32x128xf32>
    %405 = vector.extract_strided_slice %404 {offsets = [0, 0], sizes = [1, 128], strides = [1, 1]} : vector<32x128xf32> to vector<1x128xf32>
    %406 = vector.extract_strided_slice %403 {offsets = [1, 0], sizes = [1, 128], strides = [1, 1]} : vector<32x128xf32> to vector<1x128xf32>
    %407 = arith.mulf %406, %405 : vector<1x128xf32>
    %408 = vector.extract_strided_slice %404 {offsets = [1, 0], sizes = [1, 128], strides = [1, 1]} : vector<32x128xf32> to vector<1x128xf32>
    %409 = arith.addf %407, %408 : vector<1x128xf32>
    %410 = vector.extract_strided_slice %403 {offsets = [2, 0], sizes = [1, 128], strides = [1, 1]} : vector<32x128xf32> to vector<1x128xf32>
    %411 = arith.mulf %410, %409 : vector<1x128xf32>
    %412 = vector.extract_strided_slice %404 {offsets = [2, 0], sizes = [1, 128], strides = [1, 1]} : vector<32x128xf32> to vector<1x128xf32>
    %413 = arith.addf %411, %412 : vector<1x128xf32>
    %414 = vector.extract_strided_slice %403 {offsets = [3, 0], sizes = [1, 128], strides = [1, 1]} : vector<32x128xf32> to vector<1x128xf32>
    %415 = arith.mulf %414, %413 : vector<1x128xf32>
    %416 = vector.extract_strided_slice %404 {offsets = [3, 0], sizes = [1, 128], strides = [1, 1]} : vector<32x128xf32> to vector<1x128xf32>
    %417 = arith.addf %415, %416 : vector<1x128xf32>
    %418 = vector.extract_strided_slice %403 {offsets = [4, 0], sizes = [1, 128], strides = [1, 1]} : vector<32x128xf32> to vector<1x128xf32>
    %419 = arith.mulf %418, %417 : vector<1x128xf32>
    %420 = vector.extract_strided_slice %404 {offsets = [4, 0], sizes = [1, 128], strides = [1, 1]} : vector<32x128xf32> to vector<1x128xf32>
    %421 = arith.addf %419, %420 : vector<1x128xf32>
    %422 = vector.extract_strided_slice %403 {offsets = [5, 0], sizes = [1, 128], strides = [1, 1]} : vector<32x128xf32> to vector<1x128xf32>
    %423 = arith.mulf %422, %421 : vector<1x128xf32>
    %424 = vector.extract_strided_slice %404 {offsets = [5, 0], sizes = [1, 128], strides = [1, 1]} : vector<32x128xf32> to vector<1x128xf32>
    %425 = arith.addf %423, %424 : vector<1x128xf32>
    %426 = vector.extract_strided_slice %403 {offsets = [6, 0], sizes = [1, 128], strides = [1, 1]} : vector<32x128xf32> to vector<1x128xf32>
    %427 = arith.mulf %426, %425 : vector<1x128xf32>
    %428 = vector.extract_strided_slice %404 {offsets = [6, 0], sizes = [1, 128], strides = [1, 1]} : vector<32x128xf32> to vector<1x128xf32>
    %429 = arith.addf %427, %428 : vector<1x128xf32>
    %430 = vector.extract_strided_slice %403 {offsets = [7, 0], sizes = [1, 128], strides = [1, 1]} : vector<32x128xf32> to vector<1x128xf32>
    %431 = arith.mulf %430, %429 : vector<1x128xf32>
    %432 = vector.extract_strided_slice %404 {offsets = [7, 0], sizes = [1, 128], strides = [1, 1]} : vector<32x128xf32> to vector<1x128xf32>
    %433 = arith.addf %431, %432 : vector<1x128xf32>
    %434 = vector.extract_strided_slice %403 {offsets = [8, 0], sizes = [1, 128], strides = [1, 1]} : vector<32x128xf32> to vector<1x128xf32>
    %435 = arith.mulf %434, %433 : vector<1x128xf32>
    %436 = vector.extract_strided_slice %404 {offsets = [8, 0], sizes = [1, 128], strides = [1, 1]} : vector<32x128xf32> to vector<1x128xf32>
    %437 = arith.addf %435, %436 : vector<1x128xf32>
    %438 = vector.extract_strided_slice %403 {offsets = [9, 0], sizes = [1, 128], strides = [1, 1]} : vector<32x128xf32> to vector<1x128xf32>
    %439 = arith.mulf %438, %437 : vector<1x128xf32>
    %440 = vector.extract_strided_slice %404 {offsets = [9, 0], sizes = [1, 128], strides = [1, 1]} : vector<32x128xf32> to vector<1x128xf32>
    %441 = arith.addf %439, %440 : vector<1x128xf32>
    %442 = vector.extract_strided_slice %403 {offsets = [10, 0], sizes = [1, 128], strides = [1, 1]} : vector<32x128xf32> to vector<1x128xf32>
    %443 = arith.mulf %442, %441 : vector<1x128xf32>
    %444 = vector.extract_strided_slice %404 {offsets = [10, 0], sizes = [1, 128], strides = [1, 1]} : vector<32x128xf32> to vector<1x128xf32>
    %445 = arith.addf %443, %444 : vector<1x128xf32>
    %446 = vector.extract_strided_slice %403 {offsets = [11, 0], sizes = [1, 128], strides = [1, 1]} : vector<32x128xf32> to vector<1x128xf32>
    %447 = arith.mulf %446, %445 : vector<1x128xf32>
    %448 = vector.extract_strided_slice %404 {offsets = [11, 0], sizes = [1, 128], strides = [1, 1]} : vector<32x128xf32> to vector<1x128xf32>
    %449 = arith.addf %447, %448 : vector<1x128xf32>
    %450 = vector.extract_strided_slice %403 {offsets = [12, 0], sizes = [1, 128], strides = [1, 1]} : vector<32x128xf32> to vector<1x128xf32>
    %451 = arith.mulf %450, %449 : vector<1x128xf32>
    %452 = vector.extract_strided_slice %404 {offsets = [12, 0], sizes = [1, 128], strides = [1, 1]} : vector<32x128xf32> to vector<1x128xf32>
    %453 = arith.addf %451, %452 : vector<1x128xf32>
    %454 = vector.extract_strided_slice %403 {offsets = [13, 0], sizes = [1, 128], strides = [1, 1]} : vector<32x128xf32> to vector<1x128xf32>
    %455 = arith.mulf %454, %453 : vector<1x128xf32>
    %456 = vector.extract_strided_slice %404 {offsets = [13, 0], sizes = [1, 128], strides = [1, 1]} : vector<32x128xf32> to vector<1x128xf32>
    %457 = arith.addf %455, %456 : vector<1x128xf32>
    %458 = vector.extract_strided_slice %403 {offsets = [14, 0], sizes = [1, 128], strides = [1, 1]} : vector<32x128xf32> to vector<1x128xf32>
    %459 = arith.mulf %458, %457 : vector<1x128xf32>
    %460 = vector.extract_strided_slice %404 {offsets = [14, 0], sizes = [1, 128], strides = [1, 1]} : vector<32x128xf32> to vector<1x128xf32>
    %461 = arith.addf %459, %460 : vector<1x128xf32>
    %462 = vector.extract_strided_slice %403 {offsets = [15, 0], sizes = [1, 128], strides = [1, 1]} : vector<32x128xf32> to vector<1x128xf32>
    %463 = arith.mulf %462, %461 : vector<1x128xf32>
    %464 = vector.extract_strided_slice %404 {offsets = [15, 0], sizes = [1, 128], strides = [1, 1]} : vector<32x128xf32> to vector<1x128xf32>
    %465 = arith.addf %463, %464 : vector<1x128xf32>
    %466 = vector.extract_strided_slice %403 {offsets = [16, 0], sizes = [1, 128], strides = [1, 1]} : vector<32x128xf32> to vector<1x128xf32>
    %467 = arith.mulf %466, %465 : vector<1x128xf32>
    %468 = vector.extract_strided_slice %404 {offsets = [16, 0], sizes = [1, 128], strides = [1, 1]} : vector<32x128xf32> to vector<1x128xf32>
    %469 = arith.addf %467, %468 : vector<1x128xf32>
    %470 = vector.extract_strided_slice %403 {offsets = [17, 0], sizes = [1, 128], strides = [1, 1]} : vector<32x128xf32> to vector<1x128xf32>
    %471 = arith.mulf %470, %469 : vector<1x128xf32>
    %472 = vector.extract_strided_slice %404 {offsets = [17, 0], sizes = [1, 128], strides = [1, 1]} : vector<32x128xf32> to vector<1x128xf32>
    %473 = arith.addf %471, %472 : vector<1x128xf32>
    %474 = vector.extract_strided_slice %403 {offsets = [18, 0], sizes = [1, 128], strides = [1, 1]} : vector<32x128xf32> to vector<1x128xf32>
    %475 = arith.mulf %474, %473 : vector<1x128xf32>
    %476 = vector.extract_strided_slice %404 {offsets = [18, 0], sizes = [1, 128], strides = [1, 1]} : vector<32x128xf32> to vector<1x128xf32>
    %477 = arith.addf %475, %476 : vector<1x128xf32>
    %478 = vector.extract_strided_slice %403 {offsets = [19, 0], sizes = [1, 128], strides = [1, 1]} : vector<32x128xf32> to vector<1x128xf32>
    %479 = arith.mulf %478, %477 : vector<1x128xf32>
    %480 = vector.extract_strided_slice %404 {offsets = [19, 0], sizes = [1, 128], strides = [1, 1]} : vector<32x128xf32> to vector<1x128xf32>
    %481 = arith.addf %479, %480 : vector<1x128xf32>
    %482 = vector.extract_strided_slice %403 {offsets = [20, 0], sizes = [1, 128], strides = [1, 1]} : vector<32x128xf32> to vector<1x128xf32>
    %483 = arith.mulf %482, %481 : vector<1x128xf32>
    %484 = vector.extract_strided_slice %404 {offsets = [20, 0], sizes = [1, 128], strides = [1, 1]} : vector<32x128xf32> to vector<1x128xf32>
    %485 = arith.addf %483, %484 : vector<1x128xf32>
    %486 = vector.extract_strided_slice %403 {offsets = [21, 0], sizes = [1, 128], strides = [1, 1]} : vector<32x128xf32> to vector<1x128xf32>
    %487 = arith.mulf %486, %485 : vector<1x128xf32>
    %488 = vector.extract_strided_slice %404 {offsets = [21, 0], sizes = [1, 128], strides = [1, 1]} : vector<32x128xf32> to vector<1x128xf32>
    %489 = arith.addf %487, %488 : vector<1x128xf32>
    %490 = vector.extract_strided_slice %403 {offsets = [22, 0], sizes = [1, 128], strides = [1, 1]} : vector<32x128xf32> to vector<1x128xf32>
    %491 = arith.mulf %490, %489 : vector<1x128xf32>
    %492 = vector.extract_strided_slice %404 {offsets = [22, 0], sizes = [1, 128], strides = [1, 1]} : vector<32x128xf32> to vector<1x128xf32>
    %493 = arith.addf %491, %492 : vector<1x128xf32>
    %494 = vector.extract_strided_slice %403 {offsets = [23, 0], sizes = [1, 128], strides = [1, 1]} : vector<32x128xf32> to vector<1x128xf32>
    %495 = arith.mulf %494, %493 : vector<1x128xf32>
    %496 = vector.extract_strided_slice %404 {offsets = [23, 0], sizes = [1, 128], strides = [1, 1]} : vector<32x128xf32> to vector<1x128xf32>
    %497 = arith.addf %495, %496 : vector<1x128xf32>
    %498 = vector.extract_strided_slice %403 {offsets = [24, 0], sizes = [1, 128], strides = [1, 1]} : vector<32x128xf32> to vector<1x128xf32>
    %499 = arith.mulf %498, %497 : vector<1x128xf32>
    %500 = vector.extract_strided_slice %404 {offsets = [24, 0], sizes = [1, 128], strides = [1, 1]} : vector<32x128xf32> to vector<1x128xf32>
    %501 = arith.addf %499, %500 : vector<1x128xf32>
    %502 = vector.extract_strided_slice %403 {offsets = [25, 0], sizes = [1, 128], strides = [1, 1]} : vector<32x128xf32> to vector<1x128xf32>
    %503 = arith.mulf %502, %501 : vector<1x128xf32>
    %504 = vector.extract_strided_slice %404 {offsets = [25, 0], sizes = [1, 128], strides = [1, 1]} : vector<32x128xf32> to vector<1x128xf32>
    %505 = arith.addf %503, %504 : vector<1x128xf32>
    %506 = vector.extract_strided_slice %403 {offsets = [26, 0], sizes = [1, 128], strides = [1, 1]} : vector<32x128xf32> to vector<1x128xf32>
    %507 = arith.mulf %506, %505 : vector<1x128xf32>
    %508 = vector.extract_strided_slice %404 {offsets = [26, 0], sizes = [1, 128], strides = [1, 1]} : vector<32x128xf32> to vector<1x128xf32>
    %509 = arith.addf %507, %508 : vector<1x128xf32>
    %510 = vector.extract_strided_slice %403 {offsets = [27, 0], sizes = [1, 128], strides = [1, 1]} : vector<32x128xf32> to vector<1x128xf32>
    %511 = arith.mulf %510, %509 : vector<1x128xf32>
    %512 = vector.extract_strided_slice %404 {offsets = [27, 0], sizes = [1, 128], strides = [1, 1]} : vector<32x128xf32> to vector<1x128xf32>
    %513 = arith.addf %511, %512 : vector<1x128xf32>
    %514 = vector.extract_strided_slice %403 {offsets = [28, 0], sizes = [1, 128], strides = [1, 1]} : vector<32x128xf32> to vector<1x128xf32>
    %515 = arith.mulf %514, %513 : vector<1x128xf32>
    %516 = vector.extract_strided_slice %404 {offsets = [28, 0], sizes = [1, 128], strides = [1, 1]} : vector<32x128xf32> to vector<1x128xf32>
    %517 = arith.addf %515, %516 : vector<1x128xf32>
    %518 = vector.extract_strided_slice %403 {offsets = [29, 0], sizes = [1, 128], strides = [1, 1]} : vector<32x128xf32> to vector<1x128xf32>
    %519 = arith.mulf %518, %517 : vector<1x128xf32>
    %520 = vector.extract_strided_slice %404 {offsets = [29, 0], sizes = [1, 128], strides = [1, 1]} : vector<32x128xf32> to vector<1x128xf32>
    %521 = arith.addf %519, %520 : vector<1x128xf32>
    %522 = vector.extract_strided_slice %403 {offsets = [30, 0], sizes = [1, 128], strides = [1, 1]} : vector<32x128xf32> to vector<1x128xf32>
    %523 = arith.mulf %522, %521 : vector<1x128xf32>
    %524 = vector.extract_strided_slice %404 {offsets = [30, 0], sizes = [1, 128], strides = [1, 1]} : vector<32x128xf32> to vector<1x128xf32>
    %525 = arith.addf %523, %524 : vector<1x128xf32>
    %526 = vector.extract_strided_slice %403 {offsets = [31, 0], sizes = [1, 128], strides = [1, 1]} : vector<32x128xf32> to vector<1x128xf32>
    %527 = arith.mulf %526, %525 : vector<1x128xf32>
    %528 = vector.extract_strided_slice %404 {offsets = [31, 0], sizes = [1, 128], strides = [1, 1]} : vector<32x128xf32> to vector<1x128xf32>
    %529 = arith.addf %527, %528 : vector<1x128xf32>
    %530 = tpu.concatenate %405, %409, %413, %417, %421, %425, %429, %433, %437, %441, %445, %449, %453, %457, %461, %465 in 0 : vector<1x128xf32>, vector<1x128xf32>, vector<1x128xf32>, vector<1x128xf32>, vector<1x128xf32>, vector<1x128xf32>, vector<1x128xf32>, vector<1x128xf32>, vector<1x128xf32>, vector<1x128xf32>, vector<1x128xf32>, vector<1x128xf32>, vector<1x128xf32>, vector<1x128xf32>, vector<1x128xf32>, vector<1x128xf32> -> vector<16x128xf32>
    %531 = tpu.concatenate %469, %473, %477, %481, %485, %489, %493, %497, %501, %505, %509, %513, %517, %521, %525, %529 in 0 : vector<1x128xf32>, vector<1x128xf32>, vector<1x128xf32>, vector<1x128xf32>, vector<1x128xf32>, vector<1x128xf32>, vector<1x128xf32>, vector<1x128xf32>, vector<1x128xf32>, vector<1x128xf32>, vector<1x128xf32>, vector<1x128xf32>, vector<1x128xf32>, vector<1x128xf32>, vector<1x128xf32>, vector<1x128xf32> -> vector<16x128xf32>
    %532 = tpu.concatenate %530, %531 in 0 : vector<16x128xf32>, vector<16x128xf32> -> vector<32x128xf32>
    %533 = vector.extract_strided_slice %35 {offsets = [0, 0], sizes = [1, 1], strides = [1, 1]} : vector<1x2xf32> to vector<1x1xf32>
    %534 = vector.broadcast %533 : vector<1x1xf32> to vector<32x8xf32>
    %535 = arith.mulf %534, %155 : vector<32x8xf32>
    %536 = vector.extract_strided_slice %532 {offsets = [0, 0], sizes = [32, 8], strides = [1, 1]} : vector<32x128xf32> to vector<32x8xf32>
    %537 = arith.mulf %254, %536 : vector<32x8xf32>
    %538 = arith.addf %535, %537 : vector<32x8xf32>
    %539 = vector.extract_strided_slice %532 {offsets = [0, 8], sizes = [32, 8], strides = [1, 1]} : vector<32x128xf32> to vector<32x8xf32>
    %540 = arith.mulf %261, %539 : vector<32x8xf32>
    %541 = arith.addf %538, %540 : vector<32x8xf32>
    %542 = vector.extract_strided_slice %532 {offsets = [0, 16], sizes = [32, 8], strides = [1, 1]} : vector<32x128xf32> to vector<32x8xf32>
    %543 = arith.mulf %268, %542 : vector<32x8xf32>
    %544 = arith.addf %541, %543 : vector<32x8xf32>
    %545 = vector.extract_strided_slice %532 {offsets = [0, 24], sizes = [32, 8], strides = [1, 1]} : vector<32x128xf32> to vector<32x8xf32>
    %546 = arith.mulf %275, %545 : vector<32x8xf32>
    %547 = arith.addf %544, %546 : vector<32x8xf32>
    %548 = vector.extract_strided_slice %532 {offsets = [0, 32], sizes = [32, 8], strides = [1, 1]} : vector<32x128xf32> to vector<32x8xf32>
    %549 = arith.mulf %282, %548 : vector<32x8xf32>
    %550 = arith.addf %547, %549 : vector<32x8xf32>
    %551 = vector.extract_strided_slice %532 {offsets = [0, 40], sizes = [32, 8], strides = [1, 1]} : vector<32x128xf32> to vector<32x8xf32>
    %552 = arith.mulf %289, %551 : vector<32x8xf32>
    %553 = arith.addf %550, %552 : vector<32x8xf32>
    %554 = vector.extract_strided_slice %532 {offsets = [0, 48], sizes = [32, 8], strides = [1, 1]} : vector<32x128xf32> to vector<32x8xf32>
    %555 = arith.mulf %296, %554 : vector<32x8xf32>
    %556 = arith.addf %553, %555 : vector<32x8xf32>
    %557 = vector.extract_strided_slice %532 {offsets = [0, 56], sizes = [32, 8], strides = [1, 1]} : vector<32x128xf32> to vector<32x8xf32>
    %558 = arith.mulf %303, %557 : vector<32x8xf32>
    %559 = arith.addf %556, %558 : vector<32x8xf32>
    %cst_127 = arith.constant 0.000000e+00 : f32
    %560 = vector.broadcast %cst_127 : f32 to vector<32x8xf32>
    %561 = arith.subf %560, %132 : vector<32x8xf32>
    %562 = math.exp %561 : vector<32x8xf32>
    %cst_128 = arith.constant 1.000000e+00 : f32
    %563 = vector.broadcast %cst_128 : f32 to vector<32x8xf32>
    %564 = arith.addf %563, %562 : vector<32x8xf32>
    %cst_129 = arith.constant 1.000000e+00 : f32
    %565 = vector.broadcast %cst_129 : f32 to vector<32x8xf32>
    %566 = arith.divf %565, %564 : vector<32x8xf32>
    %567 = arith.mulf %132, %566 : vector<32x8xf32>
    %568 = arith.mulf %559, %567 : vector<32x8xf32>
    %569 = vector.extract_strided_slice %41 {offsets = [0, 0], sizes = [1, 1], strides = [1, 1]} : vector<2x1xf32> to vector<1x1xf32>
    %570 = vector.broadcast %569 : vector<1x1xf32> to vector<32x8xf32>
    %571 = arith.mulf %568, %570 : vector<32x8xf32>
    %572 = vector.extract_strided_slice %35 {offsets = [0, 1], sizes = [1, 1], strides = [1, 1]} : vector<1x2xf32> to vector<1x1xf32>
    %573 = vector.broadcast %572 : vector<1x1xf32> to vector<32x8xf32>
    %574 = arith.mulf %573, %184 : vector<32x8xf32>
    %575 = vector.extract_strided_slice %532 {offsets = [0, 64], sizes = [32, 8], strides = [1, 1]} : vector<32x128xf32> to vector<32x8xf32>
    %576 = arith.mulf %254, %575 : vector<32x8xf32>
    %577 = arith.addf %574, %576 : vector<32x8xf32>
    %578 = vector.extract_strided_slice %532 {offsets = [0, 72], sizes = [32, 8], strides = [1, 1]} : vector<32x128xf32> to vector<32x8xf32>
    %579 = arith.mulf %261, %578 : vector<32x8xf32>
    %580 = arith.addf %577, %579 : vector<32x8xf32>
    %581 = vector.extract_strided_slice %532 {offsets = [0, 80], sizes = [32, 8], strides = [1, 1]} : vector<32x128xf32> to vector<32x8xf32>
    %582 = arith.mulf %268, %581 : vector<32x8xf32>
    %583 = arith.addf %580, %582 : vector<32x8xf32>
    %584 = vector.extract_strided_slice %532 {offsets = [0, 88], sizes = [32, 8], strides = [1, 1]} : vector<32x128xf32> to vector<32x8xf32>
    %585 = arith.mulf %275, %584 : vector<32x8xf32>
    %586 = arith.addf %583, %585 : vector<32x8xf32>
    %587 = vector.extract_strided_slice %532 {offsets = [0, 96], sizes = [32, 8], strides = [1, 1]} : vector<32x128xf32> to vector<32x8xf32>
    %588 = arith.mulf %282, %587 : vector<32x8xf32>
    %589 = arith.addf %586, %588 : vector<32x8xf32>
    %590 = vector.extract_strided_slice %532 {offsets = [0, 104], sizes = [32, 8], strides = [1, 1]} : vector<32x128xf32> to vector<32x8xf32>
    %591 = arith.mulf %289, %590 : vector<32x8xf32>
    %592 = arith.addf %589, %591 : vector<32x8xf32>
    %593 = vector.extract_strided_slice %532 {offsets = [0, 112], sizes = [32, 8], strides = [1, 1]} : vector<32x128xf32> to vector<32x8xf32>
    %594 = arith.mulf %296, %593 : vector<32x8xf32>
    %595 = arith.addf %592, %594 : vector<32x8xf32>
    %596 = vector.extract_strided_slice %532 {offsets = [0, 120], sizes = [32, 8], strides = [1, 1]} : vector<32x128xf32> to vector<32x8xf32>
    %597 = arith.mulf %303, %596 : vector<32x8xf32>
    %598 = arith.addf %595, %597 : vector<32x8xf32>
    %cst_130 = arith.constant 0.000000e+00 : f32
    %599 = vector.broadcast %cst_130 : f32 to vector<32x8xf32>
    %600 = arith.subf %599, %161 : vector<32x8xf32>
    %601 = math.exp %600 : vector<32x8xf32>
    %cst_131 = arith.constant 1.000000e+00 : f32
    %602 = vector.broadcast %cst_131 : f32 to vector<32x8xf32>
    %603 = arith.addf %602, %601 : vector<32x8xf32>
    %cst_132 = arith.constant 1.000000e+00 : f32
    %604 = vector.broadcast %cst_132 : f32 to vector<32x8xf32>
    %605 = arith.divf %604, %603 : vector<32x8xf32>
    %606 = arith.mulf %161, %605 : vector<32x8xf32>
    %607 = arith.mulf %598, %606 : vector<32x8xf32>
    %608 = vector.extract_strided_slice %41 {offsets = [1, 0], sizes = [1, 1], strides = [1, 1]} : vector<2x1xf32> to vector<1x1xf32>
    %609 = vector.broadcast %608 : vector<1x1xf32> to vector<32x8xf32>
    %610 = arith.mulf %607, %609 : vector<32x8xf32>
    %611 = arith.addf %571, %610 : vector<32x8xf32>
    %612 = tpu.transpose %611, [1, 0] : vector<32x8xf32> -> vector<8x32xf32>
    %613 = arith.addf %612, %122 : vector<8x32xf32>
    %cst_133 = arith.constant dense<0.000000e+00> : vector<8x16xf32>
    %614 = tpu.matmul %70, %3, %cst_133 {dimension_numbers = #tpu.dot_dimension_numbers<[1], [0], [0], [1], [0, 0, 1, 1], [], []>} : vector<8x32xf32>, vector<32x16xf32>, vector<8x16xf32> -> vector<8x16xf32>
    %615 = vector.broadcast %2 : vector<1x16xf32> to vector<8x16xf32>
    %616 = arith.addf %614, %615 : vector<8x16xf32>
    %617 = math.exp %9 : vector<2x8xf32>
    %cst_134 = arith.constant 0.000000e+00 : f32
    %618 = vector.broadcast %cst_134 : f32 to vector<2x8xf32>
    %619 = arith.subf %618, %617 : vector<2x8xf32>
    %620 = tpu.transpose %616, [1, 0] : vector<8x16xf32> -> vector<16x8xf32>
    %621 = vector.extract_strided_slice %15 {offsets = [0, 0], sizes = [1, 1], strides = [1, 1]} : vector<1x4xf32> to vector<1x1xf32>
    %622 = vector.broadcast %621 : vector<1x1xf32> to vector<16x8xf32>
    %623 = arith.mulf %620, %622 : vector<16x8xf32>
    %624 = vector.extract_strided_slice %15 {offsets = [0, 2], sizes = [1, 1], strides = [1, 1]} : vector<1x4xf32> to vector<1x1xf32>
    %625 = vector.broadcast %624 : vector<1x1xf32> to vector<16x8xf32>
    %626 = arith.mulf %620, %625 : vector<16x8xf32>
    %cst_135 = arith.constant 0.000000e+00 : f32
    %627 = vector.broadcast %cst_135 : f32 to vector<16x8xf32>
    %cst_136 = arith.constant 0.000000e+00 : f32
    %628 = vector.broadcast %cst_136 : f32 to vector<1x8xf32>
    %629 = vector.extract_strided_slice %623 {offsets = [0, 0], sizes = [15, 8], strides = [1, 1]} : vector<16x8xf32> to vector<15x8xf32>
    %630 = tpu.concatenate %628, %629 in 0 : vector<1x8xf32>, vector<15x8xf32> -> vector<16x8xf32>
    %631 = vector.extract_strided_slice %12 {offsets = [0, 0], sizes = [1, 1], strides = [1, 1]} : vector<2x2xf32> to vector<1x1xf32>
    %632 = vector.broadcast %631 : vector<1x1xf32> to vector<16x8xf32>
    %633 = arith.mulf %630, %632 : vector<16x8xf32>
    %634 = arith.addf %627, %633 : vector<16x8xf32>
    %635 = vector.extract_strided_slice %12 {offsets = [1, 0], sizes = [1, 1], strides = [1, 1]} : vector<2x2xf32> to vector<1x1xf32>
    %636 = vector.broadcast %635 : vector<1x1xf32> to vector<16x8xf32>
    %637 = arith.mulf %623, %636 : vector<16x8xf32>
    %638 = arith.addf %634, %637 : vector<16x8xf32>
    %639 = vector.extract_strided_slice %11 {offsets = [0, 0], sizes = [1, 1], strides = [1, 1]} : vector<1x2xf32> to vector<1x1xf32>
    %640 = vector.broadcast %639 : vector<1x1xf32> to vector<16x8xf32>
    %641 = arith.addf %638, %640 : vector<16x8xf32>
    %cst_137 = arith.constant 0.000000e+00 : f32
    %642 = vector.broadcast %cst_137 : f32 to vector<16x8xf32>
    %643 = arith.subf %642, %641 : vector<16x8xf32>
    %644 = math.exp %643 : vector<16x8xf32>
    %cst_138 = arith.constant 1.000000e+00 : f32
    %645 = vector.broadcast %cst_138 : f32 to vector<16x8xf32>
    %646 = arith.addf %645, %644 : vector<16x8xf32>
    %cst_139 = arith.constant 1.000000e+00 : f32
    %647 = vector.broadcast %cst_139 : f32 to vector<16x8xf32>
    %648 = arith.divf %647, %646 : vector<16x8xf32>
    %649 = arith.mulf %641, %648 : vector<16x8xf32>
    %650 = vector.extract_strided_slice %15 {offsets = [0, 1], sizes = [1, 1], strides = [1, 1]} : vector<1x4xf32> to vector<1x1xf32>
    %651 = vector.broadcast %650 : vector<1x1xf32> to vector<16x8xf32>
    %652 = arith.mulf %620, %651 : vector<16x8xf32>
    %653 = vector.extract_strided_slice %15 {offsets = [0, 3], sizes = [1, 1], strides = [1, 1]} : vector<1x4xf32> to vector<1x1xf32>
    %654 = vector.broadcast %653 : vector<1x1xf32> to vector<16x8xf32>
    %655 = arith.mulf %620, %654 : vector<16x8xf32>
    %cst_140 = arith.constant 0.000000e+00 : f32
    %656 = vector.broadcast %cst_140 : f32 to vector<16x8xf32>
    %cst_141 = arith.constant 0.000000e+00 : f32
    %657 = vector.broadcast %cst_141 : f32 to vector<1x8xf32>
    %658 = vector.extract_strided_slice %652 {offsets = [0, 0], sizes = [15, 8], strides = [1, 1]} : vector<16x8xf32> to vector<15x8xf32>
    %659 = tpu.concatenate %657, %658 in 0 : vector<1x8xf32>, vector<15x8xf32> -> vector<16x8xf32>
    %660 = vector.extract_strided_slice %12 {offsets = [0, 1], sizes = [1, 1], strides = [1, 1]} : vector<2x2xf32> to vector<1x1xf32>
    %661 = vector.broadcast %660 : vector<1x1xf32> to vector<16x8xf32>
    %662 = arith.mulf %659, %661 : vector<16x8xf32>
    %663 = arith.addf %656, %662 : vector<16x8xf32>
    %664 = vector.extract_strided_slice %12 {offsets = [1, 1], sizes = [1, 1], strides = [1, 1]} : vector<2x2xf32> to vector<1x1xf32>
    %665 = vector.broadcast %664 : vector<1x1xf32> to vector<16x8xf32>
    %666 = arith.mulf %652, %665 : vector<16x8xf32>
    %667 = arith.addf %663, %666 : vector<16x8xf32>
    %668 = vector.extract_strided_slice %11 {offsets = [0, 1], sizes = [1, 1], strides = [1, 1]} : vector<1x2xf32> to vector<1x1xf32>
    %669 = vector.broadcast %668 : vector<1x1xf32> to vector<16x8xf32>
    %670 = arith.addf %667, %669 : vector<16x8xf32>
    %cst_142 = arith.constant 0.000000e+00 : f32
    %671 = vector.broadcast %cst_142 : f32 to vector<16x8xf32>
    %672 = arith.subf %671, %670 : vector<16x8xf32>
    %673 = math.exp %672 : vector<16x8xf32>
    %cst_143 = arith.constant 1.000000e+00 : f32
    %674 = vector.broadcast %cst_143 : f32 to vector<16x8xf32>
    %675 = arith.addf %674, %673 : vector<16x8xf32>
    %cst_144 = arith.constant 1.000000e+00 : f32
    %676 = vector.broadcast %cst_144 : f32 to vector<16x8xf32>
    %677 = arith.divf %676, %675 : vector<16x8xf32>
    %678 = arith.mulf %670, %677 : vector<16x8xf32>
    %679 = vector.extract_strided_slice %17 {offsets = [0, 0], sizes = [1, 1], strides = [1, 1]} : vector<2x17xf32> to vector<1x1xf32>
    %680 = vector.broadcast %679 : vector<1x1xf32> to vector<16x8xf32>
    %681 = arith.mulf %649, %680 : vector<16x8xf32>
    %682 = vector.extract_strided_slice %17 {offsets = [1, 0], sizes = [1, 1], strides = [1, 1]} : vector<2x17xf32> to vector<1x1xf32>
    %683 = vector.broadcast %682 : vector<1x1xf32> to vector<16x8xf32>
    %684 = arith.mulf %678, %683 : vector<16x8xf32>
    %685 = arith.addf %681, %684 : vector<16x8xf32>
    %686 = vector.extract_strided_slice %17 {offsets = [0, 1], sizes = [1, 1], strides = [1, 1]} : vector<2x17xf32> to vector<1x1xf32>
    %687 = vector.broadcast %686 : vector<1x1xf32> to vector<16x8xf32>
    %688 = arith.mulf %649, %687 : vector<16x8xf32>
    %689 = vector.extract_strided_slice %17 {offsets = [1, 1], sizes = [1, 1], strides = [1, 1]} : vector<2x17xf32> to vector<1x1xf32>
    %690 = vector.broadcast %689 : vector<1x1xf32> to vector<16x8xf32>
    %691 = arith.mulf %678, %690 : vector<16x8xf32>
    %692 = arith.addf %688, %691 : vector<16x8xf32>
    %693 = vector.extract_strided_slice %17 {offsets = [0, 2], sizes = [1, 1], strides = [1, 1]} : vector<2x17xf32> to vector<1x1xf32>
    %694 = vector.broadcast %693 : vector<1x1xf32> to vector<16x8xf32>
    %695 = arith.mulf %649, %694 : vector<16x8xf32>
    %696 = vector.extract_strided_slice %17 {offsets = [1, 2], sizes = [1, 1], strides = [1, 1]} : vector<2x17xf32> to vector<1x1xf32>
    %697 = vector.broadcast %696 : vector<1x1xf32> to vector<16x8xf32>
    %698 = arith.mulf %678, %697 : vector<16x8xf32>
    %699 = arith.addf %695, %698 : vector<16x8xf32>
    %700 = vector.extract_strided_slice %17 {offsets = [0, 3], sizes = [1, 1], strides = [1, 1]} : vector<2x17xf32> to vector<1x1xf32>
    %701 = vector.broadcast %700 : vector<1x1xf32> to vector<16x8xf32>
    %702 = arith.mulf %649, %701 : vector<16x8xf32>
    %703 = vector.extract_strided_slice %17 {offsets = [1, 3], sizes = [1, 1], strides = [1, 1]} : vector<2x17xf32> to vector<1x1xf32>
    %704 = vector.broadcast %703 : vector<1x1xf32> to vector<16x8xf32>
    %705 = arith.mulf %678, %704 : vector<16x8xf32>
    %706 = arith.addf %702, %705 : vector<16x8xf32>
    %707 = vector.extract_strided_slice %17 {offsets = [0, 4], sizes = [1, 1], strides = [1, 1]} : vector<2x17xf32> to vector<1x1xf32>
    %708 = vector.broadcast %707 : vector<1x1xf32> to vector<16x8xf32>
    %709 = arith.mulf %649, %708 : vector<16x8xf32>
    %710 = vector.extract_strided_slice %17 {offsets = [1, 4], sizes = [1, 1], strides = [1, 1]} : vector<2x17xf32> to vector<1x1xf32>
    %711 = vector.broadcast %710 : vector<1x1xf32> to vector<16x8xf32>
    %712 = arith.mulf %678, %711 : vector<16x8xf32>
    %713 = arith.addf %709, %712 : vector<16x8xf32>
    %714 = vector.extract_strided_slice %17 {offsets = [0, 5], sizes = [1, 1], strides = [1, 1]} : vector<2x17xf32> to vector<1x1xf32>
    %715 = vector.broadcast %714 : vector<1x1xf32> to vector<16x8xf32>
    %716 = arith.mulf %649, %715 : vector<16x8xf32>
    %717 = vector.extract_strided_slice %17 {offsets = [1, 5], sizes = [1, 1], strides = [1, 1]} : vector<2x17xf32> to vector<1x1xf32>
    %718 = vector.broadcast %717 : vector<1x1xf32> to vector<16x8xf32>
    %719 = arith.mulf %678, %718 : vector<16x8xf32>
    %720 = arith.addf %716, %719 : vector<16x8xf32>
    %721 = vector.extract_strided_slice %17 {offsets = [0, 6], sizes = [1, 1], strides = [1, 1]} : vector<2x17xf32> to vector<1x1xf32>
    %722 = vector.broadcast %721 : vector<1x1xf32> to vector<16x8xf32>
    %723 = arith.mulf %649, %722 : vector<16x8xf32>
    %724 = vector.extract_strided_slice %17 {offsets = [1, 6], sizes = [1, 1], strides = [1, 1]} : vector<2x17xf32> to vector<1x1xf32>
    %725 = vector.broadcast %724 : vector<1x1xf32> to vector<16x8xf32>
    %726 = arith.mulf %678, %725 : vector<16x8xf32>
    %727 = arith.addf %723, %726 : vector<16x8xf32>
    %728 = vector.extract_strided_slice %17 {offsets = [0, 7], sizes = [1, 1], strides = [1, 1]} : vector<2x17xf32> to vector<1x1xf32>
    %729 = vector.broadcast %728 : vector<1x1xf32> to vector<16x8xf32>
    %730 = arith.mulf %649, %729 : vector<16x8xf32>
    %731 = vector.extract_strided_slice %17 {offsets = [1, 7], sizes = [1, 1], strides = [1, 1]} : vector<2x17xf32> to vector<1x1xf32>
    %732 = vector.broadcast %731 : vector<1x1xf32> to vector<16x8xf32>
    %733 = arith.mulf %678, %732 : vector<16x8xf32>
    %734 = arith.addf %730, %733 : vector<16x8xf32>
    %735 = vector.extract_strided_slice %17 {offsets = [0, 8], sizes = [1, 1], strides = [1, 1]} : vector<2x17xf32> to vector<1x1xf32>
    %736 = vector.broadcast %735 : vector<1x1xf32> to vector<16x8xf32>
    %737 = arith.mulf %649, %736 : vector<16x8xf32>
    %738 = vector.extract_strided_slice %17 {offsets = [1, 8], sizes = [1, 1], strides = [1, 1]} : vector<2x17xf32> to vector<1x1xf32>
    %739 = vector.broadcast %738 : vector<1x1xf32> to vector<16x8xf32>
    %740 = arith.mulf %678, %739 : vector<16x8xf32>
    %741 = arith.addf %737, %740 : vector<16x8xf32>
    %742 = vector.extract_strided_slice %17 {offsets = [0, 9], sizes = [1, 1], strides = [1, 1]} : vector<2x17xf32> to vector<1x1xf32>
    %743 = vector.broadcast %742 : vector<1x1xf32> to vector<16x8xf32>
    %744 = arith.mulf %649, %743 : vector<16x8xf32>
    %745 = vector.extract_strided_slice %17 {offsets = [1, 9], sizes = [1, 1], strides = [1, 1]} : vector<2x17xf32> to vector<1x1xf32>
    %746 = vector.broadcast %745 : vector<1x1xf32> to vector<16x8xf32>
    %747 = arith.mulf %678, %746 : vector<16x8xf32>
    %748 = arith.addf %744, %747 : vector<16x8xf32>
    %749 = vector.extract_strided_slice %17 {offsets = [0, 10], sizes = [1, 1], strides = [1, 1]} : vector<2x17xf32> to vector<1x1xf32>
    %750 = vector.broadcast %749 : vector<1x1xf32> to vector<16x8xf32>
    %751 = arith.mulf %649, %750 : vector<16x8xf32>
    %752 = vector.extract_strided_slice %17 {offsets = [1, 10], sizes = [1, 1], strides = [1, 1]} : vector<2x17xf32> to vector<1x1xf32>
    %753 = vector.broadcast %752 : vector<1x1xf32> to vector<16x8xf32>
    %754 = arith.mulf %678, %753 : vector<16x8xf32>
    %755 = arith.addf %751, %754 : vector<16x8xf32>
    %756 = vector.extract_strided_slice %17 {offsets = [0, 11], sizes = [1, 1], strides = [1, 1]} : vector<2x17xf32> to vector<1x1xf32>
    %757 = vector.broadcast %756 : vector<1x1xf32> to vector<16x8xf32>
    %758 = arith.mulf %649, %757 : vector<16x8xf32>
    %759 = vector.extract_strided_slice %17 {offsets = [1, 11], sizes = [1, 1], strides = [1, 1]} : vector<2x17xf32> to vector<1x1xf32>
    %760 = vector.broadcast %759 : vector<1x1xf32> to vector<16x8xf32>
    %761 = arith.mulf %678, %760 : vector<16x8xf32>
    %762 = arith.addf %758, %761 : vector<16x8xf32>
    %763 = vector.extract_strided_slice %17 {offsets = [0, 12], sizes = [1, 1], strides = [1, 1]} : vector<2x17xf32> to vector<1x1xf32>
    %764 = vector.broadcast %763 : vector<1x1xf32> to vector<16x8xf32>
    %765 = arith.mulf %649, %764 : vector<16x8xf32>
    %766 = vector.extract_strided_slice %17 {offsets = [1, 12], sizes = [1, 1], strides = [1, 1]} : vector<2x17xf32> to vector<1x1xf32>
    %767 = vector.broadcast %766 : vector<1x1xf32> to vector<16x8xf32>
    %768 = arith.mulf %678, %767 : vector<16x8xf32>
    %769 = arith.addf %765, %768 : vector<16x8xf32>
    %770 = vector.extract_strided_slice %17 {offsets = [0, 13], sizes = [1, 1], strides = [1, 1]} : vector<2x17xf32> to vector<1x1xf32>
    %771 = vector.broadcast %770 : vector<1x1xf32> to vector<16x8xf32>
    %772 = arith.mulf %649, %771 : vector<16x8xf32>
    %773 = vector.extract_strided_slice %17 {offsets = [1, 13], sizes = [1, 1], strides = [1, 1]} : vector<2x17xf32> to vector<1x1xf32>
    %774 = vector.broadcast %773 : vector<1x1xf32> to vector<16x8xf32>
    %775 = arith.mulf %678, %774 : vector<16x8xf32>
    %776 = arith.addf %772, %775 : vector<16x8xf32>
    %777 = vector.extract_strided_slice %17 {offsets = [0, 14], sizes = [1, 1], strides = [1, 1]} : vector<2x17xf32> to vector<1x1xf32>
    %778 = vector.broadcast %777 : vector<1x1xf32> to vector<16x8xf32>
    %779 = arith.mulf %649, %778 : vector<16x8xf32>
    %780 = vector.extract_strided_slice %17 {offsets = [1, 14], sizes = [1, 1], strides = [1, 1]} : vector<2x17xf32> to vector<1x1xf32>
    %781 = vector.broadcast %780 : vector<1x1xf32> to vector<16x8xf32>
    %782 = arith.mulf %678, %781 : vector<16x8xf32>
    %783 = arith.addf %779, %782 : vector<16x8xf32>
    %784 = vector.extract_strided_slice %17 {offsets = [0, 15], sizes = [1, 1], strides = [1, 1]} : vector<2x17xf32> to vector<1x1xf32>
    %785 = vector.broadcast %784 : vector<1x1xf32> to vector<16x8xf32>
    %786 = arith.mulf %649, %785 : vector<16x8xf32>
    %787 = vector.extract_strided_slice %17 {offsets = [1, 15], sizes = [1, 1], strides = [1, 1]} : vector<2x17xf32> to vector<1x1xf32>
    %788 = vector.broadcast %787 : vector<1x1xf32> to vector<16x8xf32>
    %789 = arith.mulf %678, %788 : vector<16x8xf32>
    %790 = arith.addf %786, %789 : vector<16x8xf32>
    %791 = vector.extract_strided_slice %17 {offsets = [0, 16], sizes = [1, 1], strides = [1, 1]} : vector<2x17xf32> to vector<1x1xf32>
    %792 = vector.broadcast %791 : vector<1x1xf32> to vector<16x8xf32>
    %793 = arith.mulf %649, %792 : vector<16x8xf32>
    %794 = vector.extract_strided_slice %17 {offsets = [1, 16], sizes = [1, 1], strides = [1, 1]} : vector<2x17xf32> to vector<1x1xf32>
    %795 = vector.broadcast %794 : vector<1x1xf32> to vector<16x8xf32>
    %796 = arith.mulf %678, %795 : vector<16x8xf32>
    %797 = arith.addf %793, %796 : vector<16x8xf32>
    %798 = vector.extract_strided_slice %14 {offsets = [0, 0], sizes = [1, 1], strides = [1, 1]} : vector<1x2xf32> to vector<1x1xf32>
    %799 = vector.broadcast %798 : vector<1x1xf32> to vector<16x8xf32>
    %800 = arith.mulf %685, %799 : vector<16x8xf32>
    %801 = vector.extract_strided_slice %13 {offsets = [0, 0], sizes = [1, 1], strides = [1, 1]} : vector<1x2xf32> to vector<1x1xf32>
    %802 = vector.broadcast %801 : vector<1x1xf32> to vector<16x8xf32>
    %803 = arith.addf %800, %802 : vector<16x8xf32>
    %cst_145 = arith.constant 0.000000e+00 : f32
    %804 = vector.broadcast %cst_145 : f32 to vector<16x8xf32>
    %805 = arith.maximumf %803, %804 : vector<16x8xf32>
    %806 = math.absf %803 : vector<16x8xf32>
    %cst_146 = arith.constant 0.000000e+00 : f32
    %807 = vector.broadcast %cst_146 : f32 to vector<16x8xf32>
    %808 = arith.subf %807, %806 : vector<16x8xf32>
    %809 = math.exp %808 : vector<16x8xf32>
    %cst_147 = arith.constant 1.000000e+00 : f32
    %810 = vector.broadcast %cst_147 : f32 to vector<16x8xf32>
    %811 = arith.addf %810, %809 : vector<16x8xf32>
    %812 = math.log %811 : vector<16x8xf32>
    %813 = arith.addf %805, %812 : vector<16x8xf32>
    %814 = arith.mulf %813, %649 : vector<16x8xf32>
    %815 = vector.extract_strided_slice %14 {offsets = [0, 1], sizes = [1, 1], strides = [1, 1]} : vector<1x2xf32> to vector<1x1xf32>
    %816 = vector.broadcast %815 : vector<1x1xf32> to vector<16x8xf32>
    %817 = arith.mulf %685, %816 : vector<16x8xf32>
    %818 = vector.extract_strided_slice %13 {offsets = [0, 1], sizes = [1, 1], strides = [1, 1]} : vector<1x2xf32> to vector<1x1xf32>
    %819 = vector.broadcast %818 : vector<1x1xf32> to vector<16x8xf32>
    %820 = arith.addf %817, %819 : vector<16x8xf32>
    %cst_148 = arith.constant 0.000000e+00 : f32
    %821 = vector.broadcast %cst_148 : f32 to vector<16x8xf32>
    %822 = arith.maximumf %820, %821 : vector<16x8xf32>
    %823 = math.absf %820 : vector<16x8xf32>
    %cst_149 = arith.constant 0.000000e+00 : f32
    %824 = vector.broadcast %cst_149 : f32 to vector<16x8xf32>
    %825 = arith.subf %824, %823 : vector<16x8xf32>
    %826 = math.exp %825 : vector<16x8xf32>
    %cst_150 = arith.constant 1.000000e+00 : f32
    %827 = vector.broadcast %cst_150 : f32 to vector<16x8xf32>
    %828 = arith.addf %827, %826 : vector<16x8xf32>
    %829 = math.log %828 : vector<16x8xf32>
    %830 = arith.addf %822, %829 : vector<16x8xf32>
    %831 = arith.mulf %830, %678 : vector<16x8xf32>
    %832 = vector.extract_strided_slice %619 {offsets = [0, 0], sizes = [1, 1], strides = [1, 1]} : vector<2x8xf32> to vector<1x1xf32>
    %833 = vector.broadcast %832 : vector<1x1xf32> to vector<16x8xf32>
    %834 = arith.mulf %813, %833 : vector<16x8xf32>
    %835 = arith.mulf %692, %814 : vector<16x8xf32>
    %836 = vector.extract_strided_slice %619 {offsets = [0, 1], sizes = [1, 1], strides = [1, 1]} : vector<2x8xf32> to vector<1x1xf32>
    %837 = vector.broadcast %836 : vector<1x1xf32> to vector<16x8xf32>
    %838 = arith.mulf %813, %837 : vector<16x8xf32>
    %839 = arith.mulf %699, %814 : vector<16x8xf32>
    %840 = vector.extract_strided_slice %619 {offsets = [0, 2], sizes = [1, 1], strides = [1, 1]} : vector<2x8xf32> to vector<1x1xf32>
    %841 = vector.broadcast %840 : vector<1x1xf32> to vector<16x8xf32>
    %842 = arith.mulf %813, %841 : vector<16x8xf32>
    %843 = arith.mulf %706, %814 : vector<16x8xf32>
    %844 = vector.extract_strided_slice %619 {offsets = [0, 3], sizes = [1, 1], strides = [1, 1]} : vector<2x8xf32> to vector<1x1xf32>
    %845 = vector.broadcast %844 : vector<1x1xf32> to vector<16x8xf32>
    %846 = arith.mulf %813, %845 : vector<16x8xf32>
    %847 = arith.mulf %713, %814 : vector<16x8xf32>
    %848 = vector.extract_strided_slice %619 {offsets = [0, 4], sizes = [1, 1], strides = [1, 1]} : vector<2x8xf32> to vector<1x1xf32>
    %849 = vector.broadcast %848 : vector<1x1xf32> to vector<16x8xf32>
    %850 = arith.mulf %813, %849 : vector<16x8xf32>
    %851 = arith.mulf %720, %814 : vector<16x8xf32>
    %852 = vector.extract_strided_slice %619 {offsets = [0, 5], sizes = [1, 1], strides = [1, 1]} : vector<2x8xf32> to vector<1x1xf32>
    %853 = vector.broadcast %852 : vector<1x1xf32> to vector<16x8xf32>
    %854 = arith.mulf %813, %853 : vector<16x8xf32>
    %855 = arith.mulf %727, %814 : vector<16x8xf32>
    %856 = vector.extract_strided_slice %619 {offsets = [0, 6], sizes = [1, 1], strides = [1, 1]} : vector<2x8xf32> to vector<1x1xf32>
    %857 = vector.broadcast %856 : vector<1x1xf32> to vector<16x8xf32>
    %858 = arith.mulf %813, %857 : vector<16x8xf32>
    %859 = arith.mulf %734, %814 : vector<16x8xf32>
    %860 = vector.extract_strided_slice %619 {offsets = [0, 7], sizes = [1, 1], strides = [1, 1]} : vector<2x8xf32> to vector<1x1xf32>
    %861 = vector.broadcast %860 : vector<1x1xf32> to vector<16x8xf32>
    %862 = arith.mulf %813, %861 : vector<16x8xf32>
    %863 = arith.mulf %741, %814 : vector<16x8xf32>
    %864 = vector.extract_strided_slice %619 {offsets = [1, 0], sizes = [1, 1], strides = [1, 1]} : vector<2x8xf32> to vector<1x1xf32>
    %865 = vector.broadcast %864 : vector<1x1xf32> to vector<16x8xf32>
    %866 = arith.mulf %830, %865 : vector<16x8xf32>
    %867 = arith.mulf %692, %831 : vector<16x8xf32>
    %868 = vector.extract_strided_slice %619 {offsets = [1, 1], sizes = [1, 1], strides = [1, 1]} : vector<2x8xf32> to vector<1x1xf32>
    %869 = vector.broadcast %868 : vector<1x1xf32> to vector<16x8xf32>
    %870 = arith.mulf %830, %869 : vector<16x8xf32>
    %871 = arith.mulf %699, %831 : vector<16x8xf32>
    %872 = vector.extract_strided_slice %619 {offsets = [1, 2], sizes = [1, 1], strides = [1, 1]} : vector<2x8xf32> to vector<1x1xf32>
    %873 = vector.broadcast %872 : vector<1x1xf32> to vector<16x8xf32>
    %874 = arith.mulf %830, %873 : vector<16x8xf32>
    %875 = arith.mulf %706, %831 : vector<16x8xf32>
    %876 = vector.extract_strided_slice %619 {offsets = [1, 3], sizes = [1, 1], strides = [1, 1]} : vector<2x8xf32> to vector<1x1xf32>
    %877 = vector.broadcast %876 : vector<1x1xf32> to vector<16x8xf32>
    %878 = arith.mulf %830, %877 : vector<16x8xf32>
    %879 = arith.mulf %713, %831 : vector<16x8xf32>
    %880 = vector.extract_strided_slice %619 {offsets = [1, 4], sizes = [1, 1], strides = [1, 1]} : vector<2x8xf32> to vector<1x1xf32>
    %881 = vector.broadcast %880 : vector<1x1xf32> to vector<16x8xf32>
    %882 = arith.mulf %830, %881 : vector<16x8xf32>
    %883 = arith.mulf %720, %831 : vector<16x8xf32>
    %884 = vector.extract_strided_slice %619 {offsets = [1, 5], sizes = [1, 1], strides = [1, 1]} : vector<2x8xf32> to vector<1x1xf32>
    %885 = vector.broadcast %884 : vector<1x1xf32> to vector<16x8xf32>
    %886 = arith.mulf %830, %885 : vector<16x8xf32>
    %887 = arith.mulf %727, %831 : vector<16x8xf32>
    %888 = vector.extract_strided_slice %619 {offsets = [1, 6], sizes = [1, 1], strides = [1, 1]} : vector<2x8xf32> to vector<1x1xf32>
    %889 = vector.broadcast %888 : vector<1x1xf32> to vector<16x8xf32>
    %890 = arith.mulf %830, %889 : vector<16x8xf32>
    %891 = arith.mulf %734, %831 : vector<16x8xf32>
    %892 = vector.extract_strided_slice %619 {offsets = [1, 7], sizes = [1, 1], strides = [1, 1]} : vector<2x8xf32> to vector<1x1xf32>
    %893 = vector.broadcast %892 : vector<1x1xf32> to vector<16x8xf32>
    %894 = arith.mulf %830, %893 : vector<16x8xf32>
    %895 = arith.mulf %741, %831 : vector<16x8xf32>
    %896 = tpu.concatenate %834, %838, %842, %846, %850, %854, %858, %862, %866, %870, %874, %878, %882, %886, %890, %894 in 1 : vector<16x8xf32>, vector<16x8xf32>, vector<16x8xf32>, vector<16x8xf32>, vector<16x8xf32>, vector<16x8xf32>, vector<16x8xf32>, vector<16x8xf32>, vector<16x8xf32>, vector<16x8xf32>, vector<16x8xf32>, vector<16x8xf32>, vector<16x8xf32>, vector<16x8xf32>, vector<16x8xf32>, vector<16x8xf32> -> vector<16x128xf32>
    %897 = math.exp %896 : vector<16x128xf32>
    %898 = tpu.concatenate %835, %839, %843, %847, %851, %855, %859, %863, %867, %871, %875, %879, %883, %887, %891, %895 in 1 : vector<16x8xf32>, vector<16x8xf32>, vector<16x8xf32>, vector<16x8xf32>, vector<16x8xf32>, vector<16x8xf32>, vector<16x8xf32>, vector<16x8xf32>, vector<16x8xf32>, vector<16x8xf32>, vector<16x8xf32>, vector<16x8xf32>, vector<16x8xf32>, vector<16x8xf32>, vector<16x8xf32>, vector<16x8xf32> -> vector<16x128xf32>
    %899 = vector.extract_strided_slice %898 {offsets = [0, 0], sizes = [1, 128], strides = [1, 1]} : vector<16x128xf32> to vector<1x128xf32>
    %900 = vector.extract_strided_slice %897 {offsets = [1, 0], sizes = [1, 128], strides = [1, 1]} : vector<16x128xf32> to vector<1x128xf32>
    %901 = arith.mulf %900, %899 : vector<1x128xf32>
    %902 = vector.extract_strided_slice %898 {offsets = [1, 0], sizes = [1, 128], strides = [1, 1]} : vector<16x128xf32> to vector<1x128xf32>
    %903 = arith.addf %901, %902 : vector<1x128xf32>
    %904 = vector.extract_strided_slice %897 {offsets = [2, 0], sizes = [1, 128], strides = [1, 1]} : vector<16x128xf32> to vector<1x128xf32>
    %905 = arith.mulf %904, %903 : vector<1x128xf32>
    %906 = vector.extract_strided_slice %898 {offsets = [2, 0], sizes = [1, 128], strides = [1, 1]} : vector<16x128xf32> to vector<1x128xf32>
    %907 = arith.addf %905, %906 : vector<1x128xf32>
    %908 = vector.extract_strided_slice %897 {offsets = [3, 0], sizes = [1, 128], strides = [1, 1]} : vector<16x128xf32> to vector<1x128xf32>
    %909 = arith.mulf %908, %907 : vector<1x128xf32>
    %910 = vector.extract_strided_slice %898 {offsets = [3, 0], sizes = [1, 128], strides = [1, 1]} : vector<16x128xf32> to vector<1x128xf32>
    %911 = arith.addf %909, %910 : vector<1x128xf32>
    %912 = vector.extract_strided_slice %897 {offsets = [4, 0], sizes = [1, 128], strides = [1, 1]} : vector<16x128xf32> to vector<1x128xf32>
    %913 = arith.mulf %912, %911 : vector<1x128xf32>
    %914 = vector.extract_strided_slice %898 {offsets = [4, 0], sizes = [1, 128], strides = [1, 1]} : vector<16x128xf32> to vector<1x128xf32>
    %915 = arith.addf %913, %914 : vector<1x128xf32>
    %916 = vector.extract_strided_slice %897 {offsets = [5, 0], sizes = [1, 128], strides = [1, 1]} : vector<16x128xf32> to vector<1x128xf32>
    %917 = arith.mulf %916, %915 : vector<1x128xf32>
    %918 = vector.extract_strided_slice %898 {offsets = [5, 0], sizes = [1, 128], strides = [1, 1]} : vector<16x128xf32> to vector<1x128xf32>
    %919 = arith.addf %917, %918 : vector<1x128xf32>
    %920 = vector.extract_strided_slice %897 {offsets = [6, 0], sizes = [1, 128], strides = [1, 1]} : vector<16x128xf32> to vector<1x128xf32>
    %921 = arith.mulf %920, %919 : vector<1x128xf32>
    %922 = vector.extract_strided_slice %898 {offsets = [6, 0], sizes = [1, 128], strides = [1, 1]} : vector<16x128xf32> to vector<1x128xf32>
    %923 = arith.addf %921, %922 : vector<1x128xf32>
    %924 = vector.extract_strided_slice %897 {offsets = [7, 0], sizes = [1, 128], strides = [1, 1]} : vector<16x128xf32> to vector<1x128xf32>
    %925 = arith.mulf %924, %923 : vector<1x128xf32>
    %926 = vector.extract_strided_slice %898 {offsets = [7, 0], sizes = [1, 128], strides = [1, 1]} : vector<16x128xf32> to vector<1x128xf32>
    %927 = arith.addf %925, %926 : vector<1x128xf32>
    %928 = vector.extract_strided_slice %897 {offsets = [8, 0], sizes = [1, 128], strides = [1, 1]} : vector<16x128xf32> to vector<1x128xf32>
    %929 = arith.mulf %928, %927 : vector<1x128xf32>
    %930 = vector.extract_strided_slice %898 {offsets = [8, 0], sizes = [1, 128], strides = [1, 1]} : vector<16x128xf32> to vector<1x128xf32>
    %931 = arith.addf %929, %930 : vector<1x128xf32>
    %932 = vector.extract_strided_slice %897 {offsets = [9, 0], sizes = [1, 128], strides = [1, 1]} : vector<16x128xf32> to vector<1x128xf32>
    %933 = arith.mulf %932, %931 : vector<1x128xf32>
    %934 = vector.extract_strided_slice %898 {offsets = [9, 0], sizes = [1, 128], strides = [1, 1]} : vector<16x128xf32> to vector<1x128xf32>
    %935 = arith.addf %933, %934 : vector<1x128xf32>
    %936 = vector.extract_strided_slice %897 {offsets = [10, 0], sizes = [1, 128], strides = [1, 1]} : vector<16x128xf32> to vector<1x128xf32>
    %937 = arith.mulf %936, %935 : vector<1x128xf32>
    %938 = vector.extract_strided_slice %898 {offsets = [10, 0], sizes = [1, 128], strides = [1, 1]} : vector<16x128xf32> to vector<1x128xf32>
    %939 = arith.addf %937, %938 : vector<1x128xf32>
    %940 = vector.extract_strided_slice %897 {offsets = [11, 0], sizes = [1, 128], strides = [1, 1]} : vector<16x128xf32> to vector<1x128xf32>
    %941 = arith.mulf %940, %939 : vector<1x128xf32>
    %942 = vector.extract_strided_slice %898 {offsets = [11, 0], sizes = [1, 128], strides = [1, 1]} : vector<16x128xf32> to vector<1x128xf32>
    %943 = arith.addf %941, %942 : vector<1x128xf32>
    %944 = vector.extract_strided_slice %897 {offsets = [12, 0], sizes = [1, 128], strides = [1, 1]} : vector<16x128xf32> to vector<1x128xf32>
    %945 = arith.mulf %944, %943 : vector<1x128xf32>
    %946 = vector.extract_strided_slice %898 {offsets = [12, 0], sizes = [1, 128], strides = [1, 1]} : vector<16x128xf32> to vector<1x128xf32>
    %947 = arith.addf %945, %946 : vector<1x128xf32>
    %948 = vector.extract_strided_slice %897 {offsets = [13, 0], sizes = [1, 128], strides = [1, 1]} : vector<16x128xf32> to vector<1x128xf32>
    %949 = arith.mulf %948, %947 : vector<1x128xf32>
    %950 = vector.extract_strided_slice %898 {offsets = [13, 0], sizes = [1, 128], strides = [1, 1]} : vector<16x128xf32> to vector<1x128xf32>
    %951 = arith.addf %949, %950 : vector<1x128xf32>
    %952 = vector.extract_strided_slice %897 {offsets = [14, 0], sizes = [1, 128], strides = [1, 1]} : vector<16x128xf32> to vector<1x128xf32>
    %953 = arith.mulf %952, %951 : vector<1x128xf32>
    %954 = vector.extract_strided_slice %898 {offsets = [14, 0], sizes = [1, 128], strides = [1, 1]} : vector<16x128xf32> to vector<1x128xf32>
    %955 = arith.addf %953, %954 : vector<1x128xf32>
    %956 = vector.extract_strided_slice %897 {offsets = [15, 0], sizes = [1, 128], strides = [1, 1]} : vector<16x128xf32> to vector<1x128xf32>
    %957 = arith.mulf %956, %955 : vector<1x128xf32>
    %958 = vector.extract_strided_slice %898 {offsets = [15, 0], sizes = [1, 128], strides = [1, 1]} : vector<16x128xf32> to vector<1x128xf32>
    %959 = arith.addf %957, %958 : vector<1x128xf32>
    %960 = tpu.concatenate %899, %903, %907, %911, %915, %919, %923, %927, %931, %935, %939, %943, %947, %951, %955, %959 in 0 : vector<1x128xf32>, vector<1x128xf32>, vector<1x128xf32>, vector<1x128xf32>, vector<1x128xf32>, vector<1x128xf32>, vector<1x128xf32>, vector<1x128xf32>, vector<1x128xf32>, vector<1x128xf32>, vector<1x128xf32>, vector<1x128xf32>, vector<1x128xf32>, vector<1x128xf32>, vector<1x128xf32>, vector<1x128xf32> -> vector<16x128xf32>
    %961 = vector.extract_strided_slice %10 {offsets = [0, 0], sizes = [1, 1], strides = [1, 1]} : vector<1x2xf32> to vector<1x1xf32>
    %962 = vector.broadcast %961 : vector<1x1xf32> to vector<16x8xf32>
    %963 = arith.mulf %962, %649 : vector<16x8xf32>
    %964 = vector.extract_strided_slice %960 {offsets = [0, 0], sizes = [16, 8], strides = [1, 1]} : vector<16x128xf32> to vector<16x8xf32>
    %965 = arith.mulf %748, %964 : vector<16x8xf32>
    %966 = arith.addf %963, %965 : vector<16x8xf32>
    %967 = vector.extract_strided_slice %960 {offsets = [0, 8], sizes = [16, 8], strides = [1, 1]} : vector<16x128xf32> to vector<16x8xf32>
    %968 = arith.mulf %755, %967 : vector<16x8xf32>
    %969 = arith.addf %966, %968 : vector<16x8xf32>
    %970 = vector.extract_strided_slice %960 {offsets = [0, 16], sizes = [16, 8], strides = [1, 1]} : vector<16x128xf32> to vector<16x8xf32>
    %971 = arith.mulf %762, %970 : vector<16x8xf32>
    %972 = arith.addf %969, %971 : vector<16x8xf32>
    %973 = vector.extract_strided_slice %960 {offsets = [0, 24], sizes = [16, 8], strides = [1, 1]} : vector<16x128xf32> to vector<16x8xf32>
    %974 = arith.mulf %769, %973 : vector<16x8xf32>
    %975 = arith.addf %972, %974 : vector<16x8xf32>
    %976 = vector.extract_strided_slice %960 {offsets = [0, 32], sizes = [16, 8], strides = [1, 1]} : vector<16x128xf32> to vector<16x8xf32>
    %977 = arith.mulf %776, %976 : vector<16x8xf32>
    %978 = arith.addf %975, %977 : vector<16x8xf32>
    %979 = vector.extract_strided_slice %960 {offsets = [0, 40], sizes = [16, 8], strides = [1, 1]} : vector<16x128xf32> to vector<16x8xf32>
    %980 = arith.mulf %783, %979 : vector<16x8xf32>
    %981 = arith.addf %978, %980 : vector<16x8xf32>
    %982 = vector.extract_strided_slice %960 {offsets = [0, 48], sizes = [16, 8], strides = [1, 1]} : vector<16x128xf32> to vector<16x8xf32>
    %983 = arith.mulf %790, %982 : vector<16x8xf32>
    %984 = arith.addf %981, %983 : vector<16x8xf32>
    %985 = vector.extract_strided_slice %960 {offsets = [0, 56], sizes = [16, 8], strides = [1, 1]} : vector<16x128xf32> to vector<16x8xf32>
    %986 = arith.mulf %797, %985 : vector<16x8xf32>
    %987 = arith.addf %984, %986 : vector<16x8xf32>
    %cst_151 = arith.constant 0.000000e+00 : f32
    %988 = vector.broadcast %cst_151 : f32 to vector<16x8xf32>
    %989 = arith.subf %988, %626 : vector<16x8xf32>
    %990 = math.exp %989 : vector<16x8xf32>
    %cst_152 = arith.constant 1.000000e+00 : f32
    %991 = vector.broadcast %cst_152 : f32 to vector<16x8xf32>
    %992 = arith.addf %991, %990 : vector<16x8xf32>
    %cst_153 = arith.constant 1.000000e+00 : f32
    %993 = vector.broadcast %cst_153 : f32 to vector<16x8xf32>
    %994 = arith.divf %993, %992 : vector<16x8xf32>
    %995 = arith.mulf %626, %994 : vector<16x8xf32>
    %996 = arith.mulf %987, %995 : vector<16x8xf32>
    %997 = vector.extract_strided_slice %16 {offsets = [0, 0], sizes = [1, 1], strides = [1, 1]} : vector<2x1xf32> to vector<1x1xf32>
    %998 = vector.broadcast %997 : vector<1x1xf32> to vector<16x8xf32>
    %999 = arith.mulf %996, %998 : vector<16x8xf32>
    %1000 = vector.extract_strided_slice %10 {offsets = [0, 1], sizes = [1, 1], strides = [1, 1]} : vector<1x2xf32> to vector<1x1xf32>
    %1001 = vector.broadcast %1000 : vector<1x1xf32> to vector<16x8xf32>
    %1002 = arith.mulf %1001, %678 : vector<16x8xf32>
    %1003 = vector.extract_strided_slice %960 {offsets = [0, 64], sizes = [16, 8], strides = [1, 1]} : vector<16x128xf32> to vector<16x8xf32>
    %1004 = arith.mulf %748, %1003 : vector<16x8xf32>
    %1005 = arith.addf %1002, %1004 : vector<16x8xf32>
    %1006 = vector.extract_strided_slice %960 {offsets = [0, 72], sizes = [16, 8], strides = [1, 1]} : vector<16x128xf32> to vector<16x8xf32>
    %1007 = arith.mulf %755, %1006 : vector<16x8xf32>
    %1008 = arith.addf %1005, %1007 : vector<16x8xf32>
    %1009 = vector.extract_strided_slice %960 {offsets = [0, 80], sizes = [16, 8], strides = [1, 1]} : vector<16x128xf32> to vector<16x8xf32>
    %1010 = arith.mulf %762, %1009 : vector<16x8xf32>
    %1011 = arith.addf %1008, %1010 : vector<16x8xf32>
    %1012 = vector.extract_strided_slice %960 {offsets = [0, 88], sizes = [16, 8], strides = [1, 1]} : vector<16x128xf32> to vector<16x8xf32>
    %1013 = arith.mulf %769, %1012 : vector<16x8xf32>
    %1014 = arith.addf %1011, %1013 : vector<16x8xf32>
    %1015 = vector.extract_strided_slice %960 {offsets = [0, 96], sizes = [16, 8], strides = [1, 1]} : vector<16x128xf32> to vector<16x8xf32>
    %1016 = arith.mulf %776, %1015 : vector<16x8xf32>
    %1017 = arith.addf %1014, %1016 : vector<16x8xf32>
    %1018 = vector.extract_strided_slice %960 {offsets = [0, 104], sizes = [16, 8], strides = [1, 1]} : vector<16x128xf32> to vector<16x8xf32>
    %1019 = arith.mulf %783, %1018 : vector<16x8xf32>
    %1020 = arith.addf %1017, %1019 : vector<16x8xf32>
    %1021 = vector.extract_strided_slice %960 {offsets = [0, 112], sizes = [16, 8], strides = [1, 1]} : vector<16x128xf32> to vector<16x8xf32>
    %1022 = arith.mulf %790, %1021 : vector<16x8xf32>
    %1023 = arith.addf %1020, %1022 : vector<16x8xf32>
    %1024 = vector.extract_strided_slice %960 {offsets = [0, 120], sizes = [16, 8], strides = [1, 1]} : vector<16x128xf32> to vector<16x8xf32>
    %1025 = arith.mulf %797, %1024 : vector<16x8xf32>
    %1026 = arith.addf %1023, %1025 : vector<16x8xf32>
    %cst_154 = arith.constant 0.000000e+00 : f32
    %1027 = vector.broadcast %cst_154 : f32 to vector<16x8xf32>
    %1028 = arith.subf %1027, %655 : vector<16x8xf32>
    %1029 = math.exp %1028 : vector<16x8xf32>
    %cst_155 = arith.constant 1.000000e+00 : f32
    %1030 = vector.broadcast %cst_155 : f32 to vector<16x8xf32>
    %1031 = arith.addf %1030, %1029 : vector<16x8xf32>
    %cst_156 = arith.constant 1.000000e+00 : f32
    %1032 = vector.broadcast %cst_156 : f32 to vector<16x8xf32>
    %1033 = arith.divf %1032, %1031 : vector<16x8xf32>
    %1034 = arith.mulf %655, %1033 : vector<16x8xf32>
    %1035 = arith.mulf %1026, %1034 : vector<16x8xf32>
    %1036 = vector.extract_strided_slice %16 {offsets = [1, 0], sizes = [1, 1], strides = [1, 1]} : vector<2x1xf32> to vector<1x1xf32>
    %1037 = vector.broadcast %1036 : vector<1x1xf32> to vector<16x8xf32>
    %1038 = arith.mulf %1035, %1037 : vector<16x8xf32>
    %1039 = arith.addf %999, %1038 : vector<16x8xf32>
    %1040 = tpu.transpose %1039, [1, 0] : vector<16x8xf32> -> vector<8x16xf32>
    %cst_157 = arith.constant dense<0.000000e+00> : vector<8x64xf32>
    %1041 = tpu.matmul %616, %23, %cst_157 {dimension_numbers = #tpu.dot_dimension_numbers<[1], [0], [0], [1], [0, 0, 1, 1], [], []>} : vector<8x16xf32>, vector<16x64xf32>, vector<8x64xf32> -> vector<8x64xf32>
    %1042 = vector.extract_strided_slice %1041 {offsets = [0, 0], sizes = [8, 32], strides = [1, 1]} : vector<8x64xf32> to vector<8x32xf32>
    %1043 = vector.extract_strided_slice %1041 {offsets = [0, 32], sizes = [8, 32], strides = [1, 1]} : vector<8x64xf32> to vector<8x32xf32>
    %1044 = vector.extract_strided_slice %20 {offsets = [1, 0], sizes = [1, 32], strides = [1, 1]} : vector<2x32xf32> to vector<1x32xf32>
    %1045 = vector.broadcast %1044 : vector<1x32xf32> to vector<8x32xf32>
    %1046 = arith.mulf %1042, %1045 : vector<8x32xf32>
    %1047 = vector.broadcast %19 : vector<1x32xf32> to vector<8x32xf32>
    %1048 = arith.addf %1046, %1047 : vector<8x32xf32>
    %cst_158 = arith.constant 0.000000e+00 : f32
    %1049 = vector.broadcast %cst_158 : f32 to vector<8x32xf32>
    %1050 = arith.subf %1049, %1048 : vector<8x32xf32>
    %1051 = math.exp %1050 : vector<8x32xf32>
    %cst_159 = arith.constant 1.000000e+00 : f32
    %1052 = vector.broadcast %cst_159 : f32 to vector<8x32xf32>
    %1053 = arith.addf %1052, %1051 : vector<8x32xf32>
    %cst_160 = arith.constant 1.000000e+00 : f32
    %1054 = vector.broadcast %cst_160 : f32 to vector<8x32xf32>
    %1055 = arith.divf %1054, %1053 : vector<8x32xf32>
    %1056 = arith.mulf %1048, %1055 : vector<8x32xf32>
    %cst_161 = arith.constant dense<0.000000e+00> : vector<8x17xf32>
    %1057 = tpu.matmul %1056, %25, %cst_161 {dimension_numbers = #tpu.dot_dimension_numbers<[1], [0], [0], [1], [0, 0, 1, 1], [], []>} : vector<8x32xf32>, vector<32x17xf32>, vector<8x17xf32> -> vector<8x17xf32>
    %1058 = vector.extract_strided_slice %1057 {offsets = [0, 0], sizes = [8, 1], strides = [1, 1]} : vector<8x17xf32> to vector<8x1xf32>
    %1059 = vector.extract_strided_slice %1057 {offsets = [0, 1], sizes = [8, 8], strides = [1, 1]} : vector<8x17xf32> to vector<8x8xf32>
    %1060 = vector.extract_strided_slice %1057 {offsets = [0, 9], sizes = [8, 8], strides = [1, 1]} : vector<8x17xf32> to vector<8x8xf32>
    %cst_162 = arith.constant dense<0.000000e+00> : vector<8x32xf32>
    %1061 = tpu.matmul %1058, %22, %cst_162 {dimension_numbers = #tpu.dot_dimension_numbers<[1], [0], [0], [1], [0, 0, 1, 1], [], []>} : vector<8x1xf32>, vector<1x32xf32>, vector<8x32xf32> -> vector<8x32xf32>
    %1062 = vector.broadcast %21 : vector<1x32xf32> to vector<8x32xf32>
    %1063 = arith.addf %1061, %1062 : vector<8x32xf32>
    %cst_163 = arith.constant 0.000000e+00 : f32
    %1064 = vector.broadcast %cst_163 : f32 to vector<8x32xf32>
    %1065 = arith.maximumf %1063, %1064 : vector<8x32xf32>
    %1066 = math.absf %1063 : vector<8x32xf32>
    %cst_164 = arith.constant 0.000000e+00 : f32
    %1067 = vector.broadcast %cst_164 : f32 to vector<8x32xf32>
    %1068 = arith.subf %1067, %1066 : vector<8x32xf32>
    %1069 = math.exp %1068 : vector<8x32xf32>
    %cst_165 = arith.constant 1.000000e+00 : f32
    %1070 = vector.broadcast %cst_165 : f32 to vector<8x32xf32>
    %1071 = arith.addf %1070, %1069 : vector<8x32xf32>
    %1072 = math.log %1071 : vector<8x32xf32>
    %1073 = arith.addf %1065, %1072 : vector<8x32xf32>
    %1074 = arith.mulf %1060, %1059 : vector<8x8xf32>
    %cst_166 = arith.constant dense<0.000000e+00> : vector<8xf32>
    %1075 = vector.multi_reduction <add>, %1074, %cst_166 [1] : vector<8x8xf32> to vector<8xf32>
    %1076 = vector.shape_cast %1075 : vector<8xf32> to vector<8x1xf32>
    %1077 = arith.mulf %1073, %1056 : vector<8x32xf32>
    %1078 = vector.broadcast %1076 : vector<8x1xf32> to vector<8x32xf32>
    %1079 = arith.mulf %1078, %1077 : vector<8x32xf32>
    %1080 = vector.broadcast %18 : vector<1x32xf32> to vector<8x32xf32>
    %1081 = arith.mulf %1080, %1056 : vector<8x32xf32>
    %1082 = arith.addf %1079, %1081 : vector<8x32xf32>
    %cst_167 = arith.constant 0.000000e+00 : f32
    %1083 = vector.broadcast %cst_167 : f32 to vector<8x32xf32>
    %1084 = arith.subf %1083, %1043 : vector<8x32xf32>
    %1085 = math.exp %1084 : vector<8x32xf32>
    %cst_168 = arith.constant 1.000000e+00 : f32
    %1086 = vector.broadcast %cst_168 : f32 to vector<8x32xf32>
    %1087 = arith.addf %1086, %1085 : vector<8x32xf32>
    %cst_169 = arith.constant 1.000000e+00 : f32
    %1088 = vector.broadcast %cst_169 : f32 to vector<8x32xf32>
    %1089 = arith.divf %1088, %1087 : vector<8x32xf32>
    %1090 = arith.mulf %1043, %1089 : vector<8x32xf32>
    %1091 = arith.mulf %1082, %1090 : vector<8x32xf32>
    %cst_170 = arith.constant dense<0.000000e+00> : vector<8x16xf32>
    %1092 = tpu.matmul %1091, %24, %cst_170 {dimension_numbers = #tpu.dot_dimension_numbers<[1], [0], [0], [1], [0, 0, 1, 1], [], []>} : vector<8x32xf32>, vector<32x16xf32>, vector<8x16xf32> -> vector<8x16xf32>
    %1093 = arith.addf %1040, %616 : vector<8x16xf32>
    %1094 = arith.addf %1093, %1092 : vector<8x16xf32>
    %cst_171 = arith.constant dense<0.000000e+00> : vector<8x32xf32>
    %1095 = tpu.matmul %1094, %5, %cst_171 {dimension_numbers = #tpu.dot_dimension_numbers<[1], [0], [0], [1], [0, 0, 1, 1], [], []>} : vector<8x16xf32>, vector<16x32xf32>, vector<8x32xf32> -> vector<8x32xf32>
    %1096 = vector.broadcast %4 : vector<1x32xf32> to vector<8x32xf32>
    %1097 = arith.addf %1095, %1096 : vector<8x32xf32>
    %1098 = arith.addf %1097, %70 : vector<8x32xf32>
    %cst_172 = arith.constant dense<0.000000e+00> : vector<8x8xf32>
    %1099 = tpu.matmul %1098, %7, %cst_172 {dimension_numbers = #tpu.dot_dimension_numbers<[1], [0], [0], [1], [0, 0, 1, 1], [], []>} : vector<8x32xf32>, vector<32x8xf32>, vector<8x8xf32> -> vector<8x8xf32>
    %cst_173 = arith.constant dense<0.000000e+00> : vector<8x8xf32>
    %1100 = tpu.matmul %613, %8, %cst_173 {dimension_numbers = #tpu.dot_dimension_numbers<[1], [0], [0], [1], [0, 0, 1, 1], [], []>} : vector<8x32xf32>, vector<32x8xf32>, vector<8x8xf32> -> vector<8x8xf32>
    %1101 = arith.addf %1099, %1100 : vector<8x8xf32>
    %1102 = vector.broadcast %6 : vector<1x8xf32> to vector<8x8xf32>
    %1103 = arith.addf %1101, %1102 : vector<8x8xf32>
    %1104 = vector.broadcast %43 : vector<8x1xf32> to vector<8x8xf32>
    %1105 = arith.subf %1103, %1104 : vector<8x8xf32>
    %cst_174 = arith.constant 1.000000e-10 : f32
    %1106 = vector.broadcast %cst_174 : f32 to vector<8x1xf32>
    %1107 = arith.addf %44, %1106 : vector<8x1xf32>
    %1108 = vector.broadcast %1107 : vector<8x1xf32> to vector<8x8xf32>
    %1109 = arith.divf %1105, %1108 : vector<8x8xf32>
    %1110 = vector.broadcast %59 : vector<8x1xf32> to vector<8x8xf32>
    %1111 = arith.mulf %1109, %1110 : vector<8x8xf32>
    %1112 = vector.broadcast %49 : vector<8x1xf32> to vector<8x8xf32>
    %1113 = arith.addf %1111, %1112 : vector<8x8xf32>
    %c0_175 = arith.constant 0 : index
    %c0_176 = arith.constant 0 : index
    %1114 = vector.load %arg48[%c0_175, %c0_176] : memref<8x8xf32, #tpu.memory_space<vmem>>, vector<8x8xf32>
    tpu.vector_store %arg48[%c0_175, %c0_176], %1113 {strides = array<i32>} : memref<8x8xf32, #tpu.memory_space<vmem>>, vector<8x8xf32>,
    return
  }
}

</mosaic_0001>

<bundles_post_ra>
// kernel: tile.1
= control target key start
LH: loop header
LB: loop body
LE: loop exit
PB: predicated region body
PF: predicated region fallthrough
CT: control target
= control target key end

     0   :  { %s34_s8 = smov 125   ;;  %s35_s9 = smov 126   ;;  %vm7_vm0 = vcmask 7168   ;;  %s61_s0 = inlined_call_operand.vmem [shape: f32[2,4], index: 0, kind: input, shape index: {}]   ;;  %s62_s1 = inlined_call_operand.vmem [shape: f32[8,1], index: 1, kind: output, shape index: {}]  }
   0x1   :  { %v4_v0 = vld [vmem:[%s61_s0] sm:$0x3]  ;;  %s33_s0 = smov 127  }
   0x2   :  { %5 = vst [vmem:[#allocation0] sm:$0x3] %v4_v0 }
   0x9   :  { %v9_v1 = vld [vmem:[#allocation0] sm:$0x3]  }
   0xa   :  { %v21_v2 = vld [vmem:[#allocation0] sm:$0x3]   ;;  %10 = vrot.lane.b32.xlu0 %v9_v1, %s33_s0 }
   0xb   :  { %22 = vrot.lane.b32.xlu1 %v21_v2, %s34_s8  ;;  %v15_v3 = vld [vmem:[#allocation0] sm:$0x3]  }
   0xc   :  { %v6_v4 = vld [vmem:[#allocation0] sm:$0x3]  }
   0xd   :  { %8 = vst.msk [vmem:[%s62_s1] ss:$4 sm:$0x3] %vm7_vm0, %v6_v4  }
  0x12   :  { %16 = vrot.lane.b32.xlu0 %v15_v3, %s35_s9 }
  0x7c   :  { %v11_v5 = vpop.permute.xlu0 %10  }
  0x7d   :  { %v23_v6 = vpop.permute.xlu1 %22   ;;  %27 = vst.msk [vmem:[%s62_s1 + $0x1] ss:$4 sm:$0x3] %vm7_vm0, %v11_v5  }
  0x7e   :  { %29 = vst.msk [vmem:[%s62_s1 + $0x3] ss:$4 sm:$0x3] %vm7_vm0, %v23_v6  }
  0x84   :  { %v17_v7 = vpop.permute.xlu0 %16  }
  0x85   :  { %28 = vst.msk [vmem:[%s62_s1 + $0x2] ss:$4 sm:$0x3] %vm7_vm0, %v17_v7  }

// kernel: tile.18
= control target key start
LH: loop header
LB: loop body
LE: loop exit
PB: predicated region body
PF: predicated region fallthrough
CT: control target
= control target key end

     0   :  { %s22_s0 = inlined_call_operand.vmem [shape: f32[4], index: 0, kind: input, shape index: {}]   ;;  %s23_s1 = inlined_call_operand.vmem [shape: f32[2,4], index: 1, kind: output, shape index: {}]  }
   0x1   :  { %v4_v0 = vld [vmem:[%s22_s0] ss:$0 sm:$0xff] }
   0x2   :  { %5 = vst [vmem:[%s23_s1] sm:$0x3] %v4_v0 }

// kernel: _lambda_.1
= control target key start
LH: loop header
LB: loop body
LE: loop exit
PB: predicated region body
PF: predicated region fallthrough
CT: control target
= control target key end

     0   :  { %s5257_s6 = smov 1   ;;  %s5258_s10 = smov 2   ;;  %s9708_s0 = inlined_call_operand.smem [shape: u32[49], index: -1, kind: input, shape index: {}] }
   0x1   :  { %s5346_s5 = sld [smem:[%s9708_s0]]   ;;  %s5259_s14 = smov 3  }
   0x2   :  { %s5351_s9 = sld [smem:[%s9708_s0 + %s5257_s6]]   ;;  %s5260_s18 = smov 4  }
   0x3   :  { %s5356_s13 = sld [smem:[%s9708_s0 + %s5258_s10]]   ;;  %s5261_s22 = smov 5  }
   0x4   :  { %s5361_s17 = sld [smem:[%s9708_s0 + %s5259_s14]]   ;;  %s5262_s26 = smov 6  }
   0x5   :  { %s5366_s21 = sld [smem:[%s9708_s0 + %s5260_s18]]   ;;  %s5263_s30 = smov 7  }
   0x6   :  { %s5371_s25 = sld [smem:[%s9708_s0 + %s5261_s22]]   ;;  %s5264_s4 = smov 8  }
   0x7   :  { %s5376_s29 = sld [smem:[%s9708_s0 + %s5262_s26]]   ;;  %s5265_s10 = smov 9  }
   0x8   :  { %s5381_s3 = sld [smem:[%s9708_s0 + %s5263_s30]]   ;;  %s5266_s15 = smov 10  }
   0x9   :  { %9956 = sst [smem:[#allocation5_spill]] %s5356_s13  ;;  %s5267_s20 = smov 11  }
   0xa   :  { %s5386_s8 = sld [smem:[%s9708_s0 + %s5264_s4]]   ;;  %s5268_s26 = smov 12  }
   0xb   :  { %9957 = sst [smem:[#allocation6_spill]] %s5366_s21  ;;  %s5269_s1 = smov 13  }
   0xc   :  { %9958 = sst [smem:[#allocation7_spill]] %s5371_s25  ;;  %s5270_s7 = smov 14  }
   0xd   :  { %9959 = sst [smem:[#allocation8_spill]] %s5376_s29  ;;  %s5272_s22 = smov 16  }
   0xe   :  { %9960 = sst [smem:[#allocation9_spill]] %s5381_s3  ;;  %s5273_s28 = smov 17  }
   0xf   :  { %s5391_s14 = sld [smem:[%s9708_s0 + %s5265_s10]]   ;;  %s5298_s10 = smov 44  }
  0x10   :  { %9961 = sst [smem:[#allocation10_spill]] %s5386_s8  ;;  %s5299_s16 = smov 45  }
  0x11   :  { %s5396_s19 = sld [smem:[%s9708_s0 + %s5266_s15]]   ;;  %s5271_s15 = smov 15  }
  0x12   :  { %s5401_s24 = sld [smem:[%s9708_s0 + %s5267_s20]]   ;;  %s5300_s13 = smov 46  }
  0x13   :  { %s5406_s30 = sld [smem:[%s9708_s0 + %s5268_s26]]  }
  0x14   :  { %s5411_s6 = sld [smem:[%s9708_s0 + %s5269_s1]]   ;;  %s5297_s1 = smov 43  }
  0x15   :  { %9962 = sst [smem:[#allocation11_spill]] %s5391_s14 }
  0x16   :  { %s5416_s12 = sld [smem:[%s9708_s0 + %s5270_s7]]   ;;  %s5274_s7 = smov 19  }
  0x17   :  { %9963 = sst [smem:[#allocation12_spill]] %s5396_s19 }
  0x18   :  { %9964 = sst [smem:[#allocation13_spill]] %s5401_s24 }
  0x19   :  { %9965 = sst [smem:[#allocation14_spill]] %s5406_s30 }
  0x1a   :  { %9966 = sst [smem:[#allocation15_spill]] %s5411_s6 }
  0x1b   :  { %s5421_s20 = sld [smem:[%s9708_s0 + %s5271_s15]]   ;;  %s5275_s15 = smov 20  }
  0x1c   :  { %9967 = sst [smem:[#allocation16_spill]] %s5416_s12 }
  0x1d   :  { %s5426_s27 = sld [smem:[%s9708_s0 + %s5272_s22]]   ;;  %s5276_s22 = smov 21  }
  0x1e   :  { %s5431_s4 = sld [smem:[%s9708_s0 + %s5273_s28]]   ;;  %s5277_s28 = smov 22  }
  0x1f   :  { %s5436_s29 = sld [smem:[%s9708_s0 + %s5274_s7]]   ;;  %s5278_s7 = smov 23  }
  0x20   :  { %s5441_s21 = sld [smem:[%s9708_s0 + %s5275_s15]]   ;;  %s5279_s15 = smov 24  }
  0x21   :  { %9968 = sst [smem:[#allocation17_spill]] %s5421_s20 }
  0x22   :  { %s5446_s3 = sld [smem:[%s9708_s0 + %s5276_s22]]   ;;  %s5280_s22 = smov 25  }
  0x23   :  { %9969 = sst [smem:[#allocation18_spill]] %s5426_s27 }
  0x24   :  { %9970 = sst [smem:[#allocation19_spill]] %s5431_s4 }
  0x25   :  { %9971 = sst [smem:[#allocation20_spill]] %s5436_s29 }
  0x26   :  { %9972 = sst [smem:[#allocation21_spill]] %s5441_s21 }
  0x27   :  { %s5451_s25 = sld [smem:[%s9708_s0 + %s5277_s28]]   ;;  %s5281_s28 = smov 26  }
  0x28   :  { %9973 = sst [smem:[#allocation22_spill]] %s5446_s3 }
  0x29   :  { %s5456_s8 = sld [smem:[%s9708_s0 + %s5278_s7]]   ;;  %s5282_s7 = smov 28  }
  0x2a   :  { %s5461_s27 = sld [smem:[%s9708_s0 + %s5279_s15]]   ;;  %s5283_s15 = smov 29  }
  0x2b   :  { %s5466_s29 = sld [smem:[%s9708_s0 + %s5280_s22]]   ;;  %s5284_s22 = smov 30  }
  0x2c   :  { %s5476_s19 = sld [smem:[%s9708_s0 + %s5282_s7]]   ;;  %s5286_s7 = smov 32  }
  0x2d   :  { %9974 = sst [smem:[#allocation23_spill]] %s5451_s25 }
  0x2e   :  { %s5471_s25 = sld [smem:[%s9708_s0 + %s5281_s28]]   ;;  %s5285_s28 = smov 31  }
  0x2f   :  { %9975 = sst [smem:[#allocation24_spill]] %s5456_s8 }
  0x30   :  { %s5481_s12 = sld [smem:[%s9708_s0 + %s5283_s15]]   ;;  %s5287_s15 = smov 33  }
  0x31   :  { %9976 = sst [smem:[#allocation25_spill]] %s5466_s29 }
  0x32   :  { %9978 = sst [smem:[#allocation27_spill]] %s5476_s19 }
  0x33   :  { %s5486_s29 = sld [smem:[%s9708_s0 + %s5284_s22]]   ;;  %s5288_s22 = smov 34  }
  0x34   :  { %9977 = sst [smem:[#allocation26_spill]] %s5471_s25 }
  0x35   :  { %s5491_s6 = sld [smem:[%s9708_s0 + %s5285_s28]]   ;;  %s5289_s28 = smov 35  }
  0x36   :  { %9979 = sst [smem:[#allocation28_spill]] %s5481_s12 }
  0x37   :  { %s5496_s19 = sld [smem:[%s9708_s0 + %s5286_s7]]   ;;  %s5290_s7 = smov 36  }
  0x38   :  { %s5501_s14 = sld [smem:[%s9708_s0 + %s5287_s15]]   ;;  %s5291_s15 = smov 37  }
  0x39   :  { %9980 = sst [smem:[#allocation29_spill]] %s5486_s29  ;;  %s5302_s29 = smov 48  }
  0x3a   :  { %s5506_s20 = sld [smem:[%s9708_s0 + %s5288_s22]]   ;;  %s5292_s22 = smov 38  }
  0x3b   :  { %9981 = sst [smem:[#allocation30_spill]] %s5491_s6 }
  0x3c   :  { %s5511_s6 = sld [smem:[%s9708_s0 + %s5289_s28]]   ;;  %s5293_s28 = smov 39  }
  0x3d   :  { %9982 = sst [smem:[#allocation31_spill]] %s5496_s19 }
  0x3e   :  { %s5516_s24 = sld [smem:[%s9708_s0 + %s5290_s7]]   ;;  %s5294_s7 = smov 40  }
  0x3f   :  { %s5521_s4 = sld [smem:[%s9708_s0 + %s5291_s15]]   ;;  %s5295_s15 = smov 41  }
  0x40   :  { %9983 = sst [smem:[#allocation32_spill]] %s5506_s20 }
  0x41   :  { %s5526_s20 = sld [smem:[%s9708_s0 + %s5292_s22]]   ;;  %s5296_s22 = smov 42  }
  0x42   :  { %s5531_s8 = sld [smem:[%s9708_s0 + %s5293_s28]]   ;;  %s5301_s28 = smov 47  }
  0x43   :  { %s5536_s19 = sld [smem:[%s9708_s0 + %s5294_s7]]  }
  0x44   :  { %s5541_s25 = sld [smem:[%s9708_s0 + %s5295_s15]]  }
  0x45   :  { %9984 = sst [smem:[#allocation33_spill]] %s5521_s4 }
  0x46   :  { %s4664_s21 = sld [smem:[%s9708_s0 + %s5296_s22]]  }
  0x47   :  { %s5549_s3 = sld [smem:[%s9708_s0 + %s5297_s1]]  }
  0x48   :  { %s5554_s30 = sld [smem:[%s9708_s0 + %s5298_s10]]  }
  0x49   :  { %s4667_s12 = sld [smem:[%s9708_s0 + %s5299_s16]]  }
  0x4a   :  { %s5562_s26 = sld [smem:[%s9708_s0 + %s5300_s13]]  }
  0x4b   :  { %s5570_s11 = sld [smem:[%s9708_s0 + %s5302_s29]]  }
  0x4d   :  { %9985 = sst [smem:[#allocation34_spill]] %s5549_s3 }
  0x4e   :  { %s4669_s3 = sld [smem:[%s9708_s0 + %s5301_s28]]  }
  0x50   :  { %9986 = sst [smem:[#allocation35_spill]] %s5562_s26 }
  0x51   :  { %9987 = sst [smem:[#allocation36_spill]] %s5570_s11 }
  0x52   :  { %vm9883_vm0 = vcmask 130048   ;;  %v278_v1 = vld [vmem:[%s5562_s26] sm:$0xff]  ;;  %v9755_v2 = vmov 0   ;;  %v9757_v4 = vmov 1  }
  0x53   :  { %4992 = vset.pattern.permute.xlu1 %v9755_v2  ;;  %4997 = vset.pattern.permute.xlu0 %v9757_v4  ;;  %v277_v5 = vld [vmem:[%s4667_s12] sm:$0xff] }
  0x54   :  { %v5572_v0 = vld [vmem:[%s4669_s3] sm:$0xff]  ;;  %328 = vperm.xlu1 %4992, %v278_v1   ;;  %5000 = vset.pattern.permute.xlu2 %v9757_v4 }
  0x55   :  { %v281_v3 = vsel %vm9883_vm0, %v5572_v0, 0.0 }
  0x56   :  { %282 = vadd.xlane.f32.xlu0 %v281_v3 }
  0x5c   :  { %334 = vperm.xlu1 %4992, %v277_v5  }
  0x5d   :  { %102 = vsyncpa [#allocation3], 0  ;;  %v5014_v6 = vld [vmem:[%s4664_s21] ss:$0 sm:$0xff]  ;;  %s9744_s0 = smov 127   ;;  %v9753_v9 = vmov 2  }
  0x5e   :  { %v271_v7 = vld [vmem:[%s5531_s8] sm:$0x3]  ;;  %s9742_s13 = smov 126   ;;  %v9754_v12 = vmov 3   ;;  %s9740_s21 = smov 125   ;;  %v5316_v14 = vmov 16.0  }
  0x5f   :  { %v627_v8 = vrot.slane %v271_v7, 1  ;;  %761 = vrot.lane.b32.xlu2 %v271_v7, %s9744_s0  ;;  %4686 = vpush %v271_v7  ;;  %v5015_v10 = vld [vmem:[%s5526_s20] ss:$0 sm:$0xff]  ;;  %s9738_s29 = smov 124   ;;  %s9736_s3 = smov 123   ;;  %5034 = vrcp.f32 %v5316_v14  ;;  %v201_v56 = vld [vmem:[%s5351_s9 + $0x8] sm:$0xff] }
  0x60   :  { %v5588_v11 = vld [vmem:[%s5554_s30] sm:$0x3]  ;;  %s9718_s8 = smov 113   ;;  %s9732_s30 = smov 122   ;;  %358 = vmatpush.msra.mxu0 %v201_v56  ;;  %vm9875_vm8 = vcmask 261120   ;;  %vm602_vm9 = vcmask 1040384  }
  0x61   :  { %4688 = vpush %v627_v8  ;;  %v5604_v13 = vrot.slane %v5588_v11, 1  ;;  %s9730_s12 = smov 121   ;;  %s9748_s20 = smov 120   ;;  %v5016_v38 = vld [vmem:[%s5541_s25] ss:$0 sm:$0xff]  ;;  %vm9884_vm14 = vcmask 523264  }
  0x62   :  { %s9728_s16 = smov 119   ;;  %s9734_s15 = smov 118   ;;  %v200_v57 = vld [vmem:[%s5351_s9] sm:$0xff] }
  0x63   :  { %s9726_s18 = smov 117   ;;  %s9724_s23 = smov 116   ;;  %359 = vmatpush.msra.mxu0 %v200_v57  ;;  %v248_v56 = vld [vmem:[%s5501_s14] sm:$0xff] }
  0x64   :  { %4993 = vset.pattern.permute.xlu1 %v9753_v9  ;;  %s9722_s22 = smov 115   ;;  %s9720_s28 = smov 114  }
  0x65   :  { %591 = vperm.xlu1 %4993, %v5014_v6   ;;  %v5035_v15 = vpop.eup %5034  ;;  %s9746_s1 = smov 112   ;;  %s9995_s9 = sld [smem:[#allocation5_spill]] }
  0x66   :  { %v285_v16 = vmul.f32 16.0, %v5035_v15  ;;  %vm289_vm1 = vweird.f32 %v5035_v15 }
  0x67   :  { %1203 = vrot.lane.b32.xlu2 %v5588_v11, %s9718_s8 }
  0x68   :  { %v286_v17 = vsub.f32 1.0, %v285_v16 }
  0x6a   :  { %788 = vperm.xlu0 %4997, %v5015_v10   ;;  %v287_v18 = vmul.f32 %v5035_v15, %v286_v17 }
  0x6c   :  { %v288_v19 = vadd.f32 %v5035_v15, %v287_v18 }
  0x6d   :  { %4994 = vset.pattern.permute.xlu1 %v9755_v2 }
  0x6e   :  { %642 = vperm.xlu1 %4994, %v5015_v10   ;;  %v5626_v20 = vsel %vm289_vm1, %v5035_v15, %v288_v19 }
  0x6f   :  { %1234 = vrot.lane.b32.xlu2 %v5604_v13, %s9746_s1 }
  0x72   :  { %4998 = vset.pattern.permute.xlu0 %v9755_v2 }
  0x73   :  { %583 = vperm.xlu0 %4998, %v5014_v6  }
  0x76   :  { %4995 = vset.pattern.permute.xlu1 %v9757_v4 }
  0x77   :  { %730 = vperm.xlu1 %4995, %v5014_v6   ;;  %1308 = vperm.xlu2 %5000, %v5016_v38  }
  0x7b   :  { %917 = vrot.lane.b32.xlu0 %v5588_v11, %s9742_s13 }
  0x7f   :  { %4996 = vset.pattern.permute.xlu1 %v9754_v12 }
  0x80   :  { %738 = vperm.xlu1 %4996, %v5014_v6  }
  0x83   :  { %939 = vrot.lane.b32.xlu0 %v5588_v11, %s9740_s21 }
  0x88   :  { %774 = vrot.lane.b32.xlu1 %v627_v8, %s9744_s0  ;;  %v5017_v8 = vld [vmem:[%s5536_s19] ss:$0 sm:$0xff] }
  0x89   :  { %4999 = vset.pattern.permute.xlu1 %v9755_v2 }
  0x8b   :  { %961 = vrot.lane.b32.xlu0 %v5588_v11, %s9738_s29 }
  0x90   :  { %895 = vrot.lane.b32.xlu1 %v5588_v11, %s9744_s0  ;;  %s4687_s25 = spop %4686 }
  0x93   :  { %983 = vrot.lane.b32.xlu0 %v5588_v11, %s9736_s3 }
  0x98   :  { %904 = vrot.lane.b32.xlu1 %v5604_v13, %s9744_s0 }
  0x9b   :  { %1005 = vrot.lane.b32.xlu0 %v5588_v11, %s9732_s30 }
  0xa0   :  { %926 = vrot.lane.b32.xlu1 %v5604_v13, %s9742_s13 }
  0xa3   :  { %1027 = vrot.lane.b32.xlu0 %v5588_v11, %s9730_s12 }
  0xa8   :  { %948 = vrot.lane.b32.xlu1 %v5604_v13, %s9740_s21 }
  0xab   :  { %1049 = vrot.lane.b32.xlu0 %v5588_v11, %s9748_s20 }
  0xb0   :  { %970 = vrot.lane.b32.xlu1 %v5604_v13, %s9738_s29 }
  0xb8   :  { %992 = vrot.lane.b32.xlu1 %v5604_v13, %s9736_s3 }
  0xb9   :  { %v762_v30 = vpop.permute.xlu2 %761 }
  0xba   :  { %4690 = vpush %v762_v30 }
  0xc0   :  { %1014 = vrot.lane.b32.xlu1 %v5604_v13, %s9732_s30 }
  0xc6   :  { %v5628_v21 = vpop.permute.xlu1 %328 }
  0xc8   :  { %1036 = vrot.lane.b32.xlu1 %v5604_v13, %s9730_s12 }
  0xc9   :  { %v283_v22 = vpop.xlane.xlu0 %282 }
  0xca   :  { %v5631_v23 = vmul.f32 %v5626_v20, %v283_v22 }
  0xcc   :  { %9988 = vst [vmem:[#allocation37_spill] sm:$0xff] %v5631_v23  ;;  %v5637_v24 = vsub.f32 %v5572_v0, %v5631_v23 }
  0xce   :  { %v5639_v25 = vpop.permute.xlu1 %334  ;;  %v293_v26 = vmul.f32 %v5637_v24, %v5637_v24 }
  0xcf   :  { %9989 = vst [vmem:[#allocation38_spill] sm:$0xff] %v5639_v25 }
  0xd0   :  { %1058 = vrot.lane.b32.xlu1 %v5604_v13, %s9748_s20  ;;  %v294_v27 = vsel %vm9883_vm0, %v293_v26, 0.0 }
  0xd5   :  { %295 = vadd.xlane.f32.xlu0 %v294_v27 }
  0xd7   :  { %v5646_v28 = vpop.permute.xlu1 %591 }
  0xd8   :  { %9990 = vst [vmem:[#allocation39_spill] sm:$0xff] %v5646_v28  ;;  %1080 = vrot.lane.b32.xlu1 %v5604_v13, %s9728_s16 }
  0xdc   :  { %v5660_v32 = vpop.permute.xlu0 %788 }
  0xe0   :  { %v5650_v29 = vpop.permute.xlu1 %642  ;;  %1102 = vrot.lane.b32.xlu1 %v5604_v13, %s9734_s15 }
  0xe5   :  { %v5668_v34 = vpop.permute.xlu0 %583 }
  0xe8   :  { %1124 = vrot.lane.b32.xlu1 %v5604_v13, %s9726_s18 }
  0xe9   :  { %1071 = vrot.lane.b32.xlu0 %v5588_v11, %s9728_s16  ;;  %v5658_v31 = vpop.permute.xlu1 %730 }
  0xed   :  { %v918_v36 = vpop.permute.xlu0 %917 }
  0xf0   :  { %1146 = vrot.lane.b32.xlu1 %v5604_v13, %s9724_s23 }
  0xf1   :  { %1093 = vrot.lane.b32.xlu0 %v5588_v11, %s9734_s15 }
  0xf2   :  { %v5666_v33 = vpop.permute.xlu1 %738 }
  0xf3   :  { %9991 = vst [vmem:[#allocation40_spill] sm:$0xff] %v5666_v33 }
  0xf5   :  { %v940_v39 = vpop.permute.xlu0 %939 }
  0xf8   :  { %1168 = vrot.lane.b32.xlu1 %v5604_v13, %s9722_s22 }
  0xf9   :  { %1115 = vrot.lane.b32.xlu0 %v5588_v11, %s9726_s18 }
  0xfa   :  { %v775_v35 = vpop.permute.xlu1 %774 }
  0xfb   :  { %4692 = vpush %v775_v35 }
  0xfc   :  { %4694 = vpush %v5588_v11 }
  0xfd   :  { %4696 = vpush %v5604_v13  ;;  %v962_v42 = vpop.permute.xlu0 %961 }
 0x100   :  { %1190 = vrot.lane.b32.xlu1 %v5604_v13, %s9720_s28 }
 0x101   :  { %1137 = vrot.lane.b32.xlu0 %v5588_v11, %s9724_s23 }
 0x102   :  { %v896_v37 = vpop.permute.xlu1 %895 }
 0x103   :  { %4698 = vpush %v896_v37  ;;  %v206_v37 = vld [vmem:[%s5361_s17 + $0x18] sm:$0xff] }
 0x104   :  { %2942 = vmatpush.msrb.mxu0 %v206_v37  ;;  %v5021_v37 = vld [vmem:[%s9995_s9] ss:$0 sm:$0xff] }
 0x105   :  { %v984_v44 = vpop.permute.xlu0 %983 }
 0x108   :  { %1225 = vrot.lane.b32.xlu1 %v5588_v11, %s9746_s1 }
 0x109   :  { %1159 = vrot.lane.b32.xlu0 %v5588_v11, %s9722_s22 }
 0x10a   :  { %v905_v40 = vpop.permute.xlu1 %904 }
 0x10b   :  { %4700 = vpush %v905_v40 }
 0x10c   :  { %4702 = vpush %v918_v36 }
 0x10d   :  { %v1006_v46 = vpop.permute.xlu0 %1005 }
 0x110   :  { %1260 = vperm.xlu1 %4999, %v5017_v8  }
 0x111   :  { %1181 = vrot.lane.b32.xlu0 %v5588_v11, %s9720_s28 }
 0x112   :  { %v927_v41 = vpop.permute.xlu1 %926 }
 0x113   :  { %4704 = vpush %v927_v41  ;;  %v250_v41 = vld [vmem:[%s5501_s14 + $0x10] sm:$0xff] }
 0x114   :  { %4706 = vpush %v940_v39  ;;  %v205_v39 = vld [vmem:[%s5361_s17 + $0x10] sm:$0xff] }
 0x115   :  { %v1028_v48 = vpop.permute.xlu0 %1027  ;;  %2943 = vmatpush.msrb.mxu0 %v205_v39 }
 0x118   :  { %5001 = vset.pattern.permute.xlu1 %v9757_v4 }
 0x119   :  { %1212 = vrot.lane.b32.xlu0 %v5604_v13, %s9718_s8  ;;  %1316 = vperm.xlu1 %5001, %v5017_v8  }
 0x11a   :  { %v949_v43 = vpop.permute.xlu1 %948 }
 0x11b   :  { %4708 = vpush %v949_v43  ;;  %v204_v43 = vld [vmem:[%s5361_s17 + $0x8] sm:$0xff] }
 0x11c   :  { %4710 = vpush %v962_v42  ;;  %2944 = vmatpush.msrb.mxu0 %v204_v43 }
 0x11d   :  { %v1050_v51 = vpop.permute.xlu0 %1049 }
 0x121   :  { %1250 = vperm.xlu0 %4998, %v5016_v38   ;;  %5002 = vset.pattern.permute.xlu1 %v9755_v2  ;;  %v251_v38 = vld [vmem:[%s5501_s14 + $0x18] sm:$0xff] }
 0x122   :  { %v971_v45 = vpop.permute.xlu1 %970  ;;  %380 = vmatpush.msra.mxu1 %v251_v38 }
 0x123   :  { %4712 = vpush %v971_v45 }
 0x124   :  { %4714 = vpush %v984_v44  ;;  %381 = vmatpush.msra.mxu1 %v250_v41 }
 0x12a   :  { %v993_v47 = vpop.permute.xlu1 %992 }
 0x12b   :  { %4716 = vpush %v993_v47 }
 0x12c   :  { %4718 = vpush %v1006_v46 }
 0x132   :  { %v1015_v49 = vpop.permute.xlu1 %1014 }
 0x133   :  { %4720 = vpush %v1015_v49 }
 0x134   :  { %4722 = vpush %v1028_v48 }
 0x13a   :  { %v1037_v50 = vpop.permute.xlu1 %1036 }
 0x13b   :  { %4724 = vpush %v1037_v50 }
 0x13c   :  { %4726 = vpush %v1050_v51  ;;  %v1204_v51 = vpop.permute.xlu2 %1203 }
 0x142   :  { %v1059_v35 = vpop.permute.xlu1 %1058 }
 0x143   :  { %4728 = vpush %v1059_v35 }
 0x144   :  { %v1235_v57 = vpop.permute.xlu2 %1234 }
 0x148   :  { %v296_v52 = vpop.xlane.xlu0 %295 }
 0x149   :  { %v297_v53 = vmul.f32 %v296_v52, %v5626_v20  ;;  %v268_v20 = vld [vmem:[%s5516_s24] sm:$0x3] }
 0x14a   :  { %v545_v22 = vmul.f32 1.442695, %v268_v20 }
 0x14b   :  { %v298_v54 = vadd.f32 1e-05, %v297_v53 }
 0x14d   :  { %5036 = vrsqrt.f32 %v298_v54  ;;  %vm306_vm2 = vcmp.eq.f32.partialorder %v298_v54, inf  ;;  %v309_v0 = vand.u32 2147483648, %v298_v54  ;;  %vm308_vm3 = vcmp.eq.f32.partialorder %v298_v54, 0.0 }
 0x153   :  { %v5037_v55 = vpop.eup %5036 }
 0x154   :  { %v300_v58 = vmul.f32 %v5037_v55, %v298_v54 }
 0x156   :  { %v301_v59 = vmul.f32 %v5037_v55, %v300_v58 }
 0x158   :  { %v302_v60 = vmul.f32 0.5, %v301_v59  ;;  %v5731_v59 = vpop.permute.xlu2 %1308 }
 0x15a   :  { %v303_v61 = vsub.f32 1.5, %v302_v60 }
 0x15b   :  { %v1072_v11 = vpop.permute.xlu0 %1071 }
 0x15c   :  { %v304_v62 = vmul.f32 %v5037_v55, %v303_v61  ;;  %4730 = vpush %v1072_v11  ;;  %v203_v55 = vld [vmem:[%s5361_s17] sm:$0xff]  ;;  %s9996_s17 = sld [smem:[#allocation28_spill]] }
 0x15d   :  { %2945 = vmatpush.msrb.mxu0 %v203_v55 }
 0x15e   :  { %v305_v63 = vmul.f32 %v304_v62, %v298_v54 }
 0x160   :  { %v307_v1 = vsel %vm306_vm2, %v298_v54, %v305_v63  ;;  %v249_v54 = vld [vmem:[%s5501_s14 + $0x8] sm:$0xff]  ;;  %s4689_s14 = spop %4688 }
 0x161   :  { %v5694_v3 = vsel %vm308_vm3, %v309_v0, %v307_v1  ;;  %382 = vmatpush.msra.mxu1 %v249_v54  ;;  %s4691_s19 = spop %4690 }
 0x162   :  { %9992 = vst [vmem:[#allocation41_spill] sm:$0xff] %v5694_v3  ;;  %5038 = vrcp.f32 %v5694_v3  ;;  %v322_v10 = vand.u32 2147483648, %v5694_v3  ;;  %v320_v14 = vand.u32 2147483647, %v5694_v3  ;;  %vm316_vm5 = vweird.f32 %v5694_v3  ;;  %v5020_v38 = vld [vmem:[%s9996_s17] ss:$0 sm:$0xff]  ;;  %s4693_s24 = spop %4692 }
 0x163   :  { %5040 = vpow2.f32 %v545_v22  ;;  %v1094_v27 = vpop.permute.xlu0 %1093  ;;  %383 = vmatpush.msra.mxu1 %v248_v56  ;;  %v234_v22 = vld [vmem:[%s5461_s27 + $0x8] sm:$0xff] }
 0x164   :  { %v323_v16 = vor.u32 1.1754944e-38, %v322_v10  ;;  %vm321_vm7 = vcmp.eq.f32.partialorder %v320_v14, 8.507059e+37 }
 0x165   :  { %4345 = vmatpush.msrb.mxu1 %v234_v22 }
 0x168   :  { %v5039_v5 = vpop.eup %5038 }
 0x169   :  { %v312_v6 = vmul.f32 %v5039_v5, %v5694_v3  ;;  %vm317_vm4 = vweird.f32 %v5039_v5 }
 0x16a   :  { %vm318_vm6 = vmor %vm316_vm5, %vm317_vm4 }
 0x16b   :  { %v313_v7 = vsub.f32 1.0, %v312_v6  ;;  %v1116_v40 = vpop.permute.xlu0 %1115  ;;  %v5018_v6 = vld [vmem:[%s5346_s5] ss:$0 sm:$0xff]  ;;  %s9994_s5 = sld [smem:[#allocation29_spill]] }
 0x16d   :  { %v314_v13 = vmul.f32 %v5039_v5, %v313_v7 }
 0x16f   :  { %v315_v15 = vadd.f32 %v5039_v5, %v314_v13 }
 0x171   :  { %v319_v17 = vsel %vm318_vm6, %v5039_v5, %v315_v15  ;;  %v245_v35 = vld [vmem:[%s9994_s5] sm:$0x3] }
 0x172   :  { %v324_v18 = vsel %vm321_vm7, %v323_v16, %v319_v17  ;;  %v5019_v17 = vld [vmem:[%s5521_s4] ss:$0 sm:$0xff] }
 0x173   :  { %v325_v19 = vmul.f32 %v324_v18, %v5637_v24  ;;  %v5041_v24 = vpop.eup %5040  ;;  %v1138_v44 = vpop.permute.xlu0 %1137 }
 0x174   :  { %v547_v36 = vsub.f32 0.0, %v5041_v24  ;;  %v265_v24 = vld [vmem:[%s5511_s6 + $0x28] sm:$0xff] }
 0x175   :  { %v331_v26 = vmul.f32 %v5628_v21, %v325_v19  ;;  %v1081_v21 = vpop.permute.xlu1 %1080 }
 0x176   :  { %1401 = vrot.lane.b32.xlu1 %v547_v36, %s9740_s21  ;;  %1388 = vrot.lane.b32.xlu0 %v547_v36, %s9742_s13  ;;  %4732 = vpush %v1081_v21  ;;  %v1466_v45 = vrot.slane %v547_v36, 1  ;;  %v388_v21 = vperm.slane %v245_v35, 1 }
 0x177   :  { %v337_v30 = vadd.f32 %v5639_v25, %v331_v26  ;;  %1375 = vrot.lane.b32.xlu2 %v547_v36, %s9744_s0  ;;  %4734 = vpush %v1094_v27  ;;  %v233_v26 = vld [vmem:[%s5461_s27] sm:$0xff]  ;;  %v267_v27 = vld [vmem:[%s5511_s6 + $0x38] sm:$0xff] }
 0x178   :  { %4346 = vmatpush.msrb.mxu1 %v233_v26  ;;  %426 = vmatpush.msra.mxu2 %v267_v27 }
 0x179   :  { %4671 = vmatmul.msk.f32.vlgmr.msra.gmra.mxu0 %vm9883_vm0, %v337_v30  ;;  %v266_v30 = vld [vmem:[%s5511_s6 + $0x30] sm:$0xff] }
 0x17a   :  { %427 = vmatpush.msra.mxu2 %v266_v30 }
 0x17b   :  { %v1160_v47 = vpop.permute.xlu0 %1159 }
 0x17c   :  { %428 = vmatpush.msra.mxu2 %v265_v24 }
 0x17d   :  { %v1103_v42 = vpop.permute.xlu1 %1102 }
 0x17e   :  { %1440 = vrot.lane.b32.xlu1 %v547_v36, %s9732_s30  ;;  %1427 = vrot.lane.b32.xlu0 %v547_v36, %s9736_s3  ;;  %4736 = vpush %v1103_v42 }
 0x17f   :  { %1414 = vrot.lane.b32.xlu2 %v547_v36, %s9738_s29  ;;  %4738 = vpush %v1116_v40  ;;  %v263_v40 = vld [vmem:[%s5511_s6 + $0x18] sm:$0xff] }
 0x183   :  { %v1182_v49 = vpop.permute.xlu0 %1181 }
 0x185   :  { %v1125_v46 = vpop.permute.xlu1 %1124 }
 0x186   :  { %1491 = vrot.lane.b32.xlu1 %v1466_v45, %s9742_s13  ;;  %1478 = vrot.lane.b32.xlu0 %v1466_v45, %s9744_s0  ;;  %4740 = vpush %v1125_v46  ;;  %v261_v46 = vld [vmem:[%s5511_s6 + $0x8] sm:$0xff] }
 0x187   :  { %1453 = vrot.lane.b32.xlu2 %v547_v36, %s9730_s12  ;;  %4742 = vpush %v1138_v44  ;;  %v262_v44 = vld [vmem:[%s5511_s6 + $0x10] sm:$0xff] }
 0x18b   :  { %v1213_v53 = vpop.permute.xlu0 %1212 }
 0x18d   :  { %v1147_v48 = vpop.permute.xlu1 %1146 }
 0x18e   :  { %1530 = vrot.lane.b32.xlu1 %v1466_v45, %s9736_s3  ;;  %1517 = vrot.lane.b32.xlu0 %v1466_v45, %s9738_s29  ;;  %4744 = vpush %v1147_v48  ;;  %v260_v48 = vld [vmem:[%s5511_s6] sm:$0xff] }
 0x18f   :  { %1504 = vrot.lane.b32.xlu2 %v1466_v45, %s9740_s21  ;;  %4746 = vpush %v1160_v47 }
 0x193   :  { %v5735_v61 = vpop.permute.xlu0 %1250 }
 0x195   :  { %v1169_v50 = vpop.permute.xlu1 %1168 }
 0x196   :  { %1556 = vrot.lane.b32.xlu0 %v1466_v45, %s9730_s12  ;;  %4748 = vpush %v1169_v50  ;;  %2379 = vperm.xlu1 %5002, %v5019_v17  }
 0x197   :  { %1543 = vrot.lane.b32.xlu2 %v1466_v45, %s9732_s30  ;;  %4750 = vpush %v1182_v49  ;;  %s10015_s30 = sld [smem:[#allocation14_spill]] }
 0x19d   :  { %v1191_v52 = vpop.permute.xlu1 %1190 }
 0x19e   :  { %4752 = vpush %v1191_v52 }
 0x19f   :  { %4754 = vpush %v1204_v51 }
 0x1a0   :  { %4756 = vpush %v1213_v53 }
 0x1a5   :  { %v1226_v58 = vpop.permute.xlu1 %1225 }
 0x1a6   :  { %4758 = vpush %v1226_v58 }
 0x1a7   :  { %4760 = vpush %v1235_v57 }
 0x1a8   :  { %4762 = vpush %v547_v36  ;;  %v264_v36 = vld [vmem:[%s5511_s6 + $0x20] sm:$0xff]  ;;  %s5823_s6 = spop %4694 }
 0x1a9   :  { %429 = vmatpush.msra.mxu2 %v264_v36  ;;  %s5833_s27 = spop %4696 }
 0x1aa   :  { %s5841_s2 = spop %4698 }
 0x1ab   :  { %430 = vmatpush.msra.mxu2 %v263_v40  ;;  %s5851_s7 = spop %4700 }
 0x1ac   :  { %s5856_s10 = spop %4702 }
 0x1ad   :  { %v5733_v60 = vpop.permute.xlu1 %1260  ;;  %431 = vmatpush.msra.mxu2 %v262_v44  ;;  %s5861_s5 = spop %4704 }
 0x1ae   :  { %s5866_s9 = spop %4706 }
 0x1af   :  { %432 = vmatpush.msra.mxu2 %v261_v46  ;;  %s5873_s17 = spop %4708 }
 0x1b1   :  { %433 = vmatpush.msra.mxu2 %v260_v48 }
 0x1b5   :  { %v5737_v62 = vpop.permute.xlu1 %1316 }
 0x1d1   :  { %v1376_v63 = vpop.permute.xlu2 %1375 }
 0x1d2   :  { %4764 = vpush %v1376_v63  ;;  %v5775_v63 = vstv %s4687_s25  ;;  %s5886_s25 = spop %4710 }
 0x1d9   :  { %v1415_v5 = vpop.permute.xlu2 %1414 }
 0x1e1   :  { %v1454_v13 = vpop.permute.xlu2 %1453 }
 0x1e8   :  { %v1389_v0 = vpop.permute.xlu0 %1388  ;;  %v1402_v1 = vpop.permute.xlu1 %1401 }
 0x1e9   :  { %4766 = vpush %v1389_v0  ;;  %v1505_v15 = vpop.permute.xlu2 %1504  ;;  %v5777_v0 = vstv %s4689_s14  ;;  %s5890_s14 = spop %4712 }
 0x1ea   :  { %4768 = vpush %v1402_v1 }
 0x1eb   :  { %4770 = vpush %v1415_v5 }
 0x1f0   :  { %v1428_v10 = vpop.permute.xlu0 %1427  ;;  %v1441_v11 = vpop.permute.xlu1 %1440 }
 0x1f1   :  { %4772 = vpush %v1428_v10  ;;  %v1544_v19 = vpop.permute.xlu2 %1543  ;;  %v5779_v10 = vstv %s4691_s19  ;;  %s5904_s19 = spop %4714 }
 0x1f2   :  { %4774 = vpush %v1441_v11  ;;  %v5781_v11 = vstv %s4693_s24  ;;  %s5907_s24 = spop %4716 }
 0x1f3   :  { %4776 = vpush %v1454_v13 }
 0x1f4   :  { %4778 = vpush %v1466_v45 }
 0x1f6   :  { %v361_v7 = vpop.f32.mrf.mxu0 }
 0x1f7   :  { %v5740_v8 = vadd.f32 %v5018_v6, %v361_v7 }
 0x1f8   :  { %v1479_v14 = vpop.permute.xlu0 %1478  ;;  %v1492_v16 = vpop.permute.xlu1 %1491 }
 0x1f9   :  { %9993 = vst [vmem:[#allocation42_spill] sm:$0xff] %v5740_v8  ;;  %548 = vxpose.xlu2.b32.start.end [1/1] (short) (narrow) %v5740_v8, 32  ;;  %4672 = vmatmul.msk.f32.vlgmr.msra.gmra.mxu1 %vm9875_vm8, %v5740_v8 }
 0x1fa   :  { %4677 = vmatmul.msk.f32.vlgmr.msrb.gmra.mxu0 %vm9875_vm8, %v5740_v8  ;;  %4780 = vpush %v1479_v14 }
 0x1fb   :  { %4782 = vpush %v1492_v16 }
 0x1fc   :  { %4784 = vpush %v1505_v15 }
 0x200   :  { %v1518_v18 = vpop.permute.xlu0 %1517  ;;  %v1531_v20 = vpop.permute.xlu1 %1530 }
 0x201   :  { %4786 = vpush %v1518_v18 }
 0x202   :  { %4788 = vpush %v1531_v20 }
 0x203   :  { %4790 = vpush %v1544_v19 }
 0x276   :  { %v5757_v39 = vpop.f32.mrf.mxu1 }
 0x277   :  { %9997 = vst [vmem:[#allocation43_spill] sm:$0xff] %v5757_v39  ;;  %v389_v41 = vmul.f32 %v388_v21, %v5757_v39  ;;  %v2947_v42 = vpop.f32.mrf.mxu0 }
 0x278   :  { %v5761_v43 = vadd.f32 %v5021_v37, %v2947_v42 }
 0x279   :  { %v393_v45 = vadd.f32 %v5020_v38, %v389_v41 }
 0x27a   :  { %9998 = vst [vmem:[#allocation44_spill] sm:$0xff] %v5761_v43  ;;  %2953 = vxpose.xlu2.b32.start.end [1/1] (short) (narrow) %v5761_v43, 16  ;;  %4678 = vmatmul.msk.f32.vlgmr.msrb.gmra.mxu1 %vm9883_vm0, %v5761_v43 }
 0x27b   :  { %v394_v47 = vsub.f32 0.0, %v393_v45 }
 0x27d   :  { %v395_v49 = vmul.f32 1.442695, %v394_v47 }
 0x27f   :  { %5042 = vpow2.f32 %v395_v49 }
 0x285   :  { %v5043_v50 = vpop.eup %5042 }
 0x286   :  { %v397_v51 = vadd.f32 1.0, %v5043_v50 }
 0x288   :  { %5044 = vrcp.f32 %v397_v51  ;;  %v409_v58 = vand.u32 2147483648, %v397_v51  ;;  %v407_v7 = vand.u32 2147483647, %v397_v51  ;;  %vm403_vm11 = vweird.f32 %v397_v51 }
 0x28a   :  { %v410_v16 = vor.u32 1.1754944e-38, %v409_v58  ;;  %vm408_vm13 = vcmp.eq.f32.partialorder %v407_v7, 8.507059e+37 }
 0x28e   :  { %v5045_v52 = vpop.eup %5044 }
 0x28f   :  { %v399_v53 = vmul.f32 %v5045_v52, %v397_v51  ;;  %vm404_vm10 = vweird.f32 %v5045_v52 }
 0x290   :  { %vm405_vm12 = vmor %vm403_vm11, %vm404_vm10 }
 0x291   :  { %v400_v54 = vsub.f32 1.0, %v399_v53 }
 0x292   :  { %v5769_v55 = vpop.trf.xlu2 }
 0x293   :  { %9999 = vst [vmem:[#allocation45_spill] sm:$0xff] %v5769_v55  ;;  %v586_v56 = vmul.f32 %v5668_v34, %v5769_v55  ;;  %v733_v57 = vmul.f32 %v5658_v31, %v5769_v55  ;;  %v401_v1 = vmul.f32 %v5045_v52, %v400_v54 }
 0x295   :  { %v603_v5 = vrot.slane %v586_v56, 7  ;;  %v749_v6 = vrot.slane %v733_v57, 7  ;;  %v402_v13 = vadd.f32 %v5045_v52, %v401_v1  ;;  %v631_v18 = vmul.f32 %v5777_v0, %v586_v56  ;;  %v1557_v1 = vpop.permute.xlu0 %1556 }
 0x296   :  { %v779_v20 = vmul.f32 %v5781_v11, %v733_v57  ;;  %4792 = vpush %v1557_v1 }
 0x297   :  { %v614_v14 = vsel %vm602_vm9, 0.0, %v603_v5  ;;  %v760_v15 = vsel %vm602_vm9, 0.0, %v749_v6  ;;  %v406_v22 = vsel %vm405_vm12, %v5045_v52, %v402_v13 }
 0x298   :  { %v619_v17 = vmul.f32 %v5775_v63, %v614_v14  ;;  %v766_v19 = vmul.f32 %v5779_v10, %v760_v15  ;;  %v411_v35 = vsel %vm408_vm13, %v410_v16, %v406_v22 }
 0x299   :  { %v5801_v38 = vmul.f32 %v411_v35, %v393_v45 }
 0x29a   :  { %v635_v26 = vadd.f32 %v631_v18, %v619_v17  ;;  %v783_v27 = vadd.f32 %v779_v20, %v766_v19  ;;  %v5789_v30 = vpop.trf.xlu2 }
 0x29b   :  { %10000 = vst [vmem:[#allocation46_spill] sm:$0xff] %v5789_v30  ;;  %v587_v24 = vmul.f32 %v5668_v34, %v5789_v30  ;;  %v734_v36 = vmul.f32 %v5658_v31, %v5789_v30  ;;  %4673 = vmatmul.msk.f32.vlgmr.msra.gmra.mxu2 %vm9884_vm14, %v5801_v38 }
 0x29c   :  { %v5796_v21 = vadd.f32 %v5650_v29, %v635_v26  ;;  %v5799_v37 = vadd.f32 %v5660_v32, %v783_v27  ;;  %10001 = vst [vmem:[#allocation47_spill] sm:$0xff] %v5801_v38 }
 0x29d   :  { %v604_v40 = vrot.slane %v587_v24, 7  ;;  %v750_v41 = vrot.slane %v734_v36, 7  ;;  %v632_v47 = vmul.f32 %v5777_v0, %v587_v24  ;;  %v780_v49 = vmul.f32 %v5781_v11, %v734_v36 }
 0x29e   :  { %v649_v42 = vsub.f32 0.0, %v5796_v21  ;;  %v795_v44 = vsub.f32 0.0, %v5799_v37 }
 0x29f   :  { %v605_v46 = vsel %vm602_vm9, %v603_v5, %v604_v40  ;;  %v751_v48 = vsel %vm602_vm9, %v749_v6, %v750_v41 }
 0x2a0   :  { %v653_v50 = vmul.f32 1.442695, %v649_v42  ;;  %v799_v45 = vmul.f32 1.442695, %v795_v44  ;;  %v620_v51 = vmul.f32 %v5775_v63, %v605_v46  ;;  %v767_v52 = vmul.f32 %v5779_v10, %v751_v48 }
 0x2a2   :  { %5046 = vpow2.f32 %v653_v50  ;;  %v636_v53 = vadd.f32 %v632_v47, %v620_v51  ;;  %v784_v54 = vadd.f32 %v780_v49, %v767_v52  ;;  %v5813_v56 = vpop.trf.xlu2 }
 0x2a3   :  { %10002 = vst [vmem:[#allocation48_spill] sm:$0xff] %v5813_v56  ;;  %5048 = vpow2.f32 %v799_v45  ;;  %v5817_v57 = vmul.f32 %v5668_v34, %v5813_v56  ;;  %v5821_v58 = vmul.f32 %v5658_v31, %v5813_v56 }
 0x2a4   :  { %v5826_v5 = vadd.f32 %v5650_v29, %v636_v53  ;;  %v5829_v6 = vadd.f32 %v5660_v32, %v784_v54 }
 0x2a5   :  { %v606_v7 = vrot.slane %v5817_v57, 7  ;;  %v752_v13 = vrot.slane %v5821_v58, 7  ;;  %v633_v22 = vmul.f32 %v5777_v0, %v5817_v57  ;;  %v781_v36 = vmul.f32 %v5781_v11, %v5821_v58 }
 0x2a6   :  { %v650_v14 = vsub.f32 0.0, %v5826_v5  ;;  %v796_v15 = vsub.f32 0.0, %v5829_v6  ;;  %v5884_v57 = vstv %s5823_s6  ;;  %s5917_s6 = spop %4718 }
 0x2a7   :  { %v607_v16 = vsel %vm602_vm9, %v604_v40, %v606_v7  ;;  %v753_v17 = vsel %vm602_vm9, %v750_v41, %v752_v13  ;;  %s5922_s8 = spop %4720 }
 0x2a8   :  { %v5047_v18 = vpop.eup %5046  ;;  %v655_v19 = vmul.f32 1.442695, %v650_v14  ;;  %v621_v20 = vmul.f32 %v5775_v63, %v607_v16  ;;  %v768_v26 = vmul.f32 %v5779_v10, %v753_v17  ;;  %v801_v24 = vmul.f32 1.442695, %v796_v15  ;;  %s5937_s28 = spop %4722 }
 0x2a9   :  { %v5049_v27 = vpop.eup %5048  ;;  %v5847_v35 = vadd.f32 1.0, %v5047_v18  ;;  %s5952_s22 = spop %4724 }
 0x2aa   :  { %v5853_v40 = vadd.f32 1.0, %v5049_v27  ;;  %5050 = vpow2.f32 %v655_v19  ;;  %v637_v41 = vadd.f32 %v633_v22, %v621_v20  ;;  %v785_v42 = vadd.f32 %v781_v36, %v768_v26  ;;  %v5859_v44 = vpop.trf.xlu2  ;;  %s5977_s23 = spop %4726 }
 0x2ab   :  { %5052 = vrcp.f32 %v5847_v35  ;;  %10003 = vst [vmem:[#allocation49_spill] sm:$0xff] %v5859_v44  ;;  %v589_v48 = vmul.f32 %v5668_v34, %v5859_v44  ;;  %vm670_vm15 = vweird.f32 %v5847_v35  ;;  %v674_v15 = vand.u32 2147483647, %v5847_v35  ;;  %s5981_s18 = spop %4728 }
 0x2ac   :  { %5054 = vrcp.f32 %v5853_v40  ;;  %v5864_v46 = vadd.f32 %v5650_v29, %v637_v41  ;;  %v5869_v47 = vadd.f32 %v5660_v32, %v785_v42  ;;  %v676_v18 = vand.u32 2147483648, %v5847_v35  ;;  %s5992_s16 = spop %4730 }
 0x2ad   :  { %5056 = vpow2.f32 %v801_v24  ;;  %v608_v53 = vrot.slane %v589_v48, 7  ;;  %v5902_v20 = vmul.f32 %v5658_v31, %v5859_v44  ;;  %vm816_vm1 = vweird.f32 %v5853_v40  ;;  %s6003_s12 = spop %4732 }
 0x2ae   :  { %v651_v50 = vsub.f32 0.0, %v5864_v46  ;;  %v797_v52 = vsub.f32 0.0, %v5869_v47  ;;  %v820_v36 = vand.u32 2147483647, %v5853_v40  ;;  %v822_v41 = vand.u32 2147483648, %v5853_v40  ;;  %s6017_s15 = spop %4734 }
 0x2af   :  { %v609_v27 = vsel %vm602_vm9, %v606_v7, %v608_v53  ;;  %vm5928_vm4 = vcmp.eq.f32.partialorder %v674_v15, 8.507059e+37  ;;  %v6024_v15 = vld [vmem:[%s10015_s30] sm:$0x3]  ;;  %v6283_v3 = vstv %s5977_s23  ;;  %s9887_s23 = smov 16  }
 0x2b0   :  { %v5051_v49 = vpop.eup %5050  ;;  %v657_v1 = vmul.f32 1.442695, %v651_v50  ;;  %v803_v26 = vmul.f32 1.442695, %v797_v52  ;;  %v622_v50 = vmul.f32 %v5775_v63, %v609_v27  ;;  %vm5932_vm5 = vcmp.eq.f32.partialorder %v820_v36, 8.507059e+37  ;;  %10018 = vst [vmem:[#allocation53_spill] sm:$0xff] %v6024_v15  ;;  %3091 = vrot.lane.b32.xlu0 %v6024_v15, %s9744_s0 }
 0x2b1   :  { %v5876_v45 = vpop.eup %5052  ;;  %v5878_v51 = vadd.f32 1.0, %v5051_v49  ;;  %10049 = vst [vmem:[#allocation82_spill] sm:$0xff] %v6283_v3 }
 0x2b2   :  { %v5881_v54 = vpop.eup %5054  ;;  %v666_v34 = vmul.f32 %v5876_v45, %v5847_v35  ;;  %vm671_vm2 = vweird.f32 %v5876_v45 }
 0x2b3   :  { %v5057_v14 = vpop.eup %5056  ;;  %v812_v16 = vmul.f32 %v5881_v54, %v5853_v40  ;;  %5058 = vrcp.f32 %v5878_v51  ;;  %v689_v42 = vand.u32 2147483647, %v5878_v51  ;;  %v691_v49 = vand.u32 2147483648, %v5878_v51  ;;  %vm5943_vm6 = vmor %vm670_vm15, %vm671_vm2 }
 0x2b4   :  { %v667_v17 = vsub.f32 1.0, %v666_v34  ;;  %v5898_v19 = vadd.f32 1.0, %v5057_v14  ;;  %5060 = vpow2.f32 %v657_v1  ;;  %vm817_vm3 = vweird.f32 %v5881_v54 }
 0x2b5   :  { %v813_v22 = vsub.f32 1.0, %v812_v16  ;;  %v634_v34 = vmul.f32 %v5777_v0, %v589_v48  ;;  %v754_v1 = vrot.slane %v5902_v20, 7  ;;  %v677_v16 = vor.u32 1.1754944e-38, %v676_v18  ;;  %vm5961_vm11 = vmor %vm816_vm1, %vm817_vm3 }
 0x2b6   :  { %v668_v24 = vmul.f32 %v5876_v45, %v667_v17  ;;  %5062 = vrcp.f32 %v5898_v19  ;;  %v823_v48 = vor.u32 1.1754944e-38, %v822_v41  ;;  %vm685_vm7 = vweird.f32 %v5878_v51 }
 0x2b7   :  { %v814_v31 = vmul.f32 %v5881_v54, %v813_v22  ;;  %5064 = vpow2.f32 %v803_v26  ;;  %vm5948_vm10 = vcmp.eq.f32.partialorder %v689_v42, 8.507059e+37  ;;  %v638_v18 = vadd.f32 %v634_v34, %v622_v50 }
 0x2b8   :  { %v669_v7 = vadd.f32 %v5876_v45, %v668_v24  ;;  %v692_v36 = vor.u32 1.1754944e-38, %v691_v49  ;;  %v755_v40 = vsel %vm602_vm9, %v752_v13, %v754_v1  ;;  %v835_v49 = vand.u32 2147483647, %v5898_v19 }
 0x2b9   :  { %v5059_v52 = vpop.eup %5058  ;;  %v815_v53 = vadd.f32 %v5881_v54, %v814_v31  ;;  %v837_v1 = vand.u32 2147483648, %v5898_v19  ;;  %vm831_vm1 = vweird.f32 %v5898_v19 }
 0x2ba   :  { %v681_v63 = vmul.f32 %v5059_v52, %v5878_v51  ;;  %v5061_v22 = vpop.eup %5060  ;;  %v673_v27 = vsel %vm5943_vm6, %v5876_v45, %v669_v7  ;;  %v5972_v45 = vadd.f32 %v5650_v29, %v638_v18  ;;  %vm686_vm12 = vweird.f32 %v5059_v52 }
 0x2bb   :  { %v5965_v31 = vadd.f32 1.0, %v5061_v22  ;;  %v819_v41 = vsel %vm5961_vm11, %v5881_v54, %v815_v53  ;;  %v678_v54 = vsel %vm5928_vm4, %v677_v16, %v673_v27  ;;  %vm687_vm13 = vmor %vm685_vm7, %vm686_vm12  ;;  %v782_v16 = vmul.f32 %v5781_v11, %v5902_v20 }
 0x2bc   :  { %v5063_v26 = vpop.eup %5062  ;;  %v682_v24 = vsub.f32 1.0, %v681_v63  ;;  %v652_v58 = vsub.f32 0.0, %v5972_v45  ;;  %v824_v13 = vsel %vm5932_vm5, %v823_v48, %v819_v41  ;;  %v769_v63 = vmul.f32 %v5779_v10, %v755_v40 }
 0x2bd   :  { %v827_v42 = vmul.f32 %v5063_v26, %v5898_v19  ;;  %v5065_v7 = vpop.eup %5064  ;;  %5066 = vrcp.f32 %v5965_v31  ;;  %vm832_vm15 = vweird.f32 %v5063_v26  ;;  %v6000_v17 = vmul.f32 %v678_v54, %v5796_v21 }
 0x2be   :  { %v683_v50 = vmul.f32 %v5059_v52, %v682_v24  ;;  %v5985_v53 = vadd.f32 1.0, %v5065_v7  ;;  %v659_v10 = vmul.f32 1.442695, %v652_v58  ;;  %v6006_v51 = vmul.f32 %v824_v13, %v5799_v37  ;;  %vm833_vm2 = vmor %vm831_vm1, %vm832_vm15 }
 0x2bf   :  { %v828_v29 = vsub.f32 1.0, %v827_v42  ;;  %10014 = vst [vmem:[#allocation50_spill] sm:$0xff] %v6000_v17  ;;  %v786_v18 = vadd.f32 %v782_v16, %v769_v63  ;;  %v6011_v11 = vstv %s5833_s27  ;;  %v838_v19 = vor.u32 1.1754944e-38, %v837_v1  ;;  %s6032_s27 = spop %4736 }
 0x2c0   :  { %v684_v34 = vadd.f32 %v5059_v52, %v683_v50  ;;  %5068 = vrcp.f32 %v5985_v53  ;;  %10016 = vst [vmem:[#allocation51_spill] sm:$0xff] %v6006_v51  ;;  %vm836_vm3 = vcmp.eq.f32.partialorder %v835_v49, 8.507059e+37  ;;  %v706_v24 = vand.u32 2147483648, %v5965_v31  ;;  %s6047_s3 = spop %4738 }
 0x2c1   :  { %v829_v14 = vmul.f32 %v5063_v26, %v828_v29  ;;  %5070 = vpow2.f32 %v659_v10  ;;  %v887_v40 = vmul.f32 %v6011_v11, %v6006_v51  ;;  %v704_v7 = vand.u32 2147483647, %v5965_v31  ;;  %s6053_s29 = spop %4740 }
 0x2c2   :  { %v688_v22 = vsel %vm687_vm13, %v5059_v52, %v684_v34  ;;  %v6021_v52 = vadd.f32 %v5660_v32, %v786_v18  ;;  %vm700_vm5 = vweird.f32 %v5965_v31  ;;  %v707_v34 = vor.u32 1.1754944e-38, %v706_v24  ;;  %s6062_s21 = spop %4742 }
 0x2c3   :  { %v693_v0 = vsel %vm5948_vm10, %v692_v36, %v688_v22  ;;  %v830_v48 = vadd.f32 %v5063_v26, %v829_v14  ;;  %v5067_v27 = vpop.eup %5066  ;;  %v879_v36 = vmul.f32 %v5884_v57, %v6000_v17  ;;  %v852_v63 = vand.u32 2147483648, %v5985_v53  ;;  %s6070_s13 = spop %4744 }
 0x2c4   :  { %v6014_v21 = vmul.f32 %v693_v0, %v5826_v5  ;;  %v696_v37 = vmul.f32 %v5067_v27, %v5965_v31  ;;  %v9759_v5 = vrot.slane %v6024_v15, 1  ;;  %v798_v42 = vsub.f32 0.0, %v6021_v52 }
 0x2c5   :  { %v834_v20 = vsel %vm833_vm2, %v5063_v26, %v830_v48  ;;  %vm701_vm4 = vweird.f32 %v5067_v27  ;;  %v891_v29 = vadd.f32 %v887_v40, %v879_v36  ;;  %v850_v0 = vand.u32 2147483647, %v5985_v53 }
 0x2c6   :  { %10017 = vst [vmem:[#allocation52_spill] sm:$0xff] %v6014_v21  ;;  %v839_v35 = vsel %vm836_vm3, %v838_v19, %v834_v20  ;;  %v5069_v26 = vpop.eup %5068  ;;  %v697_v32 = vsub.f32 1.0, %v696_v37  ;;  %3100 = vrot.lane.b32.xlu1 %v9759_v5, %s9744_s0  ;;  %v880_v49 = vmul.f32 %v5884_v57, %v6014_v21  ;;  %v805_v54 = vmul.f32 1.442695, %v798_v42  ;;  %vm702_vm6 = vmor %vm700_vm5, %vm701_vm4  ;;  %s6078_s0 = spop %4746 }
 0x2c7   :  { %v6035_v41 = vmul.f32 %v839_v35, %v5829_v6  ;;  %v842_v50 = vmul.f32 %v5069_v26, %v5985_v53  ;;  %v5071_v13 = vpop.eup %5070  ;;  %v1253_v22 = vmul.f32 %v5735_v61, %v891_v29  ;;  %vm847_vm7 = vweird.f32 %v5069_v26  ;;  %s6091_s1 = spop %4748 }
 0x2c8   :  { %v698_v6 = vmul.f32 %v5067_v27, %v697_v32  ;;  %v6055_v16 = vadd.f32 1.0, %v5071_v13  ;;  %5072 = vpow2.f32 %v805_v54  ;;  %vm705_vm10 = vcmp.eq.f32.partialorder %v704_v7, 8.507059e+37  ;;  %s6099_s20 = spop %4750 }
 0x2c9   :  { %10019 = vst [vmem:[#allocation54_spill] sm:$0xff] %v6035_v41  ;;  %v888_v58 = vmul.f32 %v6011_v11, %v6035_v41  ;;  %v843_v1 = vsub.f32 1.0, %v842_v50  ;;  %v1311_v18 = vmul.f32 %v5731_v59, %v891_v29  ;;  %vm846_vm11 = vweird.f32 %v5985_v53  ;;  %s6103_s11 = spop %4752 }
 0x2ca   :  { %v699_v14 = vadd.f32 %v5067_v27, %v698_v6  ;;  %5074 = vrcp.f32 %v6055_v16  ;;  %v6068_v37 = vadd.f32 %v5733_v60, %v1253_v22  ;;  %vm848_vm12 = vmor %vm846_vm11, %vm847_vm7  ;;  %v853_v35 = vor.u32 1.1754944e-38, %v852_v63  ;;  %10022 = sst [smem:[#allocation57_spill]] %s6103_s11  ;;  %s6106_s26 = spop %4754 }
 0x2cb   :  { %v844_v10 = vmul.f32 %v5069_v26, %v843_v1  ;;  %v6060_v48 = vadd.f32 %v888_v58, %v880_v49  ;;  %vm851_vm13 = vcmp.eq.f32.partialorder %v850_v0, 8.507059e+37  ;;  %v6084_v7 = vadd.f32 %v5737_v62, %v1311_v18  ;;  %10023 = sst [smem:[#allocation58_spill]] %s6106_s26  ;;  %s6109_s4 = spop %4756 }
 0x2cc   :  { %v703_v31 = vsel %vm702_vm6, %v5067_v27, %v699_v14  ;;  %v1271_v32 = vand.u32 2147483647, %v6068_v37  ;;  %v721_v14 = vand.u32 2147483648, %v6055_v16  ;;  %v719_v18 = vand.u32 2147483647, %v6055_v16  ;;  %10024 = sst [smem:[#allocation59_spill]] %s6109_s4  ;;  %s6113_s30 = spop %4758 }
 0x2cd   :  { %v708_v19 = vsel %vm705_vm10, %v707_v34, %v703_v31  ;;  %v845_v20 = vadd.f32 %v5069_v26, %v844_v10  ;;  %v1254_v24 = vmul.f32 %v5735_v61, %v6060_v48  ;;  %v1327_v54 = vand.u32 2147483647, %v6084_v7  ;;  %10025 = sst [smem:[#allocation60_spill]] %s6113_s30  ;;  %s6122_s26 = spop %4760 }
 0x2ce   :  { %v6075_v27 = vmul.f32 %v708_v19, %v5864_v46  ;;  %v5073_v42 = vpop.eup %5072  ;;  %v1275_v46 = vsub.f32 0.0, %v1271_v32  ;;  %vm715_vm1 = vweird.f32 %v6055_v16  ;;  %vm720_vm3 = vcmp.eq.f32.partialorder %v719_v18, 8.507059e+37  ;;  %10026 = sst [smem:[#allocation61_spill]] %s6122_s26  ;;  %s6125_s4 = spop %4762 }
 0x2cf   :  { %v849_v36 = vsel %vm848_vm12, %v5069_v26, %v845_v20  ;;  %v6081_v40 = vadd.f32 %v5733_v60, %v1254_v24  ;;  %v6089_v49 = vadd.f32 1.0, %v5073_v42  ;;  %v1331_v1 = vsub.f32 0.0, %v1327_v54 }
 0x2d0   :  { %10020 = vst [vmem:[#allocation55_spill] sm:$0xff] %v6075_v27  ;;  %v854_v53 = vsel %vm851_vm13, %v853_v35, %v849_v36  ;;  %v5075_v26 = vpop.eup %5074  ;;  %v881_v58 = vmul.f32 %v5884_v57, %v6075_v27  ;;  %v722_v36 = vor.u32 1.1754944e-38, %v721_v14  ;;  %v6286_v25 = vstv %s6125_s4 }
 0x2d1   :  { %v6087_v50 = vmul.f32 %v854_v53, %v5869_v47  ;;  %v1272_v6 = vand.u32 2147483647, %v6081_v40  ;;  %v711_v29 = vmul.f32 %v5075_v26, %v6055_v16  ;;  %5076 = vrcp.f32 %v6089_v49  ;;  %10050 = vst [vmem:[#allocation83_spill] sm:$0xff] %v6286_v25 }
 0x2d2   :  { %v1279_v47 = vmul.f32 1.442695, %v1275_v46  ;;  %vm716_vm15 = vweird.f32 %v5075_v26  ;;  %v1335_v0 = vmul.f32 1.442695, %v1331_v1  ;;  %v6117_v53 = vstv %s5917_s6 }
 0x2d3   :  { %10021 = vst [vmem:[#allocation56_spill] sm:$0xff] %v6087_v50  ;;  %v1276_v13 = vsub.f32 0.0, %v1272_v6  ;;  %v712_v34 = vsub.f32 1.0, %v711_v29  ;;  %v889_v63 = vmul.f32 %v6011_v11, %v6087_v50  ;;  %vm717_vm2 = vmor %vm715_vm1, %vm716_vm15  ;;  %v6120_v6 = vstv %s5922_s8  ;;  %s6134_s8 = spop %4764 }
 0x2d4   :  { %5078 = vpow2.f32 %v1279_v47  ;;  %v867_v54 = vand.u32 2147483648, %v6089_v49  ;;  %v865_v47 = vand.u32 2147483647, %v6089_v49  ;;  %vm861_vm5 = vweird.f32 %v6089_v49  ;;  %s6141_s6 = spop %4766 }
 0x2d5   :  { %v1281_v22 = vmul.f32 1.442695, %v1276_v13  ;;  %v713_v10 = vmul.f32 %v5075_v26, %v712_v34  ;;  %v893_v31 = vadd.f32 %v889_v63, %v881_v58  ;;  %v1010_v13 = vmul.f32 %v6117_v53, %v6000_v17  ;;  %s4769_s26 = spop %4768 }
 0x2d6   :  { %v868_v18 = vor.u32 1.1754944e-38, %v867_v54  ;;  %vm866_vm7 = vcmp.eq.f32.partialorder %v865_v47, 8.507059e+37  ;;  %s6153_s30 = spop %4770  ;;  %v1011_v30 = vmul.f32 %v6117_v53, %v6014_v21  ;;  %vm9873_vm10 = vcmask 1041408  }
 0x2d7   :  { %5080 = vpow2.f32 %v1281_v22  ;;  %v5077_v19 = vpop.eup %5076  ;;  %v714_v20 = vadd.f32 %v5075_v26, %v713_v10  ;;  %v1255_v32 = vmul.f32 %v5735_v61, %v893_v31  ;;  %s6162_s11 = spop %4772  ;;  %vm441_vm1 = vcmask 15360  }
 0x2d8   :  { %5082 = vpow2.f32 %v1335_v0  ;;  %v857_v35 = vmul.f32 %v5077_v19, %v6089_v49  ;;  %vm862_vm4 = vweird.f32 %v5077_v19  ;;  %v1019_v0 = vmul.f32 %v6120_v6, %v6006_v51 }
 0x2d9   :  { %v718_v24 = vsel %vm717_vm2, %v5075_v26, %v714_v20  ;;  %v6132_v63 = vadd.f32 %v5733_v60, %v1255_v32  ;;  %vm863_vm6 = vmor %vm861_vm5, %vm862_vm4  ;;  %v1312_v49 = vmul.f32 %v5731_v59, %v6060_v48  ;;  %vm4403_vm2 = vcmask 7168  }
 0x2da   :  { %v5079_v42 = vpop.eup %5078  ;;  %v858_v46 = vsub.f32 1.0, %v857_v35  ;;  %v723_v16 = vsel %vm720_vm3, %v722_v36, %v718_v24  ;;  %v6145_v35 = vadd.f32 %v1019_v0, %v1010_v13  ;;  %v6176_v13 = vstv %s5861_s5  ;;  %s9885_s5 = smov 24  }
 0x2db   :  { %v1287_v29 = vadd.f32 1.0, %v5079_v42  ;;  %v6137_v14 = vmul.f32 %v723_v16, %v5972_v45  ;;  %v1273_v24 = vand.u32 2147483647, %v6132_v63  ;;  %v6156_v48 = vadd.f32 %v5737_v62, %v1312_v49  ;;  %10033 = vst [vmem:[#allocation68_spill] sm:$0xff] %v6176_v13 }
 0x2dc   :  { %v859_v26 = vmul.f32 %v5077_v19, %v858_v46  ;;  %10028 = vst [vmem:[#allocation63_spill] sm:$0xff] %v6145_v35  ;;  %v6160_v46 = vstv %s5841_s2  ;;  %v1267_v16 = vmax.f32 %v6068_v37, 0.0  ;;  %s6178_s2 = spop %4774 }
 0x2dd   :  { %v5081_v58 = vpop.eup %5080  ;;  %5084 = vlog2.f32 %v1287_v29  ;;  %10027 = vst [vmem:[#allocation62_spill] sm:$0xff] %v6137_v14  ;;  %v882_v32 = vmul.f32 %v5884_v57, %v6137_v14  ;;  %v6168_v29 = vstv %s5851_s7  ;;  %s10037_s7 = sld [smem:[#allocation22_spill]] }
 0x2de   :  { %v5083_v34 = vpop.eup %5082  ;;  %v1288_v1 = vadd.f32 1.0, %v5081_v58  ;;  %v860_v22 = vadd.f32 %v5077_v19, %v859_v26  ;;  %10030 = vst [vmem:[#allocation65_spill] sm:$0xff] %v6160_v46  ;;  %v6171_v58 = vstv %s5856_s10  ;;  %v6173_v26 = vstv %s4769_s26  ;;  %s6201_s26 = spop %4776 }
 0x2df   :  { %v1343_v10 = vadd.f32 1.0, %v5083_v34  ;;  %10031 = vst [vmem:[#allocation66_spill] sm:$0xff] %v6168_v29  ;;  %s4779_s10 = spop %4778 }
 0x2e0   :  { %5086 = vlog2.f32 %v1288_v1  ;;  %v864_v20 = vsel %vm863_vm6, %v5077_v19, %v860_v22  ;;  %v1313_v19 = vmul.f32 %v5731_v59, %v893_v31  ;;  %10032 = vst [vmem:[#allocation67_spill] sm:$0xff] %v6171_v58  ;;  %v1277_v31 = vsub.f32 0.0, %v1273_v24 }
 0x2e1   :  { %5088 = vlog2.f32 %v1343_v10  ;;  %v869_v45 = vsel %vm866_vm7, %v868_v18, %v864_v20  ;;  %v6183_v1 = vstv %s6134_s8  ;;  %v1268_v22 = vmax.f32 %v6081_v40, 0.0 }
 0x2e2   :  { %v6149_v36 = vmul.f32 %v869_v45, %v6021_v52  ;;  %v1328_v10 = vand.u32 2147483647, %v6156_v48  ;;  %v6188_v0 = vadd.f32 %v5737_v62, %v1313_v19  ;;  %v6191_v18 = vstv %s5866_s9  ;;  %s9917_s9 = smov 8  }
 0x2e3   :  { %v5085_v42 = vpop.eup %5084  ;;  %v6199_v24 = vstv %s5873_s17  ;;  %v6206_v19 = vstv %s5886_s25  ;;  %s6227_s17 = spop %4780  ;;  %vm9955_vm7 = vcmask 64512  }
 0x2e4   :  { %10029 = vst [vmem:[#allocation64_spill] sm:$0xff] %v6149_v36  ;;  %v890_v52 = vmul.f32 %v6011_v11, %v6149_v36  ;;  %v1292_v57 = vmul.f32 0.6931472, %v5085_v42  ;;  %v1283_v42 = vmul.f32 1.442695, %v1277_v31  ;;  %v1332_v31 = vsub.f32 0.0, %v1328_v10  ;;  %s6248_s25 = spop %4782 }
 0x2e5   :  { %10035 = vst [vmem:[#allocation70_spill] sm:$0xff] %v6206_v19  ;;  %v6244_v10 = vstv %s6153_s30  ;;  %s4785_s30 = spop %4784 }
 0x2e6   :  { %v5087_v54 = vpop.eup %5086  ;;  %v894_v34 = vadd.f32 %v890_v52, %v882_v32  ;;  %v6180_v11 = vadd.f32 %v1292_v57, %v1267_v16  ;;  %v6209_v52 = vstv %s5890_s14  ;;  %5090 = vpow2.f32 %v1283_v42  ;;  %s10043_s14 = sld [smem:[#allocation21_spill]]  ;;  %s4787_s4 = spop %4786 }
 0x2e7   :  { %v5089_v47 = vpop.eup %5088  ;;  %v1294_v37 = vmul.f32 0.6931472, %v5087_v54  ;;  %10036 = vst [vmem:[#allocation71_spill] sm:$0xff] %v6209_v52  ;;  %v1323_v54 = vmax.f32 %v6084_v7, 0.0  ;;  %v1337_v2 = vmul.f32 1.442695, %v1332_v31 }
 0x2e8   :  { %10034 = vst [vmem:[#allocation69_spill] sm:$0xff] %v6180_v11  ;;  %v1314_v49 = vmul.f32 %v5731_v59, %v894_v34  ;;  %v1406_v20 = vmul.f32 %v6173_v26, %v6180_v11  ;;  %v1380_v45 = vmul.f32 %v6183_v1, %v6180_v11  ;;  %v1348_v32 = vmul.f32 0.6931472, %v5089_v47 }
 0x2e9   :  { %v6203_v40 = vadd.f32 %v1294_v37, %v1268_v22  ;;  %v1256_v16 = vmul.f32 %v5735_v61, %v894_v34  ;;  %v6222_v47 = vstv %s5904_s19  ;;  %v6225_v37 = vstv %s5907_s24  ;;  %s9913_s19 = smov 48   ;;  %s9911_s24 = smov 32  }
 0x2ea   :  { %v6212_v59 = vadd.f32 %v5737_v62, %v1314_v49  ;;  %1605 = vrot.lane.b32.xlu0 %v1406_v20, %s9885_s5  ;;  %1573 = vrot.lane.b32.xlu1 %v1380_v45, %s9917_s9  ;;  %v1329_v62 = vand.u32 2147483647, %v6188_v0  ;;  %10038 = vst [vmem:[#allocation72_spill] sm:$0xff] %v6222_v47  ;;  %v230_v49 = vld [vmem:[%s10037_s7] sm:$0x3]  ;;  %v6235_v34 = vstv %s6141_s6  ;;  %v6241_v7 = vadd.f32 %v1348_v32, %v1323_v54  ;;  %s9891_s7 = smov 80  }
 0x2eb   :  { %v1381_v57 = vmul.f32 %v6183_v1, %v6203_v40  ;;  %10039 = vst [vmem:[#allocation73_spill] sm:$0xff] %v6225_v37  ;;  %v6232_v61 = vadd.f32 %v5733_v60, %v1256_v16  ;;  %v6238_v20 = vstv %s6178_s2  ;;  %v6246_v45 = vstv %s4779_s10  ;;  %s10059_s2 = sld [smem:[#allocation26_spill]] }
 0x2ec   :  { %v1330_v22 = vand.u32 2147483647, %v6212_v59  ;;  %10040 = vst [vmem:[#allocation74_spill] sm:$0xff] %v6238_v20  ;;  %v6252_v16 = vstv %s6201_s26  ;;  %v4351_v12 = vperm.slane %v230_v49, 1  ;;  %v1333_v4 = vsub.f32 0.0, %v1329_v62  ;;  %v5091_v23 = vpop.eup %5090  ;;  %s9893_s26 = smov 96  }
 0x2ed   :  { %1575 = vrot.lane.b32.xlu2 %v1381_v57, %s9917_s9  ;;  %10041 = vst [vmem:[#allocation75_spill] sm:$0xff] %v6241_v7  ;;  %v1274_v60 = vand.u32 2147483647, %v6232_v61  ;;  %v1445_v32 = vmul.f32 %v6238_v20, %v6180_v11  ;;  %v1419_v42 = vmul.f32 %v6244_v10, %v6180_v11  ;;  %v6264_v31 = vmul.f32 %v6173_v26, %v6203_v40  ;;  %v5022_v43 = vld [vmem:[%s10043_s14] ss:$0 sm:$0xff]  ;;  %s10065_s10 = sld [smem:[#allocation31_spill]] }
 0x2ee   :  { %v1334_v9 = vsub.f32 0.0, %v1330_v22  ;;  %v6260_v22 = vmul.f32 %v6252_v16, %v6203_v40  ;;  %v6272_v62 = vmul.f32 %v6246_v45, %v6241_v7  ;;  %v6275_v49 = vstv %s5937_s28  ;;  %s9907_s28 = smov 56   ;;  %s10262_s14 = sld [smem:[#allocation13_spill]] }
 0x2ef   :  { %v1278_v54 = vsub.f32 0.0, %v1274_v60  ;;  %10044 = vst [vmem:[#allocation77_spill] sm:$0xff] %v6264_v31  ;;  %v6278_v60 = vstv %s5952_s22  ;;  %v1393_v8 = vmul.f32 %v6235_v34, %v6180_v11  ;;  %v6293_v56 = vmul.f32 %v6238_v20, %v6203_v40  ;;  %s4789_s22 = spop %4788 }
 0x2f0   :  { %v1341_v57 = vmul.f32 1.442695, %v1334_v9  ;;  %10042 = vst [vmem:[#allocation76_spill] sm:$0xff] %v6260_v22  ;;  %v6268_v9 = vmul.f32 %v6235_v34, %v6203_v40  ;;  %v6306_v38 = vmul.f32 %v6286_v25, %v6203_v40  ;;  %v1289_v33 = vadd.f32 1.0, %v5091_v23  ;;  %s6361_s8 = spop %4790 }
 0x2f1   :  { %10046 = vst [vmem:[#allocation79_spill] sm:$0xff] %v6272_v62  ;;  %v1285_v5 = vmul.f32 1.442695, %v1278_v54  ;;  %v1020_v23 = vmul.f32 %v6120_v6, %v6035_v41  ;;  %v1458_v55 = vmul.f32 %v6252_v16, %v6180_v11  ;;  %s4793_s6 = spop %4792  ;;  %v1326_v20 = vmax.f32 %v6212_v59, 0.0 }
 0x2f2   :  { %10045 = vst [vmem:[#allocation78_spill] sm:$0xff] %v6268_v9  ;;  %5092 = vpow2.f32 %v1341_v57  ;;  %1653 = vrot.lane.b32.xlu0 %v1445_v32, %s9913_s19  ;;  %1621 = vrot.lane.b32.xlu1 %v1419_v42, %s9911_s24  ;;  %v6296_v57 = vstv %s6227_s17  ;;  %v6298_v32 = vstv %s4785_s30  ;;  %v1339_v42 = vmul.f32 1.442695, %v1333_v4  ;;  %s10066_s17 = smov 120   ;;  %s10261_s30 = sld [smem:[#allocation19_spill]] }
 0x2f3   :  { %10047 = vst [vmem:[#allocation80_spill] sm:$0xff] %v6275_v49  ;;  %5094 = vpow2.f32 %v1285_v5  ;;  %v6312_v4 = vmul.f32 %v6298_v32, %v6241_v7  ;;  %v975_v5 = vmul.f32 %v6209_v52, %v6006_v51  ;;  %v1483_v28 = vmul.f32 %v6296_v57, %v6241_v7 }
 0x2f4   :  { %10048 = vst [vmem:[#allocation81_spill] sm:$0xff] %v6278_v60  ;;  %5096 = vpow2.f32 %v1337_v2  ;;  %v922_v52 = vmul.f32 %v6171_v58, %v6000_v17  ;;  %v241_v58 = vld [vmem:[%s10059_s2 + $0x10] sm:$0xff] }
 0x2f5   :  { %10051 = vst [vmem:[#allocation84_spill] sm:$0xff] %v6293_v56  ;;  %1589 = vrot.lane.b32.xlu2 %v1393_v8, %s9887_s23  ;;  %5098 = vpow2.f32 %v1339_v42  ;;  %v6316_v8 = vmul.f32 %v6286_v25, %v6180_v11 }
 0x2f6   :  { %10053 = vst [vmem:[#allocation86_spill] sm:$0xff] %v6306_v38  ;;  %v6340_v38 = vstv %s4787_s4  ;;  %5100 = vlog2.f32 %v1289_v33  ;;  %v901_v33 = vmul.f32 %v6160_v46, %v6014_v21  ;;  %s10265_s4 = sld [smem:[#allocation17_spill]] }
 0x2f7   :  { %v6300_v44 = vpop.f32.mrf.mxu1  ;;  %10054 = vst [vmem:[#allocation87_spill] sm:$0xff] %v6312_v4  ;;  %v6343_v4 = vstv %s4789_s22  ;;  %s10267_s22 = sld [smem:[#allocation33_spill]] }
 0x2f8   :  { %10052 = vst [vmem:[#allocation85_spill] sm:$0xff] %v6300_v44  ;;  %v4352_v54 = vmul.f32 %v4351_v12, %v6300_v44  ;;  %v966_v12 = vmul.f32 %v6206_v19, %v6000_v17  ;;  %v5093_v42 = vpop.eup %5092  ;;  %v6327_v44 = vstv %s5981_s18  ;;  %s9905_s18 = smov 72   ;;  %v6349_v19 = vadd.f32 %v1020_v23, %v1011_v30 }
 0x2f9   :  { %10055 = vst [vmem:[#allocation88_spill] sm:$0xff] %v6316_v8  ;;  %v1346_v8 = vadd.f32 1.0, %v5093_v42  ;;  %v5095_v15 = vpop.eup %5094  ;;  %v1032_v30 = vmul.f32 %v6275_v49, %v6000_v17  ;;  %v953_v23 = vmul.f32 %v6199_v24, %v6006_v51  ;;  %v6393_v49 = vmul.f32 %v6222_v47, %v6000_v17 }
 0x2fa   :  { %v6318_v2 = vadd.f32 %v5022_v43, %v4352_v54  ;;  %10056 = vst [vmem:[#allocation89_spill] sm:$0xff] %v6327_v44  ;;  %v6335_v43 = vmul.f32 %v6203_v40, %v6014_v21  ;;  %v6338_v54 = vstv %s6248_s25  ;;  %1701 = vrot.lane.b32.xlu0 %v1483_v28, %s9905_s18  ;;  %1669 = vrot.lane.b32.xlu1 %v1458_v55, %s9907_s28  ;;  %v5097_v62 = vpop.eup %5096  ;;  %v1290_v56 = vadd.f32 1.0, %v5095_v15  ;;  %s9889_s25 = smov 104  }
 0x2fb   :  { %10057 = vst [vmem:[#allocation90_spill] sm:$0xff] %v6349_v19  ;;  %5102 = vlog2.f32 %v1346_v8  ;;  %v6351_v22 = vadd.f32 %v975_v5, %v966_v12  ;;  %v5099_v9 = vpop.eup %5098  ;;  %v1344_v31 = vadd.f32 1.0, %v5097_v62  ;;  %v910_v55 = vmul.f32 %v6168_v29, %v6035_v41 }
 0x2fc   :  { %v4357_v39 = vsub.f32 0.0, %v6318_v2  ;;  %v6355_v28 = vmul.f32 %v6335_v43, %v6349_v19  ;;  %v1345_v15 = vadd.f32 1.0, %v5099_v9  ;;  %v1041_v62 = vmul.f32 %v6278_v60, %v6006_v51 }
 0x2fd   :  { %v944_v8 = vmul.f32 %v6191_v18, %v6000_v17  ;;  %v6371_v12 = vadd.f32 %v910_v55, %v901_v33  ;;  %v1522_v5 = vmul.f32 %v6340_v38, %v6241_v7  ;;  %v900_v9 = vmul.f32 %v6160_v46, %v6000_v17 }
 0x2fe   :  { %v4358_v42 = vmul.f32 1.442695, %v4357_v39  ;;  %10058 = vst [vmem:[#allocation91_spill] sm:$0xff] %v6355_v28  ;;  %v931_v39 = vmul.f32 %v6176_v13, %v6006_v51  ;;  %v909_v28 = vmul.f32 %v6168_v29, %v6006_v51  ;;  %v947_v33 = vmul.f32 %v6191_v18, %v6137_v14 }
 0x2ff   :  { %v6385_v60 = vstv %s4793_s6  ;;  %v6406_v29 = vmul.f32 %v6225_v37, %v6006_v51  ;;  %v6410_v59 = vadd.f32 %v953_v23, %v944_v8  ;;  %v1270_v46 = vmax.f32 %v6232_v61, 0.0  ;;  %v240_v8 = vld [vmem:[%s10059_s2 + $0x8] sm:$0xff]  ;;  %s10276_s6 = smov 126  }
 0x300   :  { %5104 = vpow2.f32 %v4358_v42  ;;  %v5101_v42 = vpop.eup %5100  ;;  %v6400_v25 = vadd.f32 %v931_v39, %v922_v52  ;;  %v1324_v39 = vmax.f32 %v6156_v48, 0.0  ;;  %v946_v23 = vmul.f32 %v6191_v18, %v6075_v27 }
 0x301   :  { %5106 = vlog2.f32 %v1290_v56  ;;  %v1496_v56 = vmul.f32 %v6338_v54, %v6241_v7  ;;  %v5103_v55 = vpop.eup %5102  ;;  %v1296_v48 = vmul.f32 0.6931472, %v5101_v42 }
 0x302   :  { %5108 = vlog2.f32 %v1344_v31  ;;  %v6389_v31 = vmul.f32 %v6180_v11, %v6000_v17  ;;  %v1354_v19 = vmul.f32 0.6931472, %v5103_v55  ;;  %1749 = vrot.lane.b32.xlu0 %v1522_v5, %s9893_s26  ;;  %v6402_v11 = vadd.f32 %v1041_v62, %v1032_v30 }
 0x303   :  { %5110 = vlog2.f32 %v1345_v15  ;;  %v956_v15 = vmul.f32 %v6199_v24, %v6149_v36  ;;  %1717 = vrot.lane.b32.xlu1 %v1496_v56, %s9891_s7  ;;  %v242_v36 = vld [vmem:[%s10059_s2 + $0x18] sm:$0xff]  ;;  %v6412_v55 = vadd.f32 %v909_v28, %v900_v9  ;;  %v1325_v30 = vmax.f32 %v6188_v0, 0.0 }
 0x304   :  { %v6416_v56 = vadd.f32 %v1354_v19, %v1326_v20  ;;  %4392 = vmatpush.msra.mxu0 %v242_v36  ;;  %v6430_v19 = vmul.f32 %v6389_v31, %v6410_v59  ;;  %v1535_v9 = vmul.f32 %v6343_v4, %v6241_v7 }
 0x305   :  { %v6414_v5 = vadd.f32 %v956_v15, %v947_v33  ;;  %v6426_v28 = vmul.f32 %v6389_v31, %v6412_v55  ;;  %v239_v33 = vld [vmem:[%s10059_s2] sm:$0xff]  ;;  %s10280_s2 = smov 125  }
 0x306   :  { %v5105_v13 = vpop.eup %5104  ;;  %10061 = vst [vmem:[#allocation93_spill] sm:$0xff] %v6430_v19  ;;  %v6434_v36 = vmul.f32 %v6385_v60, %v6416_v56  ;;  %4393 = vmatpush.msra.mxu0 %v241_v58  ;;  %v6443_v61 = vmul.f32 %v6246_v45, %v6416_v56  ;;  %v6452_v42 = vmul.f32 %v6298_v32, %v6416_v56  ;;  %v1269_v58 = vmax.f32 %v6132_v63, 0.0 }
 0x307   :  { %v5107_v14 = vpop.eup %5106  ;;  %v6418_v52 = vadd.f32 1.0, %v5105_v13  ;;  %10060 = vst [vmem:[#allocation92_spill] sm:$0xff] %v6426_v28  ;;  %v945_v63 = vmul.f32 %v6191_v18, %v6014_v21 }
 0x308   :  { %v5109_v62 = vpop.eup %5108  ;;  %v1298_v35 = vmul.f32 0.6931472, %v5107_v14  ;;  %10062 = vst [vmem:[#allocation94_spill] sm:$0xff] %v6434_v36  ;;  %v1561_v14 = vmul.f32 %v6385_v60, %v6241_v7  ;;  %4394 = vmatpush.msra.mxu0 %v240_v8  ;;  %v1063_v8 = vmul.f32 %v6327_v44, %v6006_v51  ;;  %v6475_v19 = vadd.f32 %v1296_v48, %v1269_v58 }
 0x309   :  { %v5111_v13 = vpop.eup %5110  ;;  %5112 = vrcp.f32 %v6418_v52  ;;  %10063 = vst [vmem:[#allocation95_spill] sm:$0xff] %v6443_v61  ;;  %v1350_v20 = vmul.f32 0.6931472, %v5109_v62  ;;  %v1054_v62 = vmul.f32 %v6283_v3, %v6000_v17  ;;  %vm4366_vm12 = vweird.f32 %v6418_v52 }
 0x30a   :  { %v6439_v0 = vadd.f32 %v1298_v35, %v1270_v46  ;;  %v1352_v15 = vmul.f32 0.6931472, %v5111_v13  ;;  %10064 = vst [vmem:[#allocation96_spill] sm:$0xff] %v6452_v42  ;;  %v955_v35 = vmul.f32 %v6199_v24, %v6087_v50  ;;  %v6464_v13 = vstv %s6162_s11  ;;  %1797 = vrot.lane.b32.xlu0 %v1561_v14, %s10066_s17  ;;  %4395 = vmatpush.msra.mxu0 %v239_v33  ;;  %v247_v42 = vld [vmem:[%s10065_s10] sm:$0x3]  ;;  %s9915_s11 = smov 40  }
 0x30b   :  { %1765 = vrot.lane.b32.xlu1 %v1535_v9, %s9889_s25  ;;  %v6468_v28 = vadd.f32 %v1350_v20, %v1324_v39  ;;  %v954_v14 = vmul.f32 %v6199_v24, %v6035_v41  ;;  %4674 = vmatpush.msk.msra.mxu3 %vm9873_vm10, %v247_v42  ;;  %v998_v33 = vmul.f32 %v6225_v37, %v6035_v41  ;;  %s10285_s10 = smov 124   ;;  %vm9881_vm10 = vcmask 982016  }
 0x30c   :  { %v1396_v46 = vmul.f32 %v6235_v34, %v6439_v0  ;;  %v6470_v36 = vadd.f32 %v1352_v15, %v1325_v30  ;;  %v6480_v61 = vadd.f32 %v955_v35, %v946_v23  ;;  %v989_v23 = vmul.f32 %v6222_v47, %v6014_v21 }
 0x30d   :  { %10067 = vst [vmem:[#allocation97_spill] sm:$0xff] %v6468_v28  ;;  %v6485_v39 = vmul.f32 %v6296_v57, %v6468_v28  ;;  %v6489_v18 = vmul.f32 %v6246_v45, %v6468_v28  ;;  %v6497_v24 = vmul.f32 %v6340_v38, %v6468_v28  ;;  %v6502_v20 = vmul.f32 %v6298_v32, %v6468_v28 }
 0x30e   :  { %1595 = vrot.lane.b32.xlu2 %v1396_v46, %s9887_s23  ;;  %v6493_v30 = vmul.f32 %v6296_v57, %v6470_v36  ;;  %v4370_v15 = vand.u32 2147483647, %v6418_v52  ;;  %v6511_v42 = vmul.f32 %v6338_v54, %v6468_v28  ;;  %v6515_v35 = vmul.f32 %v6385_v60, %v6468_v28 }
 0x30f   :  { %v5113_v9 = vpop.eup %5112  ;;  %10068 = vst [vmem:[#allocation98_spill] sm:$0xff] %v6485_v39  ;;  %v6519_v46 = vmul.f32 %v6340_v38, %v6470_v36  ;;  %v1408_v39 = vmul.f32 %v6173_v26, %v6475_v19 }
 0x310   :  { %10069 = vst [vmem:[#allocation99_spill] sm:$0xff] %v6489_v18  ;;  %v4362_v48 = vmul.f32 %v5113_v9, %v6418_v52  ;;  %vm4367_vm11 = vweird.f32 %v5113_v9  ;;  %vm4371_vm13 = vcmp.eq.f32.partialorder %v4370_v15, 8.507059e+37  ;;  %v6606_v15 = vmul.f32 %v6343_v4, %v6470_v36 }
 0x311   :  { %10070 = vst [vmem:[#allocation100_spill] sm:$0xff] %v6493_v30  ;;  %v4372_v30 = vand.u32 2147483648, %v6418_v52  ;;  %vm4368_vm15 = vmor %vm4366_vm12, %vm4367_vm11  ;;  %v1012_v52 = vmul.f32 %v6117_v53, %v6075_v27  ;;  %vm9882_vm11 = vcmask 195584   ;;  %vm9874_vm12 = vcmask 326656  }
 0x312   :  { %10071 = vst [vmem:[#allocation101_spill] sm:$0xff] %v6497_v24  ;;  %v4363_v58 = vsub.f32 1.0, %v4362_v48  ;;  %v6528_v24 = vmul.f32 %v6343_v4, %v6468_v28  ;;  %v6538_v48 = vadd.f32 %v1063_v8, %v1054_v62  ;;  %v6555_v62 = vadd.f32 %v998_v33, %v989_v23 }
 0x313   :  { %10072 = vst [vmem:[#allocation102_spill] sm:$0xff] %v6502_v20  ;;  %v6524_v20 = vmul.f32 %v6468_v28, %v6035_v41  ;;  %v6547_v28 = vstv %s6361_s8  ;;  %v6595_v23 = vmul.f32 %v6338_v54, %v6470_v36  ;;  %s10274_s8 = smov 127  }
 0x314   :  { %10073 = vst [vmem:[#allocation103_spill] sm:$0xff] %v6511_v42  ;;  %v1410_v42 = vmul.f32 %v6389_v31, %v6351_v22  ;;  %v4364_v18 = vmul.f32 %v5113_v9, %v4363_v58  ;;  %v4373_v58 = vor.u32 1.1754944e-38, %v4372_v30 }
 0x315   :  { %10074 = vst [vmem:[#allocation104_spill] sm:$0xff] %v6515_v35  ;;  %v1384_v35 = vmul.f32 %v6389_v31, %v6400_v25 }
 0x316   :  { %10075 = vst [vmem:[#allocation105_spill] sm:$0xff] %v6519_v46  ;;  %v6536_v46 = vadd.f32 %v6406_v29, %v6393_v49  ;;  %1924 = vrot.lane.b32.xlu0 %v1410_v42, %s9885_s5  ;;  %v1420_v29 = vmul.f32 %v6244_v10, %v6203_v40  ;;  %v6553_v49 = vadd.f32 %v954_v14, %v945_v63 }
 0x317   :  { %10076 = vst [vmem:[#allocation106_spill] sm:$0xff] %v6528_v24  ;;  %v6544_v24 = vmul.f32 %v6524_v20, %v6371_v12  ;;  %1892 = vrot.lane.b32.xlu1 %v1384_v35, %s9917_s9  ;;  %v4365_v8 = vadd.f32 %v5113_v9, %v4364_v18  ;;  %1609 = vrot.lane.b32.xlu2 %v1408_v39, %s9885_s5 }
 0x318   :  { %10078 = vst [vmem:[#allocation108_spill] sm:$0xff] %v6547_v28  ;;  %v6561_v42 = vmul.f32 %v6235_v34, %v6475_v19  ;;  %v6565_v35 = vmul.f32 %v6183_v1, %v6475_v19  ;;  %v6569_v63 = vmul.f32 %v6385_v60, %v6470_v36  ;;  %v6575_v39 = vmul.f32 %v6464_v13, %v6475_v19 }
 0x319   :  { %10077 = vst [vmem:[#allocation107_spill] sm:$0xff] %v6544_v24  ;;  %v4369_v14 = vsel %vm4368_vm15, %v5113_v9, %v4365_v8  ;;  %v6579_v34 = vmul.f32 %v6244_v10, %v6475_v19  ;;  %v6583_v18 = vmul.f32 %v6246_v45, %v6470_v36  ;;  %v6587_v60 = vmul.f32 %v6252_v16, %v6475_v19 }
 0x31a   :  { %10079 = vst [vmem:[#allocation109_spill] sm:$0xff] %v6555_v62  ;;  %v4374_v30 = vsel %vm4371_vm13, %v4373_v58, %v4369_v14  ;;  %v6591_v9 = vmul.f32 %v6298_v32, %v6470_v36  ;;  %v6602_v45 = vmul.f32 %v6547_v28, %v6470_v36  ;;  %v6610_v8 = vmul.f32 %v6475_v19, %v6075_v27 }
 0x31b   :  { %10080 = vst [vmem:[#allocation110_spill] sm:$0xff] %v6561_v42  ;;  %v6598_v33 = vmul.f32 %v4374_v30, %v6318_v2  ;;  %v1449_v32 = vmul.f32 %v6389_v31, %v6402_v11  ;;  %v1423_v58 = vmul.f32 %v6389_v31, %v6536_v46  ;;  %v6618_v2 = vmul.f32 %v6335_v43, %v6555_v62 }
 0x31c   :  { %10081 = vst [vmem:[#allocation111_spill] sm:$0xff] %v6565_v35  ;;  %v1021_v14 = vmul.f32 %v6120_v6, %v6087_v50  ;;  %v1055_v30 = vmul.f32 %v6283_v3, %v6014_v21  ;;  %vm9877_vm13 = vcmask 392192   ;;  %vm9876_vm15 = vcmask 457728  }
 0x31d   :  { %10082 = vst [vmem:[#allocation112_spill] sm:$0xff] %v6569_v63  ;;  %4679 = vmatmul.msk.f32.vlgmr.msra.gmra.mxu0 %vm9875_vm8, %v6598_v33 }
 0x31e   :  { %10083 = vst [vmem:[#allocation113_spill] sm:$0xff] %v6575_v39  ;;  %1972 = vrot.lane.b32.xlu0 %v1449_v32, %s9913_s19  ;;  %v10100_v39 = vld [vmem:[#allocation68_spill] sm:$0xff]  ;;  %v6676_v28 = vpop.f32.mrf.mxu2 }
 0x31f   :  { %10084 = vst [vmem:[#allocation114_spill] sm:$0xff] %v6579_v34  ;;  %1940 = vrot.lane.b32.xlu1 %v1423_v58, %s9911_s24  ;;  %1623 = vrot.lane.b32.xlu2 %v1420_v29, %s9911_s24  ;;  %v10099_v58 = vld [vmem:[#allocation66_spill] sm:$0xff]  ;;  %v933_v35 = vmul.f32 %v10100_v39, %v6087_v50  ;;  %v6672_v39 = vmul.f32 %v6470_v36, %v6087_v50 }
 0x320   :  { %10085 = vst [vmem:[#allocation115_spill] sm:$0xff] %v6583_v18  ;;  %v911_v34 = vmul.f32 %v10099_v58, %v6087_v50  ;;  %4675 = vmatmul.msk.f32.vlgmr.msra.gmra.mxu3 %vm441_vm1, %v6676_v28  ;;  %vm1845_vm1 = vcmask 588800  }
 0x321   :  { %10086 = vst [vmem:[#allocation116_spill] sm:$0xff] %v6587_v60  ;;  %v10096_v60 = vld [vmem:[#allocation65_spill] sm:$0xff] }
 0x322   :  { %10087 = vst [vmem:[#allocation117_spill] sm:$0xff] %v6591_v9  ;;  %v902_v18 = vmul.f32 %v10096_v60, %v6075_v27 }
 0x323   :  { %10088 = vst [vmem:[#allocation118_spill] sm:$0xff] %v6595_v23  ;;  %v10094_v23 = vld [vmem:[#allocation63_spill] sm:$0xff] }
 0x324   :  { %10089 = vst [vmem:[#allocation119_spill] sm:$0xff] %v6598_v33  ;;  %v6634_v9 = vmul.f32 %v6389_v31, %v10094_v23  ;;  %v6640_v33 = vmul.f32 %v6241_v7, %v6006_v51  ;;  %v6668_v24 = vadd.f32 %v911_v34, %v902_v18 }
 0x325   :  { %10090 = vst [vmem:[#allocation120_spill] sm:$0xff] %v6602_v45  ;;  %v6630_v45 = vmul.f32 %v6610_v8, %v6480_v61 }
 0x326   :  { %10091 = vst [vmem:[#allocation121_spill] sm:$0xff] %v6606_v15  ;;  %v1064_v15 = vmul.f32 %v6327_v44, %v6035_v41  ;;  %v6688_v36 = vmul.f32 %v6672_v39, %v6668_v24  ;;  %v6696_v18 = vmul.f32 %v6640_v33, %v6412_v55 }
 0x327   :  { %10092 = vst [vmem:[#allocation122_spill] sm:$0xff] %v6618_v2  ;;  %v1025_v2 = vadd.f32 %v1021_v14, %v1012_v52  ;;  %v10102_v14 = vld [vmem:[#allocation64_spill] sm:$0xff] }
 0x328   :  { %10093 = vst [vmem:[#allocation123_spill] sm:$0xff] %v6630_v45  ;;  %v10097_v45 = vld [vmem:[#allocation62_spill] sm:$0xff]  ;;  %v1022_v42 = vmul.f32 %v6120_v6, %v10102_v14  ;;  %v6662_v7 = vadd.f32 %v1064_v15, %v1055_v30  ;;  %v999_v6 = vmul.f32 %v6225_v37, %v6087_v50  ;;  %v1462_v30 = vmul.f32 %v6389_v31, %v6538_v48 }
 0x329   :  { %10095 = vst [vmem:[#allocation63_spill] sm:$0xff] %v6634_v9  ;;  %v6647_v63 = vmul.f32 %v6439_v0, %v10097_v45  ;;  %v10098_v9 = vld [vmem:[#allocation67_spill] sm:$0xff]  ;;  %v6656_v52 = vmul.f32 %v6610_v8, %v1025_v2  ;;  %v1013_v29 = vmul.f32 %v6117_v53, %v10097_v45  ;;  %v990_v53 = vmul.f32 %v6222_v47, %v6075_v27  ;;  %v10112_v37 = vld [vmem:[#allocation90_spill] sm:$0xff] }
 0x32a   :  { %v924_v32 = vmul.f32 %v10098_v9, %v6075_v27  ;;  %v10103_v9 = vld [vmem:[#allocation69_spill] sm:$0xff]  ;;  %10104 = vst [vmem:[#allocation66_spill] sm:$0xff] %v6676_v28  ;;  %v6692_v34 = vmul.f32 %v6335_v43, %v6662_v7  ;;  %v6708_v28 = vmul.f32 %v6672_v39, %v6480_v61  ;;  %v912_v55 = vmul.f32 %v10099_v58, %v10102_v14 }
 0x32b   :  { %10101 = vst [vmem:[#allocation65_spill] sm:$0xff] %v6656_v52  ;;  %v6666_v62 = vmul.f32 %v6647_v63, %v6414_v5  ;;  %v1432_v52 = vmul.f32 %v6464_v13, %v10103_v9  ;;  %v6682_v15 = vadd.f32 %v1022_v42, %v1013_v29  ;;  %v903_v9 = vmul.f32 %v10096_v60, %v10097_v45 }
 0x32c   :  { %v1487_v42 = vmul.f32 %v6640_v33, %v6400_v25  ;;  %v6704_v29 = vadd.f32 %v933_v35, %v924_v32  ;;  %v6714_v60 = vmul.f32 %v6335_v43, %v6371_v12  ;;  %v6718_v25 = vmul.f32 %v6524_v20, %v6553_v49  ;;  %1988 = vrot.lane.b32.xlu1 %v1462_v30, %s9907_s28 }
 0x32d   :  { %v6722_v31 = vmul.f32 %v6640_v33, %v6351_v22  ;;  %v6727_v61 = vmul.f32 %v6672_v39, %v1025_v2  ;;  %1637 = vrot.lane.b32.xlu2 %v1432_v52, %s9915_s11  ;;  %v6730_v12 = vadd.f32 %v999_v6, %v990_v53  ;;  %v916_v35 = vadd.f32 %v912_v55, %v903_v9  ;;  %v10109_v22 = vld [vmem:[#allocation83_spill] sm:$0xff] }
 0x32e   :  { %10105 = vst [vmem:[#allocation69_spill] sm:$0xff] %v6714_v60  ;;  %2020 = vrot.lane.b32.xlu0 %v1487_v42, %s9905_s18  ;;  %v6734_v32 = vmul.f32 %v6672_v39, %v6704_v29  ;;  %v6738_v58 = vmul.f32 %v10109_v22, %v6475_v19  ;;  %v6741_v42 = vstv %s5992_s16  ;;  %v6744_v30 = vstv %s6003_s12  ;;  %s10119_s12 = sld [smem:[#allocation60_spill]] }
 0x32f   :  { %10106 = vst [vmem:[#allocation124_spill] sm:$0xff] %v6718_v25  ;;  %v6747_v2 = vstv %s6017_s15  ;;  %v6750_v60 = vstv %s6032_s27  ;;  %v6754_v52 = vmul.f32 %v6672_v39, %v6730_v12  ;;  %v6757_v53 = vstv %s6047_s3  ;;  %s10117_s3 = sld [smem:[#allocation57_spill]] }
 0x330   :  { %10107 = vst [vmem:[#allocation125_spill] sm:$0xff] %v6722_v31  ;;  %v1435_v6 = vmul.f32 %v6464_v13, %v6439_v0  ;;  %v1526_v9 = vmul.f32 %v6640_v33, %v6536_v46  ;;  %v1500_v55 = vmul.f32 %v6640_v33, %v6410_v59  ;;  %v1065_v31 = vmul.f32 %v6327_v44, %v6087_v50  ;;  %s10121_s16 = sld [smem:[#allocation61_spill]] }
 0x331   :  { %10108 = vst [vmem:[#allocation126_spill] sm:$0xff] %v6734_v32  ;;  %v6775_v47 = vmul.f32 %v6640_v33, %v6402_v11  ;;  %v6779_v46 = vmul.f32 %v6647_v63, %v6682_v15  ;;  %v6783_v59 = vmul.f32 %v6173_v26, %v6439_v0  ;;  %v6787_v44 = vmul.f32 %v6183_v1, %v6439_v0  ;;  %s10198_s15 = sld [smem:[#allocation24_spill]] }
 0x332   :  { %10110 = vst [vmem:[#allocation83_spill] sm:$0xff] %v6738_v58  ;;  %v1056_v58 = vmul.f32 %v6283_v3, %v6075_v27  ;;  %v6795_v11 = vmul.f32 %v6244_v10, %v6439_v0  ;;  %v6803_v26 = vmul.f32 %v6296_v57, %v6416_v56  ;;  %v6807_v1 = vmul.f32 %v6252_v16, %v6439_v0  ;;  %s10202_s27 = sld [smem:[#allocation14_spill]] }
 0x333   :  { %10111 = vst [vmem:[#allocation127_spill] sm:$0xff] %v6754_v52  ;;  %v6771_v52 = vmul.f32 %v6524_v20, %v10112_v37  ;;  %v10115_v37 = vld [vmem:[#allocation74_spill] sm:$0xff]  ;;  %v6810_v3 = vstv %s6053_s29  ;;  %v6816_v10 = vmul.f32 %v6340_v38, %v6416_v56  ;;  %v6820_v57 = vmul.f32 %v6338_v54, %v6416_v56  ;;  %s9895_s29 = smov 88  }
 0x334   :  { %10114 = vst [vmem:[#allocation128_spill] sm:$0xff] %v6775_v47  ;;  %v6799_v47 = vmul.f32 %v6416_v56, %v10102_v14  ;;  %2036 = vrot.lane.b32.xlu1 %v1500_v55, %s9891_s7  ;;  %v6824_v16 = vmul.f32 %v6343_v4, %v6416_v56  ;;  %v6827_v25 = vstv %s6062_s21  ;;  %v6830_v32 = vstv %s6070_s13  ;;  %s10131_s13 = sld [smem:[#allocation58_spill]]  ;;  %s9909_s21 = smov 64  }
 0x335   :  { %10113 = vst [vmem:[#allocation90_spill] sm:$0xff] %v6771_v52  ;;  %v6791_v52 = vmul.f32 %v10115_v37, %v6439_v0  ;;  %1643 = vrot.lane.b32.xlu2 %v1435_v6, %s9915_s11  ;;  %v6839_v55 = vstv %s6078_s0  ;;  %v6842_v54 = vstv %s6091_s1  ;;  %v6852_v4 = vmul.f32 %v6610_v8, %v6668_v24  ;;  %s10127_s0 = sld [smem:[#allocation59_spill]] }
 0x336   :  { %10116 = vst [vmem:[#allocation74_spill] sm:$0xff] %v6799_v47  ;;  %2068 = vrot.lane.b32.xlu0 %v1526_v9, %s9893_s26  ;;  %v6833_v9 = vadd.f32 %v1065_v31, %v1056_v58  ;;  %v6836_v38 = vmul.f32 %v6799_v47, %v916_v35  ;;  %v6860_v31 = vmul.f32 %v10109_v22, %v6439_v0  ;;  %s10200_s1 = sld [smem:[#allocation34_spill]] }
 0x337   :  { %10118 = vst [vmem:[#allocation129_spill] sm:$0xff] %v6816_v10  ;;  %v6848_v10 = vstv %s10117_s3  ;;  %v1076_v58 = vmul.f32 %v6741_v42, %v6000_v17  ;;  %v1565_v24 = vmul.f32 %v6640_v33, %v6538_v48  ;;  %v6880_v0 = vmul.f32 %v6799_v47, %v6682_v15  ;;  %s10287_s3 = smov 123  }
 0x338   :  { %10120 = vst [vmem:[#allocation130_spill] sm:$0xff] %v6820_v57  ;;  %v6845_v57 = vstv %s6099_s20  ;;  %v6856_v6 = vmul.f32 %v6672_v39, %v6833_v9  ;;  %v6883_v22 = vmul.f32 %v6647_v63, %v916_v35  ;;  %v1447_v48 = vmul.f32 %v10115_v37, %v6475_v19  ;;  %s10180_s20 = smov 112  }
 0x339   :  { %10122 = vst [vmem:[#allocation131_spill] sm:$0xff] %v6824_v16  ;;  %v6865_v16 = vstv %s10119_s12  ;;  %v1173_v35 = vmul.f32 %v6842_v54, %v6006_v51 }
 0x33a   :  { %10123 = vst [vmem:[#allocation132_spill] sm:$0xff] %v6836_v38  ;;  %v6868_v38 = vstv %s10121_s16 }
 0x33b   :  { %10124 = vst [vmem:[#allocation133_spill] sm:$0xff] %v6852_v4  ;;  %v6874_v4 = vmul.f32 %v6799_v47, %v6414_v5  ;;  %v1098_v5 = vmul.f32 %v6747_v2, %v6000_v17  ;;  %v1239_v19 = vmul.f32 %v6868_v38, %v6006_v51  ;;  %v6904_v37 = vstv %s10127_s0 }
 0x33c   :  { %10125 = vst [vmem:[#allocation134_spill] sm:$0xff] %v6856_v6  ;;  %v1539_v6 = vmul.f32 %v6640_v33, %v10094_v23  ;;  %v1107_v23 = vmul.f32 %v6750_v60, %v6006_v51  ;;  %v1164_v33 = vmul.f32 %v6839_v55, %v6000_v17 }
 0x33d   :  { %10126 = vst [vmem:[#allocation135_spill] sm:$0xff] %v6860_v31  ;;  %v1085_v31 = vmul.f32 %v6744_v30, %v6006_v51  ;;  %1657 = vrot.lane.b32.xlu2 %v1447_v48, %s9913_s19 }
 0x33e   :  { %10128 = vst [vmem:[#allocation136_spill] sm:$0xff] %v6874_v4  ;;  %2116 = vrot.lane.b32.xlu0 %v1565_v24, %s10066_s17  ;;  %2084 = vrot.lane.b32.xlu1 %v1539_v6, %s9889_s25  ;;  %v6918_v4 = vadd.f32 %v1173_v35, %v1164_v33  ;;  %v1142_v24 = vmul.f32 %v6827_v25, %v6000_v17 }
 0x33f   :  { %10129 = vst [vmem:[#allocation137_spill] sm:$0xff] %v6880_v0  ;;  %v6895_v15 = vadd.f32 %v1085_v31, %v1076_v58  ;;  %v6908_v0 = vadd.f32 %v1107_v23, %v1098_v5  ;;  %v1120_v31 = vmul.f32 %v6757_v53, %v6000_v17  ;;  %v1129_v58 = vmul.f32 %v6810_v3, %v6006_v51 }
 0x340   :  { %10130 = vst [vmem:[#allocation138_spill] sm:$0xff] %v6883_v22  ;;  %v1230_v22 = vmul.f32 %v6865_v16, %v6000_v17  ;;  %v1151_v5 = vmul.f32 %v6830_v32, %v6006_v51  ;;  %v1186_v23 = vmul.f32 %v6845_v57, %v6000_v17 }
 0x341   :  { %10132 = vst [vmem:[#allocation139_spill] sm:$0xff] %v6895_v15  ;;  %v6915_v15 = vstv %s10131_s13  ;;  %v6924_v6 = vadd.f32 %v1129_v58, %v1120_v31  ;;  %v1143_v31 = vmul.f32 %v6827_v25, %v6014_v21  ;;  %v1152_v58 = vmul.f32 %v6830_v32, %v6035_v41 }
 0x342   :  { %10133 = vst [vmem:[#allocation140_spill] sm:$0xff] %v6908_v0  ;;  %v6920_v47 = vadd.f32 %v1239_v19, %v1230_v22  ;;  %v1195_v0 = vmul.f32 %v6848_v10, %v6006_v51  ;;  %v1208_v48 = vmul.f32 %v6915_v15, %v6000_v17  ;;  %v1217_v22 = vmul.f32 %v6904_v37, %v6006_v51  ;;  %v232_v17 = vld [vmem:[%s10198_s15] sm:$0x1] }
 0x343   :  { %10134 = vst [vmem:[#allocation141_spill] sm:$0xff] %v6918_v4  ;;  %v6936_v33 = vadd.f32 %v1151_v5, %v1142_v24  ;;  %v10141_v4 = vld [vmem:[#allocation77_spill] sm:$0xff]  ;;  %v10143_v24 = vld [vmem:[#allocation76_spill] sm:$0xff]  ;;  %v1218_v5 = vmul.f32 %v6904_v37, %v6035_v41  ;;  %v1121_v51 = vmul.f32 %v6757_v53, %v6014_v21  ;;  %4680 = vmatpush.msk.msra.mxu1 %vm602_vm9, %v232_v17 }
 0x344   :  { %10135 = vst [vmem:[#allocation142_spill] sm:$0xff] %v6920_v47  ;;  %v6938_v35 = vadd.f32 %v1195_v0, %v1186_v23  ;;  %v6940_v19 = vadd.f32 %v1217_v22, %v1208_v48  ;;  %v6946_v47 = vadd.f32 %v1152_v58, %v1143_v31  ;;  %v1209_v0 = vmul.f32 %v6915_v15, %v6014_v21  ;;  %v6960_v48 = vpop.trf.xlu2  ;;  %v5226_v17 = vld [vmem:[%s10202_s27] sm:$0x3] }
 0x345   :  { %10136 = vst [vmem:[#allocation143_spill] sm:$0xff] %v6924_v6  ;;  %v10142_v6 = vld [vmem:[#allocation78_spill] sm:$0xff]  ;;  %1671 = vrot.lane.b32.xlu2 %v10143_v24, %s9907_s28  ;;  %v1077_v23 = vmul.f32 %v6741_v42, %v6014_v21  ;;  %v1108_v22 = vmul.f32 %v6750_v60, %v6035_v41 }
 0x346   :  { %10137 = vst [vmem:[#allocation144_spill] sm:$0xff] %v6936_v33  ;;  %1607 = vrot.lane.b32.xlu1 %v10141_v4, %s9885_s5  ;;  %1591 = vrot.lane.b32.xlu0 %v10142_v6, %s9887_s23  ;;  %v1086_v4 = vmul.f32 %v6744_v30, %v6035_v41  ;;  %v1099_v6 = vmul.f32 %v6747_v2, %v6014_v21 }
 0x347   :  { %10138 = vst [vmem:[#allocation145_spill] sm:$0xff] %v6938_v35  ;;  %v6968_v31 = vadd.f32 %v1218_v5, %v1209_v0  ;;  %v1165_v35 = vmul.f32 %v6839_v55, %v6014_v21  ;;  %v1174_v0 = vmul.f32 %v6842_v54, %v6035_v41  ;;  %v1187_v5 = vmul.f32 %v6845_v57, %v6014_v21 }
 0x348   :  { %10139 = vst [vmem:[#allocation146_spill] sm:$0xff] %v6940_v19  ;;  %v6970_v58 = vadd.f32 %v1086_v4, %v1077_v23  ;;  %v6972_v24 = vadd.f32 %v1108_v22, %v1099_v6  ;;  %v1130_v19 = vmul.f32 %v6810_v3, %v6035_v41  ;;  %v1196_v23 = vmul.f32 %v6848_v10, %v6035_v41  ;;  %v10150_v22 = vld [vmem:[#allocation79_spill] sm:$0xff] }
 0x349   :  { %10140 = vst [vmem:[#allocation147_spill] sm:$0xff] %v6946_v47  ;;  %v1433_v47 = vmul.f32 %v6464_v13, %v6203_v40  ;;  %v1231_v40 = vmul.f32 %v6865_v16, %v6014_v21  ;;  %v10148_v13 = vld [vmem:[#allocation84_spill] sm:$0xff]  ;;  %v1240_v6 = vmul.f32 %v6868_v38, %v6035_v41 }
 0x34a   :  { %10144 = vst [vmem:[#allocation77_spill] sm:$0xff] %v6960_v48  ;;  %v6993_v4 = vadd.f32 %v1130_v19, %v1121_v51  ;;  %v1131_v51 = vmul.f32 %v6810_v3, %v6087_v50  ;;  %v1197_v19 = vmul.f32 %v6848_v10, %v6087_v50 }
 0x34b   :  { %10145 = vst [vmem:[#allocation78_spill] sm:$0xff] %v6968_v31  ;;  %v6999_v31 = vadd.f32 %v1174_v0, %v1165_v35 }
 0x34c   :  { %10146 = vst [vmem:[#allocation76_spill] sm:$0xff] %v6970_v58  ;;  %v7003_v58 = vadd.f32 %v1240_v6, %v1231_v40  ;;  %v10159_v40 = vld [vmem:[#allocation99_spill] sm:$0xff] }
 0x34d   :  { %10147 = vst [vmem:[#allocation148_spill] sm:$0xff] %v6972_v24  ;;  %1685 = vrot.lane.b32.xlu2 %v10150_v22, %s9909_s21  ;;  %v7001_v24 = vadd.f32 %v1196_v23, %v1187_v5  ;;  %v7019_v5 = vpop.permute.xlu1 %2379  ;;  %v10158_v23 = vld [vmem:[#allocation98_spill] sm:$0xff]  ;;  %v10160_v6 = vld [vmem:[#allocation95_spill] sm:$0xff]  ;;  %v1100_v22 = vmul.f32 %v6747_v2, %v6075_v27 }
 0x34e   :  { %1655 = vrot.lane.b32.xlu1 %v10148_v13, %s9913_s19  ;;  %1639 = vrot.lane.b32.xlu0 %v1433_v47, %s9915_s11  ;;  %10149 = vst [vmem:[#allocation84_spill] sm:$0xff] %v6993_v4  ;;  %v1122_v13 = vmul.f32 %v6757_v53, %v6075_v27  ;;  %v1188_v47 = vmul.f32 %v6845_v57, %v6075_v27  ;;  %v7013_v4 = vpop.trf.xlu2 }
 0x34f   :  { %10151 = vst [vmem:[#allocation79_spill] sm:$0xff] %v6999_v31  ;;  %v1175_v31 = vmul.f32 %v6842_v54, %v6087_v50 }
 0x350   :  { %10152 = vst [vmem:[#allocation149_spill] sm:$0xff] %v7001_v24  ;;  %v7015_v35 = vadd.f32 %v1131_v51, %v1122_v13  ;;  %v7017_v0 = vadd.f32 %v1197_v19, %v1188_v47  ;;  %v1109_v13 = vmul.f32 %v6750_v60, %v6087_v50  ;;  %v1144_v51 = vmul.f32 %v6827_v25, %v6075_v27 }
 0x351   :  { %10153 = vst [vmem:[#allocation150_spill] sm:$0xff] %v7003_v58  ;;  %v1153_v47 = vmul.f32 %v6830_v32, %v6087_v50  ;;  %v1078_v19 = vmul.f32 %v6741_v42, %v6075_v27  ;;  %v1219_v58 = vmul.f32 %v6904_v37, %v6087_v50  ;;  %v1166_v24 = vmul.f32 %v6839_v55, %v6075_v27 }
 0x352   :  { %10154 = vst [vmem:[#allocation151_spill] sm:$0xff] %v7013_v4  ;;  %v10221_v4 = vld [vmem:[#allocation121_spill] sm:$0xff] }
 0x353   :  { %10155 = vst [vmem:[#allocation152_spill] sm:$0xff] %v7015_v35 }
 0x354   :  { %10156 = vst [vmem:[#allocation153_spill] sm:$0xff] %v7017_v0  ;;  %v7043_v0 = vadd.f32 %v1153_v47, %v1144_v51  ;;  %v7061_v47 = vadd.f32 %v1175_v31, %v1166_v24  ;;  %v1079_v31 = vmul.f32 %v6741_v42, %v10097_v45  ;;  %v1088_v24 = vmul.f32 %v6744_v30, %v10102_v14 }
 0x355   :  { %10157 = vst [vmem:[#allocation154_spill] sm:$0xff] %v7019_v5  ;;  %1691 = vrot.lane.b32.xlu2 %v10160_v6, %s9909_s21  ;;  %v1210_v6 = vmul.f32 %v6915_v15, %v6075_v27  ;;  %v7071_v33 = vpop.permute.xlu1 %3100  ;;  %v1233_v42 = vmul.f32 %v6865_v16, %v10097_v45 }
 0x356   :  { %1703 = vrot.lane.b32.xlu1 %v10158_v23, %s9905_s18  ;;  %1687 = vrot.lane.b32.xlu0 %v10159_v40, %s9909_s21  ;;  %v1087_v23 = vmul.f32 %v6744_v30, %v6087_v50  ;;  %v7039_v40 = vadd.f32 %v1109_v13, %v1100_v22  ;;  %10162 = vst [vmem:[#allocation99_spill] sm:$0xff] %v7043_v0  ;;  %v7059_v51 = vpop.permute.xlu2 %1575  ;;  %v10168_v0 = vld [vmem:[#allocation102_spill] sm:$0xff]  ;;  %v10172_v30 = vld [vmem:[#allocation97_spill] sm:$0xff] }
 0x357   :  { %v1232_v22 = vmul.f32 %v6865_v16, %v6075_v27  ;;  %v1241_v13 = vmul.f32 %v6868_v38, %v6087_v50  ;;  %10165 = vst [vmem:[#allocation156_spill] sm:$0xff] %v7061_v47  ;;  %v1154_v16 = vmul.f32 %v6830_v32, %v10102_v14  ;;  %v10197_v47 = vld [vmem:[#allocation109_spill] sm:$0xff] }
 0x358   :  { %10161 = vst [vmem:[#allocation98_spill] sm:$0xff] %v7039_v40  ;;  %v7045_v35 = vadd.f32 %v1087_v23, %v1078_v19  ;;  %v7057_v40 = vadd.f32 %v1219_v58, %v1210_v6  ;;  %v10167_v23 = vld [vmem:[#allocation101_spill] sm:$0xff]  ;;  %v10169_v58 = vld [vmem:[#allocation100_spill] sm:$0xff]  ;;  %v1101_v6 = vmul.f32 %v6747_v2, %v10097_v45 }
 0x359   :  { %v7063_v19 = vadd.f32 %v1241_v13, %v1232_v22  ;;  %v1110_v22 = vmul.f32 %v6750_v60, %v10102_v14  ;;  %v1176_v13 = vmul.f32 %v6842_v54, %v10102_v14  ;;  %v1242_v60 = vmul.f32 %v6868_v38, %v10102_v14 }
 0x35a   :  { %10163 = vst [vmem:[#allocation95_spill] sm:$0xff] %v7045_v35  ;;  %v7069_v35 = vpop.permute.xlu0 %3091  ;;  %v1132_v54 = vmul.f32 %v6810_v3, %v10102_v14  ;;  %v1198_v38 = vmul.f32 %v6848_v10, %v10102_v14  ;;  %v1220_v3 = vmul.f32 %v6904_v37, %v10102_v14  ;;  %v10181_v10 = vld [vmem:[#allocation71_spill] sm:$0xff] }
 0x35b   :  { %10164 = vst [vmem:[#allocation155_spill] sm:$0xff] %v7057_v40  ;;  %v10184_v37 = vld [vmem:[#allocation103_spill] sm:$0xff] }
 0x35c   :  { %10166 = vst [vmem:[#allocation157_spill] sm:$0xff] %v7063_v19  ;;  %v10173_v19 = vld [vmem:[#allocation108_spill] sm:$0xff] }
 0x35d   :  { %1705 = vrot.lane.b32.xlu2 %v10169_v58, %s9905_s18  ;;  %v7089_v58 = vadd.f32 %v1110_v22, %v1101_v6  ;;  %v1549_v40 = vmul.f32 %v10173_v19, %v10172_v30  ;;  %v7109_v6 = vadd.f32 %v1242_v60, %v1233_v42  ;;  %v10176_v22 = vld [vmem:[#allocation70_spill] sm:$0xff] }
 0x35e   :  { %1751 = vrot.lane.b32.xlu1 %v10167_v23, %s9893_s26  ;;  %1735 = vrot.lane.b32.xlu0 %v10168_v0, %s9895_s29  ;;  %v1167_v0 = vmul.f32 %v6839_v55, %v10097_v45  ;;  %v7087_v23 = vadd.f32 %v1088_v24, %v1079_v31  ;;  %v1123_v55 = vmul.f32 %v6757_v53, %v10097_v45  ;;  %v7134_v30 = vpop.permute.xlu2 %1589 }
 0x35f   :  { %10171 = vst [vmem:[#allocation102_spill] sm:$0xff] %v7089_v58  ;;  %v1145_v31 = vmul.f32 %v6827_v25, %v10097_v45  ;;  %v1189_v24 = vmul.f32 %v6845_v57, %v10097_v45  ;;  %v1211_v53 = vmul.f32 %v6915_v15, %v10097_v45  ;;  %v967_v25 = vmul.f32 %v10176_v22, %v6014_v21  ;;  %v10179_v57 = vld [vmem:[#allocation104_spill] sm:$0xff] }
 0x360   :  { %10170 = vst [vmem:[#allocation101_spill] sm:$0xff] %v7087_v23  ;;  %v7095_v2 = vadd.f32 %v1176_v13, %v1167_v0  ;;  %v7119_v0 = vadd.f32 %v1132_v54, %v1123_v55  ;;  %v976_v13 = vmul.f32 %v10181_v10, %v6035_v41  ;;  %v7138_v55 = vpop.permute.xlu1 %1573 }
 0x361   :  { %10175 = vst [vmem:[#allocation97_spill] sm:$0xff] %v7109_v6  ;;  %v7121_v32 = vadd.f32 %v1154_v16, %v1145_v31  ;;  %v7128_v42 = vadd.f32 %v1198_v38, %v1189_v24  ;;  %v7130_v15 = vadd.f32 %v1220_v3, %v1211_v53  ;;  %v10185_v16 = vld [vmem:[#allocation80_spill] sm:$0xff]  ;;  %v10186_v38 = vld [vmem:[#allocation81_spill] sm:$0xff]  ;;  %v10187_v3 = vld [vmem:[#allocation87_spill] sm:$0xff] }
 0x362   :  { %10174 = vst [vmem:[#allocation100_spill] sm:$0xff] %v7095_v2  ;;  %v7136_v60 = vpop.permute.xlu0 %1605  ;;  %v980_v54 = vadd.f32 %v976_v13, %v967_v25  ;;  %v1033_v24 = vmul.f32 %v10185_v16, %v6014_v21  ;;  %v1042_v53 = vmul.f32 %v10186_v38, %v6035_v41  ;;  %v10195_v2 = vld [vmem:[#allocation105_spill] sm:$0xff] }
 0x363   :  { %10177 = vst [vmem:[#allocation108_spill] sm:$0xff] %v7119_v0 }
 0x364   :  { %10178 = vst [vmem:[#allocation70_spill] sm:$0xff] %v7121_v32  ;;  %v1411_v31 = vmul.f32 %v6335_v43, %v980_v54  ;;  %v10192_v32 = vld [vmem:[#allocation96_spill] sm:$0xff] }
 0x365   :  { %10182 = vst [vmem:[#allocation104_spill] sm:$0xff] %v7128_v42  ;;  %1719 = vrot.lane.b32.xlu2 %v10184_v37, %s9891_s7  ;;  %v10191_v42 = vld [vmem:[#allocation68_spill] sm:$0xff] }
 0x366   :  { %1799 = vrot.lane.b32.xlu1 %v10179_v57, %s10066_s17  ;;  %1783 = vrot.lane.b32.xlu0 %v1549_v40, %s10180_s20  ;;  %10183 = vst [vmem:[#allocation71_spill] sm:$0xff] %v7130_v15  ;;  %v1398_v40 = vmul.f32 %v6335_v43, %v6553_v49  ;;  %v1046_v49 = vadd.f32 %v1042_v53, %v1033_v24 }
 0x368   :  { %v7153_v25 = vpop.permute.xlu1 %1621  ;;  %v7155_v13 = vpop.permute.xlu2 %1595  ;;  %v1450_v37 = vmul.f32 %v6335_v43, %v1046_v49 }
 0x369   :  { %10188 = vst [vmem:[#allocation103_spill] sm:$0xff] %v7155_v13  ;;  %v10216_v13 = vld [vmem:[#allocation117_spill] sm:$0xff] }
 0x36a   :  { %v7151_v57 = vpop.permute.xlu0 %1653 }
 0x36d   :  { %1733 = vrot.lane.b32.xlu2 %v10187_v3, %s9895_s29  ;;  %v932_v3 = vmul.f32 %v10191_v42, %v6035_v41  ;;  %v1527_v41 = vmul.f32 %v6524_v20, %v10197_v47  ;;  %v1566_v47 = vmul.f32 %v6524_v20, %v6662_v7  ;;  %v1551_v7 = vmul.f32 %v10173_v19, %v6416_v56  ;;  %v10207_v56 = vld [vmem:[#allocation53_spill] sm:$0xff] }
 0x36e   :  { %1926 = vrot.lane.b32.xlu1 %v1411_v31, %s9885_s5  ;;  %1910 = vrot.lane.b32.xlu0 %v1398_v40, %s9887_s23  ;;  %v10189_v31 = vld [vmem:[#allocation91_spill] sm:$0xff] }
 0x36f   :  { %v10190_v40 = vld [vmem:[#allocation67_spill] sm:$0xff] }
 0x370   :  { %v923_v15 = vmul.f32 %v10190_v40, %v6014_v21  ;;  %v7169_v6 = vpop.permute.xlu1 %1669  ;;  %v10201_v21 = vld [vmem:[#allocation75_spill] sm:$0xff] }
 0x371   :  { %v7171_v24 = vpop.permute.xlu2 %1609 }
 0x372   :  { %v7167_v0 = vpop.permute.xlu0 %1701  ;;  %10193 = vst [vmem:[#allocation80_spill] sm:$0xff] %v7171_v24  ;;  %v936_v53 = vadd.f32 %v932_v3, %v923_v15  ;;  %v1514_v15 = vmul.f32 %v6524_v20, %v980_v54  ;;  %v10199_v3 = vld [vmem:[#allocation106_spill] sm:$0xff]  ;;  %v1553_v54 = vmul.f32 %v6524_v20, %v1046_v49  ;;  %v275_v49 = vld [vmem:[%s10200_s1] sm:$0x3] }
 0x373   :  { %4794 = vpush %v275_v49 }
 0x375   :  { %1739 = vrot.lane.b32.xlu2 %v10192_v32, %s9895_s29 }
 0x376   :  { %1974 = vrot.lane.b32.xlu1 %v1450_v37, %s9913_s19  ;;  %1958 = vrot.lane.b32.xlu0 %v10189_v31, %s9915_s11  ;;  %v1488_v37 = vmul.f32 %v6524_v20, %v936_v53  ;;  %v10194_v31 = vld [vmem:[#allocation107_spill] sm:$0xff] }
 0x377   :  { %v10205_v20 = vld [vmem:[#allocation111_spill] sm:$0xff] }
 0x378   :  { %v7181_v32 = vpop.permute.xlu1 %1717 }
 0x379   :  { %v7183_v23 = vpop.permute.xlu2 %1623 }
 0x37a   :  { %v7179_v58 = vpop.permute.xlu0 %1749  ;;  %10196 = vst [vmem:[#allocation81_spill] sm:$0xff] %v7183_v23 }
 0x37d   :  { %1753 = vrot.lane.b32.xlu2 %v10195_v2, %s9893_s26 }
 0x37e   :  { %2022 = vrot.lane.b32.xlu1 %v1488_v37, %s9905_s18  ;;  %2006 = vrot.lane.b32.xlu0 %v10194_v31, %s9909_s21 }
 0x380   :  { %v7194_v37 = vpop.permute.xlu1 %1765 }
 0x382   :  { %v7192_v2 = vpop.permute.xlu0 %1797 }
 0x385   :  { %1767 = vrot.lane.b32.xlu2 %v10199_v3, %s9889_s25 }
 0x386   :  { %2070 = vrot.lane.b32.xlu1 %v1527_v41, %s9893_s26  ;;  %2054 = vrot.lane.b32.xlu0 %v1514_v15, %s9895_s29  ;;  %v1548_v41 = vmul.f32 %v10173_v19, %v10201_v21  ;;  %v10204_v21 = vld [vmem:[#allocation110_spill] sm:$0xff]  ;;  %v10208_v19 = vrot.slane %v10207_v56, 1 }
 0x387   :  { %v7196_v31 = vpop.permute.xlu2 %1637 }
 0x389   :  { %v7208_v3 = vpop.permute.xlu1 %1892 }
 0x38a   :  { %v7206_v15 = vpop.permute.xlu0 %1924 }
 0x38d   :  { %1781 = vrot.lane.b32.xlu2 %v1548_v41, %s10180_s20  ;;  %v2882_v41 = vrot.slane %v275_v49, 1 }
 0x38e   :  { %2118 = vrot.lane.b32.xlu1 %v1566_v47, %s10066_s17  ;;  %2102 = vrot.lane.b32.xlu0 %v1553_v54, %s10180_s20 }
 0x38f   :  { %v7210_v5 = vpop.permute.xlu2 %1643  ;;  %4796 = vpush %v2882_v41 }
 0x390   :  { %10203 = vst [vmem:[#allocation87_spill] sm:$0xff] %v7210_v5 }
 0x391   :  { %v7224_v54 = vpop.permute.xlu1 %1940  ;;  %4798 = vpush %v5226_v17 }
 0x392   :  { %v7222_v47 = vpop.permute.xlu0 %1972  ;;  %4800 = vpush %v10208_v19  ;;  %v10214_v19 = vld [vmem:[#allocation115_spill] sm:$0xff] }
 0x393   :  { %4802 = vpush %v7069_v35  ;;  %v1385_v35 = vmul.f32 %v6335_v43, %v936_v53  ;;  %v10218_v43 = vld [vmem:[#allocation93_spill] sm:$0xff] }
 0x394   :  { %4804 = vpush %v7071_v33  ;;  %v10215_v33 = vld [vmem:[#allocation116_spill] sm:$0xff] }
 0x395   :  { %1787 = vrot.lane.b32.xlu2 %v1551_v7, %s10180_s20  ;;  %v10210_v7 = vld [vmem:[#allocation114_spill] sm:$0xff] }
 0x396   :  { %1593 = vrot.lane.b32.xlu1 %v10204_v21, %s9887_s23  ;;  %1577 = vrot.lane.b32.xlu0 %v10205_v20, %s9917_s9  ;;  %v10209_v21 = vld [vmem:[#allocation113_spill] sm:$0xff]  ;;  %v10211_v20 = vld [vmem:[#allocation112_spill] sm:$0xff] }
 0x397   :  { %v7226_v5 = vpop.permute.xlu2 %1657 }
 0x398   :  { %10206 = vst [vmem:[#allocation91_spill] sm:$0xff] %v7226_v5 }
 0x39a   :  { %v7245_v56 = vpop.f32.mrf.mxu0 }
 0x39b   :  { %10213 = vst [vmem:[#allocation68_spill] sm:$0xff] %v7245_v56  ;;  %4681 = vmatmul.msk.f32.vlgmr.msra.gmra.mxu1 %vm4403_vm2, %v7245_v56  ;;  %v10217_v56 = vld [vmem:[#allocation118_spill] sm:$0xff]  ;;  %vm1850_vm2 = vcmask 654336  }
 0x39d   :  { %1801 = vrot.lane.b32.xlu2 %v10211_v20, %s10066_s17 }
 0x39e   :  { %1641 = vrot.lane.b32.xlu1 %v10209_v21, %s9915_s11  ;;  %1625 = vrot.lane.b32.xlu0 %v10210_v7, %s9911_s24  ;;  %v7241_v41 = vpop.permute.xlu1 %1988 }
 0x39f   :  { %v7243_v17 = vpop.permute.xlu2 %1671 }
 0x3a0   :  { %v7239_v49 = vpop.permute.xlu0 %2020  ;;  %10212 = vst [vmem:[#allocation67_spill] sm:$0xff] %v7243_v17 }
 0x3a4   :  { %s7770_s12 = spop %4794 }
 0x3a5   :  { %1894 = vrot.lane.b32.xlu2 %v1385_v35, %s9917_s9 }
 0x3a6   :  { %1689 = vrot.lane.b32.xlu1 %v10214_v19, %s9909_s21  ;;  %1673 = vrot.lane.b32.xlu0 %v10215_v33, %s9907_s28  ;;  %v7256_v7 = vpop.permute.xlu1 %2036  ;;  %v10220_v33 = vld [vmem:[#allocation120_spill] sm:$0xff] }
 0x3a7   :  { %v7258_v20 = vpop.permute.xlu2 %1685 }
 0x3a8   :  { %v7254_v21 = vpop.permute.xlu0 %2068 }
 0x3ad   :  { %1908 = vrot.lane.b32.xlu2 %v10218_v43, %s9887_s23 }
 0x3ae   :  { %1737 = vrot.lane.b32.xlu1 %v10216_v13, %s9895_s29  ;;  %1721 = vrot.lane.b32.xlu0 %v10217_v56, %s9891_s7  ;;  %v968_v13 = vmul.f32 %v10176_v22, %v6075_v27  ;;  %v977_v56 = vmul.f32 %v10181_v10, %v6087_v50 }
 0x3af   :  { %v7270_v35 = vpop.permute.xlu2 %1691 }
 0x3b0   :  { %v7266_v53 = vpop.permute.xlu0 %2116  ;;  %v7268_v19 = vpop.permute.xlu1 %2084  ;;  %10219 = vst [vmem:[#allocation96_spill] sm:$0xff] %v7270_v35  ;;  %v981_v5 = vadd.f32 %v977_v56, %v968_v13  ;;  %v1425_v13 = vmul.f32 %v6610_v8, %v6730_v12  ;;  %v10226_v56 = vld [vmem:[#allocation122_spill] sm:$0xff]  ;;  %v10227_v12 = vld [vmem:[#allocation63_spill] sm:$0xff] }
 0x3b5   :  { %1914 = vrot.lane.b32.xlu2 %v6666_v62, %s9887_s23  ;;  %v10223_v62 = vld [vmem:[#allocation123_spill] sm:$0xff] }
 0x3b6   :  { %1785 = vrot.lane.b32.xlu1 %v10220_v33, %s10180_s20  ;;  %1769 = vrot.lane.b32.xlu0 %v10221_v4, %s9889_s25  ;;  %v1386_v33 = vmul.f32 %v6610_v8, %v6704_v29  ;;  %v1412_v4 = vmul.f32 %v6610_v8, %v981_v5  ;;  %v10225_v29 = vld [vmem:[#allocation65_spill] sm:$0xff] }
 0x3b7   :  { %v7286_v35 = vpop.permute.xlu2 %1705 }
 0x3b8   :  { %v7282_v43 = vpop.permute.xlu1 %1607  ;;  %v7284_v48 = vpop.permute.xlu0 %1591  ;;  %10222 = vst [vmem:[#allocation107_spill] sm:$0xff] %v7286_v35  ;;  %v1464_v35 = vmul.f32 %v6610_v8, %v6833_v9  ;;  %v1043_v9 = vmul.f32 %v10186_v38, %v6087_v50 }
 0x3bd   :  { %1928 = vrot.lane.b32.xlu2 %v1412_v4, %s9885_s5 }
 0x3be   :  { %1912 = vrot.lane.b32.xlu1 %v10223_v62, %s9887_s23  ;;  %1896 = vrot.lane.b32.xlu0 %v1386_v33, %s9917_s9 }
 0x3bf   :  { %v7299_v23 = vpop.permute.xlu2 %1719 }
 0x3c0   :  { %v7295_v24 = vpop.permute.xlu1 %1655  ;;  %v7297_v17 = vpop.permute.xlu0 %1639  ;;  %10224 = vst [vmem:[#allocation105_spill] sm:$0xff] %v7299_v23  ;;  %v1515_v23 = vmul.f32 %v6672_v39, %v981_v5  ;;  %s7777_s16 = spop %4796 }
 0x3c2   :  { %s7788_s0 = spop %4798 }
 0x3c3   :  { %s7793_s13 = spop %4800 }
 0x3c4   :  { %s7798_s15 = spop %4802 }
 0x3c5   :  { %1942 = vrot.lane.b32.xlu2 %v10226_v56, %s9911_s24  ;;  %s7809_s1 = spop %4804 }
 0x3c6   :  { %1960 = vrot.lane.b32.xlu1 %v10225_v29, %s9915_s11  ;;  %1944 = vrot.lane.b32.xlu0 %v1425_v13, %s9911_s24 }
 0x3c7   :  { %v7312_v62 = vpop.permute.xlu2 %1733 }
 0x3c8   :  { %v7308_v33 = vpop.permute.xlu1 %1703  ;;  %v7310_v4 = vpop.permute.xlu0 %1687 }
 0x3cd   :  { %1956 = vrot.lane.b32.xlu2 %v10227_v12, %s9915_s11 }
 0x3ce   :  { %2008 = vrot.lane.b32.xlu1 %v6688_v36, %s9909_s21  ;;  %1992 = vrot.lane.b32.xlu0 %v1464_v35, %s9907_s28  ;;  %v1034_v36 = vmul.f32 %v10185_v16, %v6075_v27 }
 0x3cf   :  { %v7325_v56 = vpop.permute.xlu2 %1739 }
 0x3d0   :  { %v7321_v13 = vpop.permute.xlu1 %1751  ;;  %v7323_v29 = vpop.permute.xlu0 %1735  ;;  %10228 = vst [vmem:[#allocation109_spill] sm:$0xff] %v7325_v56  ;;  %v1047_v5 = vadd.f32 %v1043_v9, %v1034_v36  ;;  %v10239_v9 = vld [vmem:[#allocation130_spill] sm:$0xff] }
 0x3d5   :  { %1962 = vrot.lane.b32.xlu2 %v6779_v46, %s9915_s11 }
 0x3d6   :  { %2056 = vrot.lane.b32.xlu1 %v1515_v23, %s9895_s29  ;;  %2040 = vrot.lane.b32.xlu0 %v6708_v28, %s9891_s7  ;;  %v1554_v23 = vmul.f32 %v6672_v39, %v1047_v5  ;;  %v1451_v28 = vmul.f32 %v6610_v8, %v1047_v5  ;;  %v10240_v5 = vld [vmem:[#allocation126_spill] sm:$0xff] }
 0x3d7   :  { %v7341_v56 = vpop.permute.xlu2 %1753 }
 0x3d8   :  { %v7337_v35 = vpop.permute.xlu1 %1799  ;;  %v7339_v12 = vpop.permute.xlu0 %1783  ;;  %10231 = vst [vmem:[#allocation110_spill] sm:$0xff] %v7341_v56  ;;  %v925_v56 = vmul.f32 %v10190_v40, %v10097_v45  ;;  %v1035_v40 = vmul.f32 %v10185_v16, %v10097_v45 }
 0x3d9   :  { %10229 = vst [vmem:[#allocation106_spill] sm:$0xff] %v7337_v35 }
 0x3da   :  { %10230 = vst [vmem:[#allocation75_spill] sm:$0xff] %v7339_v12 }
 0x3dd   :  { %1976 = vrot.lane.b32.xlu2 %v1451_v28, %s9913_s19 }
 0x3de   :  { %2104 = vrot.lane.b32.xlu1 %v1554_v23, %s10180_s20  ;;  %2088 = vrot.lane.b32.xlu0 %v6727_v61, %s9889_s25  ;;  %v10242_v23 = vld [vmem:[#allocation43_spill] sm:$0xff] }
 0x3df   :  { %v7351_v46 = vpop.permute.xlu2 %1767 }
 0x3e0   :  { %v7349_v50 = vpop.permute.xlu1 %1926  ;;  %v7353_v27 = vpop.permute.xlu0 %1910 }
 0x3e5   :  { %1990 = vrot.lane.b32.xlu2 %v6692_v34, %s9907_s28 }
 0x3e6   :  { %1611 = vrot.lane.b32.xlu0 %v6783_v59, %s9885_s5  ;;  %1579 = vrot.lane.b32.xlu1 %v6787_v44, %s9917_s9 }
 0x3e7   :  { %v7363_v8 = vpop.permute.xlu2 %1781 }
 0x3e8   :  { %v7361_v39 = vpop.permute.xlu1 %1974  ;;  %v7365_v61 = vpop.permute.xlu0 %1958 }
 0x3ed   :  { %2004 = vrot.lane.b32.xlu2 %v6696_v18, %s9909_s21  ;;  %v10238_v18 = vld [vmem:[#allocation129_spill] sm:$0xff] }
 0x3ee   :  { %1659 = vrot.lane.b32.xlu0 %v6791_v52, %s9913_s19  ;;  %1627 = vrot.lane.b32.xlu1 %v6795_v11, %s9911_s24  ;;  %v10235_v52 = vld [vmem:[#allocation132_spill] sm:$0xff] }
 0x3ef   :  { %v7373_v59 = vpop.permute.xlu2 %1787 }
 0x3f0   :  { %10232 = vst [vmem:[#allocation111_spill] sm:$0xff] %v7373_v59  ;;  %v7375_v44 = vpop.permute.xlu1 %2022  ;;  %v7377_v34 = vpop.permute.xlu0 %2006  ;;  %v969_v59 = vmul.f32 %v10176_v22, %v10097_v45 }
 0x3f1   :  { %10233 = vst [vmem:[#allocation53_spill] sm:$0xff] %v7375_v44 }
 0x3f2   :  { %10234 = vst [vmem:[#allocation113_spill] sm:$0xff] %v7377_v34 }
 0x3f5   :  { %2010 = vrot.lane.b32.xlu2 %v10235_v52, %s9909_s21 }
 0x3f6   :  { %1707 = vrot.lane.b32.xlu0 %v6803_v26, %s9905_s18  ;;  %1675 = vrot.lane.b32.xlu1 %v6807_v1, %s9907_s28  ;;  %v497_v1 = vsub.f32 0.0, %v10242_v23 }
 0x3f7   :  { %v7385_v36 = vpop.permute.xlu2 %1801 }
 0x3f8   :  { %10236 = vst [vmem:[#allocation114_spill] sm:$0xff] %v7385_v36  ;;  %v7387_v11 = vpop.permute.xlu1 %2070  ;;  %v7395_v26 = vpop.permute.xlu0 %2054  ;;  %v498_v52 = vmul.f32 1.442695, %v497_v1  ;;  %v934_v1 = vmul.f32 %v10191_v42, %v10102_v14  ;;  %v1044_v42 = vmul.f32 %v10186_v38, %v10102_v14 }
 0x3f9   :  { %10237 = vst [vmem:[#allocation112_spill] sm:$0xff] %v7387_v11  ;;  %v10246_v11 = vld [vmem:[#allocation124_spill] sm:$0xff] }
 0x3fa   :  { %10241 = vst [vmem:[#allocation115_spill] sm:$0xff] %v7395_v26  ;;  %5114 = vpow2.f32 %v498_v52  ;;  %v938_v26 = vadd.f32 %v934_v1, %v925_v56  ;;  %v10249_v56 = vld [vmem:[#allocation73_spill] sm:$0xff] }
 0x3fd   :  { %2024 = vrot.lane.b32.xlu2 %v10240_v5, %s9905_s18  ;;  %v978_v5 = vmul.f32 %v10181_v10, %v10102_v14  ;;  %v1387_v10 = vmul.f32 %v6647_v63, %v938_v26 }
 0x3fe   :  { %1755 = vrot.lane.b32.xlu0 %v10238_v18, %s9893_s26  ;;  %1723 = vrot.lane.b32.xlu1 %v10239_v9, %s9891_s7  ;;  %v10244_v18 = vld [vmem:[#allocation94_spill] sm:$0xff]  ;;  %v10245_v9 = vld [vmem:[#allocation131_spill] sm:$0xff] }
 0x3ff   :  { %v7398_v28 = vpop.permute.xlu2 %1894 }
 0x400   :  { %v7402_v36 = vpop.permute.xlu1 %2118  ;;  %v7416_v22 = vpop.permute.xlu0 %2102 }
 0x401   :  { %10243 = vst [vmem:[#allocation116_spill] sm:$0xff] %v7402_v36  ;;  %v5115_v44 = vpop.eup %5114 }
 0x402   :  { %10247 = vst [vmem:[#allocation117_spill] sm:$0xff] %v7416_v22  ;;  %v500_v16 = vadd.f32 1.0, %v5115_v44 }
 0x404   :  { %5116 = vrcp.f32 %v500_v16  ;;  %vm506_vm4 = vweird.f32 %v500_v16 }
 0x405   :  { %2038 = vrot.lane.b32.xlu2 %v10246_v11, %s9891_s7  ;;  %v10248_v11 = vld [vmem:[#allocation72_spill] sm:$0xff] }
 0x406   :  { %1803 = vrot.lane.b32.xlu0 %v10244_v18, %s10066_s17  ;;  %1771 = vrot.lane.b32.xlu1 %v10245_v9, %s9889_s25  ;;  %v982_v18 = vadd.f32 %v978_v5, %v969_v59  ;;  %v991_v52 = vmul.f32 %v10248_v11, %v10097_v45  ;;  %v1000_v59 = vmul.f32 %v10249_v56, %v10102_v14  ;;  %v10250_v5 = vld [vmem:[#allocation125_spill] sm:$0xff]  ;;  %v10253_v11 = vld [vmem:[#allocation74_spill] sm:$0xff] }
 0x407   :  { %v7418_v36 = vpop.permute.xlu2 %1908  ;;  %v10254_v56 = vld [vmem:[#allocation82_spill] sm:$0xff] }
 0x408   :  { %v1413_v9 = vmul.f32 %v6647_v63, %v982_v18  ;;  %v7434_v1 = vpop.permute.xlu1 %1593  ;;  %v1004_v35 = vadd.f32 %v1000_v59, %v991_v52  ;;  %v1516_v12 = vmul.f32 %v10253_v11, %v982_v18  ;;  %v1057_v44 = vmul.f32 %v10254_v56, %v10097_v45  ;;  %v10257_v56 = vld [vmem:[#allocation127_spill] sm:$0xff] }
 0x409   :  { %10251 = vst [vmem:[#allocation118_spill] sm:$0xff] %v7434_v1  ;;  %v1490_v18 = vmul.f32 %v10253_v11, %v938_v26 }
 0x40a   :  { %v1426_v34 = vmul.f32 %v6647_v63, %v1004_v35 }
 0x40d   :  { %2052 = vrot.lane.b32.xlu2 %v10250_v5, %s9895_s29  ;;  %v10255_v5 = vld [vmem:[#allocation89_spill] sm:$0xff] }
 0x40e   :  { %1930 = vrot.lane.b32.xlu0 %v1413_v9, %s9885_s5  ;;  %1898 = vrot.lane.b32.xlu1 %v1387_v10, %s9917_s9  ;;  %v1048_v9 = vadd.f32 %v1044_v42, %v1035_v40  ;;  %v7438_v10 = vpop.permute.xlu0 %1577  ;;  %v1066_v40 = vmul.f32 %v10255_v5, %v10102_v14 }
 0x40f   :  { %v7436_v22 = vpop.permute.xlu2 %1914 }
 0x410   :  { %10252 = vst [vmem:[#allocation93_spill] sm:$0xff] %v7436_v22  ;;  %v1452_v38 = vmul.f32 %v6647_v63, %v1048_v9  ;;  %v7452_v52 = vpop.permute.xlu1 %1641  ;;  %v1070_v59 = vadd.f32 %v1066_v40, %v1057_v44  ;;  %v5117_v22 = vpop.eup %5116  ;;  %v1529_v44 = vmul.f32 %v10253_v11, %v1004_v35  ;;  %v510_v35 = vand.u32 2147483647, %v500_v16 }
 0x411   :  { %vm507_vm3 = vweird.f32 %v5117_v22 }
 0x412   :  { %vm508_vm5 = vmor %vm506_vm4, %vm507_vm3  ;;  %vm511_vm6 = vcmp.eq.f32.partialorder %v510_v35, 8.507059e+37  ;;  %v1555_v35 = vmul.f32 %v10253_v11, %v1048_v9  ;;  %vm1855_vm3 = vcmask 719872   ;;  %vm1860_vm4 = vcmask 785408  }
 0x415   :  { %2058 = vrot.lane.b32.xlu2 %v1516_v12, %s9895_s29 }
 0x416   :  { %1978 = vrot.lane.b32.xlu0 %v1452_v38, %s9913_s19  ;;  %1946 = vrot.lane.b32.xlu1 %v1426_v34, %s9911_s24  ;;  %v1465_v38 = vmul.f32 %v6647_v63, %v1070_v59  ;;  %v7456_v1 = vpop.permute.xlu0 %1625  ;;  %v502_v34 = vmul.f32 %v5117_v22, %v500_v16  ;;  %v10259_v63 = vld [vmem:[#allocation136_spill] sm:$0xff] }
 0x417   :  { %v7450_v42 = vpop.permute.xlu2 %1928 }
 0x418   :  { %10256 = vst [vmem:[#allocation120_spill] sm:$0xff] %v7450_v42  ;;  %v503_v5 = vsub.f32 1.0, %v502_v34  ;;  %v7464_v14 = vpop.permute.xlu1 %1689  ;;  %v512_v34 = vand.u32 2147483648, %v500_v16 }
 0x419   :  { %10258 = vst [vmem:[#allocation121_spill] sm:$0xff] %v7464_v14 }
 0x41a   :  { %v504_v26 = vmul.f32 %v5117_v22, %v503_v5  ;;  %v1568_v5 = vmul.f32 %v10253_v11, %v1070_v59  ;;  %v7489_v59 = vld [vmem:[%s10261_s30] sm:$0x3] }
 0x41b   :  { %4806 = vpush %v7489_v59 }
 0x41d   :  { %2072 = vrot.lane.b32.xlu2 %v10257_v56, %s9893_s26  ;;  %v505_v56 = vadd.f32 %v5117_v22, %v504_v26  ;;  %v10264_v26 = vld [vmem:[#allocation128_spill] sm:$0xff] }
 0x41e   :  { %2026 = vrot.lane.b32.xlu0 %v1490_v18, %s9905_s18  ;;  %1994 = vrot.lane.b32.xlu1 %v1465_v38, %s9907_s28  ;;  %v7470_v40 = vpop.permute.xlu0 %1673  ;;  %v10260_v18 = vld [vmem:[#allocation90_spill] sm:$0xff] }
 0x41f   :  { %v7462_v12 = vpop.permute.xlu2 %1942 }
 0x420   :  { %v7477_v45 = vpop.permute.xlu1 %1737 }
 0x425   :  { %2086 = vrot.lane.b32.xlu2 %v10260_v18, %s9889_s25  ;;  %v513_v18 = vor.u32 1.1754944e-38, %v512_v34 }
 0x426   :  { %2074 = vrot.lane.b32.xlu0 %v1529_v44, %s9893_s26  ;;  %2042 = vrot.lane.b32.xlu1 %v10259_v63, %s9891_s7  ;;  %v509_v44 = vsel %vm508_vm5, %v5117_v22, %v505_v56  ;;  %v10263_v63 = vld [vmem:[#allocation137_spill] sm:$0xff]  ;;  %v7484_v14 = vpop.permute.xlu0 %1721  ;;  %v7493_v56 = vrot.slane %v7489_v59, 1  ;;  %vm1865_vm5 = vcmask 850944  }
 0x427   :  { %v7474_v38 = vpop.permute.xlu2 %1956  ;;  %v514_v42 = vsel %vm511_vm6, %v513_v18, %v509_v44  ;;  %v5025_v22 = vld [vmem:[%s10262_s14] ss:$0 sm:$0xff]  ;;  %vm1870_vm6 = vcmask 916480  }
 0x428   :  { %10268 = vst [vmem:[#allocation65_spill] sm:$0xff] %v7493_v56  ;;  %v516_v34 = vmul.f32 %v514_v42, %v10242_v23  ;;  %v10273_v23 = vld [vmem:[#allocation134_spill] sm:$0xff]  ;;  %v5227_v42 = vld [vmem:[%s10267_s22] ss:$0 sm:$0xff] }
 0x429   :  { %4808 = vpush %v7493_v56 }
 0x42d   :  { %2100 = vrot.lane.b32.xlu2 %v10264_v26, %s10180_s20  ;;  %v10272_v26 = vmov 1  }
 0x42e   :  { %2122 = vrot.lane.b32.xlu0 %v1568_v5, %s10066_s17  ;;  %2090 = vrot.lane.b32.xlu1 %v10263_v63, %s9889_s25  ;;  %v7501_v5 = vpop.permute.xlu1 %1785  ;;  %v5026_v63 = vld [vmem:[%s10265_s4] ss:$0 sm:$0xff]  ;;  %v7506_v18 = vpop.permute.xlu0 %1769 }
 0x42f   :  { %v7486_v16 = vpop.permute.xlu2 %1962  ;;  %10269 = vst [vmem:[#allocation122_spill] sm:$0xff] %v7501_v5 }
 0x430   :  { %10266 = vst [vmem:[#allocation123_spill] sm:$0xff] %v7486_v16 }
 0x431   :  { %10271 = vst [vmem:[#allocation132_spill] sm:$0xff] %v7506_v18 }
 0x435   :  { %2106 = vrot.lane.b32.xlu2 %v1555_v35, %s10180_s20 }
 0x436   :  { %3026 = vperm.xlu0 %4998, %v5025_v22   ;;  %518 = vrot.lane.b32.xlu1 %v516_v34, %s9909_s21  ;;  %v7514_v11 = vpop.permute.xlu1 %1912  ;;  %v7516_v34 = vpop.permute.xlu0 %1896 }
 0x437   :  { %v7503_v44 = vpop.permute.xlu2 %1976 }
 0x438   :  { %10270 = vst [vmem:[#allocation63_spill] sm:$0xff] %v7503_v44 }
 0x43d   :  { %2120 = vrot.lane.b32.xlu2 %v10273_v23, %s10066_s17  ;;  %v10275_v23 = vld [vmem:[#allocation66_spill] sm:$0xff] }
 0x43e   :  { %5003 = vset.pattern.permute.xlu0 %v10272_v26  ;;  %2988 = vperm.xlu1 %5002, %v5026_v63   ;;  %v7521_v16 = vpop.permute.xlu1 %1960  ;;  %v7523_v5 = vpop.permute.xlu0 %1944 }
 0x43f   :  { %2631 = vperm.xlu0 %5003, %v5227_v42   ;;  %v7512_v9 = vpop.permute.xlu2 %1990  ;;  %v10277_v42 = vmov 0  }
 0x445   :  { %3072 = vperm.xlu2 %5000, %v5026_v63  }
 0x446   :  { %5004 = vset.pattern.permute.xlu1 %v10272_v26  ;;  %v7535_v63 = vpop.permute.xlu1 %2008  ;;  %v7541_v26 = vpop.permute.xlu0 %1992 }
 0x447   :  { %3110 = vperm.xlu1 %5004, %v5025_v22   ;;  %3176 = vrot.lane.b32.xlu0 %v7493_v56, %s10274_s8  ;;  %v2005_v35 = vpop.permute.xlu2 %2004  ;;  %10279 = vst [vmem:[#allocation130_spill] sm:$0xff] %v7535_v63 }
 0x448   :  { %10281 = vst [vmem:[#allocation126_spill] sm:$0xff] %v7541_v26 }
 0x44c   :  { %s8048_s27 = spop %4806 }
 0x44d   :  { %478 = vrot.lane.b32.xlu2 %v10275_v23, %s9917_s9 }
 0x44e   :  { %5006 = vset.pattern.permute.xlu2 %v10277_v42  ;;  %v7550_v44 = vpop.permute.xlu1 %2056 }
 0x44f   :  { %3169 = vrot.lane.b32.xlu1 %v7489_v59, %s10274_s8  ;;  %3192 = vrot.lane.b32.xlu0 %v7493_v56, %s10276_s6  ;;  %v7532_v22 = vpop.permute.xlu2 %2010  ;;  %10284 = vst [vmem:[#allocation94_spill] sm:$0xff] %v7550_v44 }
 0x450   :  { %10278 = vst [vmem:[#allocation129_spill] sm:$0xff] %v7532_v22  ;;  %5005 = vset.pattern.permute.xlu1 %v10277_v42  ;;  %v10283_v22 = vld [vmem:[#allocation88_spill] sm:$0xff] }
 0x451   :  { %v1809_v42 = vsel %vm9955_vm7, %v10283_v22, %v7138_v55 }
 0x452   :  { %v1813_v26 = vsel %vm9883_vm0, %v1809_v42, %v7134_v30  ;;  %v10286_v42 = vld [vmem:[#allocation92_spill] sm:$0xff] }
 0x453   :  { %v1818_v18 = vsel %vm9882_vm11, %v1813_v26, %v7136_v60  ;;  %v2128_v60 = vsel %vm9955_vm7, %v10286_v42, %v7208_v3 }
 0x454   :  { %v1822_v55 = vsel %vm9875_vm8, %v1818_v18, %v7153_v25  ;;  %v2132_v18 = vsel %vm9883_vm0, %v2128_v60, %v7418_v36 }
 0x455   :  { %v1827_v22 = vsel %vm9874_vm12, %v1822_v55, %v7196_v31 }
 0x456   :  { %v7568_v44 = vpop.permute.xlu1 %2104  ;;  %v1832_v30 = vsel %vm9877_vm13, %v1827_v22, %v7151_v57  ;;  %v2136_v57 = vsel %vm9882_vm11, %v2132_v18, %v7206_v15 }
 0x457   :  { %3185 = vrot.lane.b32.xlu1 %v7489_v59, %s10276_s6  ;;  %3208 = vrot.lane.b32.xlu0 %v7493_v56, %s10280_s2  ;;  %v7543_v23 = vpop.permute.xlu2 %2024  ;;  %v1837_v25 = vsel %vm9876_vm15, %v1832_v30, %v7169_v6  ;;  %v2140_v6 = vsel %vm9875_vm8, %v2136_v57, %v7224_v54  ;;  %v10288_v57 = vld [vmem:[#allocation86_spill] sm:$0xff] }
 0x458   :  { %10282 = vst [vmem:[#allocation43_spill] sm:$0xff] %v7543_v23  ;;  %v7558_v23 = vpop.permute.xlu0 %2040  ;;  %v1841_v31 = vsel %vm9884_vm14, %v1837_v25, %v7258_v20 }
 0x459   :  { %v1846_v3 = vsel %vm1845_vm1, %v1841_v31, %v7167_v0 }
 0x45a   :  { %v1851_v20 = vsel %vm1850_vm2, %v1846_v3, %v7181_v32  ;;  %v1810_v3 = vsel %vm9955_vm7, %v10288_v57, %v7059_v51  ;;  %s8061_s14 = spop %4808 }
 0x45b   :  { %v1856_v15 = vsel %vm1855_vm3, %v1851_v20, %v7312_v62 }
 0x45c   :  { %v1861_v54 = vsel %vm1860_vm4, %v1856_v15, %v7179_v58 }
 0x45e   :  { %v7593_v36 = vpop.permute.xlu1 %1579 }
 0x45f   :  { %3201 = vrot.lane.b32.xlu1 %v7489_v59, %s10280_s2  ;;  %3224 = vrot.lane.b32.xlu0 %v7493_v56, %s10285_s10  ;;  %v7554_v63 = vpop.permute.xlu2 %2038 }
 0x460   :  { %v7575_v26 = vpop.permute.xlu0 %2088 }
 0x466   :  { %v7616_v60 = vpop.permute.xlu1 %1627 }
 0x467   :  { %3217 = vrot.lane.b32.xlu1 %v7489_v59, %s10285_s10  ;;  %v2053_v56 = vpop.permute.xlu2 %2052 }
 0x468   :  { %v7601_v22 = vpop.permute.xlu0 %1611 }
 0x46e   :  { %v7631_v31 = vpop.permute.xlu1 %1675 }
 0x46f   :  { %3233 = vrot.lane.b32.xlu1 %v7489_v59, %s10287_s3  ;;  %v7587_v55 = vpop.permute.xlu2 %2058  ;;  %v2144_v59 = vsel %vm9874_vm12, %v2140_v6, %v7474_v38  ;;  %v1866_v38 = vsel %vm1865_vm5, %v1861_v54, %v7194_v37 }
 0x470   :  { %v2148_v0 = vsel %vm9877_vm13, %v2144_v59, %v7222_v47  ;;  %v1871_v42 = vsel %vm1870_vm6, %v1866_v38, %v7363_v8  ;;  %v7622_v25 = vpop.permute.xlu0 %1659 }
 0x471   :  { %v2152_v32 = vsel %vm9876_vm15, %v2148_v0, %v7241_v41  ;;  %v1876_v47 = vsel %vm9881_vm10, %v1871_v42, %v7192_v2  ;;  %v10289_v0 = vld [vmem:[#allocation81_spill] sm:$0xff] }
 0x472   :  { %v2156_v62 = vsel %vm9884_vm14, %v2152_v32, %v2005_v35  ;;  %v1880_v35 = vmul.f32 1.442695, %v1876_v47 }
 0x473   :  { %v2160_v58 = vsel %vm1845_vm1, %v2156_v62, %v7239_v49 }
 0x474   :  { %v2164_v37 = vsel %vm1850_vm2, %v2160_v58, %v7256_v7  ;;  %5118 = vpow2.f32 %v1880_v35  ;;  %v1814_v7 = vsel %vm9883_vm0, %v1810_v3, %v7284_v48  ;;  %v10290_v58 = vld [vmem:[#allocation69_spill] sm:$0xff] }
 0x475   :  { %v2168_v18 = vsel %vm1855_vm3, %v2164_v37, %v2053_v56  ;;  %v2129_v47 = vsel %vm9955_vm7, %v10290_v58, %v7398_v28  ;;  %v10291_v37 = vld [vmem:[#allocation67_spill] sm:$0xff] }
 0x476   :  { %v2172_v8 = vsel %vm1860_vm4, %v2168_v18, %v7254_v21  ;;  %v7658_v32 = vpop.permute.xlu1 %1723 }
 0x477   :  { %v7607_v30 = vpop.permute.xlu2 %2072  ;;  %v2176_v49 = vsel %vm1865_vm5, %v2172_v8, %v7268_v19  ;;  %v1819_v19 = vsel %vm9882_vm11, %v1814_v7, %v7282_v43  ;;  %v2133_v8 = vsel %vm9883_vm0, %v2129_v47, %v7353_v27  ;;  %v10296_v47 = vld [vmem:[#allocation106_spill] sm:$0xff] }
 0x478   :  { %v7641_v56 = vpop.permute.xlu0 %1707  ;;  %v1823_v48 = vsel %vm9875_vm8, %v1819_v19, %v10289_v0  ;;  %v2137_v28 = vsel %vm9882_vm11, %v2133_v8, %v7349_v50 }
 0x479   :  { %v1828_v54 = vsel %vm9874_vm12, %v1823_v48, %v7297_v17  ;;  %v2141_v3 = vsel %vm9875_vm8, %v2137_v28, %v7462_v12  ;;  %vm2347_vm8 = vcmask 1043456  }
 0x47a   :  { %v7648_v59 = vpop.eup %5118  ;;  %v1833_v62 = vsel %vm9877_vm13, %v1828_v54, %v7295_v24  ;;  %v2145_v19 = vsel %vm9874_vm12, %v2141_v3, %v7365_v61  ;;  %v10293_v61 = vld [vmem:[#allocation75_spill] sm:$0xff]  ;;  %vm2345_vm12 = vcmask 1042432  }
 0x47b   :  { %v1838_v35 = vsel %vm9876_vm15, %v1833_v62, %v10291_v37  ;;  %v2149_v0 = vsel %vm9877_vm13, %v2145_v19, %v7361_v39  ;;  %v10294_v62 = vld [vmem:[#allocation113_spill] sm:$0xff]  ;;  %vm10295_vm13 = vcmask 1041408  }
 0x47c   :  { %v1842_v18 = vsel %vm9884_vm14, %v1838_v35, %v7310_v4  ;;  %v10292_v4 = vld [vmem:[#allocation105_spill] sm:$0xff] }
 0x47f   :  { %v7624_v41 = vpop.permute.xlu2 %2086 }
 0x480   :  { %v7663_v42 = vpop.permute.xlu0 %1755 }
 0x487   :  { %v2101_v2 = vpop.permute.xlu2 %2100 }
 0x488   :  { %v2180_v6 = vsel %vm1870_vm6, %v2176_v49, %v2101_v2  ;;  %v1847_v49 = vsel %vm1845_vm1, %v1842_v18, %v7308_v33  ;;  %v7678_v2 = vpop.permute.xlu1 %1771  ;;  %v7687_v27 = vpop.permute.xlu0 %1803  ;;  %v10297_v18 = vld [vmem:[#allocation53_spill] sm:$0xff] }
 0x489   :  { %v7645_v21 = vsel %vm9881_vm10, %v2180_v6, %v7266_v53  ;;  %v1852_v7 = vsel %vm1850_vm2, %v1847_v49, %v10292_v4 }
 0x48a   :  { %v2189_v20 = vrot.slane %v7645_v21, 7 }
 0x48c   :  { %v2191_v51 = vmul.f32 %v7648_v59, %v2189_v20  ;;  %v1857_v20 = vsel %vm1855_vm3, %v1852_v7, %v7323_v29  ;;  %v2153_v29 = vsel %vm9876_vm15, %v2149_v0, %v7512_v9  ;;  %vm9878_vm15 = vcmask 1044480  }
 0x48d   :  { %v1862_v50 = vsel %vm1860_vm4, %v1857_v20, %v7321_v13  ;;  %v2157_v13 = vsel %vm9884_vm14, %v2153_v29, %v10294_v62  ;;  %v10302_v62 = vld [vmem:[#allocation116_spill] sm:$0xff] }
 0x48e   :  { %v2192_v15 = vadd.f32 %v2191_v51, %v7645_v21  ;;  %v1867_v12 = vsel %vm1865_vm5, %v1862_v50, %v7351_v46  ;;  %v2161_v8 = vsel %vm1845_vm1, %v2157_v13, %v10297_v18 }
 0x48f   :  { %v2165_v49 = vsel %vm1850_vm2, %v2161_v8, %v7554_v63 }
 0x490   :  { %v2194_v53 = vrot.slane %v2192_v15, 7  ;;  %v7703_v54 = vpop.permute.xlu1 %1898  ;;  %v2343_v39 = vsel %vm602_vm9, %v7645_v21, %v2192_v15  ;;  %v7713_v58 = vpop.permute.xlu0 %1930 }
 0x492   :  { %v2196_v38 = vmul.f32 %v7648_v59, %v2194_v53 }
 0x494   :  { %v2197_v43 = vadd.f32 %v2196_v38, %v7645_v21  ;;  %v1872_v38 = vsel %vm1870_vm6, %v1867_v12, %v10293_v61 }
 0x495   :  { %v1877_v37 = vsel %vm9881_vm10, %v1872_v38, %v10296_v47 }
 0x496   :  { %v2199_v17 = vrot.slane %v2197_v43, 7  ;;  %v2344_v9 = vsel %vm10295_vm13, %v2343_v39, %v2197_v43  ;;  %v1882_v3 = vmul.f32 1.442695, %v1877_v37  ;;  %vm9880_vm13 = vcmask 1045504  }
 0x498   :  { %v2201_v24 = vmul.f32 %v7648_v59, %v2199_v17  ;;  %v7730_v20 = vpop.permute.xlu1 %1946  ;;  %5120 = vpow2.f32 %v1882_v3  ;;  %v7739_v12 = vpop.permute.xlu0 %1978 }
 0x49a   :  { %v2202_v57 = vadd.f32 %v2201_v24, %v7645_v21 }
 0x49c   :  { %v2204_v6 = vrot.slane %v2202_v57, 7  ;;  %v2346_v17 = vsel %vm2345_vm12, %v2344_v9, %v2202_v57  ;;  %v10303_v9 = vld [vmem:[#allocation118_spill] sm:$0xff] }
 0x49e   :  { %v2206_v33 = vmul.f32 %v7648_v59, %v2204_v6  ;;  %v10298_v6 = vld [vmem:[#allocation115_spill] sm:$0xff]  ;;  %v7747_v38 = vpop.eup %5120 }
 0x49f   :  { %v2169_v4 = vsel %vm1855_vm3, %v2165_v49, %v10298_v6  ;;  %v10307_v6 = vld [vmem:[#allocation91_spill] sm:$0xff] }
 0x4a0   :  { %v2207_v51 = vadd.f32 %v2206_v33, %v7645_v21  ;;  %v10299_v33 = vld [vmem:[#allocation112_spill] sm:$0xff]  ;;  %v7764_v39 = vpop.permute.xlu1 %1994 }
 0x4a1   :  { %v2173_v63 = vsel %vm1860_vm4, %v2169_v4, %v10299_v33  ;;  %v10310_v33 = vld [vmem:[#allocation77_spill] sm:$0xff] }
 0x4a2   :  { %v2209_v48 = vrot.slane %v2207_v51, 7  ;;  %v2348_v24 = vsel %vm2347_vm8, %v2346_v17, %v2207_v51  ;;  %v7735_v51 = vpop.permute.xlu2 %2106  ;;  %v2177_v50 = vsel %vm1865_vm5, %v2173_v63, %v7624_v41  ;;  %v10301_v41 = vld [vmem:[#allocation83_spill] sm:$0xff]  ;;  %v10304_v17 = vld [vmem:[#allocation80_spill] sm:$0xff] }
 0x4a4   :  { %v2211_v53 = vmul.f32 %v7648_v59, %v2209_v48  ;;  %v10300_v48 = vld [vmem:[#allocation117_spill] sm:$0xff] }
 0x4a5   :  { %v2181_v29 = vsel %vm1870_vm6, %v2177_v50, %v10300_v48 }
 0x4a6   :  { %v2212_v46 = vadd.f32 %v2211_v53, %v7645_v21  ;;  %v7761_v13 = vsel %vm9881_vm10, %v2181_v29, %v10302_v62  ;;  %vm10309_vm10 = vcmask 457728  }
 0x4a8   :  { %v2214_v35 = vrot.slane %v2212_v46, 7  ;;  %v2350_v28 = vsel %vm9878_vm15, %v2348_v24, %v2212_v46  ;;  %vm9879_vm15 = vcmask 1046528  }
 0x4aa   :  { %v2216_v15 = vmul.f32 %v7648_v59, %v2214_v35  ;;  %v7768_v35 = vpop.permute.xlu2 %2120 }
 0x4ac   :  { %v2217_v43 = vadd.f32 %v2216_v15, %v7645_v21 }
 0x4ae   :  { %v2219_v57 = vrot.slane %v2217_v43, 7  ;;  %v2352_v7 = vsel %vm9880_vm13, %v2350_v28, %v2217_v43  ;;  %vm10306_vm13 = vcmask 326656   ;;  %v7796_v43 = vpop.permute.xlu1 %2042 }
 0x4b0   :  { %v2221_v19 = vmul.f32 %v7648_v59, %v2219_v57  ;;  %v1811_v59 = vsel %vm9955_vm7, %v10301_v41, %v7438_v10  ;;  %v7772_v10 = vpop.permute.xlu0 %2026  ;;  %v10313_v41 = vld [vmem:[#allocation121_spill] sm:$0xff] }
 0x4b1   :  { %v1815_v47 = vsel %vm9883_vm0, %v1811_v59, %v10303_v9  ;;  %v3103_v9 = vstv %s7809_s1 }
 0x4b2   :  { %v2222_v0 = vadd.f32 %v2221_v19, %v7645_v21  ;;  %v1820_v18 = vsel %vm9882_vm11, %v1815_v47, %v10304_v17  ;;  %v3073_v57 = vpop.permute.xlu2 %3072  ;;  %v10311_v19 = vld [vmem:[#allocation151_spill] sm:$0xff] }
 0x4b3   :  { %v7806_v63 = vmul.f32 %v3073_v57, %v10310_v33  ;;  %v3076_v50 = vmul.f32 %v3073_v57, %v10311_v19 }
 0x4b4   :  { %v2224_v53 = vrot.slane %v2222_v0, 7  ;;  %v7745_v61 = vsel %vm9879_vm15, %v2352_v7, %v2222_v0  ;;  %vm10305_vm15 = vcmask 261120  }
 0x4b5   :  { %2418 = vrot.lane.b32.xlu0 %v7745_v61, %s10180_s20  ;;  %2438 = vrot.lane.b32.xlu1 %v7745_v61, %s9889_s25  ;;  %v1824_v24 = vsel %vm10305_vm15, %v1820_v18, %v7456_v1  ;;  %vm10308_vm15 = vcmask 392192   ;;  %v3085_v29 = vrot.slane %v7806_v63, 7  ;;  %v3106_v17 = vmul.f32 %v3103_v9, %v3076_v50 }
 0x4b6   :  { %v2226_v21 = vmul.f32 %v7747_v38, %v2224_v53  ;;  %2398 = vrot.lane.b32.xlu2 %v7745_v61, %s10066_s17  ;;  %v1829_v15 = vsel %vm10306_vm13, %v1824_v24, %v7452_v52  ;;  %v3086_v53 = vrot.slane %v3076_v50, 7  ;;  %vm10317_vm13 = vcmask 261120  }
 0x4b7   :  { %v1834_v4 = vsel %vm10308_vm15, %v1829_v15, %v10307_v6  ;;  %v7841_v15 = vpop.permute.xlu1 %2090  ;;  %vm10319_vm15 = vcmask 326656  }
 0x4b8   :  { %v2227_v46 = vadd.f32 %v2226_v21, %v7761_v13  ;;  %v1839_v7 = vsel %vm10309_vm10, %v1834_v4, %v7470_v40  ;;  %v7811_v0 = vpop.permute.xlu0 %2074  ;;  %vm10312_vm10 = vcmask 1041408   ;;  %v10314_v21 = vld [vmem:[#allocation133_spill] sm:$0xff]  ;;  %v10316_v4 = vld [vmem:[#allocation120_spill] sm:$0xff] }
 0x4b9   :  { %v1843_v59 = vsel %vm9884_vm14, %v1839_v7, %v10313_v41  ;;  %v2130_v62 = vsel %vm9955_vm7, %v10314_v21, %v7516_v34  ;;  %v10320_v41 = vld [vmem:[#allocation132_spill] sm:$0xff] }
 0x4ba   :  { %v2229_v37 = vrot.slane %v2227_v46, 7 }
 0x4bc   :  { %v2231_v8 = vmul.f32 %v7747_v38, %v2229_v37  ;;  %v3087_v37 = vsel %vm602_vm9, %v3085_v29, %v3086_v53 }
 0x4bd   :  { %2478 = vrot.lane.b32.xlu0 %v7745_v61, %s9895_s29  ;;  %2498 = vrot.lane.b32.xlu1 %v7745_v61, %s9891_s7 }
 0x4be   :  { %v2232_v49 = vadd.f32 %v2231_v8, %v7761_v13  ;;  %2458 = vrot.lane.b32.xlu2 %v7745_v61, %s9893_s26  ;;  %v10315_v8 = vld [vmem:[#allocation107_spill] sm:$0xff] }
 0x4bf   :  { %v1848_v24 = vsel %vm1845_vm1, %v1843_v59, %v10315_v8  ;;  %v7871_v21 = vpop.permute.xlu1 %518  ;;  %v10324_v8 = vld [vmem:[#allocation126_spill] sm:$0xff] }
 0x4c0   :  { %v2234_v28 = vrot.slane %v2232_v49, 7  ;;  %v2355_v3 = vsel %vm602_vm9, %v2227_v46, %v2232_v49  ;;  %v3094_v46 = vstv %s7798_s15  ;;  %v2134_v49 = vsel %vm9883_vm0, %v2130_v62, %v7514_v11  ;;  %v10321_v62 = vld [vmem:[#allocation63_spill] sm:$0xff] }
 0x4c1   :  { %v3097_v18 = vmul.f32 %v3094_v46, %v3087_v37  ;;  %v2138_v57 = vsel %vm9882_vm11, %v2134_v49, %v10316_v4  ;;  %v10326_v49 = vld [vmem:[#allocation114_spill] sm:$0xff] }
 0x4c2   :  { %v2236_v1 = vmul.f32 %v7747_v38, %v2234_v28  ;;  %v1853_v28 = vsel %vm1850_vm2, %v1848_v24, %v7484_v14  ;;  %v2142_v14 = vsel %vm10317_vm13, %v2138_v57, %v7523_v5  ;;  %vm10325_vm13 = vcmask 457728   ;;  %v10330_v57 = vld [vmem:[#allocation43_spill] sm:$0xff] }
 0x4c3   :  { %v1858_v11 = vsel %vm1855_vm3, %v1853_v28, %v7477_v45  ;;  %v2146_v53 = vsel %vm10319_vm15, %v2142_v14, %v7521_v16  ;;  %vm10327_vm15 = vcmask 982016   ;;  %v10328_v28 = vld [vmem:[#allocation130_spill] sm:$0xff] }
 0x4c4   :  { %v2237_v52 = vadd.f32 %v2236_v1, %v7761_v13 }
 0x4c5   :  { %2658 = vrot.lane.b32.xlu0 %v7745_v61, %s9907_s28  ;;  %2638 = vrot.lane.b32.xlu1 %v7745_v61, %s9909_s21 }
 0x4c6   :  { %v2239_v40 = vrot.slane %v2237_v52, 7  ;;  %v2356_v48 = vsel %vm10312_vm10, %v2355_v3, %v2237_v52  ;;  %2518 = vrot.lane.b32.xlu2 %v7745_v61, %s9905_s18  ;;  %v7845_v3 = vadd.f32 %v3106_v17, %v3097_v18  ;;  %v7861_v52 = vpop.permute.xlu0 %2122  ;;  %vm10322_vm10 = vcmask 392192   ;;  %v10323_v17 = vld [vmem:[#allocation122_spill] sm:$0xff] }
 0x4c8   :  { %v2241_v47 = vmul.f32 %v7747_v38, %v2239_v40  ;;  %v10318_v40 = vld [vmem:[#allocation110_spill] sm:$0xff] }
 0x4ca   :  { %v2242_v34 = vadd.f32 %v2241_v47, %v7761_v13  ;;  %v2150_v47 = vsel %vm10322_vm10, %v2146_v53, %v10321_v62  ;;  %vm10329_vm10 = vcmask 1044480   ;;  %v3017_v62 = vstv %s7793_s13 }
 0x4cb   :  { %v2154_v24 = vsel %vm10325_vm13, %v2150_v47, %v10324_v8  ;;  %vm10332_vm13 = vcmask 1045504  }
 0x4cc   :  { %v2244_v1 = vrot.slane %v2242_v34, 7  ;;  %v2357_v6 = vsel %vm2345_vm12, %v2356_v48, %v2242_v34  ;;  %v1863_v48 = vsel %vm1860_vm4, %v1858_v11, %v10318_v40 }
 0x4cd   :  { %2738 = vrot.lane.b32.xlu0 %v7745_v61, %s9885_s5  ;;  %2678 = vrot.lane.b32.xlu1 %v7745_v61, %s9913_s19  ;;  %v1868_v45 = vsel %vm1865_vm5, %v1863_v48, %v10320_v41 }
 0x4ce   :  { %v2246_v7 = vmul.f32 %v7747_v38, %v2244_v1  ;;  %2698 = vrot.lane.b32.xlu2 %v7745_v61, %s9915_s11  ;;  %v1873_v18 = vsel %vm1870_vm6, %v1868_v45, %v10323_v17  ;;  %v2158_v1 = vsel %vm9884_vm14, %v2154_v24, %v10328_v28  ;;  %v3027_v14 = vpop.permute.xlu0 %3026  ;;  %v10333_v24 = vld [vmem:[#allocation94_spill] sm:$0xff] }
 0x4cf   :  { %v1878_v34 = vsel %vm10327_vm15, %v1873_v18, %v10326_v49  ;;  %v2162_v11 = vsel %vm1845_vm1, %v2158_v1, %v10330_v57  ;;  %vm10335_vm15 = vcmask 1046528  }
 0x4d0   :  { %v2247_v50 = vadd.f32 %v2246_v7, %v7761_v13  ;;  %v1884_v40 = vmul.f32 1.442695, %v1878_v34  ;;  %v2166_v41 = vsel %vm1850_vm2, %v2162_v11, %v7558_v23  ;;  %v3090_v11 = vsel %vm602_vm9, 0.0, %v3085_v29 }
 0x4d1   :  { %v2170_v23 = vsel %vm1855_vm3, %v2166_v41, %v10333_v24 }
 0x4d2   :  { %v2249_v59 = vrot.slane %v2247_v50, 7  ;;  %v2358_v5 = vsel %vm2347_vm8, %v2357_v6, %v2247_v50  ;;  %v2989_v50 = vpop.permute.xlu1 %2988  ;;  %5122 = vpow2.f32 %v1884_v40  ;;  %v2174_v34 = vsel %vm1860_vm4, %v2170_v23, %v7607_v30  ;;  %v10338_v23 = vld [vmem:[#allocation87_spill] sm:$0xff] }
 0x4d3   :  { %v2991_v48 = vmul.f32 %v2989_v50, %v10310_v33  ;;  %v2992_v53 = vmul.f32 %v2989_v50, %v10311_v19  ;;  %v2178_v40 = vsel %vm1865_vm5, %v2174_v34, %v7575_v26 }
 0x4d4   :  { %v2251_v37 = vmul.f32 %v7747_v38, %v2249_v59  ;;  %v3009_v59 = vstv %s7788_s0 }
 0x4d5   :  { %2758 = vrot.lane.b32.xlu1 %v7745_v61, %s9887_s23  ;;  %v3002_v47 = vrot.slane %v2992_v53, 7  ;;  %v3020_v1 = vmul.f32 %v3017_v62, %v2992_v53 }
 0x4d6   :  { %v2252_v16 = vadd.f32 %v2251_v37, %v7761_v13  ;;  %2718 = vrot.lane.b32.xlu2 %v7745_v61, %s9911_s24  ;;  %v10331_v37 = vld [vmem:[#allocation135_spill] sm:$0xff]  ;;  %v7921_v30 = vpop.permute.xlu0 %2631 }
 0x4d7   :  { %v1812_v17 = vsel %vm9955_vm7, %v10331_v37, %v7593_v36 }
 0x4d8   :  { %v2254_v6 = vrot.slane %v2252_v16, 7  ;;  %v2359_v4 = vsel %vm10329_vm10, %v2358_v5, %v2252_v16  ;;  %v3001_v5 = vrot.slane %v2991_v48, 7  ;;  %vm10336_vm10 = vcmask 261120  }
 0x4da   :  { %v2256_v7 = vmul.f32 %v7747_v38, %v2254_v6  ;;  %v3003_v16 = vsel %vm602_vm9, %v3001_v5, %v3002_v47  ;;  %v3006_v49 = vsel %vm602_vm9, 0.0, %v3001_v5  ;;  %v10334_v6 = vld [vmem:[#allocation103_spill] sm:$0xff] }
 0x4db   :  { %v3012_v36 = vmul.f32 %v3009_v59, %v3003_v16 }
 0x4dc   :  { %v2257_v45 = vadd.f32 %v2256_v7, %v7761_v13  ;;  %v3011_v7 = vmul.f32 %v3009_v59, %v3006_v49  ;;  %v3096_v59 = vmul.f32 %v3094_v46, %v3090_v11 }
 0x4dd   :  { %v3022_v50 = vadd.f32 %v3020_v1, %v3012_v36 }
 0x4de   :  { %v2259_v18 = vrot.slane %v2257_v45, 7  ;;  %v2360_v8 = vsel %vm10332_vm13, %v2359_v4, %v2257_v45  ;;  %2778 = vrot.lane.b32.xlu2 %v7745_v61, %s9917_s9  ;;  %v1816_v4 = vsel %vm9883_vm0, %v1812_v17, %v10334_v6  ;;  %v3019_v45 = vmul.f32 %v3017_v62, %v2991_v48 }
 0x4df   :  { %v7926_v5 = vadd.f32 %v3027_v14, %v3022_v50  ;;  %v1821_v29 = vsel %vm9882_vm11, %v1816_v4, %v7601_v22  ;;  %v2182_v48 = vsel %vm1870_vm6, %v2178_v40, %v7568_v44  ;;  %vm10337_vm13 = vcmask 982016  }
 0x4e0   :  { %v2261_v28 = vmul.f32 %v7747_v38, %v2259_v18  ;;  %v3111_v38 = vpop.permute.xlu1 %3110  ;;  %v3021_v47 = vadd.f32 %v3019_v45, %v3011_v7  ;;  %v1825_v22 = vsel %vm10336_vm10, %v1821_v29, %v7616_v60  ;;  %v7951_v46 = vsel %vm10337_vm13, %v2182_v48, %v7768_v35  ;;  %v3177_v35 = vpop.permute.xlu0 %3176  ;;  %v10343_v7 = vld [vmem:[#allocation138_spill] sm:$0xff] }
 0x4e1   :  { %v7935_v26 = vadd.f32 %v3111_v38, %v7845_v3  ;;  %v3032_v37 = vsub.f32 0.0, %v7926_v5  ;;  %v3105_v3 = vmul.f32 %v3103_v9, %v7806_v63  ;;  %vm10340_vm10 = vcmask 392192  }
 0x4e2   :  { %v2262_v57 = vadd.f32 %v2261_v28, %v7761_v13  ;;  %v7928_v13 = vpop.eup %5122  ;;  %v7960_v34 = vadd.f32 %v3027_v14, %v3021_v47  ;;  %vm10341_vm13 = vcmask 457728   ;;  %v2131_v50 = vsel %vm9955_vm7, %v10343_v7, %v7703_v54  ;;  %v10344_v47 = vld [vmem:[#allocation93_spill] sm:$0xff] }
 0x4e3   :  { %v3116_v44 = vsub.f32 0.0, %v7935_v26  ;;  %v3035_v18 = vmul.f32 1.442695, %v3032_v37  ;;  %v2135_v54 = vsel %vm9883_vm0, %v2131_v50, %v10344_v47 }
 0x4e4   :  { %v2264_v41 = vrot.slane %v2262_v57, 7  ;;  %v7924_v53 = vsel %vm10335_vm15, %v2360_v8, %v2262_v57  ;;  %v3107_v8 = vadd.f32 %v3105_v3, %v3096_v59  ;;  %vm10339_vm15 = vcmask 326656   ;;  %v10342_v57 = vld [vmem:[#allocation96_spill] sm:$0xff] }
 0x4e5   :  { %2400 = vrot.lane.b32.xlu0 %v7924_v53, %s10066_s17  ;;  %2420 = vrot.lane.b32.xlu1 %v7924_v53, %s10180_s20  ;;  %v3119_v24 = vmul.f32 1.442695, %v3116_v44  ;;  %v1830_v16 = vsel %vm10339_vm15, %v1825_v22, %v10338_v23  ;;  %5124 = vpow2.f32 %v3035_v18  ;;  %v3031_v1 = vsub.f32 0.0, %v7960_v34  ;;  %v10347_v23 = vld [vmem:[#allocation109_spill] sm:$0xff] }
 0x4e6   :  { %v2266_v62 = vmul.f32 %v7928_v13, %v2264_v41  ;;  %2440 = vrot.lane.b32.xlu2 %v7924_v53, %s9889_s25  ;;  %v7962_v60 = vadd.f32 %v3111_v38, %v3107_v8  ;;  %v1835_v9 = vsel %vm10340_vm10, %v1830_v16, %v7622_v25  ;;  %vm10345_vm15 = vcmask 1041408  }
 0x4e7   :  { %5126 = vpow2.f32 %v3119_v24  ;;  %v1840_v14 = vsel %vm10341_vm13, %v1835_v9, %v7631_v31  ;;  %v3033_v40 = vmul.f32 1.442695, %v3031_v1  ;;  %v2139_v18 = vsel %vm9882_vm11, %v2135_v54, %v7713_v58  ;;  %v10348_v9 = vld [vmem:[#allocation123_spill] sm:$0xff] }
 0x4e8   :  { %v2267_v17 = vadd.f32 %v2266_v62, %v7951_v46  ;;  %v3170_v28 = vpop.permute.xlu1 %3169  ;;  %v3115_v25 = vsub.f32 0.0, %v7962_v60  ;;  %v1844_v11 = vsel %vm9884_vm14, %v1840_v14, %v10342_v57  ;;  %v3193_v29 = vpop.permute.xlu0 %3192  ;;  %vm10346_vm10 = vcmask 261120  }
 0x4e9   :  { %4810 = vpush %v3170_v28  ;;  %v1849_v62 = vsel %vm1845_vm1, %v1844_v11, %v7641_v56  ;;  %vm10349_vm13 = vcmask 326656  }
 0x4ea   :  { %v2269_v49 = vrot.slane %v2267_v17, 7  ;;  %4812 = vpush %v3177_v35  ;;  %v3117_v45 = vmul.f32 1.442695, %v3115_v25  ;;  %v1854_v56 = vsel %vm1850_vm2, %v1849_v62, %v7658_v32 }
 0x4eb   :  { %v5125_v4 = vpop.eup %5124  ;;  %v1859_v16 = vsel %vm1855_vm3, %v1854_v56, %v10347_v23  ;;  %v10355_v23 = vld [vmem:[#allocation129_spill] sm:$0xff] }
 0x4ec   :  { %v2271_v63 = vmul.f32 %v7928_v13, %v2269_v49  ;;  %v7984_v38 = vadd.f32 1.0, %v5125_v4 }
 0x4ed   :  { %2460 = vrot.lane.b32.xlu0 %v7924_v53, %s9893_s26  ;;  %2480 = vrot.lane.b32.xlu1 %v7924_v53, %s9895_s29  ;;  %v5127_v41 = vpop.eup %5126 }
 0x4ee   :  { %v2272_v36 = vadd.f32 %v2271_v63, %v7951_v46  ;;  %2500 = vrot.lane.b32.xlu2 %v7924_v53, %s9891_s7  ;;  %5128 = vrcp.f32 %v7984_v38  ;;  %v7997_v3 = vadd.f32 1.0, %v5127_v41  ;;  %v3065_v7 = vand.u32 2147483648, %v7984_v38 }
 0x4ef   :  { %5130 = vpow2.f32 %v3033_v40  ;;  %vm3059_vm11 = vweird.f32 %v7984_v38 }
 0x4f0   :  { %v2274_v6 = vrot.slane %v2272_v36, 7  ;;  %v3186_v59 = vpop.permute.xlu1 %3185  ;;  %v2362_v22 = vsel %vm602_vm9, %v2267_v17, %v2272_v36  ;;  %5132 = vpow2.f32 %v3117_v45  ;;  %v2143_v17 = vsel %vm10346_vm10, %v2139_v18, %v7730_v20  ;;  %v3209_v35 = vpop.permute.xlu0 %3208 }
 0x4f1   :  { %4814 = vpush %v3186_v59  ;;  %5134 = vrcp.f32 %v7997_v3  ;;  %v2147_v58 = vsel %vm10349_vm13, %v2143_v17, %v10348_v9  ;;  %v1864_v20 = vsel %vm1860_vm4, %v1859_v16, %v7663_v42  ;;  %vm10351_vm13 = vcmask 457728  }
 0x4f2   :  { %v2276_v31 = vmul.f32 %v7928_v13, %v2274_v6  ;;  %4816 = vpush %v3193_v29  ;;  %v3063_v6 = vand.u32 2147483647, %v7984_v38  ;;  %v1869_v57 = vsel %vm1865_vm5, %v1864_v20, %v7678_v2  ;;  %v3066_v47 = vor.u32 1.1754944e-38, %v3065_v7 }
 0x4f4   :  { %v2277_v48 = vadd.f32 %v2276_v31, %v7951_v46  ;;  %v5129_v24 = vpop.eup %5128  ;;  %vm8039_vm0 = vcmp.eq.f32.partialorder %v3063_v6, 8.507059e+37 }
 0x4f5   :  { %2520 = vrot.lane.b32.xlu0 %v7924_v53, %s9905_s18  ;;  %2660 = vrot.lane.b32.xlu1 %v7924_v53, %s9907_s28  ;;  %v3055_v32 = vmul.f32 %v5129_v24, %v7984_v38  ;;  %v5131_v63 = vpop.eup %5130  ;;  %vm3060_vm10 = vweird.f32 %v5129_v24  ;;  %v3147_v38 = vand.u32 2147483647, %v7997_v3 }
 0x4f6   :  { %v2279_v37 = vrot.slane %v2277_v48, 7  ;;  %2640 = vrot.lane.b32.xlu2 %v7924_v53, %s9909_s21  ;;  %v2363_v44 = vsel %vm10345_vm15, %v2362_v22, %v2277_v48  ;;  %v5133_v1 = vpop.eup %5132  ;;  %vm10350_vm15 = vcmask 392192   ;;  %v8036_v2 = vadd.f32 1.0, %v5131_v63 }
 0x4f7   :  { %v3056_v25 = vsub.f32 1.0, %v3055_v32  ;;  %v5135_v4 = vpop.eup %5134  ;;  %v2151_v42 = vsel %vm10350_vm15, %v2147_v58, %v7739_v12  ;;  %v8043_v59 = vadd.f32 1.0, %v5133_v1  ;;  %vm3061_vm15 = vmor %vm3059_vm11, %vm3060_vm10  ;;  %vm3143_vm11 = vweird.f32 %v7997_v3 }
 0x4f8   :  { %v2281_v8 = vmul.f32 %v7928_v13, %v2279_v37  ;;  %v3202_v28 = vpop.permute.xlu1 %3201  ;;  %v3139_v31 = vmul.f32 %v5135_v4, %v7997_v3  ;;  %v2155_v40 = vsel %vm10351_vm13, %v2151_v42, %v7764_v39  ;;  %v3149_v39 = vand.u32 2147483648, %v7997_v3  ;;  %v3225_v22 = vpop.permute.xlu0 %3224 }
 0x4f9   :  { %4818 = vpush %v3202_v28  ;;  %v3057_v50 = vmul.f32 %v5129_v24, %v3056_v25  ;;  %vm3144_vm13 = vweird.f32 %v5135_v4  ;;  %5136 = vrcp.f32 %v8036_v2  ;;  %vm10356_vm10 = vcmask 982016  }
 0x4fa   :  { %v2282_v49 = vadd.f32 %v2281_v8, %v7951_v46  ;;  %4820 = vpush %v3209_v35  ;;  %v3140_v12 = vsub.f32 1.0, %v3139_v31  ;;  %v3150_v35 = vor.u32 1.1754944e-38, %v3149_v39  ;;  %5138 = vrcp.f32 %v8043_v59 }
 0x4fb   :  { %v3058_v45 = vadd.f32 %v5129_v24, %v3057_v50 }
 0x4fc   :  { %v2284_v14 = vrot.slane %v2282_v49, 7  ;;  %v2364_v36 = vsel %vm2345_vm12, %v2363_v44, %v2282_v49  ;;  %v3141_v37 = vmul.f32 %v5135_v4, %v3140_v12  ;;  %v10354_v44 = vld [vmem:[#allocation111_spill] sm:$0xff] }
 0x4fd   :  { %2700 = vrot.lane.b32.xlu0 %v7924_v53, %s9915_s11  ;;  %2740 = vrot.lane.b32.xlu1 %v7924_v53, %s9885_s5  ;;  %v3062_v54 = vsel %vm3061_vm15, %v5129_v24, %v3058_v45  ;;  %v1874_v18 = vsel %vm1870_vm6, %v1869_v57, %v10354_v44  ;;  %v2159_v24 = vsel %vm9884_vm14, %v2155_v40, %v10355_v23  ;;  %vm3148_vm15 = vcmp.eq.f32.partialorder %v3147_v38, 8.507059e+37 }
 0x4fe   :  { %v2286_v11 = vmul.f32 %v7928_v13, %v2284_v14  ;;  %2680 = vrot.lane.b32.xlu2 %v7924_v53, %s9913_s19  ;;  %v3067_v17 = vsel %vm8039_vm0, %v3066_v47, %v3062_v54  ;;  %v3142_v49 = vadd.f32 %v5135_v4, %v3141_v37  ;;  %vm3145_vm0 = vmor %vm3143_vm11, %vm3144_vm13  ;;  %v1879_v3 = vsel %vm10356_vm10, %v1874_v18, %v7687_v27 }
 0x4ff   :  { %v8058_v16 = vmul.f32 %v3067_v17, %v7926_v5  ;;  %v9904_v5 = vstv %s8048_s27  ;;  %vm10357_vm14 = vcmask 1044480   ;;  %v9903_v14 = vstv %s8061_s14  ;;  %vm10360_vm11 = vmmov %vm10356_vm10 }
 0x500   :  { %v2287_v41 = vadd.f32 %v2286_v11, %v7951_v46  ;;  %v3218_v56 = vpop.permute.xlu1 %3217  ;;  %v3146_v28 = vsel %vm3145_vm0, %v5135_v4, %v3142_v49  ;;  %v1886_v6 = vmul.f32 1.442695, %v1879_v3  ;;  %v8090_v11 = vpop.eup %5136  ;;  %vm10359_vm13 = vcmask 1046528  }
 0x501   :  { %4822 = vpush %v3218_v56  ;;  %v3151_v58 = vsel %vm3148_vm15, %v3150_v35, %v3146_v28  ;;  %v3160_v20 = vmul.f32 %v9904_v5, %v8058_v16  ;;  %v3040_v31 = vmul.f32 %v8090_v11, %v8036_v2  ;;  %vm3045_vm0 = vweird.f32 %v8090_v11  ;;  %v8136_v56 = vpop.permute.xlu2 %478 }
 0x502   :  { %v2289_v48 = vrot.slane %v2287_v41, 7  ;;  %v2365_v62 = vsel %vm2347_vm8, %v2364_v36, %v2287_v41  ;;  %4824 = vpush %v3225_v22  ;;  %v2163_v36 = vsel %vm1845_vm1, %v2159_v24, %v7772_v10  ;;  %v8079_v1 = vmul.f32 %v3151_v58, %v7935_v26  ;;  %v8093_v26 = vpop.eup %5138 }
 0x503   :  { %v2167_v25 = vsel %vm1850_vm2, %v2163_v36, %v7796_v43  ;;  %5140 = vpow2.f32 %v1886_v6  ;;  %v3041_v12 = vsub.f32 1.0, %v3040_v31  ;;  %v3050_v44 = vand.u32 2147483648, %v8036_v2  ;;  %v10365_v36 = vld [vmem:[#allocation139_spill] sm:$0xff] }
 0x504   :  { %v2291_v8 = vmul.f32 %v7928_v13, %v2289_v48  ;;  %v3166_v4 = vmul.f32 %v9903_v14, %v8079_v1  ;;  %v2171_v7 = vsel %vm1855_vm3, %v2167_v25, %v7587_v55  ;;  %v3124_v55 = vmul.f32 %v8093_v26, %v8043_v59 }
 0x505   :  { %2720 = vrot.lane.b32.xlu0 %v7924_v53, %s9911_s24  ;;  %v2175_v41 = vsel %vm1860_vm4, %v2171_v7, %v7811_v0  ;;  %vm3129_vm10 = vweird.f32 %v8093_v26  ;;  %vm3044_vm15 = vweird.f32 %v8036_v2  ;;  %v3048_v18 = vand.u32 2147483647, %v8036_v2 }
 0x506   :  { %v2292_v32 = vadd.f32 %v2291_v8, %v7951_v46  ;;  %2760 = vrot.lane.b32.xlu2 %v7924_v53, %s9887_s23  ;;  %v8097_v42 = vadd.f32 %v3166_v4, %v3160_v20  ;;  %v2179_v45 = vsel %vm1865_vm5, %v2175_v41, %v7841_v15  ;;  %v3132_v8 = vand.u32 2147483647, %v8043_v59 }
 0x507   :  { %v2183_v47 = vsel %vm1870_vm6, %v2179_v45, %v7735_v51  ;;  %v3042_v51 = vmul.f32 %v8090_v11, %v3041_v12  ;;  %v3134_v17 = vand.u32 2147483648, %v8043_v59  ;;  %v3051_v28 = vor.u32 1.1754944e-38, %v3050_v44 }
 0x508   :  { %v2294_v63 = vrot.slane %v2292_v32, 7  ;;  %v2366_v9 = vsel %vm10357_vm14, %v2365_v62, %v2292_v32  ;;  %v3234_v57 = vpop.permute.xlu1 %3233  ;;  %vm10358_vm14 = vcmask 1045504   ;;  %v8128_v15 = vsel %vm10360_vm11, %v2183_v47, %v7861_v52  ;;  %v10372_v32 = vld [vmem:[#allocation141_spill] sm:$0xff] }
 0x509   :  { %4826 = vpush %v3234_v57  ;;  %v8117_v39 = vpop.eup %5140  ;;  %v3043_v38 = vadd.f32 %v8090_v11, %v3042_v51  ;;  %v3135_v58 = vor.u32 1.1754944e-38, %v3134_v17  ;;  %v2386_v20 = vmul.f32 %v7745_v61, %v10365_v36  ;;  %v10368_v61 = vld [vmem:[#allocation140_spill] sm:$0xff] }
 0x50a   :  { %v2296_v27 = vmul.f32 %v7928_v13, %v2294_v63 }
 0x50c   :  { %v2297_v10 = vadd.f32 %v2296_v27, %v7951_v46 }
 0x50d   :  { %2780 = vrot.lane.b32.xlu0 %v7924_v53, %s9917_s9 }
 0x50e   :  { %v2299_v43 = vrot.slane %v2297_v10, 7  ;;  %v2367_v50 = vsel %vm10358_vm14, %v2366_v9, %v2297_v10  ;;  %vm8152_vm14 = vmor %vm3044_vm15, %vm3045_vm0  ;;  %vm3049_vm0 = vcmp.eq.f32.partialorder %v3048_v18, 8.507059e+37  ;;  %vm3133_vm15 = vcmp.eq.f32.partialorder %v3132_v8, 8.507059e+37  ;;  %v10367_v10 = vld [vmem:[#allocation154_spill] sm:$0xff] }
 0x50f   :  { %v3047_v49 = vsel %vm8152_vm14, %v8090_v11, %v3043_v38  ;;  %v10366_v11 = vld [vmem:[#allocation50_spill] sm:$0xff]  ;;  %v10371_v38 = vld [vmem:[#allocation144_spill] sm:$0xff]  ;;  %vm10378_vm14 = vcmask 1044480  }
 0x510   :  { %v2301_v40 = vmul.f32 %v7928_v13, %v2299_v43  ;;  %v3125_v13 = vsub.f32 1.0, %v3124_v55  ;;  %v3052_v6 = vsel %vm3049_vm0, %v3051_v28, %v3047_v49  ;;  %v2399_v43 = vpop.permute.xlu2 %2398 }
 0x512   :  { %v2302_v29 = vadd.f32 %v2301_v40, %v7951_v46  ;;  %v3126_v54 = vmul.f32 %v8093_v26, %v3125_v13  ;;  %v2410_v40 = vmul.f32 %v2399_v43, %v10368_v61 }
 0x514   :  { %v2304_v48 = vrot.slane %v2302_v29, 7  ;;  %v8113_v62 = vsel %vm10359_vm13, %v2367_v50, %v2302_v29  ;;  %v3127_v52 = vadd.f32 %v8093_v26, %v3126_v54  ;;  %vm3128_vm13 = vweird.f32 %v8043_v59  ;;  %v10370_v54 = vld [vmem:[#allocation143_spill] sm:$0xff] }
 0x515   :  { %2442 = vrot.lane.b32.xlu0 %v8113_v62, %s9889_s25  ;;  %2402 = vrot.lane.b32.xlu1 %v8113_v62, %s10066_s17  ;;  %vm8167_vm11 = vmor %vm3128_vm13, %vm3129_vm10  ;;  %v8191_v50 = vmul.f32 %v3052_v6, %v7960_v34  ;;  %vm10369_vm10 = vcmask 1041408   ;;  %vm10380_vm13 = vcmask 1045504  }
 0x516   :  { %v2306_v0 = vmul.f32 %v8117_v39, %v2304_v48  ;;  %2422 = vrot.lane.b32.xlu2 %v8113_v62, %s10180_s20  ;;  %v3131_v63 = vsel %vm8167_vm11, %v8093_v26, %v3127_v52  ;;  %v2382_v26 = vmul.f32 %v10367_v10, %v10366_v11  ;;  %vm10381_vm11 = vcmask 1046528  }
 0x517   :  { %v3136_v57 = vsel %vm3133_vm15, %v3135_v58, %v3131_v63 }
 0x518   :  { %v2307_v46 = vadd.f32 %v2306_v0, %v8128_v15  ;;  %v2390_v31 = vadd.f32 %v2386_v20, %v2382_v26  ;;  %v8200_v45 = vmul.f32 %v3136_v57, %v7962_v60  ;;  %v2459_v24 = vpop.permute.xlu2 %2458  ;;  %v10373_v57 = vld [vmem:[#allocation145_spill] sm:$0xff] }
 0x51a   :  { %v2309_v37 = vrot.slane %v2307_v46, 7  ;;  %s8145_s22 = spop %4810  ;;  %v2414_v47 = vadd.f32 %v2410_v40, %v2390_v31  ;;  %v10374_v40 = vld [vmem:[#allocation146_spill] sm:$0xff] }
 0x51b   :  { %v9898_v2 = vstv %s8145_s22  ;;  %s8158_s0 = spop %4812 }
 0x51c   :  { %v2311_v22 = vmul.f32 %v8117_v39, %v2309_v37  ;;  %v3175_v59 = vmul.f32 %v9898_v2, %v8058_v16  ;;  %v9897_v35 = vstv %s8158_s0 }
 0x51d   :  { %2502 = vrot.lane.b32.xlu0 %v8113_v62, %s9891_s7  ;;  %2462 = vrot.lane.b32.xlu1 %v8113_v62, %s9893_s26  ;;  %v3182_v9 = vmul.f32 %v9897_v35, %v8079_v1 }
 0x51e   :  { %v2312_v23 = vadd.f32 %v2311_v22, %v8128_v15  ;;  %2482 = vrot.lane.b32.xlu2 %v8113_v62, %s9895_s29 }
 0x51f   :  { %v8185_v4 = vadd.f32 %v3182_v9, %v3175_v59  ;;  %v2470_v59 = vmul.f32 %v2459_v24, %v10372_v32 }
 0x520   :  { %v2314_v3 = vrot.slane %v2312_v23, 7  ;;  %v2369_v25 = vsel %vm602_vm9, %v2307_v46, %v2312_v23 }
 0x522   :  { %v2316_v27 = vmul.f32 %v8117_v39, %v2314_v3  ;;  %s4815_s13 = spop %4814 }
 0x523   :  { %v3188_v29 = vstv %s4815_s13  ;;  %s4817_s15 = spop %4816 }
 0x524   :  { %v2317_v7 = vadd.f32 %v2316_v27, %v8128_v15  ;;  %v3190_v34 = vmul.f32 %v3188_v29, %v8191_v50  ;;  %v3191_v12 = vmul.f32 %v3188_v29, %v8058_v16  ;;  %v3195_v48 = vstv %s4817_s15  ;;  %v10375_v29 = vld [vmem:[#allocation66_spill] sm:$0xff] }
 0x525   :  { %2682 = vrot.lane.b32.xlu0 %v8113_v62, %s9913_s19  ;;  %2522 = vrot.lane.b32.xlu1 %v8113_v62, %s9905_s18  ;;  %v3197_v46 = vmul.f32 %v3195_v48, %v8200_v45  ;;  %v3198_v60 = vmul.f32 %v3195_v48, %v8079_v1  ;;  %v10376_v48 = vld [vmem:[#allocation142_spill] sm:$0xff] }
 0x526   :  { %v2319_v41 = vrot.slane %v2317_v7, 7  ;;  %v2370_v55 = vsel %vm10369_vm10, %v2369_v25, %v2317_v7  ;;  %2662 = vrot.lane.b32.xlu2 %v8113_v62, %s9907_s28 }
 0x527   :  { %v2419_v13 = vpop.permute.xlu0 %2418  ;;  %v2439_v0 = vpop.permute.xlu1 %2438  ;;  %v8212_v52 = vadd.f32 %v3197_v46, %v3190_v34  ;;  %v8214_v18 = vadd.f32 %v3198_v60, %v3191_v12  ;;  %v481_v34 = vmul.f32 %v8136_v56, %v10375_v29 }
 0x528   :  { %v2321_v51 = vmul.f32 %v8117_v39, %v2319_v41  ;;  %v2430_v37 = vmul.f32 %v2419_v13, %v10370_v54  ;;  %v2450_v22 = vmul.f32 %v2439_v0, %v10371_v38  ;;  %v2519_v12 = vpop.permute.xlu2 %2518 }
 0x52a   :  { %v2322_v44 = vadd.f32 %v2321_v51, %v8128_v15  ;;  %v2434_v8 = vadd.f32 %v2430_v37, %v2414_v47  ;;  %s8217_s1 = spop %4818  ;;  %v2530_v47 = vmul.f32 %v2519_v12, %v10376_v48 }
 0x52b   :  { %v9902_v28 = vstv %s8217_s1  ;;  %s8226_s13 = spop %4820 }
 0x52c   :  { %v2324_v17 = vrot.slane %v2322_v44, 7  ;;  %v2371_v23 = vsel %vm2345_vm12, %v2370_v55, %v2322_v44  ;;  %v2454_v49 = vadd.f32 %v2450_v22, %v2434_v8  ;;  %v3207_v63 = vmul.f32 %v9902_v28, %v8058_v16 }
 0x52d   :  { %2762 = vrot.lane.b32.xlu0 %v8113_v62, %s9887_s23  ;;  %2642 = vrot.lane.b32.xlu1 %v8113_v62, %s9909_s21  ;;  %v9901_v9 = vstv %s8226_s13  ;;  %s10377_s23 = smov 118  }
 0x52e   :  { %v2326_v3 = vmul.f32 %v8117_v39, %v2324_v17  ;;  %2742 = vrot.lane.b32.xlu2 %v8113_v62, %s9885_s5  ;;  %v2474_v20 = vadd.f32 %v2470_v59, %v2454_v49  ;;  %v3214_v6 = vmul.f32 %v9901_v9, %v8079_v1 }
 0x52f   :  { %v2479_v58 = vpop.permute.xlu0 %2478  ;;  %v2499_v27 = vpop.permute.xlu1 %2498 }
 0x530   :  { %v2327_v25 = vadd.f32 %v2326_v3, %v8128_v15  ;;  %v2490_v11 = vmul.f32 %v2479_v58, %v10373_v57  ;;  %v8240_v43 = vadd.f32 %v3214_v6, %v3207_v63  ;;  %v2510_v41 = vmul.f32 %v2499_v27, %v10374_v40  ;;  %v2699_v27 = vpop.permute.xlu2 %2698 }
 0x532   :  { %v2329_v26 = vrot.slane %v2327_v25, 7  ;;  %v2372_v7 = vsel %vm2347_vm8, %v2371_v23, %v2327_v25  ;;  %v2494_v31 = vadd.f32 %v2490_v11, %v2474_v20  ;;  %s8246_s15 = spop %4822  ;;  %v10379_v23 = vld [vmem:[#allocation51_spill] sm:$0xff] }
 0x533   :  { %v9900_v51 = vstv %s8246_s15  ;;  %s8253_s5 = spop %4824  ;;  %v2634_v24 = vmul.f32 %v7921_v30, %v10379_v23 }
 0x534   :  { %v2331_v55 = vmul.f32 %v8117_v39, %v2329_v26  ;;  %v2514_v13 = vadd.f32 %v2510_v41, %v2494_v31  ;;  %v3223_v56 = vmul.f32 %v9900_v51, %v8058_v16  ;;  %v9899_v46 = vstv %s8253_s5 }
 0x535   :  { %2702 = vrot.lane.b32.xlu1 %v8113_v62, %s9915_s11  ;;  %v3230_v8 = vmul.f32 %v9899_v46, %v8079_v1 }
 0x536   :  { %v2332_v0 = vadd.f32 %v2331_v55, %v8128_v15  ;;  %483 = vrot.lane.b32.xlu2 %v481_v34, %s10377_s23  ;;  %v8260_v60 = vadd.f32 %v2530_v47, %v2514_v13 }
 0x537   :  { %v2639_v37 = vpop.permute.xlu1 %2638  ;;  %v2659_v17 = vpop.permute.xlu0 %2658  ;;  %v8270_v3 = vadd.f32 %v3230_v8, %v3223_v56 }
 0x538   :  { %v2334_v22 = vrot.slane %v2332_v0, 7  ;;  %v2373_v44 = vsel %vm10378_vm14, %v2372_v7, %v2332_v0  ;;  %v2650_v49 = vmul.f32 %v2639_v37, %v10365_v36  ;;  %v2670_v63 = vmul.f32 %v2659_v17, %v10368_v61  ;;  %v2719_v29 = vpop.permute.xlu2 %2718 }
 0x539   :  { %v2710_v61 = vmul.f32 %v2699_v27, %v10371_v38  ;;  %v2730_v47 = vmul.f32 %v2719_v29, %v10372_v32  ;;  %v10390_v29 = vld [vmem:[#allocation149_spill] sm:$0xff] }
 0x53a   :  { %v2336_v59 = vmul.f32 %v8117_v39, %v2334_v22  ;;  %v2654_v58 = vadd.f32 %v2650_v49, %v2634_v24  ;;  %v10382_v22 = vld [vmem:[#allocation76_spill] sm:$0xff] }
 0x53b   :  { %v10384_v24 = vld [vmem:[#allocation148_spill] sm:$0xff] }
 0x53c   :  { %v2337_v20 = vadd.f32 %v2336_v59, %v8128_v15  ;;  %v2674_v25 = vadd.f32 %v2670_v63, %v2654_v58  ;;  %v10385_v63 = vld [vmem:[#allocation84_spill] sm:$0xff]  ;;  %v10386_v58 = vld [vmem:[#allocation147_spill] sm:$0xff] }
 0x53d   :  { %2722 = vrot.lane.b32.xlu1 %v8113_v62, %s9911_s24 }
 0x53e   :  { %v2339_v6 = vrot.slane %v2337_v20, 7  ;;  %v2374_v11 = vsel %vm10380_vm13, %v2373_v44, %v2337_v20 }
 0x53f   :  { %v2679_v26 = vpop.permute.xlu1 %2678  ;;  %v2739_v34 = vpop.permute.xlu0 %2738 }
 0x540   :  { %v2341_v36 = vmul.f32 %v8117_v39, %v2339_v6  ;;  %v2690_v7 = vmul.f32 %v2679_v26, %v10370_v54  ;;  %v2750_v39 = vmul.f32 %v2739_v34, %v10373_v57  ;;  %v2779_v56 = vpop.permute.xlu2 %2778  ;;  %v8316_v6 = vld [vmem:[%s10261_s30] sm:$0x3]  ;;  %s10392_s30 = sld [smem:[#allocation11_spill]] }
 0x541   :  { %v2790_v32 = vmul.f32 %v2779_v56, %v10376_v48  ;;  %v10383_v48 = vld [vmem:[#allocation52_spill] sm:$0xff] }
 0x542   :  { %v2342_v31 = vadd.f32 %v2341_v36, %v8128_v15  ;;  %v2694_v41 = vadd.f32 %v2690_v7, %v2674_v25  ;;  %v2383_v44 = vmul.f32 %v10367_v10, %v10383_v48 }
 0x544   :  { %v8282_v55 = vsel %vm10381_vm11, %v2374_v11, %v2342_v31  ;;  %v2714_v12 = vadd.f32 %v2710_v61, %v2694_v41  ;;  %v10388_v11 = vld [vmem:[#allocation65_spill] sm:$0xff]  ;;  %v10389_v31 = vld [vmem:[#allocation79_spill] sm:$0xff] }
 0x545   :  { %2424 = vrot.lane.b32.xlu0 %v8282_v55, %s10180_s20  ;;  %2444 = vrot.lane.b32.xlu1 %v8282_v55, %s9889_s25  ;;  %s10387_s25 = smov 122  }
 0x546   :  { %2404 = vrot.lane.b32.xlu2 %v8282_v55, %s10066_s17  ;;  %v2734_v54 = vadd.f32 %v2730_v47, %v2714_v12  ;;  %v10391_v12 = vld [vmem:[#allocation78_spill] sm:$0xff] }
 0x547   :  { %v2759_v15 = vpop.permute.xlu1 %2758 }
 0x548   :  { %v2770_v38 = vmul.f32 %v2759_v15, %v10374_v40  ;;  %v2754_v13 = vadd.f32 %v2750_v39, %v2734_v54  ;;  %v2441_v57 = vpop.permute.xlu2 %2440  ;;  %v2387_v40 = vmul.f32 %v7924_v53, %v10382_v22 }
 0x549   :  { %v2451_v20 = vmul.f32 %v2441_v57, %v10386_v58 }
 0x54a   :  { %v2774_v0 = vadd.f32 %v2770_v38, %v2754_v13  ;;  %v2391_v23 = vadd.f32 %v2387_v40, %v2383_v44  ;;  %v10394_v38 = vld [vmem:[#allocation54_spill] sm:$0xff]  ;;  %v10395_v40 = vld [vmem:[#allocation150_spill] sm:$0xff] }
 0x54b   :  { %v2635_v13 = vmul.f32 %v7921_v30, %v10394_v38 }
 0x54c   :  { %v8300_v37 = vadd.f32 %v2790_v32, %v2774_v0 }
 0x54d   :  { %2484 = vrot.lane.b32.xlu0 %v8282_v55, %s9895_s29  ;;  %2504 = vrot.lane.b32.xlu1 %v8282_v55, %s9891_s7  ;;  %s10393_s7 = smov 121   ;;  %s10408_s29 = smov 115  }
 0x54e   :  { %2464 = vrot.lane.b32.xlu2 %v8282_v55, %s9893_s26  ;;  %s10398_s26 = smov 117  }
 0x550   :  { %v2501_v27 = vpop.permute.xlu2 %2500 }
 0x551   :  { %v2511_v47 = vmul.f32 %v2501_v27, %v10391_v12 }
 0x555   :  { %2664 = vrot.lane.b32.xlu0 %v8282_v55, %s9907_s28  ;;  %2684 = vrot.lane.b32.xlu1 %v8282_v55, %s9913_s19 }
 0x556   :  { %2524 = vrot.lane.b32.xlu2 %v8282_v55, %s9905_s18 }
 0x557   :  { %v2401_v8 = vpop.permute.xlu0 %2400  ;;  %v2421_v17 = vpop.permute.xlu1 %2420 }
 0x558   :  { %v2411_v49 = vmul.f32 %v2401_v8, %v10384_v24  ;;  %v2431_v53 = vmul.f32 %v2421_v17, %v10385_v63  ;;  %v2641_v39 = vpop.permute.xlu2 %2640  ;;  %v219_v17 = vld [vmem:[%s10392_s30] sm:$0x3]  ;;  %s10396_s30 = smov 119  }
 0x559   :  { %v2651_v54 = vmul.f32 %v2641_v39, %v10382_v22 }
 0x55a   :  { %v2415_v59 = vadd.f32 %v2411_v49, %v2391_v23 }
 0x55b   :  { %v2655_v57 = vadd.f32 %v2651_v54, %v2635_v13  ;;  %v10397_v13 = vld [vmem:[#allocation95_spill] sm:$0xff] }
 0x55c   :  { %v2435_v25 = vadd.f32 %v2431_v53, %v2415_v59  ;;  %v2950_v59 = vmul.f32 1.442695, %v219_v17  ;;  %v10402_v17 = vld [vmem:[#allocation152_spill] sm:$0xff] }
 0x55d   :  { %3249 = vrot.lane.b32.xlu0 %v8316_v6, %s10387_s25  ;;  %3256 = vrot.lane.b32.xlu1 %v10388_v11, %s10387_s25 }
 0x55e   :  { %2644 = vrot.lane.b32.xlu2 %v8282_v55, %s9909_s21  ;;  %v2455_v26 = vadd.f32 %v2451_v20, %v2435_v25  ;;  %5142 = vpow2.f32 %v2950_v59 }
 0x55f   :  { %v2461_v36 = vpop.permute.xlu0 %2460  ;;  %v2481_v7 = vpop.permute.xlu1 %2480 }
 0x560   :  { %v2471_v61 = vmul.f32 %v2461_v36, %v10389_v31  ;;  %v2491_v34 = vmul.f32 %v2481_v7, %v10390_v29  ;;  %v2681_v23 = vpop.permute.xlu2 %2680 }
 0x561   :  { %v2691_v49 = vmul.f32 %v2681_v23, %v10385_v63 }
 0x562   :  { %v2475_v41 = vadd.f32 %v2471_v61, %v2455_v26 }
 0x564   :  { %v2495_v15 = vadd.f32 %v2491_v34, %v2475_v41  ;;  %v5143_v63 = vpop.eup %5142 }
 0x565   :  { %3265 = vrot.lane.b32.xlu0 %v8316_v6, %s10393_s7  ;;  %3272 = vrot.lane.b32.xlu1 %v10388_v11, %s10393_s7  ;;  %v8357_v41 = vsub.f32 0.0, %v5143_v63  ;;  %v10405_v63 = vld [vmem:[#allocation156_spill] sm:$0xff] }
 0x566   :  { %2704 = vrot.lane.b32.xlu2 %v8282_v55, %s9915_s11  ;;  %v2515_v0 = vadd.f32 %v2511_v47, %v2495_v15 }
 0x567   :  { %v2521_v56 = vpop.permute.xlu0 %2520  ;;  %v2661_v32 = vpop.permute.xlu1 %2660  ;;  %v8370_v38 = vrot.slane %v8357_v41, 1 }
 0x568   :  { %v2531_v48 = vmul.f32 %v2521_v56, %v10395_v40  ;;  %v2671_v22 = vmul.f32 %v2661_v32, %v10384_v24  ;;  %v2761_v25 = vpop.permute.xlu2 %2760  ;;  %v10399_v56 = vld [vmem:[#allocation55_spill] sm:$0xff] }
 0x569   :  { %v2771_v34 = vmul.f32 %v2761_v25, %v10391_v12  ;;  %v2384_v32 = vmul.f32 %v10367_v10, %v10399_v56  ;;  %v10409_v56 = vld [vmem:[#allocation157_spill] sm:$0xff] }
 0x56a   :  { %v8338_v44 = vadd.f32 %v2531_v48, %v2515_v0  ;;  %v2675_v8 = vadd.f32 %v2671_v22, %v2655_v57  ;;  %v2388_v0 = vmul.f32 %v8113_v62, %v10397_v13  ;;  %v10400_v22 = vld [vmem:[#allocation98_spill] sm:$0xff] }
 0x56c   :  { %v2695_v20 = vadd.f32 %v2691_v49, %v2675_v8  ;;  %v2392_v48 = vadd.f32 %v2388_v0, %v2384_v32 }
 0x56d   :  { %3281 = vrot.lane.b32.xlu0 %v8316_v6, %s10066_s17  ;;  %3288 = vrot.lane.b32.xlu1 %v10388_v11, %s10066_s17 }
 0x56e   :  { %2724 = vrot.lane.b32.xlu2 %v8282_v55, %s9911_s24 }
 0x56f   :  { %v2701_v53 = vpop.permute.xlu0 %2700  ;;  %v2741_v26 = vpop.permute.xlu1 %2740 }
 0x570   :  { %v2711_v24 = vmul.f32 %v2701_v53, %v10386_v58  ;;  %v2751_v61 = vmul.f32 %v2741_v26, %v10390_v29  ;;  %v2423_v47 = vpop.permute.xlu2 %2422  ;;  %v10403_v53 = vld [vmem:[#allocation99_spill] sm:$0xff] }
 0x571   :  { %v2432_v23 = vmul.f32 %v2423_v47, %v10402_v17 }
 0x572   :  { %v2715_v27 = vadd.f32 %v2711_v24, %v2695_v20 }
 0x575   :  { %3297 = vrot.lane.b32.xlu0 %v8316_v6, %s10396_s30  ;;  %3304 = vrot.lane.b32.xlu1 %v10388_v11, %s10396_s30 }
 0x576   :  { %3240 = vrot.lane.b32.xlu2 %v10388_v11, %s10287_s3 }
 0x577   :  { %v2721_v36 = vpop.permute.xlu0 %2720 }
 0x578   :  { %v2731_v7 = vmul.f32 %v2721_v36, %v10389_v31  ;;  %v2483_v12 = vpop.permute.xlu2 %2482 }
 0x57a   :  { %v2735_v58 = vadd.f32 %v2731_v7, %v2715_v27  ;;  %v10406_v7 = vld [vmem:[#allocation153_spill] sm:$0xff] }
 0x57c   :  { %v2755_v39 = vadd.f32 %v2751_v61, %v2735_v58  ;;  %v2492_v61 = vmul.f32 %v2483_v12, %v10406_v7 }
 0x57d   :  { %3313 = vrot.lane.b32.xlu0 %v8316_v6, %s10377_s23  ;;  %3320 = vrot.lane.b32.xlu1 %v10388_v11, %s10377_s23  ;;  %s10401_s23 = sld [smem:[#allocation15_spill]] }
 0x57e   :  { %3555 = vrot.lane.b32.xlu2 %v8357_v41, %s10393_s7  ;;  %v2775_v15 = vadd.f32 %v2771_v34, %v2755_v39  ;;  %v10407_v39 = vld [vmem:[#allocation155_spill] sm:$0xff] }
 0x57f   :  { %v2781_v31 = vpop.permute.xlu0 %2780 }
 0x580   :  { %v2791_v29 = vmul.f32 %v2781_v31, %v10395_v40  ;;  %v2663_v59 = vpop.permute.xlu2 %2662 }
 0x582   :  { %v8367_v54 = vadd.f32 %v2791_v29, %v2775_v15 }
 0x583   :  { %v8394_v34 = vld [vmem:[%s10401_s23] ss:$0 sm:$0xff]  ;;  %s10411_s23 = smov 114  }
 0x585   :  { %3329 = vrot.lane.b32.xlu0 %v8316_v6, %s10398_s26  ;;  %3336 = vrot.lane.b32.xlu1 %v10388_v11, %s10398_s26  ;;  %s10404_s26 = smov 116  }
 0x586   :  { %3590 = vrot.lane.b32.xlu2 %v8370_v38, %s10280_s2 }
 0x587   :  { %v2443_v57 = vpop.permute.xlu0 %2442  ;;  %v2403_v40 = vpop.permute.xlu1 %2402 }
 0x588   :  { %v2412_v8 = vmul.f32 %v2403_v40, %v10400_v22  ;;  %v2452_v20 = vmul.f32 %v2443_v57, %v10403_v53  ;;  %v2743_v47 = vpop.permute.xlu2 %2742  ;;  %v10412_v40 = vld [vmem:[#allocation68_spill] sm:$0xff] }
 0x58a   :  { %v2416_v49 = vadd.f32 %v2412_v8, %v2392_v48  ;;  %v10413_v48 = vld [vmem:[#allocation45_spill] sm:$0xff]  ;;  %v10414_v8 = vld [vmem:[#allocation39_spill] sm:$0xff] }
 0x58c   :  { %v2436_v24 = vadd.f32 %v2432_v23, %v2416_v49  ;;  %v8415_v23 = vmul.f32 %v10414_v8, %v10413_v48 }
 0x58d   :  { %3345 = vrot.lane.b32.xlu0 %v8316_v6, %s10404_s26  ;;  %3352 = vrot.lane.b32.xlu1 %v10388_v11, %s10404_s26  ;;  %s10424_s26 = smov 16  }
 0x58e   :  { %3617 = vrot.lane.b32.xlu2 %v8370_v38, %s10387_s25  ;;  %v2456_v27 = vadd.f32 %v2452_v20, %v2436_v24  ;;  %v10415_v20 = vmov 3   ;;  %v10416_v24 = vld [vmem:[#allocation40_spill] sm:$0xff] }
 0x58f   :  { %v2463_v25 = vpop.permute.xlu1 %2462  ;;  %v2503_v36 = vpop.permute.xlu0 %2502 }
 0x590   :  { %v2472_v26 = vmul.f32 %v2463_v25, %v10405_v63  ;;  %v2512_v15 = vmul.f32 %v2503_v36, %v10407_v39  ;;  %v8405_v57 = vpop.permute.xlu2 %483  ;;  %v10417_v25 = vld [vmem:[#allocation56_spill] sm:$0xff] }
 0x592   :  { %v2476_v58 = vadd.f32 %v2472_v26, %v2456_v27  ;;  %v8420_v27 = vmul.f32 %v10416_v24, %v10413_v48  ;;  %v2636_v26 = vmul.f32 %v7921_v30, %v10417_v25 }
 0x594   :  { %v2496_v31 = vadd.f32 %v2492_v61, %v2476_v58  ;;  %v10418_v58 = vld [vmem:[#allocation101_spill] sm:$0xff]  ;;  %v2798_v48 = vsub.f32 0.0, %v8420_v27 }
 0x595   :  { %3361 = vrot.lane.b32.xlu0 %v8316_v6, %s10408_s29  ;;  %3368 = vrot.lane.b32.xlu1 %v10388_v11, %s10408_s29  ;;  %s10421_s29 = smov 113  }
 0x596   :  { %3436 = vperm.xlu2 %5006, %v8394_v34   ;;  %v2516_v29 = vadd.f32 %v2512_v15, %v2496_v31  ;;  %v2389_v15 = vmul.f32 %v8282_v55, %v10418_v58  ;;  %v2672_v31 = vmul.f32 %v2663_v59, %v10400_v22 }
 0x597   :  { %v2523_v0 = vpop.permute.xlu1 %2522  ;;  %v2683_v61 = vpop.permute.xlu0 %2682 }
 0x598   :  { %v2532_v32 = vmul.f32 %v2523_v0, %v10409_v56  ;;  %v2538_v0 = vsub.f32 0.0, %v8415_v23  ;;  %v2692_v35 = vmul.f32 %v2683_v61, %v10402_v17  ;;  %v10422_v61 = vld [vmem:[#allocation100_spill] sm:$0xff] }
 0x59a   :  { %v8403_v12 = vadd.f32 %v2532_v32, %v2516_v29  ;;  %v10419_v32 = vld [vmem:[#allocation62_spill] sm:$0xff]  ;;  %v2542_v59 = vmul.f32 1.442695, %v2538_v0 }
 0x59c   :  { %10410 = vst [vmem:[#allocation131_spill] sm:$0xff] %v8403_v12  ;;  %5144 = vpow2.f32 %v2542_v59  ;;  %v10426_v59 = vld [vmem:[#allocation70_spill] sm:$0xff] }
 0x59d   :  { %3377 = vrot.lane.b32.xlu0 %v8316_v6, %s10411_s23  ;;  %3384 = vrot.lane.b32.xlu1 %v10388_v11, %s10411_s23  ;;  %s10427_s23 = smov 24  }
 0x59e   :  { %4439 = vrot.lane.b32.xlu2 %v10412_v40, %s9917_s9 }
 0x59f   :  { %v2643_v49 = vpop.permute.xlu1 %2642  ;;  %5009 = vset.pattern.permute.xlu2 %v10415_v20  ;;  %v2385_v20 = vmul.f32 %v10367_v10, %v10419_v32  ;;  %v2802_v10 = vmul.f32 1.442695, %v2798_v48 }
 0x5a0   :  { %v2652_v36 = vmul.f32 %v2643_v49, %v10397_v13  ;;  %v2405_v25 = vpop.permute.xlu2 %2404  ;;  %v10420_v13 = vld [vmem:[#allocation102_spill] sm:$0xff] }
 0x5a1   :  { %v2393_v46 = vadd.f32 %v2389_v15, %v2385_v20  ;;  %v2413_v49 = vmul.f32 %v2405_v25, %v10420_v13  ;;  %5146 = vpow2.f32 %v2802_v10 }
 0x5a2   :  { %v2656_v29 = vadd.f32 %v2652_v36, %v2636_v26 }
 0x5a3   :  { %v2417_v26 = vadd.f32 %v2413_v49, %v2393_v46  ;;  %v5145_v46 = vpop.eup %5144 }
 0x5a4   :  { %v2676_v2 = vadd.f32 %v2672_v31, %v2656_v29  ;;  %v8444_v31 = vpop.permute.xlu0 %2762  ;;  %v8448_v20 = vadd.f32 1.0, %v5145_v46 }
 0x5a5   :  { %3393 = vrot.lane.b32.xlu0 %v8316_v6, %s10421_s29  ;;  %3400 = vrot.lane.b32.xlu1 %v10388_v11, %s10421_s29 }
 0x5a6   :  { %v2696_v22 = vadd.f32 %v2692_v35, %v2676_v2  ;;  %5148 = vrcp.f32 %v8448_v20  ;;  %vm2559_vm10 = vweird.f32 %v8448_v20 }
 0x5a7   :  { %v2703_v36 = vpop.permute.xlu1 %2702  ;;  %v5147_v29 = vpop.eup %5146 }
 0x5a8   :  { %v2712_v32 = vmul.f32 %v2703_v36, %v10403_v53  ;;  %v2465_v17 = vpop.permute.xlu2 %2464  ;;  %v2752_v53 = vmul.f32 %v2743_v47, %v10406_v7  ;;  %v8452_v49 = vadd.f32 1.0, %v5147_v29 }
 0x5a9   :  { %v2473_v15 = vmul.f32 %v2465_v17, %v10422_v61 }
 0x5aa   :  { %v2716_v51 = vadd.f32 %v2712_v32, %v2696_v22  ;;  %5150 = vrcp.f32 %v8452_v49  ;;  %vm2819_vm13 = vweird.f32 %v8452_v49 }
 0x5ad   :  { %3409 = vrot.lane.b32.xlu0 %v8316_v6, %s10180_s20  ;;  %3416 = vrot.lane.b32.xlu1 %v10388_v11, %s10180_s20  ;;  %v10423_v6 = vld [vmem:[#allocation97_spill] sm:$0xff] }
 0x5af   :  { %v2723_v2 = vpop.permute.xlu1 %2722 }
 0x5b0   :  { %v2732_v35 = vmul.f32 %v2723_v2, %v10405_v63  ;;  %v2525_v25 = vpop.permute.xlu2 %2524  ;;  %v5149_v2 = vpop.eup %5148 }
 0x5b1   :  { %v2533_v22 = vmul.f32 %v2525_v25, %v10423_v6  ;;  %v5151_v46 = vpop.eup %5150  ;;  %vm2560_vm0 = vweird.f32 %v5149_v2 }
 0x5b2   :  { %v2736_v0 = vadd.f32 %v2732_v35, %v2716_v51  ;;  %v10425_v51 = vld [vmem:[#allocation108_spill] sm:$0xff]  ;;  %vm2820_vm15 = vweird.f32 %v5151_v46  ;;  %vm8491_vm14 = vmor %vm2559_vm10, %vm2560_vm0 }
 0x5b3   :  { %vm2821_vm11 = vmor %vm2819_vm13, %vm2820_vm15 }
 0x5b4   :  { %v8450_v48 = vadd.f32 %v2752_v53, %v2736_v0  ;;  %v10428_v0 = vld [vmem:[#allocation104_spill] sm:$0xff] }
 0x5b5   :  { %3501 = vrot.lane.b32.xlu0 %v8357_v41, %s10274_s8  ;;  %2764 = vrot.lane.b32.xlu1 %v8282_v55, %s10424_s26 }
 0x5b7   :  { %v2425_v11 = vpop.permute.xlu0 %2424  ;;  %v2445_v63 = vpop.permute.xlu1 %2444 }
 0x5b8   :  { %v2433_v7 = vmul.f32 %v2425_v11, %v10425_v51  ;;  %v2453_v36 = vmul.f32 %v2445_v63, %v10426_v59  ;;  %v2645_v32 = vpop.permute.xlu2 %2644  ;;  %v2815_v11 = vmul.f32 %v5151_v46, %v8452_v49 }
 0x5b9   :  { %v2653_v17 = vmul.f32 %v2645_v32, %v10418_v58 }
 0x5ba   :  { %v2437_v47 = vadd.f32 %v2433_v7, %v2417_v26  ;;  %v2555_v26 = vmul.f32 %v5149_v2, %v8448_v20  ;;  %v10429_v7 = vld [vmem:[#allocation71_spill] sm:$0xff] }
 0x5bc   :  { %v2457_v10 = vadd.f32 %v2453_v36, %v2437_v47 }
 0x5bd   :  { %2744 = vrot.lane.b32.xlu0 %v8282_v55, %s10427_s23  ;;  %3510 = vrot.lane.b32.xlu1 %v8357_v41, %s10276_s6 }
 0x5be   :  { %v2477_v35 = vadd.f32 %v2473_v15, %v2457_v10  ;;  %v2556_v15 = vsub.f32 1.0, %v2555_v26  ;;  %v2816_v10 = vsub.f32 1.0, %v2815_v11  ;;  %v2823_v11 = vand.u32 2147483647, %v8452_v49 }
 0x5bf   :  { %v2485_v29 = vpop.permute.xlu0 %2484  ;;  %v2505_v53 = vpop.permute.xlu1 %2504 }
 0x5c0   :  { %v2493_v25 = vmul.f32 %v2485_v29, %v10428_v0  ;;  %v2513_v58 = vmul.f32 %v2505_v53, %v10429_v7  ;;  %v2705_v36 = vpop.permute.xlu2 %2704  ;;  %v10430_v29 = vld [vmem:[#allocation64_spill] sm:$0xff]  ;;  %vm2824_vm10 = vcmp.eq.f32.partialorder %v2823_v11, 8.507059e+37 }
 0x5c1   :  { %v2713_v32 = vmul.f32 %v2705_v36, %v10426_v59  ;;  %v2637_v9 = vmul.f32 %v7921_v30, %v10430_v29  ;;  %v2817_v59 = vmul.f32 %v5151_v46, %v2816_v10  ;;  %v10434_v29 = vld [vmem:[#allocation46_spill] sm:$0xff] }
 0x5c2   :  { %v2497_v63 = vadd.f32 %v2493_v25, %v2477_v35 }
 0x5c3   :  { %v2657_v53 = vadd.f32 %v2653_v17, %v2637_v9  ;;  %v2818_v9 = vadd.f32 %v5151_v46, %v2817_v59 }
 0x5c4   :  { %v2517_v47 = vadd.f32 %v2513_v58, %v2497_v63  ;;  %v2557_v58 = vmul.f32 %v5149_v2, %v2556_v15 }
 0x5c5   :  { %3519 = vrot.lane.b32.xlu0 %v8357_v41, %s10280_s2  ;;  %3528 = vrot.lane.b32.xlu1 %v8357_v41, %s10285_s10 }
 0x5c6   :  { %v8479_v28 = vadd.f32 %v2533_v22, %v2517_v47  ;;  %v2558_v30 = vadd.f32 %v5149_v2, %v2557_v58  ;;  %v2565_v22 = vand.u32 2147483648, %v8448_v20 }
 0x5c7   :  { %v2665_v35 = vpop.permute.xlu0 %2664  ;;  %v2685_v25 = vpop.permute.xlu1 %2684 }
 0x5c8   :  { %10431 = vst [vmem:[#allocation124_spill] sm:$0xff] %v8479_v28  ;;  %v2673_v63 = vmul.f32 %v2665_v35, %v10420_v13  ;;  %v2693_v14 = vmul.f32 %v2685_v25, %v10425_v51  ;;  %v2725_v12 = vpop.permute.xlu2 %2724  ;;  %v2566_v15 = vor.u32 1.1754944e-38, %v2565_v22  ;;  %v8504_v35 = vmul.f32 %v10416_v24, %v10434_v29 }
 0x5c9   :  { %v2733_v26 = vmul.f32 %v2725_v12, %v10422_v61  ;;  %v2563_v61 = vand.u32 2147483647, %v8448_v20  ;;  %v8508_v25 = vmul.f32 %v10414_v8, %v10434_v29 }
 0x5ca   :  { %v2677_v36 = vadd.f32 %v2673_v63, %v2657_v53  ;;  %v2799_v63 = vsub.f32 0.0, %v8504_v35 }
 0x5cb   :  { %vm2564_vm0 = vcmp.eq.f32.partialorder %v2563_v61, 8.507059e+37 }
 0x5cc   :  { %v2697_v5 = vadd.f32 %v2693_v14, %v2677_v36  ;;  %v2825_v14 = vand.u32 2147483648, %v8452_v49  ;;  %v2539_v36 = vsub.f32 0.0, %v8508_v25  ;;  %v2804_v22 = vmul.f32 1.442695, %v2799_v63 }
 0x5cd   :  { %3537 = vrot.lane.b32.xlu0 %v8357_v41, %s10287_s3  ;;  %3546 = vrot.lane.b32.xlu1 %v8357_v41, %s10387_s25  ;;  %s10435_s25 = sld [smem:[#allocation16_spill]]  ;;  %v10440_v63 = vmov 0  }
 0x5ce   :  { %v2717_v13 = vadd.f32 %v2713_v32, %v2697_v5  ;;  %v2562_v5 = vsel %vm8491_vm14, %v5149_v2, %v2558_v30  ;;  %v2822_v32 = vsel %vm2821_vm11, %v5151_v46, %v2818_v9  ;;  %v2826_v10 = vor.u32 1.1754944e-38, %v2825_v14 }
 0x5cf   :  { %v3250_v51 = vpop.permute.xlu0 %3249  ;;  %v3257_v17 = vpop.permute.xlu1 %3256  ;;  %v2567_v49 = vsel %vm2564_vm0, %v2566_v15, %v2562_v5  ;;  %v8521_v9 = vstv %s7770_s12  ;;  %v2544_v14 = vmul.f32 1.442695, %v2539_v36  ;;  %5152 = vpow2.f32 %v2804_v22 }
 0x5d0   :  { %v8498_v47 = vadd.f32 %v2733_v26, %v2717_v13  ;;  %v3241_v20 = vpop.permute.xlu2 %3240  ;;  %v2827_v53 = vsel %vm2824_vm10, %v2826_v10, %v2822_v32  ;;  %v2614_v58 = vmul.f32 %v2567_v49, %v8415_v23  ;;  %10436 = vst [vmem:[#allocation72_spill] sm:$0xff] %v8521_v9  ;;  %v8524_v13 = vstv %s7777_s16 }
 0x5d1   :  { %4828 = vpush %v3241_v20  ;;  %v2874_v59 = vmul.f32 %v2827_v53, %v8420_v27  ;;  %5154 = vpow2.f32 %v2544_v14  ;;  %v10438_v10 = vmov 1  }
 0x5d2   :  { %4830 = vpush %v3250_v51  ;;  %v2618_v26 = vmul.f32 %v2614_v58, %v8260_v60 }
 0x5d3   :  { %4832 = vpush %v3257_v17  ;;  %v2878_v30 = vmul.f32 %v2874_v59, %v8300_v37  ;;  %v5028_v17 = vld [vmem:[%s10435_s25] ss:$0 sm:$0xff] }
 0x5d4   :  { %10437 = vst [vmem:[#allocation73_spill] sm:$0xff] %v8524_v13  ;;  %v2626_v23 = vmul.f32 %v8521_v9, %v2618_v26 }
 0x5d5   :  { %3572 = vrot.lane.b32.xlu0 %v8370_v38, %s10274_s8  ;;  %3581 = vrot.lane.b32.xlu1 %v8370_v38, %s10276_s6  ;;  %v2886_v27 = vmul.f32 %v8524_v13, %v2878_v30  ;;  %v5153_v12 = vpop.eup %5152 }
 0x5d6   :  { %v2811_v32 = vadd.f32 1.0, %v5153_v12 }
 0x5d7   :  { %v3266_v2 = vpop.permute.xlu0 %3265  ;;  %v3273_v46 = vpop.permute.xlu1 %3272  ;;  %v8532_v37 = vadd.f32 %v2886_v27, %v2626_v23 }
 0x5d8   :  { %4834 = vpush %v3266_v2  ;;  %v5155_v61 = vpop.eup %5154  ;;  %5156 = vrcp.f32 %v2811_v32  ;;  %v10439_v2 = vmov 2   ;;  %vm2834_vm13 = vweird.f32 %v2811_v32 }
 0x5d9   :  { %4836 = vpush %v3273_v46  ;;  %v2551_v15 = vadd.f32 1.0, %v5155_v61 }
 0x5db   :  { %5158 = vrcp.f32 %v2551_v15  ;;  %vm2574_vm11 = vweird.f32 %v2551_v15  ;;  %v2580_v61 = vand.u32 2147483648, %v2551_v15 }
 0x5dd   :  { %3599 = vrot.lane.b32.xlu0 %v8370_v38, %s10285_s10  ;;  %3608 = vrot.lane.b32.xlu1 %v8370_v38, %s10287_s3 }
 0x5de   :  { %v5157_v49 = vpop.eup %5156 }
 0x5df   :  { %v3282_v60 = vpop.permute.xlu0 %3281  ;;  %v3289_v51 = vpop.permute.xlu1 %3288  ;;  %v2830_v46 = vmul.f32 %v5157_v49, %v2811_v32  ;;  %vm2835_vm15 = vweird.f32 %v5157_v49 }
 0x5e0   :  { %4838 = vpush %v3282_v60  ;;  %vm8544_vm0 = vmor %vm2834_vm13, %vm2835_vm15  ;;  %vm10523_vm13 = vcmask 130048  }
 0x5e1   :  { %4840 = vpush %v3289_v51  ;;  %v5159_v53 = vpop.eup %5158  ;;  %v2831_v26 = vsub.f32 1.0, %v2830_v46  ;;  %v2840_v51 = vand.u32 2147483648, %v2811_v32 }
 0x5e2   :  { %v2570_v58 = vmul.f32 %v5159_v53, %v2551_v15  ;;  %vm2575_vm14 = vweird.f32 %v5159_v53 }
 0x5e3   :  { %v2832_v22 = vmul.f32 %v5157_v49, %v2831_v26  ;;  %vm8548_vm10 = vmor %vm2574_vm11, %vm2575_vm14  ;;  %vm10524_vm11 = vcmask 195584  }
 0x5e4   :  { %v2571_v30 = vsub.f32 1.0, %v2570_v58 }
 0x5e5   :  { %3626 = vrot.lane.b32.xlu0 %v8370_v38, %s10393_s7  ;;  %3428 = vperm.xlu1 %5005, %v5028_v17   ;;  %s8541_s7 = spop %4826  ;;  %v2833_v27 = vadd.f32 %v5157_v49, %v2832_v22 }
 0x5e6   :  { %10441 = sst [smem:[#allocation57_spill]] %s8541_s7  ;;  %v9928_v12 = vstv %s8541_s7  ;;  %s10465_s7 = smov 8  }
 0x5e7   :  { %v3298_v11 = vpop.permute.xlu0 %3297  ;;  %v3305_v5 = vpop.permute.xlu1 %3304 }
 0x5e8   :  { %4842 = vpush %v3298_v11 }
 0x5e9   :  { %4844 = vpush %v3305_v5 }
 0x5ed   :  { %3462 = vperm.xlu0 %5003, %v5028_v17   ;;  %5007 = vset.pattern.permute.xlu1 %v10438_v10  ;;  %v2838_v17 = vand.u32 2147483647, %v2811_v32 }
 0x5ee   :  { %3468 = vperm.xlu1 %5007, %v8394_v34   ;;  %v2572_v34 = vmul.f32 %v5159_v53, %v2571_v30 }
 0x5ef   :  { %v3314_v29 = vpop.permute.xlu0 %3313  ;;  %v3321_v20 = vpop.permute.xlu1 %3320  ;;  %vm2839_vm15 = vcmp.eq.f32.partialorder %v2838_v17, 8.507059e+37 }
 0x5f0   :  { %4846 = vpush %v3314_v29  ;;  %v2573_v60 = vadd.f32 %v5159_v53, %v2572_v34  ;;  %v2578_v29 = vand.u32 2147483647, %v2551_v15  ;;  %v3239_v15 = vmul.f32 %v9928_v12, %v8058_v16 }
 0x5f1   :  { %4848 = vpush %v3321_v20  ;;  %v2837_v20 = vsel %vm8544_vm0, %v5157_v49, %v2833_v27  ;;  %vm10525_vm0 = vcmask 261120  }
 0x5f2   :  { %v2577_v32 = vsel %vm8548_vm10, %v5159_v53, %v2573_v60  ;;  %v2581_v53 = vor.u32 1.1754944e-38, %v2580_v61  ;;  %vm2579_vm14 = vcmp.eq.f32.partialorder %v2578_v29, 8.507059e+37  ;;  %vm10526_vm10 = vcmask 326656  }
 0x5f5   :  { %5008 = vset.pattern.permute.xlu0 %v10439_v2  ;;  %v2841_v2 = vor.u32 1.1754944e-38, %v2840_v51 }
 0x5f6   :  { %5010 = vset.pattern.permute.xlu1 %v10440_v63 }
 0x5f7   :  { %v3330_v59 = vpop.permute.xlu0 %3329  ;;  %v3337_v36 = vpop.permute.xlu1 %3336  ;;  %v2842_v26 = vsel %vm2839_vm15, %v2841_v2, %v2837_v20  ;;  %vm10528_vm15 = vcmask 392192  }
 0x5f8   :  { %4850 = vpush %v3330_v59  ;;  %v2875_v51 = vmul.f32 %v2842_v26, %v8504_v35 }
 0x5f9   :  { %4852 = vpush %v3337_v36 }
 0x5fa   :  { %v2879_v29 = vmul.f32 %v2875_v51, %v8367_v54 }
 0x5fc   :  { %v2887_v35 = vmul.f32 %v8524_v13, %v2879_v29 }
 0x5ff   :  { %v3346_v14 = vpop.permute.xlu0 %3345  ;;  %v3353_v23 = vpop.permute.xlu1 %3352 }
 0x600   :  { %4854 = vpush %v3346_v14 }
 0x601   :  { %4856 = vpush %v3353_v23  ;;  %v2582_v23 = vsel %vm2579_vm14, %v2581_v53, %v2577_v32  ;;  %vm10530_vm14 = vcmask 457728  }
 0x602   :  { %s8554_s8 = spop %4828  ;;  %v2615_v5 = vmul.f32 %v2582_v23, %v8508_v25 }
 0x603   :  { %v9929_v46 = vstv %s8554_s8  ;;  %s8559_s6 = spop %4830 }
 0x604   :  { %v3246_v49 = vmul.f32 %v9929_v46, %v8079_v1  ;;  %v9942_v36 = vstv %s8559_s6  ;;  %s8568_s2 = spop %4832 }
 0x605   :  { %v3255_v30 = vmul.f32 %v9942_v36, %v8058_v16  ;;  %v9941_v22 = vstv %s8568_s2  ;;  %v10474_v36 = vstv %s8253_s5  ;;  %s10478_s5 = smov 88  }
 0x606   :  { %v8576_v34 = vadd.f32 %v3246_v49, %v3239_v15  ;;  %v3262_v14 = vmul.f32 %v9941_v22, %v8079_v1 }
 0x607   :  { %v3362_v58 = vpop.permute.xlu0 %3361  ;;  %v3369_v59 = vpop.permute.xlu1 %3368 }
 0x608   :  { %4858 = vpush %v3362_v58  ;;  %v8586_v17 = vadd.f32 %v3262_v14, %v3255_v30  ;;  %v2619_v58 = vmul.f32 %v2615_v5, %v8338_v44 }
 0x609   :  { %4860 = vpush %v3369_v59  ;;  %s8574_s10 = spop %4834 }
 0x60a   :  { %s8581_s3 = spop %4836  ;;  %v9939_v27 = vstv %s8574_s10  ;;  %v2627_v54 = vmul.f32 %v8521_v9, %v2619_v58 }
 0x60b   :  { %v9937_v60 = vstv %s8581_s3  ;;  %v3271_v61 = vmul.f32 %v9939_v27, %v8058_v16 }
 0x60c   :  { %v3278_v11 = vmul.f32 %v9937_v60, %v8079_v1  ;;  %v8609_v14 = vadd.f32 %v2887_v35, %v2627_v54 }
 0x60e   :  { %v8596_v20 = vadd.f32 %v3278_v11, %v3271_v61  ;;  %10446 = vst [vmem:[#allocation125_spill] sm:$0xff] %v8609_v14 }
 0x60f   :  { %v3378_v2 = vpop.permute.xlu0 %3377  ;;  %v3385_v32 = vpop.permute.xlu1 %3384 }
 0x610   :  { %4862 = vpush %v3378_v2 }
 0x611   :  { %4864 = vpush %v3385_v32  ;;  %s4839_s12 = spop %4838 }
 0x612   :  { %v3284_v59 = vstv %s4839_s12  ;;  %s4841_s16 = spop %4840 }
 0x613   :  { %v3286_v15 = vmul.f32 %v3284_v59, %v8191_v50  ;;  %v3287_v49 = vmul.f32 %v3284_v59, %v8058_v16  ;;  %v3291_v25 = vstv %s4841_s16 }
 0x614   :  { %v3293_v53 = vmul.f32 %v3291_v25, %v8200_v45  ;;  %v3294_v26 = vmul.f32 %v3291_v25, %v8079_v1 }
 0x616   :  { %v8605_v30 = vadd.f32 %v3293_v53, %v3286_v15  ;;  %v8607_v44 = vadd.f32 %v3294_v26, %v3287_v49 }
 0x617   :  { %v3394_v23 = vpop.permute.xlu0 %3393  ;;  %v3401_v51 = vpop.permute.xlu1 %3400 }
 0x618   :  { %4866 = vpush %v3394_v23 }
 0x619   :  { %4868 = vpush %v3401_v51  ;;  %s8611_s29 = spop %4842  ;;  %v3556_v51 = vpop.permute.xlu2 %3555 }
 0x61a   :  { %v9936_v61 = vstv %s8611_s29  ;;  %s8614_s25 = spop %4844 }
 0x61b   :  { %v3302_v11 = vmul.f32 %v9936_v61, %v8191_v50  ;;  %v9935_v5 = vstv %s8614_s25 }
 0x61c   :  { %v3309_v29 = vmul.f32 %v9935_v5, %v8200_v45  ;;  %v10470_v5 = vstv %s8226_s13  ;;  %s10481_s13 = smov 96  }
 0x61d   :  { %v3213_v61 = vmul.f32 %v10470_v5, %v8200_v45 }
 0x61e   :  { %v8623_v2 = vadd.f32 %v3309_v29, %v3302_v11 }
 0x61f   :  { %v3410_v32 = vpop.permute.xlu0 %3409  ;;  %v3417_v58 = vpop.permute.xlu1 %3416 }
 0x620   :  { %4870 = vpush %v3410_v32 }
 0x621   :  { %4872 = vpush %v3417_v58  ;;  %s8645_s12 = spop %4846 }
 0x622   :  { %4874 = vpush %v8357_v41  ;;  %s8647_s16 = spop %4848 }
 0x627   :  { %v3502_v35 = vpop.permute.xlu0 %3501  ;;  %v2765_v59 = vpop.permute.xlu1 %2764 }
 0x628   :  { %v8627_v15 = vmul.f32 %v2765_v59, %v10429_v7  ;;  %4876 = vpush %v3502_v35  ;;  %v2772_v7 = vmul.f32 %v8444_v31, %v10407_v39  ;;  %v10448_v39 = vstv %s8048_s27 }
 0x629   :  { %v3159_v31 = vmul.f32 %v10448_v39, %v8191_v50  ;;  %s8654_s27 = spop %4850 }
 0x62f   :  { %v2745_v49 = vpop.permute.xlu0 %2744  ;;  %v3511_v25 = vpop.permute.xlu1 %3510 }
 0x630   :  { %v2753_v54 = vmul.f32 %v2745_v49, %v10428_v0  ;;  %4878 = vpush %v3511_v25  ;;  %v3591_v0 = vpop.permute.xlu2 %3590  ;;  %v10449_v49 = vstv %s8061_s14  ;;  %s8657_s14 = spop %4852 }
 0x631   :  { %s8659_s18 = spop %4854  ;;  %v3339_v28 = vstv %s8657_s14 }
 0x632   :  { %v8631_v53 = vadd.f32 %v2753_v54, %v8498_v47  ;;  %v8637_v47 = vadd.f32 %v2772_v7, %v8450_v48  ;;  %10450 = sst [smem:[#allocation60_spill]] %s8659_s18  ;;  %s8661_s28 = spop %4856 }
 0x633   :  { %10451 = sst [smem:[#allocation61_spill]] %s8661_s28 }
 0x634   :  { %10447 = vst [vmem:[#allocation74_spill] sm:$0xff] %v8637_v47 }
 0x637   :  { %v3520_v26 = vpop.permute.xlu0 %3519  ;;  %v3529_v23 = vpop.permute.xlu1 %3528 }
 0x638   :  { %4880 = vpush %v3520_v26  ;;  %v3618_v58 = vpop.permute.xlu2 %3617 }
 0x639   :  { %4882 = vpush %v3529_v23  ;;  %s8663_s21 = spop %4858 }
 0x63a   :  { %10452 = sst [smem:[#allocation59_spill]] %s8663_s21  ;;  %s8666_s24 = spop %4860 }
 0x63b   :  { %10453 = sst [smem:[#allocation58_spill]] %s8666_s24 }
 0x63f   :  { %v3538_v41 = vpop.permute.xlu0 %3537  ;;  %v3547_v11 = vpop.permute.xlu1 %3546 }
 0x640   :  { %4884 = vpush %v3538_v41 }
 0x641   :  { %4886 = vpush %v3547_v11  ;;  %s8668_s19 = spop %4862 }
 0x642   :  { %4888 = vpush %v3556_v51  ;;  %v8652_v51 = vpop.permute.xlu2 %3436  ;;  %10454 = sst [smem:[#allocation158_spill]] %s8668_s19  ;;  %s8672_s11 = spop %4864 }
 0x643   :  { %4890 = vpush %v8370_v38  ;;  %v3165_v38 = vmul.f32 %v10449_v49, %v8200_v45  ;;  %10455 = sst [smem:[#allocation159_spill]] %s8672_s11 }
 0x645   :  { %v3167_v25 = vadd.f32 %v3165_v38, %v3159_v31 }
 0x647   :  { %v3573_v29 = vpop.permute.xlu0 %3572  ;;  %v3582_v32 = vpop.permute.xlu1 %3581 }
 0x648   :  { %4892 = vpush %v3573_v29 }
 0x649   :  { %4894 = vpush %v3582_v32  ;;  %s8675_s9 = spop %4866 }
 0x64a   :  { %4896 = vpush %v3591_v0  ;;  %10456 = sst [smem:[#allocation160_spill]] %s8675_s9  ;;  %s8677_s4 = spop %4868 }
 0x64b   :  { %10457 = sst [smem:[#allocation161_spill]] %s8677_s4 }
 0x64f   :  { %v3600_v35 = vpop.permute.xlu0 %3599  ;;  %v3609_v59 = vpop.permute.xlu1 %3608 }
 0x650   :  { %4898 = vpush %v3600_v35 }
 0x651   :  { %4900 = vpush %v3609_v59  ;;  %s8679_s21 = spop %4870 }
 0x652   :  { %4902 = vpush %v3618_v58  ;;  %10458 = sst [smem:[#allocation162_spill]] %s8679_s21  ;;  %s8681_s19 = spop %4872 }
 0x653   :  { %10459 = sst [smem:[#allocation163_spill]] %s8681_s19  ;;  %s8683_s11 = spop %4874 }
 0x654   :  { %10460 = sst [smem:[#allocation164_spill]] %s8683_s11 }
 0x657   :  { %v3627_v48 = vpop.permute.xlu0 %3626  ;;  %v3429_v54 = vpop.permute.xlu1 %3428 }
 0x658   :  { %v3431_v26 = vmul.f32 %v3429_v54, %v3167_v25  ;;  %v8650_v23 = vmul.f32 %v3429_v54, %v8097_v42  ;;  %4904 = vpush %v3627_v48 }
 0x659   :  { %s8685_s24 = spop %4876 }
 0x65a   :  { %v3439_v41 = vadd.f32 %v8652_v51, %v3431_v26 }
 0x65c   :  { %v3443_v11 = vand.u32 2147483647, %v3439_v41 }
 0x65e   :  { %v3445_v7 = vsub.f32 0.0, %v3443_v11 }
 0x65f   :  { %v3463_v0 = vpop.permute.xlu0 %3462 }
 0x660   :  { %v3447_v29 = vmul.f32 1.442695, %v3445_v7  ;;  %v3465_v32 = vmul.f32 %v3463_v0, %v3167_v25  ;;  %v3466_v58 = vmul.f32 %v3463_v0, %v8097_v42  ;;  %v3469_v35 = vpop.permute.xlu1 %3468 }
 0x661   :  { %s8687_s9 = spop %4878 }
 0x662   :  { %5160 = vpow2.f32 %v3447_v29  ;;  %v8670_v59 = vadd.f32 %v3469_v35, %v3465_v32  ;;  %v3472_v39 = vadd.f32 %v3469_v35, %v3466_v58  ;;  %10461 = sst [smem:[#allocation165_spill]] %s8687_s9  ;;  %v3441_v29 = vmax.f32 %v3439_v41, 0.0 }
 0x663   :  { %v9924_v35 = vstv %s8683_s11 }
 0x664   :  { %v3475_v31 = vand.u32 2147483647, %v8670_v59  ;;  %v3476_v49 = vand.u32 2147483647, %v3472_v39  ;;  %v3473_v12 = vmax.f32 %v8670_v59, 0.0 }
 0x666   :  { %v3477_v38 = vsub.f32 0.0, %v3475_v31  ;;  %v3478_v25 = vsub.f32 0.0, %v3476_v49 }
 0x668   :  { %v5161_v42 = vpop.eup %5160  ;;  %v3479_v48 = vmul.f32 1.442695, %v3477_v38  ;;  %v3481_v26 = vmul.f32 1.442695, %v3478_v25  ;;  %v9927_v25 = vstv %s8685_s24 }
 0x669   :  { %v3451_v54 = vadd.f32 1.0, %v5161_v42  ;;  %s8689_s4 = spop %4880  ;;  %v9925_v42 = vstv %s8687_s9 }
 0x66a   :  { %5162 = vpow2.f32 %v3479_v48  ;;  %10462 = sst [smem:[#allocation166_spill]] %s8689_s4  ;;  %s8691_s19 = spop %4882  ;;  %v9926_v38 = vstv %s8689_s4 }
 0x66b   :  { %5164 = vlog2.f32 %v3451_v54 }
 0x66c   :  { %5166 = vpow2.f32 %v3481_v26 }
 0x670   :  { %v5163_v11 = vpop.eup %5162 }
 0x671   :  { %v5165_v7 = vpop.eup %5164  ;;  %v3483_v0 = vadd.f32 1.0, %v5163_v11  ;;  %s8694_s21 = spop %4884 }
 0x672   :  { %v3454_v32 = vmul.f32 0.6931472, %v5165_v7  ;;  %v5167_v58 = vpop.eup %5166  ;;  %10463 = sst [smem:[#allocation167_spill]] %s8694_s21  ;;  %s8699_s30 = spop %4886  ;;  %v9932_v7 = vstv %s8694_s21 }
 0x673   :  { %v3484_v49 = vadd.f32 1.0, %v5167_v58  ;;  %5168 = vlog2.f32 %v3483_v0  ;;  %10464 = sst [smem:[#allocation168_spill]] %s8699_s30  ;;  %s8709_s28 = spop %4888  ;;  %v9933_v58 = vstv %s8699_s30 }
 0x674   :  { %v3457_v31 = vadd.f32 %v3454_v32, %v3441_v29  ;;  %s8713_s18 = spop %4890  ;;  %v3474_v29 = vmax.f32 %v3472_v39, 0.0  ;;  %s10511_s14 = sld [smem:[#allocation168_spill]] }
 0x675   :  { %5170 = vlog2.f32 %v3484_v49  ;;  %v3566_v49 = vstv %s8713_s18  ;;  %s10467_s18 = smov 48  }
 0x676   :  { %v8703_v41 = vmul.f32 %v9924_v35, %v3457_v31  ;;  %v3506_v48 = vmul.f32 %v9927_v25, %v3457_v31  ;;  %v3515_v54 = vmul.f32 %v9925_v42, %v3457_v31  ;;  %v3524_v26 = vmul.f32 %v9926_v38, %v3457_v31 }
 0x677   :  { %v9934_v38 = vstv %s8691_s19  ;;  %v3551_v25 = vmul.f32 %v9933_v58, %v3457_v31  ;;  %v10469_v58 = vstv %s8217_s1  ;;  %s10475_s1 = smov 72  }
 0x678   :  { %3645 = vrot.lane.b32.xlu2 %v3515_v54, %s10424_s26  ;;  %3653 = vrot.lane.b32.xlu0 %v3524_v26, %s10427_s23  ;;  %v3542_v26 = vmul.f32 %v9932_v7, %v3457_v31  ;;  %v3533_v46 = vmul.f32 %v9934_v38, %v3457_v31  ;;  %v3206_v38 = vmul.f32 %v10469_v58, %v8191_v50 }
 0x679   :  { %s8717_s11 = spop %4892  ;;  %3637 = vrot.lane.b32.xlu1 %v3506_v48, %s10465_s7  ;;  %v5169_v11 = vpop.eup %5168  ;;  %s10466_s7 = smov 40  }
 0x67a   :  { %s8720_s9 = spop %4894  ;;  %v3486_v54 = vmul.f32 0.6931472, %v5169_v11  ;;  %v3575_v35 = vstv %s8717_s11  ;;  %v3215_v27 = vadd.f32 %v3213_v61, %v3206_v38  ;;  %v10476_v38 = vstv %s8559_s6  ;;  %s10489_s6 = smov 80  }
 0x67b   :  { %s8723_s4 = spop %4896  ;;  %v5171_v0 = vpop.eup %5170  ;;  %v3254_v47 = vmul.f32 %v10476_v38, %v8191_v50 }
 0x67c   :  { %v3488_v32 = vmul.f32 0.6931472, %v5171_v0  ;;  %v3593_v42 = vstv %s8723_s4  ;;  %v8752_v59 = vadd.f32 %v3486_v54, %v3473_v12  ;;  %s10468_s4 = smov 32   ;;  %v9940_v54 = vstv %s8709_s28 }
 0x67d   :  { %v3560_v60 = vmul.f32 %v9940_v54, %v3457_v31 }
 0x67e   :  { %v8731_v48 = vadd.f32 %v3488_v32, %v3474_v29  ;;  %v3568_v7 = vmul.f32 %v3566_v49, %v8752_v59  ;;  %v3577_v54 = vmul.f32 %v3575_v35, %v8752_v59  ;;  %v3595_v61 = vmul.f32 %v3593_v42, %v8752_v59 }
 0x680   :  { %3669 = vrot.lane.b32.xlu2 %v3542_v26, %s10466_s7  ;;  %v8741_v39 = vmul.f32 %v3566_v49, %v8731_v48  ;;  %v8744_v11 = vmul.f32 %v3575_v35, %v8731_v48  ;;  %v8747_v0 = vmul.f32 %v3593_v42, %v8731_v48  ;;  %3677 = vrot.lane.b32.xlu0 %v3551_v25, %s10467_s18  ;;  %v10477_v35 = vstv %s8568_s2  ;;  %s10491_s2 = smov 119  }
 0x681   :  { %s8750_s11 = spop %4898  ;;  %3661 = vrot.lane.b32.xlu1 %v3533_v46, %s10468_s4  ;;  %s10472_s4 = smov 56   ;;  %v8789_v49 = vmul.f32 %v3457_v31, %v8191_v50 }
 0x682   :  { %v3602_v29 = vstv %s8750_s11  ;;  %s8756_s21 = spop %4900  ;;  %s10471_s11 = smov 64  }
 0x683   :  { %v8759_v32 = vmul.f32 %v3602_v29, %v8731_v48  ;;  %v9938_v26 = vstv %s8756_s21  ;;  %s8762_s30 = spop %4902  ;;  %v3517_v5 = vmul.f32 %v8789_v49, %v3215_v27 }
 0x684   :  { %v8767_v25 = vmul.f32 %v9938_v26, %v8731_v48  ;;  %v3620_v12 = vstv %s8762_s30 }
 0x685   :  { %v8772_v46 = vmul.f32 %v3620_v12, %v8731_v48 }
 0x688   :  { %3693 = vrot.lane.b32.xlu2 %v3568_v7, %s10471_s11  ;;  %v10473_v7 = vstv %s8246_s15  ;;  %s10488_s15 = sld [smem:[#allocation61_spill]] }
 0x689   :  { %s8784_s30 = spop %4904  ;;  %3685 = vrot.lane.b32.xlu1 %v3560_v60, %s10472_s4  ;;  %v3222_v22 = vmul.f32 %v10473_v7, %v8191_v50  ;;  %v3229_v60 = vmul.f32 %v10474_v36, %v8200_v45  ;;  %v8815_v7 = vadd.f32 %v8652_v51, %v8650_v23  ;;  %v3604_v23 = vmul.f32 %v3602_v29, %v8752_v59 }
 0x68a   :  { %v3629_v26 = vstv %s8784_s30  ;;  %v10479_v51 = vstv %s8574_s10  ;;  %s10494_s10 = sld [smem:[#allocation59_spill]] }
 0x68b   :  { %v8792_v58 = vmul.f32 %v3629_v26, %v8731_v48  ;;  %v8804_v31 = vadd.f32 %v3229_v60, %v3222_v22  ;;  %v3444_v42 = vand.u32 2147483647, %v8815_v7  ;;  %v3270_v38 = vmul.f32 %v10479_v51, %v8191_v50  ;;  %s10516_s30 = sld [smem:[#allocation163_spill]] }
 0x68c   :  { %v10484_v51 = vstv %s8145_s22  ;;  %s10486_s22 = sld [smem:[#allocation57_spill]] }
 0x68d   :  { %v3526_v36 = vmul.f32 %v8789_v49, %v8804_v31  ;;  %v3446_v60 = vsub.f32 0.0, %v3444_v42  ;;  %v10482_v42 = vstv %s8611_s29  ;;  %v3174_v9 = vmul.f32 %v10484_v51, %v8191_v50  ;;  %s10497_s29 = smov 104  }
 0x68e   :  { %v3303_v29 = vmul.f32 %v10482_v42, %v8058_v16  ;;  %v3323_v42 = vstv %s8647_s16  ;;  %v3355_v19 = vstv %s10488_s15  ;;  %s10503_s16 = sld [smem:[#allocation166_spill]] }
 0x68f   :  { %s10534_s15 = sld [smem:[#allocation27_spill]] }
 0x690   :  { %3799 = vrot.lane.b32.xlu2 %v3517_v5, %s10424_s26  ;;  %v3261_v5 = vmul.f32 %v10477_v35, %v8200_v45  ;;  %v10480_v35 = vstv %s8581_s3  ;;  %s10496_s3 = smov 8  }
 0x691   :  { %3701 = vrot.lane.b32.xlu1 %v3577_v54, %s10475_s1 }
 0x692   :  { %v3263_v22 = vadd.f32 %v3261_v5, %v3254_v47  ;;  %v3622_v5 = vmul.f32 %v3620_v12, %v8752_v59  ;;  %v487_v12 = vsel %vm9955_vm7, %v8405_v57, 0.0 }
 0x694   :  { %v3544_v54 = vmul.f32 %v8789_v49, %v3263_v22 }
 0x698   :  { %3717 = vrot.lane.b32.xlu2 %v3595_v61, %s10478_s5  ;;  %v3277_v61 = vmul.f32 %v10480_v35, %v8200_v45  ;;  %v10485_v35 = vstv %s8158_s0  ;;  %s10487_s0 = sld [smem:[#allocation60_spill]] }
 0x699   :  { %3807 = vrot.lane.b32.xlu1 %v3526_v36, %s10427_s23  ;;  %v3449_v36 = vmul.f32 1.442695, %v3446_v60  ;;  %v3181_v13 = vmul.f32 %v10485_v35, %v8200_v45  ;;  %v3325_v35 = vmul.f32 %v3323_v42, %v8200_v45 }
 0x69a   :  { %v8832_v47 = vadd.f32 %v3277_v61, %v3270_v38 }
 0x69b   :  { %5172 = vpow2.f32 %v3449_v36  ;;  %v8859_v61 = vadd.f32 %v3181_v13, %v3174_v9  ;;  %v3316_v36 = vstv %s8645_s12  ;;  %s10501_s12 = sld [smem:[#allocation159_spill]] }
 0x69c   :  { %v3553_v60 = vmul.f32 %v8789_v49, %v8832_v47  ;;  %v3318_v51 = vmul.f32 %v3316_v36, %v8191_v50  ;;  %v3319_v57 = vmul.f32 %v3316_v36, %v8058_v16  ;;  %v4440_v36 = vpop.permute.xlu2 %4439 }
 0x69e   :  { %v8872_v13 = vadd.f32 %v3325_v35, %v3318_v51  ;;  %v3342_v51 = vmul.f32 %v3339_v28, %v8079_v1  ;;  %v10490_v35 = vstv %s8554_s8  ;;  %v3348_v14 = vstv %s10487_s0  ;;  %s10495_s8 = sld [smem:[#allocation58_spill]] }
 0x69f   :  { %s10531_s0 = sld [smem:[#allocation167_spill]] }
 0x6a0   :  { %3823 = vrot.lane.b32.xlu2 %v3544_v54, %s10466_s7  ;;  %v10483_v54 = vstv %s8614_s25  ;;  %s10500_s25 = sld [smem:[#allocation158_spill]] }
 0x6a1   :  { %3725 = vrot.lane.b32.xlu1 %v3604_v23, %s10481_s13  ;;  %v3310_v56 = vmul.f32 %v10483_v54, %v8079_v1  ;;  %v8855_v23 = vmul.f32 %v8752_v59, %v8200_v45  ;;  %v5173_v54 = vpop.eup %5172 }
 0x6a2   :  { %v3452_v9 = vadd.f32 1.0, %v5173_v54  ;;  %v3341_v54 = vmul.f32 %v3339_v28, %v8200_v45  ;;  %v3508_v28 = vmul.f32 %v8789_v49, %v8212_v52 }
 0x6a3   :  { %v8857_v38 = vadd.f32 %v3310_v56, %v3303_v29  ;;  %v3631_v56 = vmul.f32 %v3629_v26, %v8752_v59 }
 0x6a4   :  { %5174 = vlog2.f32 %v3452_v9 }
 0x6a8   :  { %3741 = vrot.lane.b32.xlu2 %v3622_v5, %s10180_s20  ;;  %v3570_v5 = vmul.f32 %v8855_v23, %v8859_v61 }
 0x6a9   :  { %3831 = vrot.lane.b32.xlu1 %v3553_v60, %s10467_s18  ;;  %v3326_v60 = vmul.f32 %v3323_v42, %v8079_v1  ;;  %v3588_v42 = vmul.f32 %v8855_v23, %v3215_v27 }
 0x6aa   :  { %488 = vadd.xlane.f32.xlu0 %v487_v12  ;;  %v3332_v12 = vstv %s8654_s27  ;;  %s10509_s27 = smov 32  }
 0x6ab   :  { %v8874_v29 = vadd.f32 %v3326_v60, %v3319_v57  ;;  %v3334_v26 = vmul.f32 %v3332_v12, %v8191_v50  ;;  %v4442_v57 = vmul.f32 %v4440_v36, %v10412_v40  ;;  %v3245_v60 = vmul.f32 %v10490_v35, %v8200_v45 }
 0x6ad   :  { %v8889_v9 = vadd.f32 %v3341_v54, %v3334_v26  ;;  %v3350_v26 = vmul.f32 %v3348_v14, %v8191_v50  ;;  %v3357_v54 = vmul.f32 %v3355_v19, %v8200_v45 }
 0x6b0   :  { %3847 = vrot.lane.b32.xlu2 %v3570_v5, %s10471_s11  ;;  %v3335_v5 = vmul.f32 %v3332_v12, %v8058_v16  ;;  %v10493_v12 = vstv %s10486_s22  ;;  %s10527_s22 = sld [smem:[#allocation165_spill]] }
 0x6b1   :  { %3749 = vrot.lane.b32.xlu1 %v3631_v56, %s10066_s17  ;;  %v5175_v56 = vpop.eup %5174  ;;  %v3238_v6 = vmul.f32 %v10493_v12, %v8191_v50 }
 0x6b2   :  { %v8891_v27 = vadd.f32 %v3342_v51, %v3335_v5  ;;  %v3456_v36 = vmul.f32 0.6931472, %v5175_v56  ;;  %v3351_v5 = vmul.f32 %v3348_v14, %v8058_v16  ;;  %v3358_v51 = vmul.f32 %v3355_v19, %v8079_v1 }
 0x6b3   :  { %v3247_v40 = vadd.f32 %v3245_v60, %v3238_v6  ;;  %v8914_v14 = vadd.f32 %v8627_v15, %v8631_v53  ;;  %v3364_v19 = vstv %s10494_s10  ;;  %v3584_v56 = vstv %s8720_s9  ;;  %s10506_s9 = sld [smem:[#allocation160_spill]] }
 0x6b4   :  { %10492 = vst [vmem:[#allocation82_spill] sm:$0xff] %v8891_v27  ;;  %v8918_v60 = vadd.f32 %v3358_v51, %v3351_v5  ;;  %v3586_v12 = vmul.f32 %v3584_v56, %v8752_v59  ;;  %v3367_v15 = vmul.f32 %v3364_v19, %v8058_v16  ;;  %v3633_v5 = vmul.f32 %v8855_v23, %v8605_v30  ;;  %s10537_s10 = sld [smem:[#allocation17_spill]] }
 0x6b5   :  { %v3606_v6 = vmul.f32 %v8855_v23, %v3247_v40  ;;  %10498 = vst [vmem:[#allocation89_spill] sm:$0xff] %v8914_v14  ;;  %v10517_v14 = vstv %s8709_s28  ;;  %s10520_s28 = sld [smem:[#allocation30_spill]] }
 0x6b6   :  { %10499 = vst [vmem:[#allocation127_spill] sm:$0xff] %v8918_v60  ;;  %v3587_v60 = vmul.f32 %v3584_v56, %v8731_v48 }
 0x6b8   :  { %3863 = vrot.lane.b32.xlu2 %v3588_v42, %s10489_s6  ;;  %v3615_v42 = vmul.f32 %v8855_v23, %v3263_v22  ;;  %v8916_v22 = vadd.f32 %v3357_v54, %v3350_v26 }
 0x6b9   :  { %4444 = vrot.lane.b32.xlu1 %v4442_v57, %s10491_s2  ;;  %v3442_v57 = vmax.f32 %v8815_v7, 0.0  ;;  %v3371_v7 = vstv %s10495_s8  ;;  %s10535_s2 = sld [smem:[#allocation164_spill]] }
 0x6ba   :  { %v3373_v53 = vmul.f32 %v3371_v7, %v8200_v45  ;;  %v3374_v26 = vmul.f32 %v3371_v7, %v8079_v1  ;;  %v10508_v7 = vstv %s8691_s19  ;;  %s10514_s19 = sld [smem:[#allocation162_spill]] }
 0x6bb   :  { %v8909_v35 = vadd.f32 %v3456_v36, %v3442_v57  ;;  %v3380_v57 = vstv %s10500_s25  ;;  %s10539_s8 = sld [smem:[#allocation12_spill]] }
 0x6bc   :  { %v8938_v51 = vadd.f32 %v3374_v26, %v3367_v15  ;;  %s10548_s25 = sld [smem:[#allocation23_spill]] }
 0x6bd   :  { %v9000_v56 = vmul.f32 %v8909_v35, %v8058_v16 }
 0x6be   :  { %3791 = vrot.lane.b32.xlu0 %v3508_v28, %s10496_s3  ;;  %v10502_v28 = vstv %s8685_s24  ;;  %10505 = vst [vmem:[#allocation90_spill] sm:$0xff] %v8938_v51  ;;  %s10507_s24 = sld [smem:[#allocation161_spill]] }
 0x6bf   :  { %v3507_v36 = vmul.f32 %v10502_v28, %v8909_v35  ;;  %v3382_v28 = vmul.f32 %v3380_v57, %v8191_v50 }
 0x6c0   :  { %3887 = vrot.lane.b32.xlu2 %v3615_v42, %s10497_s29  ;;  %v3366_v42 = vmul.f32 %v3364_v19, %v8191_v50  ;;  %v3535_v19 = vmul.f32 %v8789_v49, %v3247_v40 }
 0x6c1   :  { %3879 = vrot.lane.b32.xlu1 %v3606_v6, %s10481_s13  ;;  %v3387_v6 = vstv %s10501_s12  ;;  %s10558_s12 = sld [smem:[#allocation25_spill]] }
 0x6c2   :  { %v8936_v54 = vadd.f32 %v3373_v53, %v3366_v42  ;;  %v3389_v42 = vmul.f32 %v3387_v6, %v8200_v45  ;;  %v3390_v15 = vmul.f32 %v3387_v6, %v8079_v1  ;;  %v10510_v53 = vstv %s10503_s16  ;;  %s10563_s16 = sld [smem:[#allocation20_spill]] }
 0x6c3   :  { %v3525_v26 = vmul.f32 %v10510_v53, %v8909_v35  ;;  %v10515_v6 = vstv %s8756_s21  ;;  %s10522_s21 = sld [smem:[#allocation32_spill]] }
 0x6c4   :  { %10504 = vst [vmem:[#allocation136_spill] sm:$0xff] %v8936_v54  ;;  %v3403_v51 = vstv %s10507_s24  ;;  %v3561_v54 = vmul.f32 %v10517_v14, %v8909_v35 }
 0x6c6   :  { %3709 = vrot.lane.b32.xlu0 %v3586_v12, %s10489_s6  ;;  %v3534_v12 = vmul.f32 %v10508_v7, %v8909_v35 }
 0x6c8   :  { %3639 = vrot.lane.b32.xlu2 %v3507_v36, %s10496_s3  ;;  %v3383_v36 = vmul.f32 %v3380_v57, %v8058_v16  ;;  %v3396_v57 = vstv %s10506_s9 }
 0x6c9   :  { %3903 = vrot.lane.b32.xlu1 %v3633_v5, %s10066_s17  ;;  %v8956_v5 = vadd.f32 %v3389_v42, %v3382_v28  ;;  %v3398_v53 = vmul.f32 %v3396_v57, %v8191_v50  ;;  %v3406_v28 = vmul.f32 %v3403_v51, %v8079_v1 }
 0x6ca   :  { %v8958_v7 = vadd.f32 %v3390_v15, %v3383_v36  ;;  %v10518_v36 = vstv %s10511_s14  ;;  %v10519_v15 = vld [vmem:[#allocation85_spill] sm:$0xff] }
 0x6cb   :  { %10512 = vst [vmem:[#allocation137_spill] sm:$0xff] %v8956_v5  ;;  %v3552_v42 = vmul.f32 %v10518_v36, %v8909_v35  ;;  %v3419_v5 = vstv %s10516_s30 }
 0x6cc   :  { %10513 = vst [vmem:[#allocation128_spill] sm:$0xff] %v8958_v7  ;;  %v3421_v27 = vmul.f32 %v3419_v5, %v8200_v45 }
 0x6ce   :  { %3815 = vrot.lane.b32.xlu0 %v3535_v19, %s10509_s27  ;;  %v3613_v19 = vmul.f32 %v10515_v6, %v8752_v59  ;;  %v4457_v59 = vsub.f32 0.0, %v10519_v15 }
 0x6d0   :  { %3663 = vrot.lane.b32.xlu2 %v3534_v12, %s10509_s27  ;;  %v3399_v12 = vmul.f32 %v3396_v57, %v8058_v16  ;;  %v3412_v57 = vstv %s10514_s19 }
 0x6d1   :  { %3655 = vrot.lane.b32.xlu1 %v3525_v26, %s10427_s23  ;;  %v3405_v26 = vmul.f32 %v3403_v51, %v8200_v45  ;;  %v3562_v51 = vmul.f32 %v8789_v49, %v8605_v30  ;;  %v3414_v36 = vmul.f32 %v3412_v57, %v8191_v50 }
 0x6d2   :  { %v3646_v40 = vpop.permute.xlu2 %3645  ;;  %v8981_v7 = vadd.f32 %v3406_v28, %v3399_v12 }
 0x6d3   :  { %v8979_v6 = vadd.f32 %v3405_v26, %v3398_v53  ;;  %v9004_v12 = vadd.f32 %v3421_v27, %v3414_v36  ;;  %v5023_v27 = vld [vmem:[%s10520_s28] ss:$0 sm:$0xff]  ;;  %v3597_v36 = vmul.f32 %v8855_v23, %v8804_v31 }
 0x6d6   :  { %3733 = vrot.lane.b32.xlu0 %v3613_v19, %s10497_s29  ;;  %v4458_v19 = vmul.f32 1.442695, %v4457_v59  ;;  %v466_v59 = vpop.f32.mrf.mxu3 }
 0x6d8   :  { %3687 = vrot.lane.b32.xlu2 %v3561_v54, %s10472_s4  ;;  %v3415_v54 = vmul.f32 %v3412_v57, %v8058_v16  ;;  %5176 = vpow2.f32 %v4458_v19 }
 0x6d9   :  { %3679 = vrot.lane.b32.xlu1 %v3552_v42, %s10467_s18  ;;  %v3422_v42 = vmul.f32 %v3419_v5, %v8079_v1  ;;  %v3579_v5 = vmul.f32 %v8855_v23, %v8212_v52  ;;  %v9021_v52 = vmul.f32 %v8731_v48, %v8079_v1 }
 0x6da   :  { %v3670_v14 = vpop.permute.xlu2 %3669 }
 0x6db   :  { %v9002_v53 = vadd.f32 %v3422_v42, %v3415_v54  ;;  %v9033_v42 = vadd.f32 %v5023_v27, %v466_v59 }
 0x6dd   :  { %10521 = vst [vmem:[#allocation134_spill] sm:$0xff] %v9002_v53 }
 0x6de   :  { %3839 = vrot.lane.b32.xlu0 %v3562_v51, %s10472_s4  ;;  %v5177_v26 = vpop.eup %5176 }
 0x6df   :  { %v9016_v28 = vadd.f32 1.0, %v5177_v26 }
 0x6e0   :  { %3711 = vrot.lane.b32.xlu2 %v3587_v60, %s10489_s6  ;;  %v3509_v60 = vmul.f32 %v9000_v56, %v8214_v18 }
 0x6e1   :  { %3703 = vrot.lane.b32.xlu1 %v8744_v11, %s10475_s1  ;;  %5178 = vrcp.f32 %v9016_v28 }
 0x6e2   :  { %v8996_v30 = vpop.permute.xlu2 %3693 }
 0x6e6   :  { %3855 = vrot.lane.b32.xlu0 %v3579_v5, %s10475_s1 }
 0x6e7   :  { %v9046_v26 = vpop.eup %5178 }
 0x6e8   :  { %3793 = vrot.lane.b32.xlu2 %v3509_v60, %s10496_s3  ;;  %v259_v60 = vld [vmem:[%s10522_s21 + $0x38] sm:$0xff] }
 0x6e9   :  { %3727 = vrot.lane.b32.xlu1 %v8759_v32, %s10481_s13  ;;  %v9029_v32 = vmul.f32 %v9021_v52, %v8240_v43  ;;  %533 = vmatpush.msrb.mxu3 %v259_v60 }
 0x6ea   :  { %v9014_v11 = vpop.permute.xlu2 %3799  ;;  %v3654_v57 = vpop.permute.xlu0 %3653 }
 0x6eb   :  { %v3638_v51 = vpop.permute.xlu1 %3637 }
 0x6ec   :  { %v3755_v19 = vsel %vm9955_vm7, %v8703_v41, %v3638_v51  ;;  %v3518_v41 = vmul.f32 %v9000_v56, %v8240_v43 }
 0x6ed   :  { %v3757_v54 = vsel %vm10523_vm13, %v3755_v19, %v3646_v40  ;;  %v470_v40 = vand.u32 2147483647, %v9033_v42  ;;  %v258_v19 = vld [vmem:[%s10522_s21 + $0x30] sm:$0xff]  ;;  %vm4466_vm13 = vweird.f32 %v9016_v28 }
 0x6ee   :  { %3871 = vrot.lane.b32.xlu0 %v3597_v36, %s10478_s5  ;;  %v3759_v48 = vsel %vm10524_vm11, %v3757_v54, %v3654_v57  ;;  %v4462_v36 = vmul.f32 %v9046_v26, %v9016_v28  ;;  %534 = vmatpush.msrb.mxu3 %v258_v19  ;;  %vm4467_vm11 = vweird.f32 %v9046_v26 }
 0x6ef   :  { %v471_v57 = vsub.f32 0.0, %v470_v40  ;;  %v255_v40 = vld [vmem:[%s10522_s21 + $0x18] sm:$0xff] }
 0x6f0   :  { %3743 = vrot.lane.b32.xlu2 %v8772_v46, %s10180_s20  ;;  %v3624_v46 = vmul.f32 %v8855_v23, %v8832_v47  ;;  %v257_v47 = vld [vmem:[%s10522_s21 + $0x28] sm:$0xff] }
 0x6f1   :  { %3801 = vrot.lane.b32.xlu1 %v3518_v41, %s10424_s26  ;;  %535 = vmatpush.msrb.mxu3 %v257_v47  ;;  %v472_v54 = vmul.f32 1.442695, %v471_v57  ;;  %v256_v41 = vld [vmem:[%s10522_s21 + $0x20] sm:$0xff]  ;;  %v3616_v57 = vmul.f32 %v9021_v52, %v8586_v17 }
 0x6f2   :  { %v9042_v31 = vpop.permute.xlu2 %3717  ;;  %v3678_v59 = vpop.permute.xlu0 %3677 }
 0x6f3   :  { %v3662_v5 = vpop.permute.xlu1 %3661  ;;  %536 = vmatpush.msrb.mxu3 %v256_v41  ;;  %5180 = vpow2.f32 %v472_v54  ;;  %v10533_v41 = vstv %s10531_s0 }
 0x6f4   :  { %v3761_v27 = vsel %vm10525_vm0, %v3759_v48, %v3662_v5  ;;  %v10529_v5 = vstv %s10527_s22  ;;  %vm10532_vm0 = vcmask 523264  }
 0x6f5   :  { %v3763_v43 = vsel %vm10526_vm10, %v3761_v27, %v3670_v14  ;;  %v4463_v14 = vsub.f32 1.0, %v4462_v36  ;;  %v3516_v60 = vmul.f32 %v10529_v5, %v8909_v35  ;;  %537 = vmatpush.msrb.mxu3 %v255_v40  ;;  %v4470_v36 = vand.u32 2147483647, %v9016_v28  ;;  %v252_v5 = vld [vmem:[%s10522_s21] sm:$0xff]  ;;  %vm4468_vm10 = vmor %vm4466_vm13, %vm4467_vm11 }
 0x6f6   :  { %3895 = vrot.lane.b32.xlu0 %v3624_v46, %s10180_s20  ;;  %v3765_v51 = vsel %vm10528_vm15, %v3763_v43, %v3678_v59  ;;  %v254_v43 = vld [vmem:[%s10522_s21 + $0x10] sm:$0xff]  ;;  %v3543_v40 = vmul.f32 %v10533_v41, %v8909_v35  ;;  %vm10541_vm13 = vcmask 130048   ;;  %vm10542_vm11 = vcmask 195584  }
 0x6f7   :  { %v4464_v46 = vmul.f32 %v9046_v26, %v4463_v14  ;;  %538 = vmatpush.msrb.mxu3 %v254_v43  ;;  %v3634_v43 = vmul.f32 %v9021_v52, %v8607_v44  ;;  %vm4471_vm15 = vcmp.eq.f32.partialorder %v4470_v36, 8.507059e+37 }
 0x6f8   :  { %3751 = vrot.lane.b32.xlu2 %v8792_v58, %s10066_s17  ;;  %v3545_v58 = vmul.f32 %v9000_v56, %v8586_v17 }
 0x6f9   :  { %v4465_v19 = vadd.f32 %v9046_v26, %v4464_v46  ;;  %v5181_v14 = vpop.eup %5180  ;;  %v9103_v46 = vmul.f32 %v9000_v56, %v8185_v4 }
 0x6fa   :  { %v9060_v23 = vpop.permute.xlu2 %3823 }
 0x6fb   :  { %v3686_v48 = vpop.permute.xlu1 %3685 }
 0x6fc   :  { %v3767_v27 = vsel %vm10530_vm14, %v3765_v51, %v3686_v48  ;;  %v253_v51 = vld [vmem:[%s10522_s21 + $0x8] sm:$0xff]  ;;  %v4472_v48 = vand.u32 2147483648, %v9016_v28  ;;  %vm10540_vm14 = vmmov %vm10532_vm0 }
 0x6fd   :  { %v3769_v54 = vsel %vm10532_vm0, %v3767_v27, %v8996_v30  ;;  %539 = vmatpush.msrb.mxu3 %v253_v51  ;;  %v3536_v30 = vmul.f32 %v9000_v56, %v8576_v34  ;;  %v3554_v27 = vmul.f32 %v9000_v56, %v8596_v20  ;;  %v4469_v51 = vsel %vm4468_vm10, %v9046_v26, %v4465_v19 }
 0x6fe   :  { %3647 = vrot.lane.b32.xlu0 %v3516_v60, %s10424_s26  ;;  %v3527_v60 = vmul.f32 %v9000_v56, %v8270_v3  ;;  %v9123_v26 = vmul.f32 %v9021_v52, %v8270_v3  ;;  %v9129_v19 = vmul.f32 %v9021_v52, %v8596_v20  ;;  %v5029_v20 = vld [vmem:[%s10534_s15] ss:$0 sm:$0xff]  ;;  %vm10543_vm0 = vcmask 261120  }
 0x6ff   :  { %540 = vmatpush.msrb.mxu3 %v252_v5  ;;  %v10536_v5 = vld [vmem:[#allocation47_spill] sm:$0xff]  ;;  %vm10544_vm10 = vcmask 326656  }
 0x700   :  { %3825 = vrot.lane.b32.xlu2 %v3545_v58, %s10466_s7  ;;  %v3563_v58 = vmul.f32 %v9000_v56, %v8607_v44  ;;  %v3607_v44 = vmul.f32 %v9021_v52, %v8576_v34  ;;  %v469_v34 = vmax.f32 %v9033_v42, 0.0 }
 0x702   :  { %v9073_v59 = vpop.permute.xlu2 %3741 }
 0x703   :  { %v3702_v47 = vpop.permute.xlu1 %3701 }
 0x704   :  { %v9090_v17 = vsel %vm1845_vm1, %v3769_v54, %v3702_v47  ;;  %v474_v47 = vadd.f32 1.0, %v5181_v14  ;;  %v4473_v54 = vor.u32 1.1754944e-38, %v4472_v48 }
 0x706   :  { %3671 = vrot.lane.b32.xlu0 %v3543_v40, %s10466_s7  ;;  %v4474_v41 = vsel %vm4471_vm15, %v4473_v54, %v4469_v51  ;;  %5182 = vlog2.f32 %v474_v47  ;;  %v3571_v40 = vmul.f32 %v9021_v52, %v8185_v4  ;;  %v495_v47 = vmul.f32 %v5029_v20, %v10536_v5  ;;  %v5030_v20 = vld [vmem:[%s10539_s8] ss:$0 sm:$0xff] }
 0x707   :  { %v4476_v28 = vmul.f32 %v4474_v41, %v10519_v15  ;;  %vm10545_vm15 = vcmask 392192  }
 0x708   :  { %3841 = vrot.lane.b32.xlu2 %v3563_v58, %s10472_s4 }
 0x70a   :  { %v9114_v56 = vpop.permute.xlu2 %3847 }
 0x70b   :  { %v3808_v53 = vpop.permute.xlu1 %3807 }
 0x70c   :  { %v5183_v15 = vpop.eup %5182 }
 0x70d   :  { %v476_v14 = vmul.f32 0.6931472, %v5183_v15 }
 0x70e   :  { %3695 = vrot.lane.b32.xlu0 %v8741_v39, %s10471_s11 }
 0x70f   :  { %v477_v3 = vadd.f32 %v476_v14, %v469_v34  ;;  %v5229_v34 = vld [vmem:[%s10537_s10] ss:$0 sm:$0xff] }
 0x710   :  { %4478 = vrot.lane.b32.xlu2 %v4476_v28, %s10481_s13 }
 0x711   :  { %v490_v58 = vmul.f32 %v477_v3, %v10536_v5 }
 0x712   :  { %v9132_v36 = vpop.permute.xlu2 %3863 }
 0x713   :  { %v3726_v4 = vpop.permute.xlu1 %3725 }
 0x716   :  { %3719 = vrot.lane.b32.xlu0 %v8747_v0, %s10478_s5  ;;  %v10538_v0 = vstv %s10535_s2 }
 0x718   :  { %3865 = vrot.lane.b32.xlu2 %v9029_v32, %s10489_s6  ;;  %v3498_v32 = vmul.f32 %v10538_v0, %v8909_v35 }
 0x71a   :  { %v9139_v39 = vpop.permute.xlu2 %3887 }
 0x71b   :  { %v3832_v48 = vpop.permute.xlu1 %3831 }
 0x71d   :  { %v489_v51 = vpop.xlane.xlu0 %488 }
 0x71e   :  { %v491_v54 = vmul.f32 %v490_v58, %v489_v51  ;;  %3735 = vrot.lane.b32.xlu0 %v8767_v25, %s10497_s29 }
 0x720   :  { %3889 = vrot.lane.b32.xlu2 %v3616_v57, %s10497_s29  ;;  %v496_v42 = vadd.f32 %v495_v47, %v491_v54 }
 0x722   :  { %v3640_v41 = vpop.permute.xlu2 %3639  ;;  %v521_v28 = vmul.f32 %v7871_v21, %v496_v42 }
 0x723   :  { %v9152_v15 = vsel %vm9955_vm7, %v3498_v32, %v3640_v41  ;;  %v3750_v14 = vpop.permute.xlu1 %3749 }
 0x724   :  { %4676 = vmatmul.msk.f32.vlgmr.msrb.gmra.mxu3 %vm10540_vm14, %v521_v28  ;;  %vm10546_vm14 = vcmask 457728  }
 0x726   :  { %3809 = vrot.lane.b32.xlu0 %v3527_v60, %s10427_s23  ;;  %v3499_v60 = vmul.f32 %v8789_v49, %v8859_v61 }
 0x728   :  { %3905 = vrot.lane.b32.xlu2 %v3634_v43, %s10066_s17 }
 0x72a   :  { %v9157_v25 = vpop.permute.xlu2 %3663 }
 0x72b   :  { %v4445_v57 = vpop.permute.xlu1 %4444 }
 0x72c   :  { %v4447_v35 = vsel %vm9955_vm7, %v4445_v57, 0.0 }
 0x72d   :  { %4448 = vadd.xlane.f32.xlu1 %v4447_v35 }
 0x72e   :  { %3817 = vrot.lane.b32.xlu0 %v3536_v30, %s10509_s27 }
 0x730   :  { %3078 = vperm.xlu2 %5009, %v5229_v34   ;;  %v3792_v21 = vpop.permute.xlu0 %3791 }
 0x731   :  { %v3909_v30 = vsel %vm9955_vm7, %v3499_v60, %v3792_v21 }
 0x732   :  { %v9162_v3 = vpop.permute.xlu2 %3687 }
 0x733   :  { %v3880_v0 = vpop.permute.xlu1 %3879 }
 0x736   :  { %3833 = vrot.lane.b32.xlu0 %v3554_v27, %s10467_s18 }
 0x738   :  { %5011 = vset.pattern.permute.xlu2 %v10438_v10  ;;  %v3710_v43 = vpop.permute.xlu0 %3709  ;;  %v3911_v10 = vsel %vm10541_vm13, %v3909_v30, %v9014_v11  ;;  %v3580_v11 = vmul.f32 %v9021_v52, %v8214_v18  ;;  %vm10547_vm13 = vcmask 523264  }
 0x739   :  { %4161 = vperm.xlu2 %5011, %v5030_v20   ;;  %v3773_v5 = vsel %vm1850_vm2, %v9090_v17, %v3710_v43  ;;  %v3913_v61 = vsel %vm10542_vm11, %v3911_v10, %v3808_v53  ;;  %vm10549_vm11 = vcmask 982016  }
 0x73a   :  { %v9171_v58 = vpop.permute.xlu2 %3711  ;;  %v3775_v51 = vsel %vm1855_vm3, %v3773_v5, %v9042_v31 }
 0x73b   :  { %v3777_v47 = vsel %vm1860_vm4, %v3775_v51, %v3726_v4  ;;  %v3904_v57 = vpop.permute.xlu1 %3903 }
 0x73e   :  { %3849 = vrot.lane.b32.xlu0 %v3571_v40, %s10471_s11 }
 0x740   :  { %v3816_v49 = vpop.permute.xlu0 %3815 }
 0x741   :  { %5012 = vset.pattern.permute.xlu2 %v10440_v63  ;;  %v3915_v17 = vsel %vm10543_vm0, %v3913_v61, %v3816_v49  ;;  %vm10550_vm0 = vmmov %vm10549_vm11 }
 0x742   :  { %v3794_v27 = vpop.permute.xlu2 %3793  ;;  %v3917_v54 = vsel %vm10544_vm10, %v3915_v17, %v9060_v23  ;;  %vm10551_vm10 = vcmask 130048  }
 0x743   :  { %v9187_v31 = vsel %vm9955_vm7, %v9103_v46, %v3794_v27  ;;  %v3919_v4 = vsel %vm10545_vm15, %v3917_v54, %v3832_v48  ;;  %v3656_v5 = vpop.permute.xlu1 %3655  ;;  %vm10552_vm15 = vcmask 1041408   ;;  %vm10573_vm7 = vcmask 523264  }
 0x746   :  { %3881 = vrot.lane.b32.xlu1 %v3607_v44, %s10481_s13  ;;  %3857 = vrot.lane.b32.xlu0 %v3580_v11, %s10475_s1 }
 0x748   :  { %v3734_v53 = vpop.permute.xlu0 %3733 }
 0x749   :  { %v3779_v46 = vsel %vm1865_vm5, %v3777_v47, %v3734_v53 }
 0x74a   :  { %v3781_v18 = vsel %vm1870_vm6, %v3779_v46, %v9073_v59 }
 0x74b   :  { %v3680_v53 = vpop.permute.xlu1 %3679 }
 0x74e   :  { %4031 = vperm.xlu1 %5010, %v5030_v20   ;;  %3873 = vrot.lane.b32.xlu0 %v9123_v26, %s10478_s5  ;;  %v3783_v26 = vsel %vm10549_vm11, %v3781_v18, %v3750_v14  ;;  %v5024_v20 = vld [vmem:[%s10548_s25] ss:$0 sm:$0xff]  ;;  %v3744_v18 = vpop.permute.xlu2 %3743  ;;  %vm10555_vm11 = vcmask 261120  }
 0x74f   :  { %v3785_v42 = vmul.f32 1.442695, %v3783_v26 }
 0x750   :  { %v3840_v40 = vpop.permute.xlu0 %3839 }
 0x751   :  { %v3921_v48 = vsel %vm10546_vm14, %v3919_v4, %v3840_v40  ;;  %5184 = vpow2.f32 %v3785_v42  ;;  %vm10553_vm14 = vcmask 195584  }
 0x752   :  { %v3923_v52 = vsel %vm10547_vm13, %v3921_v48, %v9114_v56  ;;  %vm10554_vm13 = vcmask 1044480  }
 0x756   :  { %3897 = vrot.lane.b32.xlu0 %v9129_v19, %s10180_s20 }
 0x757   :  { %v5185_v21 = vpop.eup %5184 }
 0x758   :  { %v3856_v23 = vpop.permute.xlu0 %3855 }
 0x759   :  { %v3925_v44 = vsel %vm1845_vm1, %v3923_v52, %v3856_v23 }
 0x75a   :  { %v3927_v19 = vsel %vm1850_vm2, %v3925_v44, %v9132_v36  ;;  %v4427_v36 = vpop.f32.mrf.mxu1 }
 0x75b   :  { %v9215_v30 = vadd.f32 %v5024_v20, %v4427_v36 }
 0x75d   :  { %v4431_v49 = vand.u32 2147483647, %v9215_v30 }
 0x75e   :  { %2994 = vperm.xlu0 %5008, %v5229_v34  }
 0x75f   :  { %v4432_v4 = vsub.f32 0.0, %v4431_v49 }
 0x760   :  { %v3872_v32 = vpop.permute.xlu0 %3871 }
 0x761   :  { %v3929_v41 = vsel %vm1855_vm3, %v3927_v19, %v3872_v32  ;;  %v4433_v23 = vmul.f32 1.442695, %v4432_v4 }
 0x762   :  { %v3931_v28 = vsel %vm1860_vm4, %v3929_v41, %v3880_v0 }
 0x763   :  { %v3933_v56 = vsel %vm1865_vm5, %v3931_v28, %v9139_v39  ;;  %5186 = vpow2.f32 %v4433_v23 }
 0x768   :  { %v3896_v59 = vpop.permute.xlu0 %3895 }
 0x769   :  { %v3935_v35 = vsel %vm1870_vm6, %v3933_v56, %v3896_v59  ;;  %v5187_v41 = vpop.eup %5186  ;;  %v3752_v59 = vpop.permute.xlu2 %3751 }
 0x76a   :  { %v3937_v34 = vsel %vm10550_vm0, %v3935_v35, %v3904_v57  ;;  %vm10556_vm0 = vcmask 326656  }
 0x76b   :  { %v3940_v14 = vrot.slane %v3937_v34, 7 }
 0x76d   :  { %v3942_v60 = vmul.f32 %v5185_v21, %v3940_v14  ;;  %v4435_v14 = vadd.f32 1.0, %v5187_v41 }
 0x76f   :  { %v3943_v43 = vadd.f32 %v3942_v60, %v3937_v34  ;;  %5188 = vlog2.f32 %v4435_v14 }
 0x770   :  { %v3648_v61 = vpop.permute.xlu0 %3647 }
 0x771   :  { %v3945_v51 = vrot.slane %v3943_v43, 7  ;;  %v4014_v10 = vsel %vm602_vm9, %v3937_v34, %v3943_v43  ;;  %v3758_v17 = vsel %vm10551_vm10, %v9152_v15, %v3648_v61  ;;  %v3704_v15 = vpop.permute.xlu1 %3703  ;;  %vm10557_vm10 = vcmask 392192  }
 0x772   :  { %v3760_v57 = vsel %vm10553_vm14, %v3758_v17, %v3656_v5  ;;  %vm10560_vm14 = vcmask 457728   ;;  %v3826_v17 = vpop.permute.xlu2 %3825 }
 0x773   :  { %v3947_v47 = vmul.f32 %v5185_v21, %v3945_v51  ;;  %v3762_v20 = vsel %vm10555_vm11, %v3760_v57, %v9157_v25  ;;  %vm10562_vm11 = vcmask 1046528  }
 0x775   :  { %v3948_v39 = vadd.f32 %v3947_v47, %v3937_v34 }
 0x777   :  { %v3950_v27 = vrot.slane %v3948_v39, 7  ;;  %v4015_v54 = vsel %vm10552_vm15, %v4014_v10, %v3948_v39  ;;  %vm10559_vm15 = vcmask 1045504  }
 0x778   :  { %v3672_v0 = vpop.permute.xlu0 %3671 }
 0x779   :  { %v3952_v11 = vmul.f32 %v5185_v21, %v3950_v27  ;;  %v3764_v36 = vsel %vm10556_vm0, %v3762_v20, %v3672_v0  ;;  %v3728_v47 = vpop.permute.xlu1 %3727  ;;  %v236_v0 = vld [vmem:[%s10558_s12 + $0x8] sm:$0xff]  ;;  %vm10565_vm0 = vcmask 982016  }
 0x77a   :  { %v3766_v10 = vsel %vm10557_vm10, %v3764_v36, %v3680_v53  ;;  %v237_v53 = vld [vmem:[%s10558_s12 + $0x10] sm:$0xff]  ;;  %vm10566_vm10 = vcmask 261120  }
 0x77b   :  { %v3953_v40 = vadd.f32 %v3952_v11, %v3937_v34  ;;  %v3768_v61 = vsel %vm10560_vm14, %v3766_v10, %v9162_v3  ;;  %v238_v3 = vld [vmem:[%s10558_s12 + $0x18] sm:$0xff]  ;;  %vm10568_vm14 = vcmask 195584  }
 0x77c   :  { %4497 = vmatpush.msrb.mxu2 %v238_v3 }
 0x77d   :  { %v3955_v46 = vrot.slane %v3953_v40, 7  ;;  %v4016_v48 = vsel %vm2345_vm12, %v4015_v54, %v3953_v40  ;;  %v5189_v54 = vpop.eup %5188 }
 0x77e   :  { %4498 = vmatpush.msrb.mxu2 %v237_v53 }
 0x77f   :  { %v3957_v52 = vmul.f32 %v5185_v21, %v3955_v46  ;;  %v4430_v46 = vmax.f32 %v9215_v30, 0.0  ;;  %v10564_v30 = vld [vmem:[#allocation119_spill] sm:$0xff] }
 0x780   :  { %v3696_v42 = vpop.permute.xlu0 %3695  ;;  %4499 = vmatpush.msrb.mxu2 %v236_v0 }
 0x781   :  { %v3958_v44 = vadd.f32 %v3957_v52, %v3937_v34  ;;  %v3802_v40 = vpop.permute.xlu1 %3801 }
 0x783   :  { %v3960_v26 = vrot.slane %v3958_v44, 7  ;;  %v4017_v32 = vsel %vm2347_vm8, %v4016_v48, %v3958_v44  ;;  %v3842_v44 = vpop.permute.xlu2 %3841 }
 0x785   :  { %v3962_v19 = vmul.f32 %v5185_v21, %v3960_v26 }
 0x787   :  { %v3963_v28 = vadd.f32 %v3962_v19, %v3937_v34  ;;  %v5031_v19 = vld [vmem:[%s10563_s16] ss:$0 sm:$0xff] }
 0x788   :  { %v3720_v51 = vpop.permute.xlu0 %3719  ;;  %v4455_v57 = vmul.f32 %v5031_v19, %v10564_v30 }
 0x789   :  { %v3965_v56 = vrot.slane %v3963_v28, 7  ;;  %v4018_v35 = vsel %vm10554_vm13, %v4017_v32, %v3963_v28  ;;  %vm10561_vm13 = vcmask 523264   ;;  %v235_v32 = vld [vmem:[%s10558_s12] sm:$0xff] }
 0x78a   :  { %v3770_v25 = vsel %vm10561_vm13, %v3768_v61, %v3696_v42  ;;  %4500 = vmatpush.msrb.mxu2 %v235_v32  ;;  %vm10569_vm13 = vmmov %vm10566_vm10 }
 0x78b   :  { %v3967_v60 = vmul.f32 %v5185_v21, %v3965_v56  ;;  %v3772_v11 = vsel %vm1845_vm1, %v3770_v25, %v3704_v15  ;;  %v4479_v20 = vpop.permute.xlu2 %4478 }
 0x78c   :  { %v3774_v23 = vsel %vm1850_vm2, %v3772_v11, %v9171_v58 }
 0x78d   :  { %v3968_v43 = vadd.f32 %v3967_v60, %v3937_v34  ;;  %v3776_v48 = vsel %vm1855_vm3, %v3774_v23, %v3720_v51 }
 0x78e   :  { %v3778_v26 = vsel %vm1860_vm4, %v3776_v48, %v3728_v47 }
 0x78f   :  { %v3970_v49 = vrot.slane %v3968_v43, 7  ;;  %v4019_v5 = vsel %vm10559_vm15, %v4018_v35, %v3968_v43  ;;  %vm10567_vm15 = vcmask 130048  }
 0x791   :  { %v3972_v39 = vmul.f32 %v5185_v21, %v3970_v49  ;;  %v3736_v21 = vpop.permute.xlu0 %3735 }
 0x792   :  { %v3780_v15 = vsel %vm1865_vm5, %v3778_v26, %v3736_v21 }
 0x793   :  { %v3973_v27 = vadd.f32 %v3972_v39, %v3937_v34  ;;  %v4437_v34 = vmul.f32 0.6931472, %v5189_v54  ;;  %v3782_v41 = vsel %vm1870_vm6, %v3780_v15, %v3744_v18  ;;  %v3866_v39 = vpop.permute.xlu2 %3865 }
 0x794   :  { %v3784_v35 = vsel %vm10565_vm0, %v3782_v41, %v3752_v59  ;;  %vm10571_vm0 = vcmask 392192  }
 0x795   :  { %v9235_v4 = vsel %vm10562_vm11, %v4019_v5, %v3973_v27  ;;  %v4438_v52 = vadd.f32 %v4437_v34, %v4430_v46  ;;  %v3787_v60 = vmul.f32 1.442695, %v3784_v35  ;;  %v3975_v18 = vrot.slane %v3973_v27, 7 }
 0x796   :  { %4176 = vrot.lane.b32.xlu2 %v9235_v4, %s10472_s4  ;;  %4042 = vrot.lane.b32.xlu1 %v9235_v4, %s10066_s17  ;;  %v3912_v5 = vsel %vm10567_vm15, %v9187_v31, %v3802_v40  ;;  %vm10570_vm11 = vcmask 326656   ;;  %vm10574_vm15 = vcmask 982016  }
 0x797   :  { %4166 = vrot.lane.b32.xlu0 %v9235_v4, %s10471_s11  ;;  %v4450_v42 = vmul.f32 %v4438_v52, %v10564_v30  ;;  %5190 = vpow2.f32 %v3787_v60 }
 0x799   :  { %v3810_v58 = vpop.permute.xlu0 %3809 }
 0x79a   :  { %v3914_v59 = vsel %vm10568_vm14, %v3912_v5, %v3810_v58 }
 0x79b   :  { %v3890_v34 = vpop.permute.xlu2 %3889 }
 0x79d   :  { %v5191_v47 = vpop.eup %5190 }
 0x79e   :  { %4186 = vrot.lane.b32.xlu2 %v9235_v4, %s10467_s18  ;;  %4052 = vrot.lane.b32.xlu1 %v9235_v4, %s10180_s20  ;;  %v3977_v10 = vmul.f32 %v5191_v47, %v3975_v18 }
 0x7a0   :  { %v4449_v28 = vpop.xlane.xlu1 %4448 }
 0x7a1   :  { %v4451_v56 = vmul.f32 %v4450_v42, %v4449_v28  ;;  %v3818_v43 = vpop.permute.xlu0 %3817 }
 0x7a2   :  { %v3916_v61 = vsel %vm10569_vm13, %v3914_v59, %v3818_v43 }
 0x7a3   :  { %v4456_v14 = vadd.f32 %v4455_v57, %v4451_v56  ;;  %v3918_v25 = vsel %vm10570_vm11, %v3916_v61, %v3826_v17  ;;  %v3906_v0 = vpop.permute.xlu2 %3905 }
 0x7a5   :  { %v4481_v36 = vmul.f32 %v4479_v20, %v4456_v14 }
 0x7a6   :  { %4062 = vrot.lane.b32.xlu2 %v9235_v4, %s10497_s29 }
 0x7a7   :  { %4682 = vmatmul.msk.f32.vlgmr.msrb.gmra.mxu2 %vm10566_vm10, %v4481_v36  ;;  %vm10572_vm10 = vcmask 457728  }
 0x7a9   :  { %v3834_v51 = vpop.permute.xlu0 %3833 }
 0x7aa   :  { %v3920_v11 = vsel %vm10571_vm0, %v3918_v25, %v3834_v51 }
 0x7ab   :  { %v3922_v21 = vsel %vm10572_vm10, %v3920_v11, %v3842_v44  ;;  %v9286_v61 = vpop.permute.xlu2 %3078 }
 0x7b1   :  { %v3850_v49 = vpop.permute.xlu0 %3849 }
 0x7b2   :  { %v3924_v3 = vsel %vm10573_vm7, %v3922_v21, %v3850_v49  ;;  %vm10575_vm7 = vcmask 1041408  }
 0x7b8   :  { %v3882_v23 = vpop.permute.xlu1 %3881 }
 0x7b9   :  { %v3858_v54 = vpop.permute.xlu0 %3857 }
 0x7ba   :  { %v3926_v27 = vsel %vm1845_vm1, %v3924_v3, %v3858_v54  ;;  %vm10576_vm1 = vcmask 1044480  }
 0x7bb   :  { %v3928_v31 = vsel %vm1850_vm2, %v3926_v27, %v3866_v39 }
 0x7c0   :  { %v9296_v27 = vpop.permute.xlu1 %4031 }
 0x7c1   :  { %v3874_v53 = vpop.permute.xlu0 %3873 }
 0x7c2   :  { %v3930_v40 = vsel %vm1855_vm3, %v3928_v31, %v3874_v53  ;;  %v4036_v31 = vmul.f32 %v9235_v4, %v8623_v2 }
 0x7c3   :  { %v3932_v46 = vsel %vm1860_vm4, %v3930_v40, %v3882_v23 }
 0x7c4   :  { %v3934_v17 = vsel %vm1865_vm5, %v3932_v46, %v3890_v34  ;;  %v9300_v34 = vpop.permute.xlu2 %4161 }
 0x7c9   :  { %v3898_v48 = vpop.permute.xlu0 %3897 }
 0x7ca   :  { %v3936_v52 = vsel %vm1870_vm6, %v3934_v17, %v3898_v48 }
 0x7cb   :  { %v3938_v44 = vsel %vm10574_vm15, %v3936_v52, %v3906_v0 }
 0x7cc   :  { %v3978_v26 = vadd.f32 %v3977_v10, %v3938_v44 }
 0x7ce   :  { %v3980_v32 = vrot.slane %v3978_v26, 7 }
 0x7d0   :  { %v3982_v15 = vmul.f32 %v5191_v47, %v3980_v32 }
 0x7d1   :  { %v9302_v53 = vpop.permute.xlu0 %2994 }
 0x7d2   :  { %v3983_v19 = vadd.f32 %v3982_v15, %v3938_v44 }
 0x7d4   :  { %v3985_v58 = vrot.slane %v3983_v19, 7  ;;  %v4021_v42 = vsel %vm602_vm9, %v3978_v26, %v3983_v19  ;;  %vm10577_vm9 = vcmask 1045504  }
 0x7d6   :  { %v3987_v30 = vmul.f32 %v5191_v47, %v3985_v58 }
 0x7d8   :  { %v3988_v41 = vadd.f32 %v3987_v30, %v3938_v44 }
 0x7da   :  { %v3990_v28 = vrot.slane %v3988_v41, 7  ;;  %v4022_v57 = vsel %vm10575_vm7, %v4021_v42, %v3988_v41 }
 0x7dc   :  { %v3992_v56 = vmul.f32 %v5191_v47, %v3990_v28  ;;  %v10581_v28 = vld [vmem:[#allocation49_spill] sm:$0xff] }
 0x7de   :  { %v3993_v35 = vadd.f32 %v3992_v56, %v3938_v44 }
 0x7e0   :  { %v3995_v14 = vrot.slane %v3993_v35, 7  ;;  %v4023_v20 = vsel %vm2345_vm12, %v4022_v57, %v3993_v35  ;;  %vm10578_vm12 = vcmask 1046528   ;;  %v9364_v57 = vmul.f32 %v10414_v8, %v10581_v28 }
 0x7e2   :  { %v3997_v60 = vmul.f32 %v5191_v47, %v3995_v14 }
 0x7e4   :  { %v3998_v36 = vadd.f32 %v3997_v60, %v3938_v44 }
 0x7e6   :  { %v4000_v43 = vrot.slane %v3998_v36, 7  ;;  %v4024_v51 = vsel %vm2347_vm8, %v4023_v20, %v3998_v36 }
 0x7e8   :  { %v4002_v18 = vmul.f32 %v5191_v47, %v4000_v43 }
 0x7ea   :  { %v4003_v10 = vadd.f32 %v4002_v18, %v3938_v44 }
 0x7ec   :  { %v4005_v49 = vrot.slane %v4003_v10, 7  ;;  %v4025_v5 = vsel %vm10576_vm1, %v4024_v51, %v4003_v10 }
 0x7ee   :  { %v4007_v59 = vmul.f32 %v5191_v47, %v4005_v49 }
 0x7f0   :  { %v4008_v39 = vadd.f32 %v4007_v59, %v3938_v44  ;;  %v4177_v46 = vpop.permute.xlu2 %4176 }
 0x7f2   :  { %v4010_v25 = vrot.slane %v4008_v39, 7  ;;  %v4026_v54 = vsel %vm10577_vm9, %v4025_v5, %v4008_v39  ;;  %v10582_v5 = vld [vmem:[#allocation48_spill] sm:$0xff] }
 0x7f4   :  { %v4012_v11 = vmul.f32 %v5191_v47, %v4010_v25  ;;  %v4034_v47 = vmul.f32 %v9296_v27, %v8191_v50  ;;  %v4164_v50 = vmul.f32 %v9300_v34, %v8200_v45 }
 0x7f6   :  { %v4013_v21 = vadd.f32 %v4012_v11, %v3938_v44  ;;  %v4038_v23 = vadd.f32 %v4036_v31, %v4034_v47  ;;  %v4182_v44 = vmul.f32 %v4177_v46, %v8872_v13  ;;  %v4165_v47 = vmul.f32 %v9300_v34, %v8079_v1  ;;  %v10583_v1 = vld [vmem:[#allocation82_spill] sm:$0xff] }
 0x7f8   :  { %v9290_v3 = vsel %vm10578_vm12, %v4026_v54, %v4013_v21  ;;  %v4187_v58 = vpop.permute.xlu2 %4186  ;;  %v9390_v54 = vmul.f32 %v9286_v61, %v10310_v33 }
 0x7f9   :  { %4188 = vrot.lane.b32.xlu2 %v9290_v3, %s10467_s18  ;;  %4178 = vrot.lane.b32.xlu1 %v9290_v3, %s10472_s4  ;;  %v4192_v56 = vmul.f32 %v4187_v58, %v8889_v9  ;;  %s10621_s18 = sld [smem:[#allocation7_spill]] }
 0x7fa   :  { %4168 = vrot.lane.b32.xlu0 %v9290_v3, %s10471_s11  ;;  %s10622_s4 = sld [smem:[#allocation9_spill]] }
 0x7fb   :  { %s10623_s11 = sld [smem:[#allocation6_spill]] }
 0x800   :  { %v4063_v30 = vpop.permute.xlu2 %4062 }
 0x801   :  { %4064 = vrot.lane.b32.xlu2 %v9290_v3, %s10497_s29  ;;  %4054 = vrot.lane.b32.xlu1 %v9290_v3, %s10180_s20  ;;  %s10580_s20 = sld [smem:[#allocation18_spill]]  ;;  %v4068_v43 = vmul.f32 %v4063_v30, %v8916_v22 }
 0x802   :  { %4044 = vrot.lane.b32.xlu0 %v9290_v3, %s10066_s17  ;;  %s10579_s17 = sld [smem:[#allocation35_spill]] }
 0x807   :  { %v226_v42 = vld [vmem:[%s10580_s20] sm:$0x3] }
 0x808   :  { %v4043_v40 = vpop.permute.xlu1 %4042  ;;  %4906 = vpush %v226_v42 }
 0x809   :  { %v4048_v48 = vmul.f32 %v4043_v40, %v8872_v13  ;;  %v4167_v17 = vpop.permute.xlu0 %4166  ;;  %4216 = vrot.lane.b32.xlu2 %v9235_v4, %s10427_s23  ;;  %4206 = vrot.lane.b32.xlu1 %v9235_v4, %s10509_s27  ;;  %v9402_v40 = vmul.f32 %v9302_v53, %v10310_v33  ;;  %v4035_v33 = vmul.f32 %v9296_v27, %v8058_v16  ;;  %v10584_v16 = vld [vmem:[#allocation151_spill] sm:$0xff] }
 0x80a   :  { %v4172_v0 = vmul.f32 %v4167_v17, %v8623_v2  ;;  %4196 = vrot.lane.b32.xlu0 %v9235_v4, %s10466_s7  ;;  %v5230_v2 = vld [vmem:[%s10579_s17] sm:$0xff]  ;;  %v4037_v17 = vmul.f32 %v9290_v3, %v8857_v38  ;;  %v9429_v27 = vmul.f32 %v9302_v53, %v10584_v16  ;;  %v9434_v58 = vmul.f32 %v9286_v61, %v10584_v16 }
 0x80b   :  { %v4050_v52 = vadd.f32 %v4048_v48, %v4038_v23  ;;  %v4585_v13 = vadd.f32 1e-10, %v5230_v2  ;;  %v4246_v48 = vsub.f32 0.0, %v9390_v54 }
 0x80c   :  { %v4174_v26 = vadd.f32 %v4172_v0, %v4164_v50  ;;  %v4247_v61 = vsub.f32 0.0, %v9434_v58 }
 0x80e   :  { %v4184_v32 = vadd.f32 %v4182_v44, %v4174_v26 }
 0x810   :  { %v4053_v15 = vpop.permute.xlu1 %4052  ;;  %v9373_v20 = vadd.f32 %v4192_v56, %v4184_v32 }
 0x811   :  { %v4058_v19 = vmul.f32 %v4053_v15, %v8889_v9  ;;  %4092 = vrot.lane.b32.xlu2 %v9235_v4, %s10489_s6  ;;  %4082 = vrot.lane.b32.xlu1 %v9235_v4, %s10478_s5  ;;  %v9382_v9 = vmul.f32 %v10414_v8, %v10582_v5  ;;  %v4248_v15 = vmul.f32 1.442695, %v4246_v48 }
 0x812   :  { %4072 = vrot.lane.b32.xlu0 %v9235_v4, %s10481_s13 }
 0x813   :  { %v4060_v45 = vadd.f32 %v4058_v19, %v4050_v52  ;;  %v2540_v8 = vsub.f32 0.0, %v9382_v9  ;;  %v4112_v52 = vsub.f32 0.0, %v9402_v40 }
 0x815   :  { %v9378_v18 = vadd.f32 %v4068_v43, %v4060_v45  ;;  %v2546_v0 = vmul.f32 1.442695, %v2540_v8  ;;  %v4114_v30 = vmul.f32 1.442695, %v4112_v52  ;;  %v10587_v8 = vld [vmem:[#allocation136_spill] sm:$0xff] }
 0x819   :  { %4218 = vrot.lane.b32.xlu2 %v9290_v3, %s10427_s23  ;;  %4208 = vrot.lane.b32.xlu1 %v9290_v3, %s10509_s27 }
 0x81a   :  { %4198 = vrot.lane.b32.xlu0 %v9290_v3, %s10466_s7 }
 0x821   :  { %4094 = vrot.lane.b32.xlu2 %v9290_v3, %s10489_s6  ;;  %4084 = vrot.lane.b32.xlu1 %v9290_v3, %s10478_s5  ;;  %s10630_s5 = sld [smem:[#allocation36_spill]] }
 0x822   :  { %4074 = vrot.lane.b32.xlu0 %v9290_v3, %s10481_s13  ;;  %s5337_s13 = smov [#allocation2]  }
 0x823   :  { %s4614_s6 = sshll.u32 %s5337_s13, 4  ;;  %s4615_s6 = int_to_ptr.vmem [resolvable:$true] %s4614_s6 }
 0x827   :  { %s5247_s24 = scalar_lea.hbm %s10630_s5, 8 }
 0x829   :  { %4238 = vrot.lane.b32.xlu2 %v9290_v3, %s10496_s3  ;;  %4236 = vrot.lane.b32.xlu1 %v9235_v4, %s10496_s3 }
 0x82a   :  { %4226 = vrot.lane.b32.xlu0 %v9235_v4, %s10424_s26 }
 0x831   :  { %2784 = vrot.lane.b32.xlu2 %v8282_v55, %s10496_s3  ;;  %4104 = vrot.lane.b32.xlu1 %v9290_v3, %s10475_s1  ;;  %v4288_v55 = vrot.slane %v226_v42, 1 }
 0x832   :  { %4102 = vrot.lane.b32.xlu0 %v9235_v4, %s10475_s1  ;;  %v9368_v4 = vmul.f32 %v10416_v24, %v10581_v28  ;;  %s10627_s1 = sld [smem:[#allocation8_spill]] }
 0x833   :  { %4908 = vpush %v4288_v55 }
 0x834   :  { %v2801_v14 = vsub.f32 0.0, %v9368_v4 }
 0x836   :  { %v2808_v36 = vmul.f32 1.442695, %v2801_v14  ;;  %v4113_v14 = vsub.f32 0.0, %v9429_v27 }
 0x839   :  { %2782 = vrot.lane.b32.xlu1 %v8113_v62, %s10496_s3  ;;  %4588 = vperm.xlu2 %5012, %v4585_v13   ;;  %v2541_v62 = vsub.f32 0.0, %v9364_v57  ;;  %v10585_v13 = vld [vmem:[#allocation125_spill] sm:$0xff]  ;;  %s9619_s23 = spop %4906  ;;  %s4616_s3 = sshll.u32 %s10630_s5, 4  ;;  %s4617_s3 = int_to_ptr.hbm [resolvable:$true] %s4616_s3 }
 0x83a   :  { %4228 = vrot.lane.b32.xlu0 %v9290_v3, %s10424_s26  ;;  %s10602_s26 = sld [smem:[#allocation10_spill]]  ;;  %s5243_s29 = sshra.s32 %s4617_s3, 4  ;;  %s5244_s29 = int_to_ptr.hbm [resolvable:$true] %s5243_s29 }
 0x83b   :  { %v2548_v60 = vmul.f32 1.442695, %v2541_v62  ;;  %s5245_s9 = scalar_lea.hbm %s5244_s29, 8  ;;  %p5248_p1 = scmp.lt.s32.totalorder %s5244_s29, %s10630_s5 }
 0x83c   :  { %p5246_p0 = scmp.ne.s32.totalorder %s5244_s29, %s5245_s9  ;;  %p5249_p2 = scmp.lt.s32.totalorder %s5247_s24, %s5245_s9 }
 0x83d   :  { %5192 = vpow2.f32 %v2548_v60 }
 0x83e   :  { %5194 = vpow2.f32 %v2808_v36  ;;  %p5250_p3 = por %p5249_p2, %p5248_p1 }
 0x840   :  { %p5251_p4 = pnand %p5250_p3, %p5246_p0 }
 0x843   :  { %v5193_v10 = vpop.eup %5192 }
 0x844   :  { %v5195_v49 = vpop.eup %5194  ;;  %v9384_v59 = vadd.f32 1.0, %v5193_v10 }
 0x845   :  { %v9392_v21 = vadd.f32 1.0, %v5195_v49 }
 0x846   :  { %5196 = vrcp.f32 %v9384_v59  ;;  %v2610_v16 = vand.u32 2147483648, %v9384_v59  ;;  %vm2604_vm4 = vweird.f32 %v9384_v59 }
 0x847   :  { %5198 = vrcp.f32 %v9392_v21  ;;  %vm2864_vm3 = vweird.f32 %v9392_v21 }
 0x848   :  { %5200 = vpow2.f32 %v2546_v0 }
 0x849   :  { %5202 = vpow2.f32 %v4248_v15 }
 0x84a   :  { %5204 = vpow2.f32 %v4114_v30 }
 0x84c   :  { %v9421_v45 = vpop.eup %5196 }
 0x84d   :  { %v9425_v2 = vpop.eup %5198  ;;  %v2600_v53 = vmul.f32 %v9421_v45, %v9384_v59  ;;  %vm2605_vm8 = vweird.f32 %v9421_v45 }
 0x84e   :  { %v2860_v62 = vmul.f32 %v9425_v2, %v9392_v21  ;;  %v5201_v10 = vpop.eup %5200  ;;  %vm2865_vm2 = vweird.f32 %v9425_v2  ;;  %vm9489_vm6 = vmor %vm2604_vm4, %vm2605_vm8 }
 0x84f   :  { %v9451_v48 = vadd.f32 1.0, %v5201_v10  ;;  %vm9483_vm5 = vmor %vm2864_vm3, %vm2865_vm2  ;;  %v2611_v10 = vor.u32 1.1754944e-38, %v2610_v16 }
 0x851   :  { %vm2589_vm11 = vweird.f32 %v9451_v48 }
 0x853   :  { %v4189_v41 = vpop.permute.xlu2 %4188 }
 0x854   :  { %v4193_v34 = vmul.f32 %v4189_v41, %v10583_v1 }
 0x85b   :  { %v4065_v35 = vpop.permute.xlu2 %4064 }
 0x863   :  { %v9376_v51 = vpop.permute.xlu2 %4216 }
 0x864   :  { %s9640_s7 = spop %4908 }
 0x86b   :  { %v4179_v39 = vpop.permute.xlu1 %4178  ;;  %v9386_v25 = vpop.permute.xlu2 %4092 }
 0x86c   :  { %v4169_v11 = vpop.permute.xlu0 %4168  ;;  %v4183_v23 = vmul.f32 %v4179_v39, %v8874_v29  ;;  %v5203_v39 = vpop.eup %5202 }
 0x86d   :  { %v4173_v31 = vmul.f32 %v4169_v11, %v8857_v38  ;;  %v4039_v38 = vadd.f32 %v4037_v17, %v4035_v33  ;;  %v2601_v11 = vsub.f32 1.0, %v2600_v53  ;;  %v10588_v17 = vld [vmem:[#allocation137_spill] sm:$0xff] }
 0x86e   :  { %2894 = vxpose.xlu1.b32.start [1/4] (short) (narrow) %v8532_v37, 8  ;;  %v9412_v37 = vmul.f32 %v10416_v24, %v10582_v5  ;;  %v2861_v5 = vsub.f32 1.0, %v2860_v62  ;;  %v2608_v62 = vand.u32 2147483647, %v9384_v59 }
 0x86f   :  { %v4175_v46 = vadd.f32 %v4173_v31, %v4165_v47  ;;  %v4116_v47 = vmul.f32 1.442695, %v4113_v14  ;;  %v4250_v31 = vmul.f32 1.442695, %v4247_v61  ;;  %v2602_v33 = vmul.f32 %v9421_v45, %v2601_v11 }
 0x870   :  { %v2800_v24 = vsub.f32 0.0, %v9412_v37  ;;  %vm2609_vm13 = vcmp.eq.f32.partialorder %v2608_v62, 8.507059e+37 }
 0x871   :  { %v4185_v50 = vadd.f32 %v4183_v23, %v4175_v46 }
 0x872   :  { %v2806_v56 = vmul.f32 1.442695, %v2800_v24  ;;  %v2603_v24 = vadd.f32 %v9421_v45, %v2602_v33  ;;  %v10595_v33 = vld [vmem:[#allocation90_spill] sm:$0xff] }
 0x873   :  { %v4055_v44 = vpop.permute.xlu1 %4054  ;;  %v9417_v26 = vpop.permute.xlu2 %4218  ;;  %v9419_v32 = vadd.f32 %v4193_v34, %v4185_v50  ;;  %v9453_v34 = vadd.f32 1.0, %v5203_v39  ;;  %v4222_v50 = vmul.f32 %v9376_v51, %v10588_v17 }
 0x874   :  { %v4045_v19 = vpop.permute.xlu0 %4044  ;;  %v4059_v42 = vmul.f32 %v4055_v44, %v10583_v1  ;;  %5206 = vpow2.f32 %v2806_v56  ;;  %v5205_v1 = vpop.eup %5204 }
 0x875   :  { %v4049_v3 = vmul.f32 %v4045_v19, %v8874_v29  ;;  %v10586_v29 = vld [vmem:[#allocation127_spill] sm:$0xff]  ;;  %5208 = vpow2.f32 %v4116_v47  ;;  %v9465_v19 = vadd.f32 1.0, %v5205_v1  ;;  %vm4259_vm7 = vweird.f32 %v9453_v34 }
 0x876   :  { %2895 = vxpose.xlu1.b32.cont [2/4] (short) (narrow) %v10585_v13, 8  ;;  %v4069_v41 = vmul.f32 %v4065_v35, %v10586_v29  ;;  %5210 = vpow2.f32 %v4250_v31  ;;  %v2870_v13 = vand.u32 2147483648, %v9392_v21 }
 0x877   :  { %v4051_v55 = vadd.f32 %v4049_v3, %v4039_v38  ;;  %5212 = vrcp.f32 %v9451_v48  ;;  %vm4125_vm8 = vweird.f32 %v9465_v19 }
 0x878   :  { %5214 = vrcp.f32 %v9453_v34 }
 0x879   :  { %v4061_v28 = vadd.f32 %v4059_v42, %v4051_v55  ;;  %5216 = vrcp.f32 %v9465_v19 }
 0x87a   :  { %v5207_v52 = vpop.eup %5206 }
 0x87b   :  { %v4207_v60 = vpop.permute.xlu1 %4206  ;;  %v9444_v36 = vpop.permute.xlu2 %4094  ;;  %v9446_v43 = vadd.f32 %v4069_v41, %v4061_v28  ;;  %v9474_v30 = vadd.f32 1.0, %v5207_v52  ;;  %v2868_v41 = vand.u32 2147483647, %v9392_v21  ;;  %v4098_v21 = vmul.f32 %v9386_v25, %v8979_v6 }
 0x87c   :  { %v4197_v35 = vpop.permute.xlu0 %4196  ;;  %v4212_v23 = vmul.f32 %v4207_v60, %v10587_v8  ;;  %v5209_v28 = vpop.eup %5208  ;;  %v2607_v60 = vsel %vm9489_vm6, %v9421_v45, %v2603_v24  ;;  %v10596_v24 = vld [vmem:[#allocation128_spill] sm:$0xff] }
 0x87d   :  { %v4202_v49 = vmul.f32 %v4197_v35, %v8916_v22  ;;  %v2862_v22 = vmul.f32 %v9425_v2, %v2861_v5  ;;  %v5211_v53 = vpop.eup %5210  ;;  %v2871_v35 = vor.u32 1.1754944e-38, %v2870_v13  ;;  %v9505_v5 = vadd.f32 1.0, %v5209_v28  ;;  %v10597_v28 = vld [vmem:[#allocation124_spill] sm:$0xff] }
 0x87e   :  { %v9498_v61 = vpop.eup %5212  ;;  %vm2869_vm14 = vcmp.eq.f32.partialorder %v2868_v41, 8.507059e+37  ;;  %5218 = vrcp.f32 %v9474_v30  ;;  %v4223_v16 = vmul.f32 %v9417_v26, %v10596_v24 }
 0x87f   :  { %v4204_v46 = vadd.f32 %v4202_v49, %v9373_v20  ;;  %v2863_v3 = vadd.f32 %v9425_v2, %v2862_v22  ;;  %v9503_v49 = vpop.eup %5214  ;;  %5220 = vrcp.f32 %v9505_v5  ;;  %vm2590_vm0 = vweird.f32 %v9498_v61 }
 0x880   :  { %v9514_v1 = vpop.eup %5216  ;;  %vm4260_vm10 = vweird.f32 %v9503_v49  ;;  %vm9591_vm12 = vmor %vm2589_vm11, %vm2590_vm0 }
 0x881   :  { %v4214_v0 = vadd.f32 %v4212_v23, %v4204_v46  ;;  %v2867_v59 = vsel %vm9483_vm5, %v9425_v2, %v2863_v3  ;;  %v9510_v2 = vadd.f32 1.0, %v5211_v53  ;;  %v2612_v23 = vsel %vm2609_vm13, %v2611_v10, %v2607_v60  ;;  %vm9573_vm1 = vmor %vm4259_vm7, %vm4260_vm10 }
 0x882   :  { %v2872_v31 = vsel %vm2869_vm14, %v2871_v35, %v2867_v59  ;;  %v4121_v3 = vmul.f32 %v9514_v1, %v9465_v19  ;;  %v2593_v60 = vand.u32 2147483647, %v9451_v48  ;;  %v2595_v10 = vand.u32 2147483648, %v9451_v48 }
 0x883   :  { %v4083_v44 = vpop.permute.xlu1 %4082  ;;  %v9459_v15 = vpop.permute.xlu2 %4238  ;;  %v9461_v20 = vadd.f32 %v4222_v50, %v4214_v0  ;;  %v4255_v50 = vmul.f32 %v9503_v49, %v9453_v34  ;;  %v10594_v0 = vld [vmem:[#allocation89_spill] sm:$0xff]  ;;  %5222 = vrcp.f32 %v9510_v2  ;;  %vm4126_vm9 = vweird.f32 %v9514_v1 }
 0x884   :  { %v4073_v51 = vpop.permute.xlu0 %4072  ;;  %v4088_v42 = vmul.f32 %v4083_v44, %v10588_v17  ;;  %v2585_v17 = vmul.f32 %v9498_v61, %v9451_v48  ;;  %vm9565_vm15 = vcmp.eq.f32.partialorder %v2593_v60, 8.507059e+37  ;;  %vm9604_vm2 = vmor %vm4125_vm8, %vm4126_vm9  ;;  %vm2849_vm5 = vweird.f32 %v9474_v30  ;;  %v10619_v48 = vld [vmem:[#allocation131_spill] sm:$0xff] }
 0x885   :  { %v4078_v38 = vmul.f32 %v4073_v51, %v10587_v8  ;;  %v10593_v8 = vld [vmem:[#allocation97_spill] sm:$0xff]  ;;  %v2877_v51 = vmul.f32 %v2872_v31, %v9368_v4  ;;  %v10599_v31 = vld [vmem:[#allocation72_spill] sm:$0xff]  ;;  %vm4140_vm10 = vweird.f32 %v9505_v5  ;;  %vm4274_vm7 = vweird.f32 %v9510_v2 }
 0x886   :  { %v2586_v41 = vsub.f32 1.0, %v2585_v17  ;;  %v4099_v17 = vmul.f32 %v9444_v36, %v8981_v7  ;;  %vm10624_vm8 = vcmask 261120  }
 0x887   :  { %v4080_v55 = vadd.f32 %v4078_v38, %v9378_v18  ;;  %v9527_v38 = vpop.eup %5218  ;;  %v4122_v18 = vsub.f32 1.0, %v4121_v3  ;;  %v4265_v3 = vand.u32 2147483648, %v9453_v34 }
 0x888   :  { %v2845_v56 = vmul.f32 %v9527_v38, %v9474_v30  ;;  %v9538_v53 = vpop.eup %5220  ;;  %vm2850_vm3 = vweird.f32 %v9527_v38 }
 0x889   :  { %v4090_v14 = vadd.f32 %v4088_v42, %v4080_v55  ;;  %v4256_v55 = vsub.f32 1.0, %v4255_v50  ;;  %v9542_v59 = vpop.eup %5222  ;;  %v4266_v60 = vor.u32 1.1754944e-38, %v4265_v3  ;;  %vm9623_vm14 = vmor %vm2849_vm5, %vm2850_vm3  ;;  %vm4141_vm0 = vweird.f32 %v9538_v53 }
 0x88a   :  { %vm4275_vm11 = vweird.f32 %v9542_v59  ;;  %vm10629_vm3 = vmmov %vm10624_vm8 }
 0x88b   :  { %v4209_v39 = vpop.permute.xlu1 %4208  ;;  %v2785_v25 = vpop.permute.xlu2 %2784  ;;  %v9507_v11 = vadd.f32 %v4098_v21, %v4090_v14  ;;  %v10598_v21 = vld [vmem:[#allocation73_spill] sm:$0xff]  ;;  %v4257_v35 = vmul.f32 %v9503_v49, %v4256_v55 }
 0x88c   :  { %v4199_v47 = vpop.permute.xlu0 %4198  ;;  %v2793_v45 = vmul.f32 %v2785_v25, %v10593_v8  ;;  %v4213_v52 = vmul.f32 %v4209_v39, %v10595_v33  ;;  %v2587_v39 = vmul.f32 %v9498_v61, %v2586_v41 }
 0x88d   :  { %v4203_v46 = vmul.f32 %v4199_v47, %v10586_v29  ;;  %v2617_v29 = vmul.f32 %v2612_v23, %v9364_v57  ;;  %v2846_v23 = vsub.f32 1.0, %v2845_v56  ;;  %v217_v56 = vld [vmem:[%s10602_s26 + $0x10] sm:$0xff] }
 0x88e   :  { %v2797_v22 = vadd.f32 %v2793_v45, %v10594_v0  ;;  %v4136_v45 = vmul.f32 %v9538_v53, %v9505_v5 }
 0x88f   :  { %v4205_v44 = vadd.f32 %v4203_v46, %v9419_v32  ;;  %v2621_v32 = vmul.f32 %v2617_v29, %v10597_v28  ;;  %v4123_v46 = vmul.f32 %v9514_v1, %v4122_v18  ;;  %v4263_v29 = vand.u32 2147483647, %v9453_v34 }
 0x890   :  { %v2881_v42 = vmul.f32 %v2877_v51, %v2797_v22  ;;  %v4270_v22 = vmul.f32 %v9542_v59, %v9510_v2  ;;  %v4137_v55 = vsub.f32 1.0, %v4136_v45  ;;  %v4131_v34 = vand.u32 2147483648, %v9465_v19 }
 0x891   :  { %v4215_v13 = vadd.f32 %v4213_v52, %v4205_v44  ;;  %v2629_v8 = vmul.f32 %v10599_v31, %v2621_v32  ;;  %v2596_v44 = vor.u32 1.1754944e-38, %v2595_v10  ;;  %vm4264_vm4 = vcmp.eq.f32.partialorder %v4263_v29, 8.507059e+37 }
 0x892   :  { %v2889_v14 = vmul.f32 %v10598_v21, %v2881_v42  ;;  %v4124_v42 = vadd.f32 %v9514_v1, %v4123_v46  ;;  %v4271_v32 = vsub.f32 1.0, %v4270_v22  ;;  %v2855_v46 = vand.u32 2147483648, %v9474_v30 }
 0x893   :  { %v4085_v62 = vpop.permute.xlu1 %4084  ;;  %v9534_v4 = vadd.f32 %v4223_v16, %v4215_v13  ;;  %v2847_v16 = vmul.f32 %v9527_v38, %v2846_v23  ;;  %v4146_v29 = vand.u32 2147483648, %v9505_v5  ;;  %v4280_v13 = vand.u32 2147483648, %v9510_v2 }
 0x894   :  { %v4075_v57 = vpop.permute.xlu0 %4074  ;;  %v4089_v25 = vmul.f32 %v4085_v62, %v10596_v24  ;;  %v9557_v0 = vadd.f32 %v2889_v14, %v2629_v8  ;;  %v2853_v62 = vand.u32 2147483647, %v9474_v30 }
 0x895   :  { %v4079_v26 = vmul.f32 %v4075_v57, %v10595_v33  ;;  %v2588_v33 = vadd.f32 %v9498_v61, %v2587_v39  ;;  %v218_v57 = vld [vmem:[%s10602_s26 + $0x18] sm:$0xff]  ;;  %v2848_v10 = vadd.f32 %v9527_v38, %v2847_v16 }
 0x896   :  { %4549 = vmatpush.msrb.mxu0 %v218_v57  ;;  %vm9627_vm13 = vcmp.eq.f32.partialorder %v2853_v62, 8.507059e+37 }
 0x897   :  { %v4081_v47 = vadd.f32 %v4079_v26, %v9446_v43  ;;  %v4258_v43 = vadd.f32 %v9503_v49, %v4257_v35  ;;  %v2592_v26 = vsel %vm9591_vm12, %v9498_v61, %v2588_v33  ;;  %v4138_v35 = vmul.f32 %v9538_v53, %v4137_v55 }
 0x898   :  { %4550 = vmatpush.msrb.mxu0 %v217_v56  ;;  %v2597_v8 = vsel %vm9565_vm15, %v2596_v44, %v2592_v26  ;;  %v2852_v33 = vsel %vm9623_vm14, %v9527_v38, %v2848_v10  ;;  %v4144_v38 = vand.u32 2147483647, %v9505_v5  ;;  %vm9650_vm15 = vmor %vm4140_vm10, %vm4141_vm0  ;;  %v4290_v55 = vstv %s9640_s7 }
 0x899   :  { %v4091_v50 = vadd.f32 %v4089_v25, %v4081_v47  ;;  %v4262_v28 = vsel %vm9573_vm1, %v9503_v49, %v4258_v43  ;;  %v4272_v25 = vmul.f32 %v9542_v59, %v4271_v32  ;;  %v4132_v47 = vor.u32 1.1754944e-38, %v4131_v34  ;;  %vm9663_vm1 = vmor %vm4274_vm7, %vm4275_vm11 }
 0x89a   :  { %v4267_v39 = vsel %vm4264_vm4, %v4266_v60, %v4262_v28  ;;  %v4139_v44 = vadd.f32 %v9538_v53, %v4138_v35  ;;  %v4147_v28 = vor.u32 1.1754944e-38, %v4146_v29  ;;  %vm4145_vm9 = vcmp.eq.f32.partialorder %v4144_v38, 8.507059e+37  ;;  %v5032_v29 = vld [vmem:[%s10623_s11] ss:$0 sm:$0xff] }
 0x89b   :  { %v4237_v36 = vpop.permute.xlu1 %4236  ;;  %v4101_v51 = vadd.f32 %v4099_v17, %v4091_v50  ;;  %v10613_v50 = vld [vmem:[#allocation134_spill] sm:$0xff]  ;;  %v4284_v52 = vmul.f32 %v4267_v39, %v9390_v54  ;;  %v4281_v56 = vor.u32 1.1754944e-38, %v4280_v13 }
 0x89c   :  { %v4227_v24 = vpop.permute.xlu0 %4226  ;;  %v4242_v49 = vmul.f32 %v4237_v36, %v9004_v12  ;;  %v4273_v36 = vadd.f32 %v9542_v59, %v4272_v25 }
 0x89d   :  { %v4232_v41 = vmul.f32 %v4227_v24, %v8979_v6  ;;  %v4129_v6 = vand.u32 2147483647, %v9465_v19  ;;  %v216_v19 = vld [vmem:[%s10602_s26 + $0x8] sm:$0xff] }
 0x89e   :  { %4551 = vmatpush.msrb.mxu0 %v216_v19  ;;  %v4277_v34 = vsel %vm9663_vm1, %v9542_v59, %v4273_v36  ;;  %v211_v36 = vld [vmem:[%s10622_s4] sm:$0xff] }
 0x89f   :  { %v4234_v14 = vadd.f32 %v4232_v41, %v9461_v20  ;;  %v4128_v20 = vsel %vm9604_vm2, %v9514_v1, %v4124_v42  ;;  %vm4130_vm6 = vcmp.eq.f32.partialorder %v4129_v6, 8.507059e+37  ;;  %v2856_v41 = vor.u32 1.1754944e-38, %v2855_v46  ;;  %v10618_v6 = vld [vmem:[#allocation157_spill] sm:$0xff] }
 0x8a0   :  { %v4133_v17 = vsel %vm4130_vm6, %v4132_v47, %v4128_v20  ;;  %v10620_v20 = vld [vmem:[#allocation74_spill] sm:$0xff]  ;;  %vm10626_vm2 = vcmask 130048  }
 0x8a1   :  { %v4244_v61 = vadd.f32 %v4242_v49, %v4234_v14  ;;  %v4150_v54 = vmul.f32 %v4133_v17, %v9402_v40  ;;  %v4143_v40 = vsel %vm9650_vm15, %v9538_v53, %v4139_v44  ;;  %v2857_v32 = vsel %vm9627_vm13, %v2856_v41, %v2852_v33  ;;  %v213_v44 = vld [vmem:[%s10622_s4 + $0x10] sm:$0xff] }
 0x8a2   :  { %v2616_v53 = vmul.f32 %v2597_v8, %v9382_v9  ;;  %v4148_v18 = vsel %vm4145_vm9, %v4147_v28, %v4143_v40  ;;  %v2876_v59 = vmul.f32 %v2857_v32, %v9412_v37  ;;  %v4243_v9 = vmul.f32 %v9459_v15, %v10613_v50 }
 0x8a3   :  { %v4105_v45 = vpop.permute.xlu1 %4104  ;;  %v4286_v24 = vmul.f32 %v4284_v52, %v4244_v61  ;;  %v4151_v61 = vmul.f32 %v4148_v18, %v9429_v27  ;;  %v214_v52 = vld [vmem:[%s10622_s4 + $0x18] sm:$0xff]  ;;  %vm10634_vm13 = vcmask 64512  }
 0x8a4   :  { %v4109_v43 = vmul.f32 %v4105_v45, %v10613_v50  ;;  %v4103_v22 = vpop.permute.xlu0 %4102  ;;  %v2620_v10 = vmul.f32 %v2616_v53, %v10619_v48  ;;  %4572 = vmatpush.msrb.mxu1 %v214_v52 }
 0x8a5   :  { %v4108_v30 = vmul.f32 %v4103_v22, %v9004_v12  ;;  %v4156_v12 = vstv %s9619_s23 }
 0x8a6   :  { %v4111_v3 = vadd.f32 %v4109_v43, %v4101_v51  ;;  %v4278_v51 = vand.u32 2147483647, %v9510_v2  ;;  %v4292_v2 = vmul.f32 %v4290_v55, %v4286_v24  ;;  %v2628_v37 = vmul.f32 %v10599_v31, %v2620_v10  ;;  %v208_v31 = vld [vmem:[%s10621_s18] sm:$0xff]  ;;  %4573 = vmatpush.msrb.mxu1 %v213_v44 }
 0x8a7   :  { %v4110_v16 = vadd.f32 %v4108_v30, %v9507_v11  ;;  %v212_v30 = vld [vmem:[%s10622_s4 + $0x8] sm:$0xff] }
 0x8a8   :  { %vm4279_vm12 = vcmp.eq.f32.partialorder %v4278_v51, 8.507059e+37  ;;  %v4153_v47 = vmul.f32 %v4151_v61, %v4111_v3  ;;  %4574 = vmatpush.msrb.mxu1 %v212_v30 }
 0x8a9   :  { %v4152_v5 = vmul.f32 %v4150_v54, %v4110_v16  ;;  %v4282_v19 = vsel %vm4279_vm12, %v4281_v56, %v4277_v34  ;;  %v10628_v54 = vld [vmem:[#allocation42_spill] sm:$0xff]  ;;  %v4589_v16 = vpop.permute.xlu2 %4588 }
 0x8aa   :  { %v4159_v23 = vmul.f32 %v4156_v12, %v4153_v47  ;;  %4575 = vmatpush.msrb.mxu1 %v211_v36  ;;  %5224 = vrcp.f32 %v4589_v16  ;;  %vm4596_vm4 = vweird.f32 %v4589_v16  ;;  %v4602_v41 = vand.u32 2147483648, %v4589_v16 }
 0x8ab   :  { %v4158_v62 = vmul.f32 %v4156_v12, %v4152_v5  ;;  %v2783_v57 = vpop.permute.xlu1 %2782  ;;  %v4600_v40 = vand.u32 2147483647, %v4589_v16  ;;  %v5033_v5 = vld [vmem:[%s10627_s1] ss:$0 sm:$0xff] }
 0x8ac   :  { %v2792_v49 = vmul.f32 %v2783_v57, %v10618_v6  ;;  %v4229_v14 = vpop.permute.xlu0 %4228  ;;  %v4603_v34 = vor.u32 1.1754944e-38, %v4602_v41  ;;  %v10631_v57 = vld [vmem:[#allocation38_spill] sm:$0xff]  ;;  %v10632_v6 = vld [vmem:[#allocation41_spill] sm:$0xff] }
 0x8ad   :  { %v4233_v26 = vmul.f32 %v4229_v14, %v8981_v7  ;;  %v4294_v60 = vadd.f32 %v4292_v2, %v4158_v62  ;;  %v4285_v7 = vmul.f32 %v4282_v19, %v9434_v58  ;;  %v215_v58 = vld [vmem:[%s10602_s26] sm:$0xff]  ;;  %vm4601_vm14 = vcmp.eq.f32.partialorder %v4600_v40, 8.507059e+37  ;;  %v10633_v14 = vld [vmem:[#allocation37_spill] sm:$0xff] }
 0x8ae   :  { %v2796_v35 = vadd.f32 %v2792_v49, %v10620_v20  ;;  %4552 = vmatpush.msrb.mxu0 %v215_v58 }
 0x8af   :  { %v4235_v39 = vadd.f32 %v4233_v26, %v9534_v4  ;;  %4296 = vxpose.xlu0.b32.start [1/2] (short) (narrow) %v4294_v60, 8  ;;  %v209_v4 = vld [vmem:[%s10621_s18 + $0x8] sm:$0xff] }
 0x8b0   :  { %v2880_v25 = vmul.f32 %v2876_v59, %v2796_v35  ;;  %4527 = vmatpush.msra.mxu3 %v209_v4  ;;  %v5225_v13 = vpop.eup %5224 }
 0x8b1   :  { %v4245_v8 = vadd.f32 %v4243_v9, %v4235_v39  ;;  %v4592_v42 = vmul.f32 %v5225_v13, %v4589_v16  ;;  %vm4597_vm5 = vweird.f32 %v5225_v13 }
 0x8b2   :  { %v2888_v45 = vmul.f32 %v10598_v21, %v2880_v25  ;;  %4528 = vmatpush.msra.mxu3 %v208_v31  ;;  %v542_v21 = vpop.f32.mrf.mxu3  ;;  %vm4598_vm6 = vmor %vm4596_vm4, %vm4597_vm5 }
 0x8b3   :  { %v4287_v1 = vmul.f32 %v4285_v7, %v4245_v8  ;;  %v4593_v12 = vsub.f32 1.0, %v4592_v42 }
 0x8b4   :  { %v2892_v27 = vadd.f32 %v2888_v45, %v2628_v37 }
 0x8b5   :  { %v4293_v46 = vmul.f32 %v4290_v55, %v4287_v1  ;;  %v4594_v55 = vmul.f32 %v5225_v13, %v4593_v12 }
 0x8b6   :  { %2896 = vxpose.xlu1.b32.cont [3/4] (short) (narrow) %v2892_v27, 8 }
 0x8b7   :  { %v4295_v15 = vadd.f32 %v4293_v46, %v4159_v23  ;;  %v4595_v51 = vadd.f32 %v5225_v13, %v4594_v55 }
 0x8b9   :  { %4297 = vxpose.xlu0.b32.end [2/2] (short) (narrow) %v4295_v15, 8  ;;  %v4599_v2 = vsel %vm4598_vm6, %v5225_v13, %v4595_v51 }
 0x8ba   :  { %v4604_v56 = vsel %vm4601_vm14, %v4603_v34, %v4599_v2 }
 0x8be   :  { %2897 = vxpose.xlu1.b32.end [4/4] (short) (narrow) %v9557_v0, 8  ;;  %v10625_v0 = vld [vmem:[#allocation44_spill] sm:$0xff] }
 0x920   :  { %5013 = vset.pattern.permute.xlu0 %v10440_v63  ;;  %v4502_v63 = vpop.f32.mrf.mxu2 }
 0x94a   :  { %v2910_v17 = vpop.trf.xlu1 }
 0x94b   :  { %v2926_v50 = vadd.f32 %v2910_v17, %v542_v21 }
 0x94d   :  { %4684 = vmatmul.msk.f32.vlgmr.msrb.gmra.mxu0 %vm10624_vm8, %v2926_v50 }
 0x955   :  { %v4312_v43 = vpop.trf.xlu0 }
 0x956   :  { %v4505_v22 = vadd.f32 %v4312_v43, %v10625_v0 }
 0x958   :  { %v4506_v33 = vadd.f32 %v4505_v22, %v4502_v63 }
 0x95a   :  { %4683 = vmatmul.msk.f32.vlgmr.msra.gmra.mxu3 %vm10626_vm2, %v4506_v33 }
 0x9ca   :  { %v4554_v11 = vpop.f32.mrf.mxu0 }
 0x9dd   :  { %v4530_v3 = vpop.f32.mrf.mxu3 }
 0x9de   :  { %v4531_v38 = vadd.f32 %v5032_v29, %v4530_v3 }
 0x9e0   :  { %v4533_v24 = vadd.f32 %v4531_v38, %v10628_v54 }
 0x9e2   :  { %4685 = vmatmul.msk.f32.vlgmr.msrb.gmra.mxu1 %vm10629_vm3, %v4533_v24 }
 0xa5f   :  { %v4577_v28 = vpop.f32.mrf.mxu1 }
 0xa60   :  { %v4578_v32 = vadd.f32 %v4577_v28, %v4554_v11 }
 0xa62   :  { %v4583_v62 = vadd.f32 %v5033_v5, %v4578_v32 }
 0xa64   :  { %v4584_v53 = vsub.f32 %v4583_v62, %v10631_v57 }
 0xa66   :  { %v4605_v18 = vmul.f32 %v4604_v56, %v4584_v53 }
 0xa68   :  { %v4606_v49 = vmul.f32 %v4605_v18, %v10632_v6 }
 0xa6a   :  { %v4607_v26 = vadd.f32 %v4606_v49, %v10633_v14 }
 0xa6c   :  { %4608 = vst.msk [vmem:[#allocation2] sm:$0xff] %vm10634_vm13, %v4607_v26 }
 0xa6d   :  { %5254 = shalt.err (!%p5251_p4)
}
 0xa6e   :  { %4619 = dma.vmem_to_hbm [thread:$0]  %s4615_s6, 128, %s4617_s3, [#allocation3]  }
 0xa6f   :  { %5255 = dma.done.wait [#allocation3], 128  }
 0xa70   :  { %5256 = vsyncadd [#allocation3], 4294967168 }
 0xa71   :  { %4624 = vsyncpa [#allocation3], 1 }

</bundles_post_ra>
